<compile_context>
chip_gen: v7x
topology: tpu7x:2x2x1
jax: 0.10.0
libtpu: 0.0.40
codegen_flags: <defaults>
</compile_context>

<pallas_src>
import math
import functools

import jax
import jax.numpy as jnp
from jax import lax
from jax.experimental import pallas as pl
from jax.experimental.pallas import tpu as pltpu

LN_EPS = 1e-5
NEG = -1e9

N_ENC_W = 14   # number of stacked encoder weight arrays
N_DEC_W = 24   # number of stacked decoder weight arrays


# ---------------------------------------------------------------------------
# Shared building blocks: used inside the Pallas kernel (refs/VMEM arrays,
# approx=True, scratch slab) and by the pure-JAX reference (approx=False).
# ---------------------------------------------------------------------------

def _mxu_dot(a, w):
    """Activations cast to the weight dtype (bf16 on v6e/v7x, f32 on v5e);
    f32 accumulation on the MXU."""
    return jnp.dot(a.astype(w.dtype), w, preferred_element_type=jnp.float32)


def _add_layernorm(y, res, g, b):
    x = y + res
    mean = jnp.mean(x, axis=-1, keepdims=True)
    var = jnp.mean((x - mean) ** 2, axis=-1, keepdims=True)
    return (x - mean) * lax.rsqrt(var + LN_EPS) * g + b


def _softmax_rows(s, approx):
    m = jnp.max(s, axis=-1, keepdims=True)
    e = jnp.exp(s - m)
    d = jnp.sum(e, axis=-1, keepdims=True)
    if approx:
        return e * pl.reciprocal(d, approx=True)   # EUP vrcp, free slot
    return e / d


def _attn_heads(q, k, v, bias, n_head, attn_scr, mxu_dtype, approx):
    """q: (L, D), k/v: (L, D), bias: (L, L). Heads along the lane dim.

    Softmax scale is folded into Q once. Head outputs are written to the
    preallocated (L, D) VMEM scratch slab (kernel path) instead of being
    reassembled with an H-way lane concatenate; the reference path (no
    scratch) keeps the concatenate.
    """
    _, D = q.shape
    dh = D // n_head
    q = (q * (1.0 / math.sqrt(dh))).astype(mxu_dtype)   # scale folded, one (L,D) mul
    k = k.astype(mxu_dtype)
    v = v.astype(mxu_dtype)
    outs = []
    for h in range(n_head):                     # static unroll, static lane slices
        sl = slice(h * dh, (h + 1) * dh)
        s = lax.dot_general(q[:, sl], k[:, sl], (((1,), (1,)), ((), ())),
                            preferred_element_type=jnp.float32)
        p = _softmax_rows(s + bias, approx)
        o = jnp.dot(p.astype(mxu_dtype), v[:, sl],
                    preferred_element_type=jnp.float32)
        if attn_scr is None:
            outs.append(o)
        else:
            attn_scr[:, sl] = o                 # lane-slice store into VMEM slab
    if attn_scr is None:
        return jnp.concatenate(outs, axis=-1)   # reference path only
    return attn_scr[...]                        # (L, D), lane-dense


def _self_mha(x, wqkv, bqkv, wo, bo, bias, n_head, attn_scr, mxu_dtype, approx):
    D = x.shape[-1]
    qkv = _mxu_dot(x, wqkv) + bqkv              # fused QKV projection (D, 3D)
    o = _attn_heads(qkv[:, :D], qkv[:, D:2 * D], qkv[:, 2 * D:],
                    bias, n_head, attn_scr, mxu_dtype, approx)
    return _mxu_dot(o, wo) + bo


def _cross_mha(x_q, x_kv, wq, bq, wkv, bkv, wo, bo, bias, n_head,
               attn_scr, mxu_dtype, approx):
    D = x_q.shape[-1]
    q = _mxu_dot(x_q, wq) + bq
    kv = _mxu_dot(x_kv, wkv) + bkv              # fused KV projection (D, 2D)
    o = _attn_heads(q, kv[:, :D], kv[:, D:], bias, n_head,
                    attn_scr, mxu_dtype, approx)
    return _mxu_dot(o, wo) + bo


def _ffn(x, w1, b1, w2, b2):
    h = jnp.maximum(_mxu_dot(x, w1) + b1, 0.0)
    return _mxu_dot(h, w2) + b2


def _encoder_batch(src_b, pe, bias_b,
                   emb_w, emb_b,
                   wqkv, bqkv, wo, bo, ln1_g, ln1_b,
                   w1, b1, w2, b2, ln2_g, ln2_b,
                   *, n_head, num_layers, attn_scr, mxu_dtype, approx):
    # Embedding matmul kept f32 (K=input_dim is tiny; bf16 buys nothing here).
    x = jnp.dot(src_b, emb_w[...], preferred_element_type=jnp.float32) + emb_b[...]
    x = x + pe
    for l in range(num_layers):
        a = _self_mha(x, wqkv[l], bqkv[l], wo[l], bo[l], bias_b,
                      n_head, attn_scr, mxu_dtype, approx)
        x = _add_layernorm(a, x, ln1_g[l], ln1_b[l])
        f = _ffn(x, w1[l], b1[l], w2[l], b2[l])
        x = _add_layernorm(f, x, ln2_g[l], ln2_b[l])
    return x


def _decoder_batch(trg_b, enc_b, pe, trg_bias_b, src_bias_b,
                   demb_w, demb_b,
                   sa_wqkv, sa_bqkv, sa_wo, sa_bo, ln1_g, ln1_b,
                   ca_wq, ca_bq, ca_wkv, ca_bkv, ca_wo, ca_bo, ln2_g, ln2_b,
                   w1, b1, w2, b2, ln3_g, ln3_b,
                   out_w_t, out_b,
                   *, n_head, num_layers, attn_scr, mxu_dtype, approx):
    # trg_dim == 1: the (L,1)@(1,D) embedding is a VPU outer product, not an MXU matmul.
    x = trg_b * demb_w[...] + demb_b[...]
    x = x + pe
    for l in range(num_layers):
        sa = _self_mha(x, sa_wqkv[l], sa_bqkv[l], sa_wo[l], sa_bo[l],
                       trg_bias_b, n_head, attn_scr, mxu_dtype, approx)
        x = _add_layernorm(sa, x, ln1_g[l], ln1_b[l])
        ca = _cross_mha(x, enc_b, ca_wq[l], ca_bq[l], ca_wkv[l], ca_bkv[l],
                        ca_wo[l], ca_bo[l], src_bias_b, n_head,
                        attn_scr, mxu_dtype, approx)
        x = _add_layernorm(ca, x, ln2_g[l], ln2_b[l])
        f = _ffn(x, w1[l], b1[l], w2[l], b2[l])
        x = _add_layernorm(f, x, ln3_g[l], ln3_b[l])
    # Final d_model -> trg_dim(=1) projection as VPU multiply + lane reduce.
    return jnp.sum(x * out_w_t[...], axis=-1, keepdims=True) + out_b[...]


# ---------------------------------------------------------------------------
# Single fused Pallas kernel: encoder stack + decoder stack, gridded over batch.
# enc_out never leaves VMEM/vregs.
# ---------------------------------------------------------------------------

def _transformer_kernel(*refs, n_head, num_layers, mxu_dtype):
    src_ref, trg_ref, rb_ref, pe_ref = refs[:4]
    out_ref, attn_scr = refs[-2], refs[-1]
    w = refs[4:-2]
    enc_w, dec_w = w[:N_ENC_W], w[N_ENC_W:]

    trg_b = trg_ref[0]                          # (L, 1) f32 (raw targets, may hold NaN)
    pe = pe_ref[...]                            # (L, D)
    L = trg_b.shape[0]

    # Additive attention biases built in-kernel (no (B, L, L) HBM tensors):
    #   column bias from the target block's NaN pattern, row bias from a tiny
    #   (1, L) lane-major input, causal term from a 2-D iota.
    col_bias = jnp.where(jnp.isnan(trg_b), NEG, 0.0).astype(jnp.float32)   # (L, 1)
    row_bias = rb_ref[0].astype(jnp.float32)                               # (1, L)
    src_bias = col_bias + row_bias                                         # (L, L)
    r = lax.broadcasted_iota(jnp.int32, (L, L), 0)
    c = lax.broadcasted_iota(jnp.int32, (L, L), 1)
    trg_bias = src_bias + jnp.where(r >= c, 0.0, NEG).astype(jnp.float32)

    enc = _encoder_batch(src_ref[0], pe, src_bias, *enc_w,
                         n_head=n_head, num_layers=num_layers,
                         attn_scr=attn_scr, mxu_dtype=mxu_dtype, approx=True)
    # enc stays in VMEM/vregs; fed straight into the decoder cross-attention.
    out_ref[0] = _decoder_batch(trg_b, enc, pe, trg_bias, src_bias, *dec_w,
                                n_head=n_head, num_layers=num_layers,
                                attn_scr=attn_scr, mxu_dtype=mxu_dtype,
                                approx=True)
    # TODO(synk): the (1, L, 1) output block is lane-sparse; packing B*L along
    # lanes in the epilogue is the remaining (tiny) store-density win.


# ---------------------------------------------------------------------------
# pallas_call wrapper
# ---------------------------------------------------------------------------

def _rep_spec(a):
    """Full-array block, constant index -> stays resident in VMEM across grid steps."""
    nd = a.ndim
    return pl.BlockSpec(tuple(a.shape), lambda b, _nd=nd: (0,) * _nd)


def _batch_spec(a):
    """(1, ...) block selected by the batch grid index."""
    nd = a.ndim
    return pl.BlockSpec((1,) + tuple(a.shape[1:]),
                        lambda b, _nd=nd: (b,) + (0,) * (_nd - 1))


def _encoder_weights(p):
    return (p["enc_emb_w"], p["enc_emb_b"],
            p["enc_wqkv"], p["enc_bqkv"], p["enc_wo"], p["enc_bo"],
            p["enc_ln1_g"], p["enc_ln1_b"],
            p["enc_w1"], p["enc_b1"], p["enc_w2"], p["enc_b2"],
            p["enc_ln2_g"], p["enc_ln2_b"])


def _decoder_weights(p):
    return (p["dec_emb_w"], p["dec_emb_b"],
            p["dec_sa_wqkv"], p["dec_sa_bqkv"], p["dec_sa_wo"], p["dec_sa_bo"],
            p["dec_ln1_g"], p["dec_ln1_b"],
            p["dec_ca_wq"], p["dec_ca_bq"], p["dec_ca_wkv"], p["dec_ca_bkv"],
            p["dec_ca_wo"], p["dec_ca_bo"],
            p["dec_ln2_g"], p["dec_ln2_b"],
            p["dec_w1"], p["dec_b1"], p["dec_w2"], p["dec_b2"],
            p["dec_ln3_g"], p["dec_ln3_b"],
            p["out_w_t"], p["out_b"])


def transformer_forward(params, src_input, target_input, *, n_head, num_layers):
    """Whole forward pass in ONE pallas_call; grid over batch ("parallel")."""
    B, L, _ = src_input.shape
    L_trg = target_input.shape[1]
    assert L == L_trg, "src_mask is derived from target_input: L_src must equal L_trg"
    D = params["pe"].shape[-1]
    pe = params["pe"][:L]
    trg = target_input[..., None]                                    # (B, L, 1)
    # Lane-major row bias (0 / -1e9) from the NaN validity pattern.
    row_bias = jnp.where(jnp.isnan(target_input), NEG, 0.0).astype(jnp.float32)[:, None, :]

    enc_w = _encoder_weights(params)
    dec_w = _decoder_weights(params)
    assert len(enc_w) == N_ENC_W and len(dec_w) == N_DEC_W
    mxu_dtype = params["enc_wqkv"].dtype

    args = (src_input, trg, row_bias, pe) + enc_w + dec_w
    in_specs = ([_batch_spec(src_input), _batch_spec(trg), _batch_spec(row_bias),
                 _rep_spec(pe)]
                + [_rep_spec(w) for w in enc_w + dec_w])

    out = pl.pallas_call(
        functools.partial(_transformer_kernel, n_head=n_head,
                          num_layers=num_layers, mxu_dtype=mxu_dtype),
        out_shape=jax.ShapeDtypeStruct((B, L, 1), jnp.float32),
        grid=(B,),
        in_specs=in_specs,
        out_specs=pl.BlockSpec((1, L, 1), lambda b: (b, 0, 0)),
        scratch_shapes=[pltpu.VMEM((L, D), jnp.float32)],   # per-head output slab
        compiler_params=pltpu.CompilerParams(
            dimension_semantics=("parallel",),               # v7x: 2 TCs share batch
            vmem_limit_bytes=32 * 1024 * 1024),
    )(*args)
    return out


# ---------------------------------------------------------------------------
# Pure-JAX reference (same weights, exact divide, concat-based head merge)
# ---------------------------------------------------------------------------

def transformer_reference(params, src_input, target_input, *, n_head, num_layers):
    B, L, _ = src_input.shape
    pe = params["pe"][:L]
    mxu_dtype = params["enc_wqkv"].dtype
    vbias = jnp.where(jnp.isnan(target_input), NEG, 0.0).astype(jnp.float32)   # (B, L)
    r = jnp.arange(L)[:, None]
    c = jnp.arange(L)[None, :]
    causal = jnp.where(r >= c, 0.0, NEG).astype(jnp.float32)
    enc_w = _encoder_weights(params)
    dec_w = _decoder_weights(params)
    outs = []
    for b in range(B):
        src_bias = vbias[b][:, None] + vbias[b][None, :]
        trg_bias = src_bias + causal
        enc_b = _encoder_batch(src_input[b], pe, src_bias, *enc_w,
                               n_head=n_head, num_layers=num_layers,
                               attn_scr=None, mxu_dtype=mxu_dtype, approx=False)
        out_b = _decoder_batch(target_input[b][:, None], enc_b, pe,
                               trg_bias, src_bias, *dec_w,
                               n_head=n_head, num_layers=num_layers,
                               attn_scr=None, mxu_dtype=mxu_dtype, approx=False)
        outs.append(out_b)
    return jnp.stack(outs, axis=0)


# ---------------------------------------------------------------------------
# Deterministic parameter initialization (stacked per-layer weights)
# ---------------------------------------------------------------------------

def _default_mxu_dtype():
    """bf16 MXU inputs on v6e/v7x; f32 on v5e (no bf16 VPU path -> skip casts)."""
    try:
        kind = jax.devices()[0].device_kind.lower()
    except Exception:
        return jnp.bfloat16
    return jnp.float32 if "v5" in kind else jnp.bfloat16


def init_params(key, input_dim, trg_dim, d_model, ffn_hidden, num_layers, max_len,
                mxu_dtype=jnp.bfloat16):
    assert trg_dim == 1, "decoder embedding / output head specialized for scalar targets"
    D, F, NL = d_model, ffn_hidden, num_layers

    def stacked(k, din, dout, n):
        w = (0.02 * jax.random.normal(k, (n, din, dout), jnp.float32)).astype(mxu_dtype)
        b = jnp.zeros((n, 1, dout), jnp.float32)
        return w, b

    ones = lambda n, d: jnp.ones((n, 1, d), jnp.float32)
    zeros = lambda n, d: jnp.zeros((n, 1, d), jnp.float32)

    keys = iter(jax.random.split(key, 16))
    p = {}
    # Embeddings / output head stay f32 (tiny-K matmul, VPU outer product / reduce).
    p["enc_emb_w"] = 0.02 * jax.random.normal(next(keys), (input_dim, D), jnp.float32)
    p["enc_emb_b"] = jnp.zeros((1, D), jnp.float32)
    p["dec_emb_w"] = 0.02 * jax.random.normal(next(keys), (trg_dim, D), jnp.float32)
    p["dec_emb_b"] = jnp.zeros((1, D), jnp.float32)
    p["out_w_t"] = 0.02 * jax.random.normal(next(keys), (trg_dim, D), jnp.float32)
    p["out_b"] = jnp.zeros((1, trg_dim), jnp.float32)
    # Encoder layers (stacked along a leading layer axis).
    p["enc_wqkv"], p["enc_bqkv"] = stacked(next(keys), D, 3 * D, NL)
    p["enc_wo"], p["enc_bo"] = stacked(next(keys), D, D, NL)
    p["enc_w1"], p["enc_b1"] = stacked(next(keys), D, F, NL)
    p["enc_w2"], p["enc_b2"] = stacked(next(keys), F, D, NL)
    p["enc_ln1_g"], p["enc_ln1_b"] = ones(NL, D), zeros(NL, D)
    p["enc_ln2_g"], p["enc_ln2_b"] = ones(NL, D), zeros(NL, D)
    # Decoder layers.
    p["dec_sa_wqkv"], p["dec_sa_bqkv"] = stacked(next(keys), D, 3 * D, NL)
    p["dec_sa_wo"], p["dec_sa_bo"] = stacked(next(keys), D, D, NL)
    p["dec_ca_wq"], p["dec_ca_bq"] = stacked(next(keys), D, D, NL)
    p["dec_ca_wkv"], p["dec_ca_bkv"] = stacked(next(keys), D, 2 * D, NL)
    p["dec_ca_wo"], p["dec_ca_bo"] = stacked(next(keys), D, D, NL)
    p["dec_w1"], p["dec_b1"] = stacked(next(keys), D, F, NL)
    p["dec_w2"], p["dec_b2"] = stacked(next(keys), F, D, NL)
    p["dec_ln1_g"], p["dec_ln1_b"] = ones(NL, D), zeros(NL, D)
    p["dec_ln2_g"], p["dec_ln2_b"] = ones(NL, D), zeros(NL, D)
    p["dec_ln3_g"], p["dec_ln3_b"] = ones(NL, D), zeros(NL, D)
    # Sinusoidal positional encoding.
    pos = jnp.arange(max_len, dtype=jnp.float32)[:, None]
    idx = jnp.arange(0, D, 2, dtype=jnp.float32)
    div = jnp.exp(-idx * (math.log(10000.0) / D))
    pe = jnp.zeros((max_len, D), jnp.float32)
    pe = pe.at[:, 0::2].set(jnp.sin(pos * div))
    pe = pe.at[:, 1::2].set(jnp.cos(pos * div))
    p["pe"] = pe
    return p


# ---------------------------------------------------------------------------
# Main
# ---------------------------------------------------------------------------

if __name__ == "__main__":
    B, L = 2, 8
    input_dim, trg_dim = 4, 1
    d_model, n_head, ffn_hidden, num_layers = 32, 4, 64, 2
    max_len = 64

    key = jax.random.PRNGKey(0)
    k_src, k_trg, k_par = jax.random.split(key, 3)
    src_input = jax.random.normal(k_src, (B, L, input_dim), dtype=jnp.float32)
    target_input = jax.random.normal(k_trg, (B, L), dtype=jnp.float32)

    params = init_params(k_par, input_dim, trg_dim, d_model, ffn_hidden,
                         num_layers, max_len, mxu_dtype=_default_mxu_dtype())

    fwd = jax.jit(functools.partial(transformer_forward,
                                    n_head=n_head, num_layers=num_layers))
    out = fwd(params, src_input, target_input)
    jax.block_until_ready(out)

    assert out.shape == (B, L, trg_dim)
    assert bool(jnp.all(jnp.isfinite(out)))

    # Correctness smoke test vs a pure-JAX mirror using the same weights
    # (only divergence: approx reciprocal in the kernel softmax + lowering).
    ref_fn = jax.jit(functools.partial(transformer_reference,
                                       n_head=n_head, num_layers=num_layers))
    ref = ref_fn(params, src_input, target_input)
    jax.block_until_ready(ref)
    max_err = float(jnp.max(jnp.abs(out - ref)))
    assert max_err < 2e-2, f"mismatch vs reference: {max_err}"

    print("KERNEL_OK")
</pallas_src>

<mosaic_0001>
module attributes {stable_mosaic.version = 11 : i64} {
  func.func @_transformer_kernel(%arg0: i32, %arg1: memref<1x8x4xf32, #tpu.memory_space<vmem>>, %arg2: memref<1x8x1xf32, #tpu.memory_space<vmem>>, %arg3: memref<1x1x8xf32, #tpu.memory_space<vmem>>, %arg4: memref<8x32xf32, #tpu.memory_space<vmem>>, %arg5: memref<4x32xf32, #tpu.memory_space<vmem>>, %arg6: memref<1x32xf32, #tpu.memory_space<vmem>>, %arg7: memref<2x32x96xbf16, #tpu.memory_space<vmem>>, %arg8: memref<2x1x96xf32, #tpu.memory_space<vmem>>, %arg9: memref<2x32x32xbf16, #tpu.memory_space<vmem>>, %arg10: memref<2x1x32xf32, #tpu.memory_space<vmem>>, %arg11: memref<2x1x32xf32, #tpu.memory_space<vmem>>, %arg12: memref<2x1x32xf32, #tpu.memory_space<vmem>>, %arg13: memref<2x32x64xbf16, #tpu.memory_space<vmem>>, %arg14: memref<2x1x64xf32, #tpu.memory_space<vmem>>, %arg15: memref<2x64x32xbf16, #tpu.memory_space<vmem>>, %arg16: memref<2x1x32xf32, #tpu.memory_space<vmem>>, %arg17: memref<2x1x32xf32, #tpu.memory_space<vmem>>, %arg18: memref<2x1x32xf32, #tpu.memory_space<vmem>>, %arg19: memref<1x32xf32, #tpu.memory_space<vmem>>, %arg20: memref<1x32xf32, #tpu.memory_space<vmem>>, %arg21: memref<2x32x96xbf16, #tpu.memory_space<vmem>>, %arg22: memref<2x1x96xf32, #tpu.memory_space<vmem>>, %arg23: memref<2x32x32xbf16, #tpu.memory_space<vmem>>, %arg24: memref<2x1x32xf32, #tpu.memory_space<vmem>>, %arg25: memref<2x1x32xf32, #tpu.memory_space<vmem>>, %arg26: memref<2x1x32xf32, #tpu.memory_space<vmem>>, %arg27: memref<2x32x32xbf16, #tpu.memory_space<vmem>>, %arg28: memref<2x1x32xf32, #tpu.memory_space<vmem>>, %arg29: memref<2x32x64xbf16, #tpu.memory_space<vmem>>, %arg30: memref<2x1x64xf32, #tpu.memory_space<vmem>>, %arg31: memref<2x32x32xbf16, #tpu.memory_space<vmem>>, %arg32: memref<2x1x32xf32, #tpu.memory_space<vmem>>, %arg33: memref<2x1x32xf32, #tpu.memory_space<vmem>>, %arg34: memref<2x1x32xf32, #tpu.memory_space<vmem>>, %arg35: memref<2x32x64xbf16, #tpu.memory_space<vmem>>, %arg36: memref<2x1x64xf32, #tpu.memory_space<vmem>>, %arg37: memref<2x64x32xbf16, #tpu.memory_space<vmem>>, %arg38: memref<2x1x32xf32, #tpu.memory_space<vmem>>, %arg39: memref<2x1x32xf32, #tpu.memory_space<vmem>>, %arg40: memref<2x1x32xf32, #tpu.memory_space<vmem>>, %arg41: memref<1x32xf32, #tpu.memory_space<vmem>>, %arg42: memref<1x1xf32, #tpu.memory_space<vmem>>, %arg43: memref<1x8x1xf32, #tpu.memory_space<vmem>>, %arg44: memref<8x32xf32, #tpu.memory_space<vmem>>) attributes {dimension_semantics = [#tpu.dimension_semantics<parallel>], iteration_bounds = array<i64: 2>, scalar_prefetch = 0 : i64, scratch_operands = 1 : i64, tpu.core_type = #tpu.core_type<tc>, window_params = [{transform_indices = @transform_0, window_bounds = array<i64: 1, 8, 4>}, {transform_indices = @transform_1, window_bounds = array<i64: 1, 8, 1>}, {transform_indices = @transform_2, window_bounds = array<i64: 1, 1, 8>}, {pipeline_mode = #tpu.pipeline_mode<synchronous>, transform_indices = @transform_3, window_bounds = array<i64: 8, 32>}, {pipeline_mode = #tpu.pipeline_mode<synchronous>, transform_indices = @transform_4, window_bounds = array<i64: 4, 32>}, {pipeline_mode = #tpu.pipeline_mode<synchronous>, transform_indices = @transform_5, window_bounds = array<i64: 1, 32>}, {pipeline_mode = #tpu.pipeline_mode<synchronous>, transform_indices = @transform_6, window_bounds = array<i64: 2, 32, 96>}, {pipeline_mode = #tpu.pipeline_mode<synchronous>, transform_indices = @transform_7, window_bounds = array<i64: 2, 1, 96>}, {pipeline_mode = #tpu.pipeline_mode<synchronous>, transform_indices = @transform_8, window_bounds = array<i64: 2, 32, 32>}, {pipeline_mode = #tpu.pipeline_mode<synchronous>, transform_indices = @transform_9, window_bounds = array<i64: 2, 1, 32>}, {pipeline_mode = #tpu.pipeline_mode<synchronous>, transform_indices = @transform_10, window_bounds = array<i64: 2, 1, 32>}, {pipeline_mode = #tpu.pipeline_mode<synchronous>, transform_indices = @transform_11, window_bounds = array<i64: 2, 1, 32>}, {pipeline_mode = #tpu.pipeline_mode<synchronous>, transform_indices = @transform_12, window_bounds = array<i64: 2, 32, 64>}, {pipeline_mode = #tpu.pipeline_mode<synchronous>, transform_indices = @transform_13, window_bounds = array<i64: 2, 1, 64>}, {pipeline_mode = #tpu.pipeline_mode<synchronous>, transform_indices = @transform_14, window_bounds = array<i64: 2, 64, 32>}, {pipeline_mode = #tpu.pipeline_mode<synchronous>, transform_indices = @transform_15, window_bounds = array<i64: 2, 1, 32>}, {pipeline_mode = #tpu.pipeline_mode<synchronous>, transform_indices = @transform_16, window_bounds = array<i64: 2, 1, 32>}, {pipeline_mode = #tpu.pipeline_mode<synchronous>, transform_indices = @transform_17, window_bounds = array<i64: 2, 1, 32>}, {pipeline_mode = #tpu.pipeline_mode<synchronous>, transform_indices = @transform_18, window_bounds = array<i64: 1, 32>}, {pipeline_mode = #tpu.pipeline_mode<synchronous>, transform_indices = @transform_19, window_bounds = array<i64: 1, 32>}, {pipeline_mode = #tpu.pipeline_mode<synchronous>, transform_indices = @transform_20, window_bounds = array<i64: 2, 32, 96>}, {pipeline_mode = #tpu.pipeline_mode<synchronous>, transform_indices = @transform_21, window_bounds = array<i64: 2, 1, 96>}, {pipeline_mode = #tpu.pipeline_mode<synchronous>, transform_indices = @transform_22, window_bounds = array<i64: 2, 32, 32>}, {pipeline_mode = #tpu.pipeline_mode<synchronous>, transform_indices = @transform_23, window_bounds = array<i64: 2, 1, 32>}, {pipeline_mode = #tpu.pipeline_mode<synchronous>, transform_indices = @transform_24, window_bounds = array<i64: 2, 1, 32>}, {pipeline_mode = #tpu.pipeline_mode<synchronous>, transform_indices = @transform_25, window_bounds = array<i64: 2, 1, 32>}, {pipeline_mode = #tpu.pipeline_mode<synchronous>, transform_indices = @transform_26, window_bounds = array<i64: 2, 32, 32>}, {pipeline_mode = #tpu.pipeline_mode<synchronous>, transform_indices = @transform_27, window_bounds = array<i64: 2, 1, 32>}, {pipeline_mode = #tpu.pipeline_mode<synchronous>, transform_indices = @transform_28, window_bounds = array<i64: 2, 32, 64>}, {pipeline_mode = #tpu.pipeline_mode<synchronous>, transform_indices = @transform_29, window_bounds = array<i64: 2, 1, 64>}, {pipeline_mode = #tpu.pipeline_mode<synchronous>, transform_indices = @transform_30, window_bounds = array<i64: 2, 32, 32>}, {pipeline_mode = #tpu.pipeline_mode<synchronous>, transform_indices = @transform_31, window_bounds = array<i64: 2, 1, 32>}, {pipeline_mode = #tpu.pipeline_mode<synchronous>, transform_indices = @transform_32, window_bounds = array<i64: 2, 1, 32>}, {pipeline_mode = #tpu.pipeline_mode<synchronous>, transform_indices = @transform_33, window_bounds = array<i64: 2, 1, 32>}, {pipeline_mode = #tpu.pipeline_mode<synchronous>, transform_indices = @transform_34, window_bounds = array<i64: 2, 32, 64>}, {pipeline_mode = #tpu.pipeline_mode<synchronous>, transform_indices = @transform_35, window_bounds = array<i64: 2, 1, 64>}, {pipeline_mode = #tpu.pipeline_mode<synchronous>, transform_indices = @transform_36, window_bounds = array<i64: 2, 64, 32>}, {pipeline_mode = #tpu.pipeline_mode<synchronous>, transform_indices = @transform_37, window_bounds = array<i64: 2, 1, 32>}, {pipeline_mode = #tpu.pipeline_mode<synchronous>, transform_indices = @transform_38, window_bounds = array<i64: 2, 1, 32>}, {pipeline_mode = #tpu.pipeline_mode<synchronous>, transform_indices = @transform_39, window_bounds = array<i64: 2, 1, 32>}, {pipeline_mode = #tpu.pipeline_mode<synchronous>, transform_indices = @transform_40, window_bounds = array<i64: 1, 32>}, {pipeline_mode = #tpu.pipeline_mode<synchronous>, transform_indices = @transform_41, window_bounds = array<i64: 1, 1>}, {transform_indices = @transform_42, window_bounds = array<i64: 1, 8, 1>}]} {
    %c0 = arith.constant 0 : index
    %c0_0 = arith.constant 0 : index
    %c0_1 = arith.constant 0 : index
    %0 = vector.load %arg2[%c0, %c0_0, %c0_1] : memref<1x8x1xf32, #tpu.memory_space<vmem>>, vector<1x8x1xf32>
    %1 = vector.shape_cast %0 : vector<1x8x1xf32> to vector<8x1xf32>
    %c0_2 = arith.constant 0 : index
    %c0_3 = arith.constant 0 : index
    %2 = vector.load %arg4[%c0_2, %c0_3] : memref<8x32xf32, #tpu.memory_space<vmem>>, vector<8x32xf32>
    %3 = arith.cmpf one, %1, %1 : vector<8x1xf32>
    %cst = arith.constant -1.000000e+09 : f32
    %cst_4 = arith.constant 0.000000e+00 : f32
    %4 = vector.broadcast %cst : f32 to vector<8x1xf32>
    %5 = vector.broadcast %cst_4 : f32 to vector<8x1xf32>
    %6 = arith.select %3, %4, %5 : vector<8x1xi1>, vector<8x1xf32>
    %c0_5 = arith.constant 0 : index
    %c0_6 = arith.constant 0 : index
    %c0_7 = arith.constant 0 : index
    %7 = vector.load %arg3[%c0_5, %c0_6, %c0_7] : memref<1x1x8xf32, #tpu.memory_space<vmem>>, vector<1x1x8xf32>
    %8 = vector.shape_cast %7 : vector<1x1x8xf32> to vector<1x8xf32>
    %9 = vector.broadcast %6 : vector<8x1xf32> to vector<8x8xf32>
    %10 = vector.broadcast %8 : vector<1x8xf32> to vector<8x8xf32>
    %11 = arith.addf %9, %10 : vector<8x8xf32>
    %12 = tpu.iota {dimensions = array<i32: 0>} : vector<8x8xi32>
    %13 = tpu.iota {dimensions = array<i32: 1>} : vector<8x8xi32>
    %14 = arith.cmpi sge, %12, %13 : vector<8x8xi32>
    %cst_8 = arith.constant 0.000000e+00 : f32
    %cst_9 = arith.constant -1.000000e+09 : f32
    %15 = vector.broadcast %cst_8 : f32 to vector<8x8xf32>
    %16 = vector.broadcast %cst_9 : f32 to vector<8x8xf32>
    %17 = arith.select %14, %15, %16 : vector<8x8xi1>, vector<8x8xf32>
    %18 = arith.addf %11, %17 : vector<8x8xf32>
    %c0_10 = arith.constant 0 : index
    %c0_11 = arith.constant 0 : index
    %c0_12 = arith.constant 0 : index
    %19 = vector.load %arg1[%c0_10, %c0_11, %c0_12] : memref<1x8x4xf32, #tpu.memory_space<vmem>>, vector<1x8x4xf32>
    %20 = vector.shape_cast %19 : vector<1x8x4xf32> to vector<8x4xf32>
    %c0_13 = arith.constant 0 : index
    %c0_14 = arith.constant 0 : index
    %21 = vector.load %arg5[%c0_13, %c0_14] : memref<4x32xf32, #tpu.memory_space<vmem>>, vector<4x32xf32>
    %cst_15 = arith.constant dense<0.000000e+00> : vector<8x32xf32>
    %22 = tpu.matmul %20, %21, %cst_15 {dimension_numbers = #tpu.dot_dimension_numbers<[1], [0], [0], [1], [0, 0, 1, 1], [], []>} : vector<8x4xf32>, vector<4x32xf32>, vector<8x32xf32> -> vector<8x32xf32>
    %c0_16 = arith.constant 0 : index
    %c0_17 = arith.constant 0 : index
    %23 = vector.load %arg6[%c0_16, %c0_17] : memref<1x32xf32, #tpu.memory_space<vmem>>, vector<1x32xf32>
    %24 = vector.broadcast %23 : vector<1x32xf32> to vector<8x32xf32>
    %25 = arith.addf %22, %24 : vector<8x32xf32>
    %26 = arith.addf %25, %2 : vector<8x32xf32>
    %c0_18 = arith.constant 0 : index
    %c0_19 = arith.constant 0 : index
    %c0_20 = arith.constant 0 : index
    %27 = vector.load %arg7[%c0_18, %c0_19, %c0_20] : memref<2x32x96xbf16, #tpu.memory_space<vmem>>, vector<1x32x96xbf16>
    %28 = vector.shape_cast %27 : vector<1x32x96xbf16> to vector<32x96xbf16>
    %c0_21 = arith.constant 0 : index
    %c0_22 = arith.constant 0 : index
    %c0_23 = arith.constant 0 : index
    %29 = vector.load %arg8[%c0_21, %c0_22, %c0_23] : memref<2x1x96xf32, #tpu.memory_space<vmem>>, vector<1x1x96xf32>
    %30 = vector.shape_cast %29 : vector<1x1x96xf32> to vector<1x96xf32>
    %c0_24 = arith.constant 0 : index
    %c0_25 = arith.constant 0 : index
    %c0_26 = arith.constant 0 : index
    %31 = vector.load %arg9[%c0_24, %c0_25, %c0_26] : memref<2x32x32xbf16, #tpu.memory_space<vmem>>, vector<1x32x32xbf16>
    %32 = vector.shape_cast %31 : vector<1x32x32xbf16> to vector<32x32xbf16>
    %c0_27 = arith.constant 0 : index
    %c0_28 = arith.constant 0 : index
    %c0_29 = arith.constant 0 : index
    %33 = vector.load %arg10[%c0_27, %c0_28, %c0_29] : memref<2x1x32xf32, #tpu.memory_space<vmem>>, vector<1x1x32xf32>
    %34 = vector.shape_cast %33 : vector<1x1x32xf32> to vector<1x32xf32>
    %35 = arith.truncf %26 : vector<8x32xf32> to vector<8x32xbf16>
    %cst_30 = arith.constant dense<0.000000e+00> : vector<8x96xf32>
    %36 = tpu.matmul %35, %28, %cst_30 {dimension_numbers = #tpu.dot_dimension_numbers<[1], [0], [0], [1], [0, 0, 1, 1], [], []>} : vector<8x32xbf16>, vector<32x96xbf16>, vector<8x96xf32> -> vector<8x96xf32>
    %37 = vector.broadcast %30 : vector<1x96xf32> to vector<8x96xf32>
    %38 = arith.addf %36, %37 : vector<8x96xf32>
    %39 = vector.extract_strided_slice %38 {offsets = [0, 0], sizes = [8, 32], strides = [1, 1]} : vector<8x96xf32> to vector<8x32xf32>
    %40 = vector.extract_strided_slice %38 {offsets = [0, 32], sizes = [8, 32], strides = [1, 1]} : vector<8x96xf32> to vector<8x32xf32>
    %41 = vector.extract_strided_slice %38 {offsets = [0, 64], sizes = [8, 32], strides = [1, 1]} : vector<8x96xf32> to vector<8x32xf32>
    %cst_31 = arith.constant 0.353553385 : f32
    %42 = vector.broadcast %cst_31 : f32 to vector<8x32xf32>
    %43 = arith.mulf %39, %42 : vector<8x32xf32>
    %44 = arith.truncf %43 : vector<8x32xf32> to vector<8x32xbf16>
    %45 = arith.truncf %40 : vector<8x32xf32> to vector<8x32xbf16>
    %46 = arith.truncf %41 : vector<8x32xf32> to vector<8x32xbf16>
    %47 = vector.extract_strided_slice %44 {offsets = [0, 0], sizes = [8, 8], strides = [1, 1]} : vector<8x32xbf16> to vector<8x8xbf16>
    %48 = vector.extract_strided_slice %45 {offsets = [0, 0], sizes = [8, 8], strides = [1, 1]} : vector<8x32xbf16> to vector<8x8xbf16>
    %cst_32 = arith.constant dense<0.000000e+00> : vector<8x8xf32>
    %49 = tpu.matmul %47, %48, %cst_32 {dimension_numbers = #tpu.dot_dimension_numbers<[1], [1], [0], [0], [0, 0, 1, 0], [], []>} : vector<8x8xbf16>, vector<8x8xbf16>, vector<8x8xf32> -> vector<8x8xf32>
    %50 = arith.addf %49, %11 : vector<8x8xf32>
    %cst_33 = arith.constant dense<0xFF800000> : vector<8xf32>
    %51 = vector.multi_reduction <maximumf>, %50, %cst_33 [1] : vector<8x8xf32> to vector<8xf32>
    %52 = vector.shape_cast %51 : vector<8xf32> to vector<8x1xf32>
    %53 = vector.broadcast %52 : vector<8x1xf32> to vector<8x8xf32>
    %54 = arith.subf %50, %53 : vector<8x8xf32>
    %55 = math.exp %54 : vector<8x8xf32>
    %cst_34 = arith.constant dense<0.000000e+00> : vector<8xf32>
    %56 = vector.multi_reduction <add>, %55, %cst_34 [1] : vector<8x8xf32> to vector<8xf32>
    %57 = vector.shape_cast %56 : vector<8xf32> to vector<8x1xf32>
    %58 = tpu.reciprocal %57 {approx = true} : vector<8x1xf32> -> vector<8x1xf32>
    %59 = vector.broadcast %58 : vector<8x1xf32> to vector<8x8xf32>
    %60 = arith.mulf %55, %59 : vector<8x8xf32>
    %61 = arith.truncf %60 : vector<8x8xf32> to vector<8x8xbf16>
    %62 = vector.extract_strided_slice %46 {offsets = [0, 0], sizes = [8, 8], strides = [1, 1]} : vector<8x32xbf16> to vector<8x8xbf16>
    %cst_35 = arith.constant dense<0.000000e+00> : vector<8x8xf32>
    %63 = tpu.matmul %61, %62, %cst_35 {dimension_numbers = #tpu.dot_dimension_numbers<[1], [0], [0], [1], [0, 0, 1, 1], [], []>} : vector<8x8xbf16>, vector<8x8xbf16>, vector<8x8xf32> -> vector<8x8xf32>
    %c0_36 = arith.constant 0 : index
    %c0_37 = arith.constant 0 : index
    %64 = vector.load %arg44[%c0_36, %c0_37] : memref<8x32xf32, #tpu.memory_space<vmem>>, vector<8x8xf32>
    tpu.vector_store %arg44[%c0_36, %c0_37], %63 {strides = array<i32>} : memref<8x32xf32, #tpu.memory_space<vmem>>, vector<8x8xf32>,
    %65 = vector.extract_strided_slice %44 {offsets = [0, 8], sizes = [8, 8], strides = [1, 1]} : vector<8x32xbf16> to vector<8x8xbf16>
    %66 = vector.extract_strided_slice %45 {offsets = [0, 8], sizes = [8, 8], strides = [1, 1]} : vector<8x32xbf16> to vector<8x8xbf16>
    %cst_38 = arith.constant dense<0.000000e+00> : vector<8x8xf32>
    %67 = tpu.matmul %65, %66, %cst_38 {dimension_numbers = #tpu.dot_dimension_numbers<[1], [1], [0], [0], [0, 0, 1, 0], [], []>} : vector<8x8xbf16>, vector<8x8xbf16>, vector<8x8xf32> -> vector<8x8xf32>
    %68 = arith.addf %67, %11 : vector<8x8xf32>
    %cst_39 = arith.constant dense<0xFF800000> : vector<8xf32>
    %69 = vector.multi_reduction <maximumf>, %68, %cst_39 [1] : vector<8x8xf32> to vector<8xf32>
    %70 = vector.shape_cast %69 : vector<8xf32> to vector<8x1xf32>
    %71 = vector.broadcast %70 : vector<8x1xf32> to vector<8x8xf32>
    %72 = arith.subf %68, %71 : vector<8x8xf32>
    %73 = math.exp %72 : vector<8x8xf32>
    %cst_40 = arith.constant dense<0.000000e+00> : vector<8xf32>
    %74 = vector.multi_reduction <add>, %73, %cst_40 [1] : vector<8x8xf32> to vector<8xf32>
    %75 = vector.shape_cast %74 : vector<8xf32> to vector<8x1xf32>
    %76 = tpu.reciprocal %75 {approx = true} : vector<8x1xf32> -> vector<8x1xf32>
    %77 = vector.broadcast %76 : vector<8x1xf32> to vector<8x8xf32>
    %78 = arith.mulf %73, %77 : vector<8x8xf32>
    %79 = arith.truncf %78 : vector<8x8xf32> to vector<8x8xbf16>
    %80 = vector.extract_strided_slice %46 {offsets = [0, 8], sizes = [8, 8], strides = [1, 1]} : vector<8x32xbf16> to vector<8x8xbf16>
    %cst_41 = arith.constant dense<0.000000e+00> : vector<8x8xf32>
    %81 = tpu.matmul %79, %80, %cst_41 {dimension_numbers = #tpu.dot_dimension_numbers<[1], [0], [0], [1], [0, 0, 1, 1], [], []>} : vector<8x8xbf16>, vector<8x8xbf16>, vector<8x8xf32> -> vector<8x8xf32>
    %c0_42 = arith.constant 0 : index
    %c8 = arith.constant 8 : index
    %82 = vector.load %arg44[%c0_42, %c8] : memref<8x32xf32, #tpu.memory_space<vmem>>, vector<8x8xf32>
    tpu.vector_store %arg44[%c0_42, %c8], %81 {strides = array<i32>} : memref<8x32xf32, #tpu.memory_space<vmem>>, vector<8x8xf32>,
    %83 = vector.extract_strided_slice %44 {offsets = [0, 16], sizes = [8, 8], strides = [1, 1]} : vector<8x32xbf16> to vector<8x8xbf16>
    %84 = vector.extract_strided_slice %45 {offsets = [0, 16], sizes = [8, 8], strides = [1, 1]} : vector<8x32xbf16> to vector<8x8xbf16>
    %cst_43 = arith.constant dense<0.000000e+00> : vector<8x8xf32>
    %85 = tpu.matmul %83, %84, %cst_43 {dimension_numbers = #tpu.dot_dimension_numbers<[1], [1], [0], [0], [0, 0, 1, 0], [], []>} : vector<8x8xbf16>, vector<8x8xbf16>, vector<8x8xf32> -> vector<8x8xf32>
    %86 = arith.addf %85, %11 : vector<8x8xf32>
    %cst_44 = arith.constant dense<0xFF800000> : vector<8xf32>
    %87 = vector.multi_reduction <maximumf>, %86, %cst_44 [1] : vector<8x8xf32> to vector<8xf32>
    %88 = vector.shape_cast %87 : vector<8xf32> to vector<8x1xf32>
    %89 = vector.broadcast %88 : vector<8x1xf32> to vector<8x8xf32>
    %90 = arith.subf %86, %89 : vector<8x8xf32>
    %91 = math.exp %90 : vector<8x8xf32>
    %cst_45 = arith.constant dense<0.000000e+00> : vector<8xf32>
    %92 = vector.multi_reduction <add>, %91, %cst_45 [1] : vector<8x8xf32> to vector<8xf32>
    %93 = vector.shape_cast %92 : vector<8xf32> to vector<8x1xf32>
    %94 = tpu.reciprocal %93 {approx = true} : vector<8x1xf32> -> vector<8x1xf32>
    %95 = vector.broadcast %94 : vector<8x1xf32> to vector<8x8xf32>
    %96 = arith.mulf %91, %95 : vector<8x8xf32>
    %97 = arith.truncf %96 : vector<8x8xf32> to vector<8x8xbf16>
    %98 = vector.extract_strided_slice %46 {offsets = [0, 16], sizes = [8, 8], strides = [1, 1]} : vector<8x32xbf16> to vector<8x8xbf16>
    %cst_46 = arith.constant dense<0.000000e+00> : vector<8x8xf32>
    %99 = tpu.matmul %97, %98, %cst_46 {dimension_numbers = #tpu.dot_dimension_numbers<[1], [0], [0], [1], [0, 0, 1, 1], [], []>} : vector<8x8xbf16>, vector<8x8xbf16>, vector<8x8xf32> -> vector<8x8xf32>
    %c0_47 = arith.constant 0 : index
    %c16 = arith.constant 16 : index
    %100 = vector.load %arg44[%c0_47, %c16] : memref<8x32xf32, #tpu.memory_space<vmem>>, vector<8x8xf32>
    tpu.vector_store %arg44[%c0_47, %c16], %99 {strides = array<i32>} : memref<8x32xf32, #tpu.memory_space<vmem>>, vector<8x8xf32>,
    %101 = vector.extract_strided_slice %44 {offsets = [0, 24], sizes = [8, 8], strides = [1, 1]} : vector<8x32xbf16> to vector<8x8xbf16>
    %102 = vector.extract_strided_slice %45 {offsets = [0, 24], sizes = [8, 8], strides = [1, 1]} : vector<8x32xbf16> to vector<8x8xbf16>
    %cst_48 = arith.constant dense<0.000000e+00> : vector<8x8xf32>
    %103 = tpu.matmul %101, %102, %cst_48 {dimension_numbers = #tpu.dot_dimension_numbers<[1], [1], [0], [0], [0, 0, 1, 0], [], []>} : vector<8x8xbf16>, vector<8x8xbf16>, vector<8x8xf32> -> vector<8x8xf32>
    %104 = arith.addf %103, %11 : vector<8x8xf32>
    %cst_49 = arith.constant dense<0xFF800000> : vector<8xf32>
    %105 = vector.multi_reduction <maximumf>, %104, %cst_49 [1] : vector<8x8xf32> to vector<8xf32>
    %106 = vector.shape_cast %105 : vector<8xf32> to vector<8x1xf32>
    %107 = vector.broadcast %106 : vector<8x1xf32> to vector<8x8xf32>
    %108 = arith.subf %104, %107 : vector<8x8xf32>
    %109 = math.exp %108 : vector<8x8xf32>
    %cst_50 = arith.constant dense<0.000000e+00> : vector<8xf32>
    %110 = vector.multi_reduction <add>, %109, %cst_50 [1] : vector<8x8xf32> to vector<8xf32>
    %111 = vector.shape_cast %110 : vector<8xf32> to vector<8x1xf32>
    %112 = tpu.reciprocal %111 {approx = true} : vector<8x1xf32> -> vector<8x1xf32>
    %113 = vector.broadcast %112 : vector<8x1xf32> to vector<8x8xf32>
    %114 = arith.mulf %109, %113 : vector<8x8xf32>
    %115 = arith.truncf %114 : vector<8x8xf32> to vector<8x8xbf16>
    %116 = vector.extract_strided_slice %46 {offsets = [0, 24], sizes = [8, 8], strides = [1, 1]} : vector<8x32xbf16> to vector<8x8xbf16>
    %cst_51 = arith.constant dense<0.000000e+00> : vector<8x8xf32>
    %117 = tpu.matmul %115, %116, %cst_51 {dimension_numbers = #tpu.dot_dimension_numbers<[1], [0], [0], [1], [0, 0, 1, 1], [], []>} : vector<8x8xbf16>, vector<8x8xbf16>, vector<8x8xf32> -> vector<8x8xf32>
    %c0_52 = arith.constant 0 : index
    %c24 = arith.constant 24 : index
    %118 = vector.load %arg44[%c0_52, %c24] : memref<8x32xf32, #tpu.memory_space<vmem>>, vector<8x8xf32>
    tpu.vector_store %arg44[%c0_52, %c24], %117 {strides = array<i32>} : memref<8x32xf32, #tpu.memory_space<vmem>>, vector<8x8xf32>,
    %c0_53 = arith.constant 0 : index
    %c0_54 = arith.constant 0 : index
    %119 = vector.load %arg44[%c0_53, %c0_54] : memref<8x32xf32, #tpu.memory_space<vmem>>, vector<8x32xf32>
    %120 = arith.truncf %119 : vector<8x32xf32> to vector<8x32xbf16>
    %cst_55 = arith.constant dense<0.000000e+00> : vector<8x32xf32>
    %121 = tpu.matmul %120, %32, %cst_55 {dimension_numbers = #tpu.dot_dimension_numbers<[1], [0], [0], [1], [0, 0, 1, 1], [], []>} : vector<8x32xbf16>, vector<32x32xbf16>, vector<8x32xf32> -> vector<8x32xf32>
    %122 = vector.broadcast %34 : vector<1x32xf32> to vector<8x32xf32>
    %123 = arith.addf %121, %122 : vector<8x32xf32>
    %c0_56 = arith.constant 0 : index
    %c0_57 = arith.constant 0 : index
    %c0_58 = arith.constant 0 : index
    %124 = vector.load %arg11[%c0_56, %c0_57, %c0_58] : memref<2x1x32xf32, #tpu.memory_space<vmem>>, vector<1x1x32xf32>
    %125 = vector.shape_cast %124 : vector<1x1x32xf32> to vector<1x32xf32>
    %c0_59 = arith.constant 0 : index
    %c0_60 = arith.constant 0 : index
    %c0_61 = arith.constant 0 : index
    %126 = vector.load %arg12[%c0_59, %c0_60, %c0_61] : memref<2x1x32xf32, #tpu.memory_space<vmem>>, vector<1x1x32xf32>
    %127 = vector.shape_cast %126 : vector<1x1x32xf32> to vector<1x32xf32>
    %128 = arith.addf %123, %26 : vector<8x32xf32>
    %cst_62 = arith.constant dense<0.000000e+00> : vector<8xf32>
    %129 = vector.multi_reduction <add>, %128, %cst_62 [1] : vector<8x32xf32> to vector<8xf32>
    %130 = vector.shape_cast %129 : vector<8xf32> to vector<8x1xf32>
    %cst_63 = arith.constant 3.200000e+01 : f32
    %131 = vector.broadcast %cst_63 : f32 to vector<8x1xf32>
    %132 = arith.divf %130, %131 : vector<8x1xf32>
    %133 = vector.broadcast %132 : vector<8x1xf32> to vector<8x32xf32>
    %134 = arith.subf %128, %133 : vector<8x32xf32>
    %135 = arith.mulf %134, %134 : vector<8x32xf32>
    %cst_64 = arith.constant dense<0.000000e+00> : vector<8xf32>
    %136 = vector.multi_reduction <add>, %135, %cst_64 [1] : vector<8x32xf32> to vector<8xf32>
    %137 = vector.shape_cast %136 : vector<8xf32> to vector<8x1xf32>
    %cst_65 = arith.constant 3.200000e+01 : f32
    %138 = vector.broadcast %cst_65 : f32 to vector<8x1xf32>
    %139 = arith.divf %137, %138 : vector<8x1xf32>
    %140 = vector.broadcast %132 : vector<8x1xf32> to vector<8x32xf32>
    %141 = arith.subf %128, %140 : vector<8x32xf32>
    %cst_66 = arith.constant 9.99999974E-6 : f32
    %142 = vector.broadcast %cst_66 : f32 to vector<8x1xf32>
    %143 = arith.addf %139, %142 : vector<8x1xf32>
    %144 = math.rsqrt %143 : vector<8x1xf32>
    %145 = vector.broadcast %144 : vector<8x1xf32> to vector<8x32xf32>
    %146 = arith.mulf %141, %145 : vector<8x32xf32>
    %147 = vector.broadcast %125 : vector<1x32xf32> to vector<8x32xf32>
    %148 = arith.mulf %146, %147 : vector<8x32xf32>
    %149 = vector.broadcast %127 : vector<1x32xf32> to vector<8x32xf32>
    %150 = arith.addf %148, %149 : vector<8x32xf32>
    %c0_67 = arith.constant 0 : index
    %c0_68 = arith.constant 0 : index
    %c0_69 = arith.constant 0 : index
    %151 = vector.load %arg13[%c0_67, %c0_68, %c0_69] : memref<2x32x64xbf16, #tpu.memory_space<vmem>>, vector<1x32x64xbf16>
    %152 = vector.shape_cast %151 : vector<1x32x64xbf16> to vector<32x64xbf16>
    %c0_70 = arith.constant 0 : index
    %c0_71 = arith.constant 0 : index
    %c0_72 = arith.constant 0 : index
    %153 = vector.load %arg14[%c0_70, %c0_71, %c0_72] : memref<2x1x64xf32, #tpu.memory_space<vmem>>, vector<1x1x64xf32>
    %154 = vector.shape_cast %153 : vector<1x1x64xf32> to vector<1x64xf32>
    %c0_73 = arith.constant 0 : index
    %c0_74 = arith.constant 0 : index
    %c0_75 = arith.constant 0 : index
    %155 = vector.load %arg15[%c0_73, %c0_74, %c0_75] : memref<2x64x32xbf16, #tpu.memory_space<vmem>>, vector<1x64x32xbf16>
    %156 = vector.shape_cast %155 : vector<1x64x32xbf16> to vector<64x32xbf16>
    %c0_76 = arith.constant 0 : index
    %c0_77 = arith.constant 0 : index
    %c0_78 = arith.constant 0 : index
    %157 = vector.load %arg16[%c0_76, %c0_77, %c0_78] : memref<2x1x32xf32, #tpu.memory_space<vmem>>, vector<1x1x32xf32>
    %158 = vector.shape_cast %157 : vector<1x1x32xf32> to vector<1x32xf32>
    %159 = arith.truncf %150 : vector<8x32xf32> to vector<8x32xbf16>
    %cst_79 = arith.constant dense<0.000000e+00> : vector<8x64xf32>
    %160 = tpu.matmul %159, %152, %cst_79 {dimension_numbers = #tpu.dot_dimension_numbers<[1], [0], [0], [1], [0, 0, 1, 1], [], []>} : vector<8x32xbf16>, vector<32x64xbf16>, vector<8x64xf32> -> vector<8x64xf32>
    %161 = vector.broadcast %154 : vector<1x64xf32> to vector<8x64xf32>
    %162 = arith.addf %160, %161 : vector<8x64xf32>
    %cst_80 = arith.constant 0.000000e+00 : f32
    %163 = vector.broadcast %cst_80 : f32 to vector<8x64xf32>
    %164 = arith.maximumf %162, %163 : vector<8x64xf32>
    %165 = arith.truncf %164 : vector<8x64xf32> to vector<8x64xbf16>
    %cst_81 = arith.constant dense<0.000000e+00> : vector<8x32xf32>
    %166 = tpu.matmul %165, %156, %cst_81 {dimension_numbers = #tpu.dot_dimension_numbers<[1], [0], [0], [1], [0, 0, 1, 1], [], []>} : vector<8x64xbf16>, vector<64x32xbf16>, vector<8x32xf32> -> vector<8x32xf32>
    %167 = vector.broadcast %158 : vector<1x32xf32> to vector<8x32xf32>
    %168 = arith.addf %166, %167 : vector<8x32xf32>
    %c0_82 = arith.constant 0 : index
    %c0_83 = arith.constant 0 : index
    %c0_84 = arith.constant 0 : index
    %169 = vector.load %arg17[%c0_82, %c0_83, %c0_84] : memref<2x1x32xf32, #tpu.memory_space<vmem>>, vector<1x1x32xf32>
    %170 = vector.shape_cast %169 : vector<1x1x32xf32> to vector<1x32xf32>
    %c0_85 = arith.constant 0 : index
    %c0_86 = arith.constant 0 : index
    %c0_87 = arith.constant 0 : index
    %171 = vector.load %arg18[%c0_85, %c0_86, %c0_87] : memref<2x1x32xf32, #tpu.memory_space<vmem>>, vector<1x1x32xf32>
    %172 = vector.shape_cast %171 : vector<1x1x32xf32> to vector<1x32xf32>
    %173 = arith.addf %168, %150 : vector<8x32xf32>
    %cst_88 = arith.constant dense<0.000000e+00> : vector<8xf32>
    %174 = vector.multi_reduction <add>, %173, %cst_88 [1] : vector<8x32xf32> to vector<8xf32>
    %175 = vector.shape_cast %174 : vector<8xf32> to vector<8x1xf32>
    %cst_89 = arith.constant 3.200000e+01 : f32
    %176 = vector.broadcast %cst_89 : f32 to vector<8x1xf32>
    %177 = arith.divf %175, %176 : vector<8x1xf32>
    %178 = vector.broadcast %177 : vector<8x1xf32> to vector<8x32xf32>
    %179 = arith.subf %173, %178 : vector<8x32xf32>
    %180 = arith.mulf %179, %179 : vector<8x32xf32>
    %cst_90 = arith.constant dense<0.000000e+00> : vector<8xf32>
    %181 = vector.multi_reduction <add>, %180, %cst_90 [1] : vector<8x32xf32> to vector<8xf32>
    %182 = vector.shape_cast %181 : vector<8xf32> to vector<8x1xf32>
    %cst_91 = arith.constant 3.200000e+01 : f32
    %183 = vector.broadcast %cst_91 : f32 to vector<8x1xf32>
    %184 = arith.divf %182, %183 : vector<8x1xf32>
    %185 = vector.broadcast %177 : vector<8x1xf32> to vector<8x32xf32>
    %186 = arith.subf %173, %185 : vector<8x32xf32>
    %cst_92 = arith.constant 9.99999974E-6 : f32
    %187 = vector.broadcast %cst_92 : f32 to vector<8x1xf32>
    %188 = arith.addf %184, %187 : vector<8x1xf32>
    %189 = math.rsqrt %188 : vector<8x1xf32>
    %190 = vector.broadcast %189 : vector<8x1xf32> to vector<8x32xf32>
    %191 = arith.mulf %186, %190 : vector<8x32xf32>
    %192 = vector.broadcast %170 : vector<1x32xf32> to vector<8x32xf32>
    %193 = arith.mulf %191, %192 : vector<8x32xf32>
    %194 = vector.broadcast %172 : vector<1x32xf32> to vector<8x32xf32>
    %195 = arith.addf %193, %194 : vector<8x32xf32>
    %c1 = arith.constant 1 : index
    %c0_93 = arith.constant 0 : index
    %c0_94 = arith.constant 0 : index
    %196 = vector.load %arg7[%c1, %c0_93, %c0_94] : memref<2x32x96xbf16, #tpu.memory_space<vmem>>, vector<1x32x96xbf16>
    %197 = vector.shape_cast %196 : vector<1x32x96xbf16> to vector<32x96xbf16>
    %c1_95 = arith.constant 1 : index
    %c0_96 = arith.constant 0 : index
    %c0_97 = arith.constant 0 : index
    %198 = vector.load %arg8[%c1_95, %c0_96, %c0_97] : memref<2x1x96xf32, #tpu.memory_space<vmem>>, vector<1x1x96xf32>
    %199 = vector.shape_cast %198 : vector<1x1x96xf32> to vector<1x96xf32>
    %c1_98 = arith.constant 1 : index
    %c0_99 = arith.constant 0 : index
    %c0_100 = arith.constant 0 : index
    %200 = vector.load %arg9[%c1_98, %c0_99, %c0_100] : memref<2x32x32xbf16, #tpu.memory_space<vmem>>, vector<1x32x32xbf16>
    %201 = vector.shape_cast %200 : vector<1x32x32xbf16> to vector<32x32xbf16>
    %c1_101 = arith.constant 1 : index
    %c0_102 = arith.constant 0 : index
    %c0_103 = arith.constant 0 : index
    %202 = vector.load %arg10[%c1_101, %c0_102, %c0_103] : memref<2x1x32xf32, #tpu.memory_space<vmem>>, vector<1x1x32xf32>
    %203 = vector.shape_cast %202 : vector<1x1x32xf32> to vector<1x32xf32>
    %204 = arith.truncf %195 : vector<8x32xf32> to vector<8x32xbf16>
    %cst_104 = arith.constant dense<0.000000e+00> : vector<8x96xf32>
    %205 = tpu.matmul %204, %197, %cst_104 {dimension_numbers = #tpu.dot_dimension_numbers<[1], [0], [0], [1], [0, 0, 1, 1], [], []>} : vector<8x32xbf16>, vector<32x96xbf16>, vector<8x96xf32> -> vector<8x96xf32>
    %206 = vector.broadcast %199 : vector<1x96xf32> to vector<8x96xf32>
    %207 = arith.addf %205, %206 : vector<8x96xf32>
    %208 = vector.extract_strided_slice %207 {offsets = [0, 0], sizes = [8, 32], strides = [1, 1]} : vector<8x96xf32> to vector<8x32xf32>
    %209 = vector.extract_strided_slice %207 {offsets = [0, 32], sizes = [8, 32], strides = [1, 1]} : vector<8x96xf32> to vector<8x32xf32>
    %210 = vector.extract_strided_slice %207 {offsets = [0, 64], sizes = [8, 32], strides = [1, 1]} : vector<8x96xf32> to vector<8x32xf32>
    %cst_105 = arith.constant 0.353553385 : f32
    %211 = vector.broadcast %cst_105 : f32 to vector<8x32xf32>
    %212 = arith.mulf %208, %211 : vector<8x32xf32>
    %213 = arith.truncf %212 : vector<8x32xf32> to vector<8x32xbf16>
    %214 = arith.truncf %209 : vector<8x32xf32> to vector<8x32xbf16>
    %215 = arith.truncf %210 : vector<8x32xf32> to vector<8x32xbf16>
    %216 = vector.extract_strided_slice %213 {offsets = [0, 0], sizes = [8, 8], strides = [1, 1]} : vector<8x32xbf16> to vector<8x8xbf16>
    %217 = vector.extract_strided_slice %214 {offsets = [0, 0], sizes = [8, 8], strides = [1, 1]} : vector<8x32xbf16> to vector<8x8xbf16>
    %cst_106 = arith.constant dense<0.000000e+00> : vector<8x8xf32>
    %218 = tpu.matmul %216, %217, %cst_106 {dimension_numbers = #tpu.dot_dimension_numbers<[1], [1], [0], [0], [0, 0, 1, 0], [], []>} : vector<8x8xbf16>, vector<8x8xbf16>, vector<8x8xf32> -> vector<8x8xf32>
    %219 = arith.addf %218, %11 : vector<8x8xf32>
    %cst_107 = arith.constant dense<0xFF800000> : vector<8xf32>
    %220 = vector.multi_reduction <maximumf>, %219, %cst_107 [1] : vector<8x8xf32> to vector<8xf32>
    %221 = vector.shape_cast %220 : vector<8xf32> to vector<8x1xf32>
    %222 = vector.broadcast %221 : vector<8x1xf32> to vector<8x8xf32>
    %223 = arith.subf %219, %222 : vector<8x8xf32>
    %224 = math.exp %223 : vector<8x8xf32>
    %cst_108 = arith.constant dense<0.000000e+00> : vector<8xf32>
    %225 = vector.multi_reduction <add>, %224, %cst_108 [1] : vector<8x8xf32> to vector<8xf32>
    %226 = vector.shape_cast %225 : vector<8xf32> to vector<8x1xf32>
    %227 = tpu.reciprocal %226 {approx = true} : vector<8x1xf32> -> vector<8x1xf32>
    %228 = vector.broadcast %227 : vector<8x1xf32> to vector<8x8xf32>
    %229 = arith.mulf %224, %228 : vector<8x8xf32>
    %230 = arith.truncf %229 : vector<8x8xf32> to vector<8x8xbf16>
    %231 = vector.extract_strided_slice %215 {offsets = [0, 0], sizes = [8, 8], strides = [1, 1]} : vector<8x32xbf16> to vector<8x8xbf16>
    %cst_109 = arith.constant dense<0.000000e+00> : vector<8x8xf32>
    %232 = tpu.matmul %230, %231, %cst_109 {dimension_numbers = #tpu.dot_dimension_numbers<[1], [0], [0], [1], [0, 0, 1, 1], [], []>} : vector<8x8xbf16>, vector<8x8xbf16>, vector<8x8xf32> -> vector<8x8xf32>
    %c0_110 = arith.constant 0 : index
    %c0_111 = arith.constant 0 : index
    %233 = vector.load %arg44[%c0_110, %c0_111] : memref<8x32xf32, #tpu.memory_space<vmem>>, vector<8x8xf32>
    tpu.vector_store %arg44[%c0_110, %c0_111], %232 {strides = array<i32>} : memref<8x32xf32, #tpu.memory_space<vmem>>, vector<8x8xf32>,
    %234 = vector.extract_strided_slice %213 {offsets = [0, 8], sizes = [8, 8], strides = [1, 1]} : vector<8x32xbf16> to vector<8x8xbf16>
    %235 = vector.extract_strided_slice %214 {offsets = [0, 8], sizes = [8, 8], strides = [1, 1]} : vector<8x32xbf16> to vector<8x8xbf16>
    %cst_112 = arith.constant dense<0.000000e+00> : vector<8x8xf32>
    %236 = tpu.matmul %234, %235, %cst_112 {dimension_numbers = #tpu.dot_dimension_numbers<[1], [1], [0], [0], [0, 0, 1, 0], [], []>} : vector<8x8xbf16>, vector<8x8xbf16>, vector<8x8xf32> -> vector<8x8xf32>
    %237 = arith.addf %236, %11 : vector<8x8xf32>
    %cst_113 = arith.constant dense<0xFF800000> : vector<8xf32>
    %238 = vector.multi_reduction <maximumf>, %237, %cst_113 [1] : vector<8x8xf32> to vector<8xf32>
    %239 = vector.shape_cast %238 : vector<8xf32> to vector<8x1xf32>
    %240 = vector.broadcast %239 : vector<8x1xf32> to vector<8x8xf32>
    %241 = arith.subf %237, %240 : vector<8x8xf32>
    %242 = math.exp %241 : vector<8x8xf32>
    %cst_114 = arith.constant dense<0.000000e+00> : vector<8xf32>
    %243 = vector.multi_reduction <add>, %242, %cst_114 [1] : vector<8x8xf32> to vector<8xf32>
    %244 = vector.shape_cast %243 : vector<8xf32> to vector<8x1xf32>
    %245 = tpu.reciprocal %244 {approx = true} : vector<8x1xf32> -> vector<8x1xf32>
    %246 = vector.broadcast %245 : vector<8x1xf32> to vector<8x8xf32>
    %247 = arith.mulf %242, %246 : vector<8x8xf32>
    %248 = arith.truncf %247 : vector<8x8xf32> to vector<8x8xbf16>
    %249 = vector.extract_strided_slice %215 {offsets = [0, 8], sizes = [8, 8], strides = [1, 1]} : vector<8x32xbf16> to vector<8x8xbf16>
    %cst_115 = arith.constant dense<0.000000e+00> : vector<8x8xf32>
    %250 = tpu.matmul %248, %249, %cst_115 {dimension_numbers = #tpu.dot_dimension_numbers<[1], [0], [0], [1], [0, 0, 1, 1], [], []>} : vector<8x8xbf16>, vector<8x8xbf16>, vector<8x8xf32> -> vector<8x8xf32>
    %c0_116 = arith.constant 0 : index
    %c8_117 = arith.constant 8 : index
    %251 = vector.load %arg44[%c0_116, %c8_117] : memref<8x32xf32, #tpu.memory_space<vmem>>, vector<8x8xf32>
    tpu.vector_store %arg44[%c0_116, %c8_117], %250 {strides = array<i32>} : memref<8x32xf32, #tpu.memory_space<vmem>>, vector<8x8xf32>,
    %252 = vector.extract_strided_slice %213 {offsets = [0, 16], sizes = [8, 8], strides = [1, 1]} : vector<8x32xbf16> to vector<8x8xbf16>
    %253 = vector.extract_strided_slice %214 {offsets = [0, 16], sizes = [8, 8], strides = [1, 1]} : vector<8x32xbf16> to vector<8x8xbf16>
    %cst_118 = arith.constant dense<0.000000e+00> : vector<8x8xf32>
    %254 = tpu.matmul %252, %253, %cst_118 {dimension_numbers = #tpu.dot_dimension_numbers<[1], [1], [0], [0], [0, 0, 1, 0], [], []>} : vector<8x8xbf16>, vector<8x8xbf16>, vector<8x8xf32> -> vector<8x8xf32>
    %255 = arith.addf %254, %11 : vector<8x8xf32>
    %cst_119 = arith.constant dense<0xFF800000> : vector<8xf32>
    %256 = vector.multi_reduction <maximumf>, %255, %cst_119 [1] : vector<8x8xf32> to vector<8xf32>
    %257 = vector.shape_cast %256 : vector<8xf32> to vector<8x1xf32>
    %258 = vector.broadcast %257 : vector<8x1xf32> to vector<8x8xf32>
    %259 = arith.subf %255, %258 : vector<8x8xf32>
    %260 = math.exp %259 : vector<8x8xf32>
    %cst_120 = arith.constant dense<0.000000e+00> : vector<8xf32>
    %261 = vector.multi_reduction <add>, %260, %cst_120 [1] : vector<8x8xf32> to vector<8xf32>
    %262 = vector.shape_cast %261 : vector<8xf32> to vector<8x1xf32>
    %263 = tpu.reciprocal %262 {approx = true} : vector<8x1xf32> -> vector<8x1xf32>
    %264 = vector.broadcast %263 : vector<8x1xf32> to vector<8x8xf32>
    %265 = arith.mulf %260, %264 : vector<8x8xf32>
    %266 = arith.truncf %265 : vector<8x8xf32> to vector<8x8xbf16>
    %267 = vector.extract_strided_slice %215 {offsets = [0, 16], sizes = [8, 8], strides = [1, 1]} : vector<8x32xbf16> to vector<8x8xbf16>
    %cst_121 = arith.constant dense<0.000000e+00> : vector<8x8xf32>
    %268 = tpu.matmul %266, %267, %cst_121 {dimension_numbers = #tpu.dot_dimension_numbers<[1], [0], [0], [1], [0, 0, 1, 1], [], []>} : vector<8x8xbf16>, vector<8x8xbf16>, vector<8x8xf32> -> vector<8x8xf32>
    %c0_122 = arith.constant 0 : index
    %c16_123 = arith.constant 16 : index
    %269 = vector.load %arg44[%c0_122, %c16_123] : memref<8x32xf32, #tpu.memory_space<vmem>>, vector<8x8xf32>
    tpu.vector_store %arg44[%c0_122, %c16_123], %268 {strides = array<i32>} : memref<8x32xf32, #tpu.memory_space<vmem>>, vector<8x8xf32>,
    %270 = vector.extract_strided_slice %213 {offsets = [0, 24], sizes = [8, 8], strides = [1, 1]} : vector<8x32xbf16> to vector<8x8xbf16>
    %271 = vector.extract_strided_slice %214 {offsets = [0, 24], sizes = [8, 8], strides = [1, 1]} : vector<8x32xbf16> to vector<8x8xbf16>
    %cst_124 = arith.constant dense<0.000000e+00> : vector<8x8xf32>
    %272 = tpu.matmul %270, %271, %cst_124 {dimension_numbers = #tpu.dot_dimension_numbers<[1], [1], [0], [0], [0, 0, 1, 0], [], []>} : vector<8x8xbf16>, vector<8x8xbf16>, vector<8x8xf32> -> vector<8x8xf32>
    %273 = arith.addf %272, %11 : vector<8x8xf32>
    %cst_125 = arith.constant dense<0xFF800000> : vector<8xf32>
    %274 = vector.multi_reduction <maximumf>, %273, %cst_125 [1] : vector<8x8xf32> to vector<8xf32>
    %275 = vector.shape_cast %274 : vector<8xf32> to vector<8x1xf32>
    %276 = vector.broadcast %275 : vector<8x1xf32> to vector<8x8xf32>
    %277 = arith.subf %273, %276 : vector<8x8xf32>
    %278 = math.exp %277 : vector<8x8xf32>
    %cst_126 = arith.constant dense<0.000000e+00> : vector<8xf32>
    %279 = vector.multi_reduction <add>, %278, %cst_126 [1] : vector<8x8xf32> to vector<8xf32>
    %280 = vector.shape_cast %279 : vector<8xf32> to vector<8x1xf32>
    %281 = tpu.reciprocal %280 {approx = true} : vector<8x1xf32> -> vector<8x1xf32>
    %282 = vector.broadcast %281 : vector<8x1xf32> to vector<8x8xf32>
    %283 = arith.mulf %278, %282 : vector<8x8xf32>
    %284 = arith.truncf %283 : vector<8x8xf32> to vector<8x8xbf16>
    %285 = vector.extract_strided_slice %215 {offsets = [0, 24], sizes = [8, 8], strides = [1, 1]} : vector<8x32xbf16> to vector<8x8xbf16>
    %cst_127 = arith.constant dense<0.000000e+00> : vector<8x8xf32>
    %286 = tpu.matmul %284, %285, %cst_127 {dimension_numbers = #tpu.dot_dimension_numbers<[1], [0], [0], [1], [0, 0, 1, 1], [], []>} : vector<8x8xbf16>, vector<8x8xbf16>, vector<8x8xf32> -> vector<8x8xf32>
    %c0_128 = arith.constant 0 : index
    %c24_129 = arith.constant 24 : index
    %287 = vector.load %arg44[%c0_128, %c24_129] : memref<8x32xf32, #tpu.memory_space<vmem>>, vector<8x8xf32>
    tpu.vector_store %arg44[%c0_128, %c24_129], %286 {strides = array<i32>} : memref<8x32xf32, #tpu.memory_space<vmem>>, vector<8x8xf32>,
    %c0_130 = arith.constant 0 : index
    %c0_131 = arith.constant 0 : index
    %288 = vector.load %arg44[%c0_130, %c0_131] : memref<8x32xf32, #tpu.memory_space<vmem>>, vector<8x32xf32>
    %289 = arith.truncf %288 : vector<8x32xf32> to vector<8x32xbf16>
    %cst_132 = arith.constant dense<0.000000e+00> : vector<8x32xf32>
    %290 = tpu.matmul %289, %201, %cst_132 {dimension_numbers = #tpu.dot_dimension_numbers<[1], [0], [0], [1], [0, 0, 1, 1], [], []>} : vector<8x32xbf16>, vector<32x32xbf16>, vector<8x32xf32> -> vector<8x32xf32>
    %291 = vector.broadcast %203 : vector<1x32xf32> to vector<8x32xf32>
    %292 = arith.addf %290, %291 : vector<8x32xf32>
    %c1_133 = arith.constant 1 : index
    %c0_134 = arith.constant 0 : index
    %c0_135 = arith.constant 0 : index
    %293 = vector.load %arg11[%c1_133, %c0_134, %c0_135] : memref<2x1x32xf32, #tpu.memory_space<vmem>>, vector<1x1x32xf32>
    %294 = vector.shape_cast %293 : vector<1x1x32xf32> to vector<1x32xf32>
    %c1_136 = arith.constant 1 : index
    %c0_137 = arith.constant 0 : index
    %c0_138 = arith.constant 0 : index
    %295 = vector.load %arg12[%c1_136, %c0_137, %c0_138] : memref<2x1x32xf32, #tpu.memory_space<vmem>>, vector<1x1x32xf32>
    %296 = vector.shape_cast %295 : vector<1x1x32xf32> to vector<1x32xf32>
    %297 = arith.addf %292, %195 : vector<8x32xf32>
    %cst_139 = arith.constant dense<0.000000e+00> : vector<8xf32>
    %298 = vector.multi_reduction <add>, %297, %cst_139 [1] : vector<8x32xf32> to vector<8xf32>
    %299 = vector.shape_cast %298 : vector<8xf32> to vector<8x1xf32>
    %cst_140 = arith.constant 3.200000e+01 : f32
    %300 = vector.broadcast %cst_140 : f32 to vector<8x1xf32>
    %301 = arith.divf %299, %300 : vector<8x1xf32>
    %302 = vector.broadcast %301 : vector<8x1xf32> to vector<8x32xf32>
    %303 = arith.subf %297, %302 : vector<8x32xf32>
    %304 = arith.mulf %303, %303 : vector<8x32xf32>
    %cst_141 = arith.constant dense<0.000000e+00> : vector<8xf32>
    %305 = vector.multi_reduction <add>, %304, %cst_141 [1] : vector<8x32xf32> to vector<8xf32>
    %306 = vector.shape_cast %305 : vector<8xf32> to vector<8x1xf32>
    %cst_142 = arith.constant 3.200000e+01 : f32
    %307 = vector.broadcast %cst_142 : f32 to vector<8x1xf32>
    %308 = arith.divf %306, %307 : vector<8x1xf32>
    %309 = vector.broadcast %301 : vector<8x1xf32> to vector<8x32xf32>
    %310 = arith.subf %297, %309 : vector<8x32xf32>
    %cst_143 = arith.constant 9.99999974E-6 : f32
    %311 = vector.broadcast %cst_143 : f32 to vector<8x1xf32>
    %312 = arith.addf %308, %311 : vector<8x1xf32>
    %313 = math.rsqrt %312 : vector<8x1xf32>
    %314 = vector.broadcast %313 : vector<8x1xf32> to vector<8x32xf32>
    %315 = arith.mulf %310, %314 : vector<8x32xf32>
    %316 = vector.broadcast %294 : vector<1x32xf32> to vector<8x32xf32>
    %317 = arith.mulf %315, %316 : vector<8x32xf32>
    %318 = vector.broadcast %296 : vector<1x32xf32> to vector<8x32xf32>
    %319 = arith.addf %317, %318 : vector<8x32xf32>
    %c1_144 = arith.constant 1 : index
    %c0_145 = arith.constant 0 : index
    %c0_146 = arith.constant 0 : index
    %320 = vector.load %arg13[%c1_144, %c0_145, %c0_146] : memref<2x32x64xbf16, #tpu.memory_space<vmem>>, vector<1x32x64xbf16>
    %321 = vector.shape_cast %320 : vector<1x32x64xbf16> to vector<32x64xbf16>
    %c1_147 = arith.constant 1 : index
    %c0_148 = arith.constant 0 : index
    %c0_149 = arith.constant 0 : index
    %322 = vector.load %arg14[%c1_147, %c0_148, %c0_149] : memref<2x1x64xf32, #tpu.memory_space<vmem>>, vector<1x1x64xf32>
    %323 = vector.shape_cast %322 : vector<1x1x64xf32> to vector<1x64xf32>
    %c1_150 = arith.constant 1 : index
    %c0_151 = arith.constant 0 : index
    %c0_152 = arith.constant 0 : index
    %324 = vector.load %arg15[%c1_150, %c0_151, %c0_152] : memref<2x64x32xbf16, #tpu.memory_space<vmem>>, vector<1x64x32xbf16>
    %325 = vector.shape_cast %324 : vector<1x64x32xbf16> to vector<64x32xbf16>
    %c1_153 = arith.constant 1 : index
    %c0_154 = arith.constant 0 : index
    %c0_155 = arith.constant 0 : index
    %326 = vector.load %arg16[%c1_153, %c0_154, %c0_155] : memref<2x1x32xf32, #tpu.memory_space<vmem>>, vector<1x1x32xf32>
    %327 = vector.shape_cast %326 : vector<1x1x32xf32> to vector<1x32xf32>
    %328 = arith.truncf %319 : vector<8x32xf32> to vector<8x32xbf16>
    %cst_156 = arith.constant dense<0.000000e+00> : vector<8x64xf32>
    %329 = tpu.matmul %328, %321, %cst_156 {dimension_numbers = #tpu.dot_dimension_numbers<[1], [0], [0], [1], [0, 0, 1, 1], [], []>} : vector<8x32xbf16>, vector<32x64xbf16>, vector<8x64xf32> -> vector<8x64xf32>
    %330 = vector.broadcast %323 : vector<1x64xf32> to vector<8x64xf32>
    %331 = arith.addf %329, %330 : vector<8x64xf32>
    %cst_157 = arith.constant 0.000000e+00 : f32
    %332 = vector.broadcast %cst_157 : f32 to vector<8x64xf32>
    %333 = arith.maximumf %331, %332 : vector<8x64xf32>
    %334 = arith.truncf %333 : vector<8x64xf32> to vector<8x64xbf16>
    %cst_158 = arith.constant dense<0.000000e+00> : vector<8x32xf32>
    %335 = tpu.matmul %334, %325, %cst_158 {dimension_numbers = #tpu.dot_dimension_numbers<[1], [0], [0], [1], [0, 0, 1, 1], [], []>} : vector<8x64xbf16>, vector<64x32xbf16>, vector<8x32xf32> -> vector<8x32xf32>
    %336 = vector.broadcast %327 : vector<1x32xf32> to vector<8x32xf32>
    %337 = arith.addf %335, %336 : vector<8x32xf32>
    %c1_159 = arith.constant 1 : index
    %c0_160 = arith.constant 0 : index
    %c0_161 = arith.constant 0 : index
    %338 = vector.load %arg17[%c1_159, %c0_160, %c0_161] : memref<2x1x32xf32, #tpu.memory_space<vmem>>, vector<1x1x32xf32>
    %339 = vector.shape_cast %338 : vector<1x1x32xf32> to vector<1x32xf32>
    %c1_162 = arith.constant 1 : index
    %c0_163 = arith.constant 0 : index
    %c0_164 = arith.constant 0 : index
    %340 = vector.load %arg18[%c1_162, %c0_163, %c0_164] : memref<2x1x32xf32, #tpu.memory_space<vmem>>, vector<1x1x32xf32>
    %341 = vector.shape_cast %340 : vector<1x1x32xf32> to vector<1x32xf32>
    %342 = arith.addf %337, %319 : vector<8x32xf32>
    %cst_165 = arith.constant dense<0.000000e+00> : vector<8xf32>
    %343 = vector.multi_reduction <add>, %342, %cst_165 [1] : vector<8x32xf32> to vector<8xf32>
    %344 = vector.shape_cast %343 : vector<8xf32> to vector<8x1xf32>
    %cst_166 = arith.constant 3.200000e+01 : f32
    %345 = vector.broadcast %cst_166 : f32 to vector<8x1xf32>
    %346 = arith.divf %344, %345 : vector<8x1xf32>
    %347 = vector.broadcast %346 : vector<8x1xf32> to vector<8x32xf32>
    %348 = arith.subf %342, %347 : vector<8x32xf32>
    %349 = arith.mulf %348, %348 : vector<8x32xf32>
    %cst_167 = arith.constant dense<0.000000e+00> : vector<8xf32>
    %350 = vector.multi_reduction <add>, %349, %cst_167 [1] : vector<8x32xf32> to vector<8xf32>
    %351 = vector.shape_cast %350 : vector<8xf32> to vector<8x1xf32>
    %cst_168 = arith.constant 3.200000e+01 : f32
    %352 = vector.broadcast %cst_168 : f32 to vector<8x1xf32>
    %353 = arith.divf %351, %352 : vector<8x1xf32>
    %354 = vector.broadcast %346 : vector<8x1xf32> to vector<8x32xf32>
    %355 = arith.subf %342, %354 : vector<8x32xf32>
    %cst_169 = arith.constant 9.99999974E-6 : f32
    %356 = vector.broadcast %cst_169 : f32 to vector<8x1xf32>
    %357 = arith.addf %353, %356 : vector<8x1xf32>
    %358 = math.rsqrt %357 : vector<8x1xf32>
    %359 = vector.broadcast %358 : vector<8x1xf32> to vector<8x32xf32>
    %360 = arith.mulf %355, %359 : vector<8x32xf32>
    %361 = vector.broadcast %339 : vector<1x32xf32> to vector<8x32xf32>
    %362 = arith.mulf %360, %361 : vector<8x32xf32>
    %363 = vector.broadcast %341 : vector<1x32xf32> to vector<8x32xf32>
    %364 = arith.addf %362, %363 : vector<8x32xf32>
    %c0_170 = arith.constant 0 : index
    %c0_171 = arith.constant 0 : index
    %365 = vector.load %arg19[%c0_170, %c0_171] : memref<1x32xf32, #tpu.memory_space<vmem>>, vector<1x32xf32>
    %366 = vector.broadcast %1 : vector<8x1xf32> to vector<8x32xf32>
    %367 = vector.broadcast %365 : vector<1x32xf32> to vector<8x32xf32>
    %368 = arith.mulf %366, %367 : vector<8x32xf32>
    %c0_172 = arith.constant 0 : index
    %c0_173 = arith.constant 0 : index
    %369 = vector.load %arg20[%c0_172, %c0_173] : memref<1x32xf32, #tpu.memory_space<vmem>>, vector<1x32xf32>
    %370 = vector.broadcast %369 : vector<1x32xf32> to vector<8x32xf32>
    %371 = arith.addf %368, %370 : vector<8x32xf32>
    %372 = arith.addf %371, %2 : vector<8x32xf32>
    %c0_174 = arith.constant 0 : index
    %c0_175 = arith.constant 0 : index
    %c0_176 = arith.constant 0 : index
    %373 = vector.load %arg21[%c0_174, %c0_175, %c0_176] : memref<2x32x96xbf16, #tpu.memory_space<vmem>>, vector<1x32x96xbf16>
    %374 = vector.shape_cast %373 : vector<1x32x96xbf16> to vector<32x96xbf16>
    %c0_177 = arith.constant 0 : index
    %c0_178 = arith.constant 0 : index
    %c0_179 = arith.constant 0 : index
    %375 = vector.load %arg22[%c0_177, %c0_178, %c0_179] : memref<2x1x96xf32, #tpu.memory_space<vmem>>, vector<1x1x96xf32>
    %376 = vector.shape_cast %375 : vector<1x1x96xf32> to vector<1x96xf32>
    %c0_180 = arith.constant 0 : index
    %c0_181 = arith.constant 0 : index
    %c0_182 = arith.constant 0 : index
    %377 = vector.load %arg23[%c0_180, %c0_181, %c0_182] : memref<2x32x32xbf16, #tpu.memory_space<vmem>>, vector<1x32x32xbf16>
    %378 = vector.shape_cast %377 : vector<1x32x32xbf16> to vector<32x32xbf16>
    %c0_183 = arith.constant 0 : index
    %c0_184 = arith.constant 0 : index
    %c0_185 = arith.constant 0 : index
    %379 = vector.load %arg24[%c0_183, %c0_184, %c0_185] : memref<2x1x32xf32, #tpu.memory_space<vmem>>, vector<1x1x32xf32>
    %380 = vector.shape_cast %379 : vector<1x1x32xf32> to vector<1x32xf32>
    %381 = arith.truncf %372 : vector<8x32xf32> to vector<8x32xbf16>
    %cst_186 = arith.constant dense<0.000000e+00> : vector<8x96xf32>
    %382 = tpu.matmul %381, %374, %cst_186 {dimension_numbers = #tpu.dot_dimension_numbers<[1], [0], [0], [1], [0, 0, 1, 1], [], []>} : vector<8x32xbf16>, vector<32x96xbf16>, vector<8x96xf32> -> vector<8x96xf32>
    %383 = vector.broadcast %376 : vector<1x96xf32> to vector<8x96xf32>
    %384 = arith.addf %382, %383 : vector<8x96xf32>
    %385 = vector.extract_strided_slice %384 {offsets = [0, 0], sizes = [8, 32], strides = [1, 1]} : vector<8x96xf32> to vector<8x32xf32>
    %386 = vector.extract_strided_slice %384 {offsets = [0, 32], sizes = [8, 32], strides = [1, 1]} : vector<8x96xf32> to vector<8x32xf32>
    %387 = vector.extract_strided_slice %384 {offsets = [0, 64], sizes = [8, 32], strides = [1, 1]} : vector<8x96xf32> to vector<8x32xf32>
    %cst_187 = arith.constant 0.353553385 : f32
    %388 = vector.broadcast %cst_187 : f32 to vector<8x32xf32>
    %389 = arith.mulf %385, %388 : vector<8x32xf32>
    %390 = arith.truncf %389 : vector<8x32xf32> to vector<8x32xbf16>
    %391 = arith.truncf %386 : vector<8x32xf32> to vector<8x32xbf16>
    %392 = arith.truncf %387 : vector<8x32xf32> to vector<8x32xbf16>
    %393 = vector.extract_strided_slice %390 {offsets = [0, 0], sizes = [8, 8], strides = [1, 1]} : vector<8x32xbf16> to vector<8x8xbf16>
    %394 = vector.extract_strided_slice %391 {offsets = [0, 0], sizes = [8, 8], strides = [1, 1]} : vector<8x32xbf16> to vector<8x8xbf16>
    %cst_188 = arith.constant dense<0.000000e+00> : vector<8x8xf32>
    %395 = tpu.matmul %393, %394, %cst_188 {dimension_numbers = #tpu.dot_dimension_numbers<[1], [1], [0], [0], [0, 0, 1, 0], [], []>} : vector<8x8xbf16>, vector<8x8xbf16>, vector<8x8xf32> -> vector<8x8xf32>
    %396 = arith.addf %395, %18 : vector<8x8xf32>
    %cst_189 = arith.constant dense<0xFF800000> : vector<8xf32>
    %397 = vector.multi_reduction <maximumf>, %396, %cst_189 [1] : vector<8x8xf32> to vector<8xf32>
    %398 = vector.shape_cast %397 : vector<8xf32> to vector<8x1xf32>
    %399 = vector.broadcast %398 : vector<8x1xf32> to vector<8x8xf32>
    %400 = arith.subf %396, %399 : vector<8x8xf32>
    %401 = math.exp %400 : vector<8x8xf32>
    %cst_190 = arith.constant dense<0.000000e+00> : vector<8xf32>
    %402 = vector.multi_reduction <add>, %401, %cst_190 [1] : vector<8x8xf32> to vector<8xf32>
    %403 = vector.shape_cast %402 : vector<8xf32> to vector<8x1xf32>
    %404 = tpu.reciprocal %403 {approx = true} : vector<8x1xf32> -> vector<8x1xf32>
    %405 = vector.broadcast %404 : vector<8x1xf32> to vector<8x8xf32>
    %406 = arith.mulf %401, %405 : vector<8x8xf32>
    %407 = arith.truncf %406 : vector<8x8xf32> to vector<8x8xbf16>
    %408 = vector.extract_strided_slice %392 {offsets = [0, 0], sizes = [8, 8], strides = [1, 1]} : vector<8x32xbf16> to vector<8x8xbf16>
    %cst_191 = arith.constant dense<0.000000e+00> : vector<8x8xf32>
    %409 = tpu.matmul %407, %408, %cst_191 {dimension_numbers = #tpu.dot_dimension_numbers<[1], [0], [0], [1], [0, 0, 1, 1], [], []>} : vector<8x8xbf16>, vector<8x8xbf16>, vector<8x8xf32> -> vector<8x8xf32>
    %c0_192 = arith.constant 0 : index
    %c0_193 = arith.constant 0 : index
    %410 = vector.load %arg44[%c0_192, %c0_193] : memref<8x32xf32, #tpu.memory_space<vmem>>, vector<8x8xf32>
    tpu.vector_store %arg44[%c0_192, %c0_193], %409 {strides = array<i32>} : memref<8x32xf32, #tpu.memory_space<vmem>>, vector<8x8xf32>,
    %411 = vector.extract_strided_slice %390 {offsets = [0, 8], sizes = [8, 8], strides = [1, 1]} : vector<8x32xbf16> to vector<8x8xbf16>
    %412 = vector.extract_strided_slice %391 {offsets = [0, 8], sizes = [8, 8], strides = [1, 1]} : vector<8x32xbf16> to vector<8x8xbf16>
    %cst_194 = arith.constant dense<0.000000e+00> : vector<8x8xf32>
    %413 = tpu.matmul %411, %412, %cst_194 {dimension_numbers = #tpu.dot_dimension_numbers<[1], [1], [0], [0], [0, 0, 1, 0], [], []>} : vector<8x8xbf16>, vector<8x8xbf16>, vector<8x8xf32> -> vector<8x8xf32>
    %414 = arith.addf %413, %18 : vector<8x8xf32>
    %cst_195 = arith.constant dense<0xFF800000> : vector<8xf32>
    %415 = vector.multi_reduction <maximumf>, %414, %cst_195 [1] : vector<8x8xf32> to vector<8xf32>
    %416 = vector.shape_cast %415 : vector<8xf32> to vector<8x1xf32>
    %417 = vector.broadcast %416 : vector<8x1xf32> to vector<8x8xf32>
    %418 = arith.subf %414, %417 : vector<8x8xf32>
    %419 = math.exp %418 : vector<8x8xf32>
    %cst_196 = arith.constant dense<0.000000e+00> : vector<8xf32>
    %420 = vector.multi_reduction <add>, %419, %cst_196 [1] : vector<8x8xf32> to vector<8xf32>
    %421 = vector.shape_cast %420 : vector<8xf32> to vector<8x1xf32>
    %422 = tpu.reciprocal %421 {approx = true} : vector<8x1xf32> -> vector<8x1xf32>
    %423 = vector.broadcast %422 : vector<8x1xf32> to vector<8x8xf32>
    %424 = arith.mulf %419, %423 : vector<8x8xf32>
    %425 = arith.truncf %424 : vector<8x8xf32> to vector<8x8xbf16>
    %426 = vector.extract_strided_slice %392 {offsets = [0, 8], sizes = [8, 8], strides = [1, 1]} : vector<8x32xbf16> to vector<8x8xbf16>
    %cst_197 = arith.constant dense<0.000000e+00> : vector<8x8xf32>
    %427 = tpu.matmul %425, %426, %cst_197 {dimension_numbers = #tpu.dot_dimension_numbers<[1], [0], [0], [1], [0, 0, 1, 1], [], []>} : vector<8x8xbf16>, vector<8x8xbf16>, vector<8x8xf32> -> vector<8x8xf32>
    %c0_198 = arith.constant 0 : index
    %c8_199 = arith.constant 8 : index
    %428 = vector.load %arg44[%c0_198, %c8_199] : memref<8x32xf32, #tpu.memory_space<vmem>>, vector<8x8xf32>
    tpu.vector_store %arg44[%c0_198, %c8_199], %427 {strides = array<i32>} : memref<8x32xf32, #tpu.memory_space<vmem>>, vector<8x8xf32>,
    %429 = vector.extract_strided_slice %390 {offsets = [0, 16], sizes = [8, 8], strides = [1, 1]} : vector<8x32xbf16> to vector<8x8xbf16>
    %430 = vector.extract_strided_slice %391 {offsets = [0, 16], sizes = [8, 8], strides = [1, 1]} : vector<8x32xbf16> to vector<8x8xbf16>
    %cst_200 = arith.constant dense<0.000000e+00> : vector<8x8xf32>
    %431 = tpu.matmul %429, %430, %cst_200 {dimension_numbers = #tpu.dot_dimension_numbers<[1], [1], [0], [0], [0, 0, 1, 0], [], []>} : vector<8x8xbf16>, vector<8x8xbf16>, vector<8x8xf32> -> vector<8x8xf32>
    %432 = arith.addf %431, %18 : vector<8x8xf32>
    %cst_201 = arith.constant dense<0xFF800000> : vector<8xf32>
    %433 = vector.multi_reduction <maximumf>, %432, %cst_201 [1] : vector<8x8xf32> to vector<8xf32>
    %434 = vector.shape_cast %433 : vector<8xf32> to vector<8x1xf32>
    %435 = vector.broadcast %434 : vector<8x1xf32> to vector<8x8xf32>
    %436 = arith.subf %432, %435 : vector<8x8xf32>
    %437 = math.exp %436 : vector<8x8xf32>
    %cst_202 = arith.constant dense<0.000000e+00> : vector<8xf32>
    %438 = vector.multi_reduction <add>, %437, %cst_202 [1] : vector<8x8xf32> to vector<8xf32>
    %439 = vector.shape_cast %438 : vector<8xf32> to vector<8x1xf32>
    %440 = tpu.reciprocal %439 {approx = true} : vector<8x1xf32> -> vector<8x1xf32>
    %441 = vector.broadcast %440 : vector<8x1xf32> to vector<8x8xf32>
    %442 = arith.mulf %437, %441 : vector<8x8xf32>
    %443 = arith.truncf %442 : vector<8x8xf32> to vector<8x8xbf16>
    %444 = vector.extract_strided_slice %392 {offsets = [0, 16], sizes = [8, 8], strides = [1, 1]} : vector<8x32xbf16> to vector<8x8xbf16>
    %cst_203 = arith.constant dense<0.000000e+00> : vector<8x8xf32>
    %445 = tpu.matmul %443, %444, %cst_203 {dimension_numbers = #tpu.dot_dimension_numbers<[1], [0], [0], [1], [0, 0, 1, 1], [], []>} : vector<8x8xbf16>, vector<8x8xbf16>, vector<8x8xf32> -> vector<8x8xf32>
    %c0_204 = arith.constant 0 : index
    %c16_205 = arith.constant 16 : index
    %446 = vector.load %arg44[%c0_204, %c16_205] : memref<8x32xf32, #tpu.memory_space<vmem>>, vector<8x8xf32>
    tpu.vector_store %arg44[%c0_204, %c16_205], %445 {strides = array<i32>} : memref<8x32xf32, #tpu.memory_space<vmem>>, vector<8x8xf32>,
    %447 = vector.extract_strided_slice %390 {offsets = [0, 24], sizes = [8, 8], strides = [1, 1]} : vector<8x32xbf16> to vector<8x8xbf16>
    %448 = vector.extract_strided_slice %391 {offsets = [0, 24], sizes = [8, 8], strides = [1, 1]} : vector<8x32xbf16> to vector<8x8xbf16>
    %cst_206 = arith.constant dense<0.000000e+00> : vector<8x8xf32>
    %449 = tpu.matmul %447, %448, %cst_206 {dimension_numbers = #tpu.dot_dimension_numbers<[1], [1], [0], [0], [0, 0, 1, 0], [], []>} : vector<8x8xbf16>, vector<8x8xbf16>, vector<8x8xf32> -> vector<8x8xf32>
    %450 = arith.addf %449, %18 : vector<8x8xf32>
    %cst_207 = arith.constant dense<0xFF800000> : vector<8xf32>
    %451 = vector.multi_reduction <maximumf>, %450, %cst_207 [1] : vector<8x8xf32> to vector<8xf32>
    %452 = vector.shape_cast %451 : vector<8xf32> to vector<8x1xf32>
    %453 = vector.broadcast %452 : vector<8x1xf32> to vector<8x8xf32>
    %454 = arith.subf %450, %453 : vector<8x8xf32>
    %455 = math.exp %454 : vector<8x8xf32>
    %cst_208 = arith.constant dense<0.000000e+00> : vector<8xf32>
    %456 = vector.multi_reduction <add>, %455, %cst_208 [1] : vector<8x8xf32> to vector<8xf32>
    %457 = vector.shape_cast %456 : vector<8xf32> to vector<8x1xf32>
    %458 = tpu.reciprocal %457 {approx = true} : vector<8x1xf32> -> vector<8x1xf32>
    %459 = vector.broadcast %458 : vector<8x1xf32> to vector<8x8xf32>
    %460 = arith.mulf %455, %459 : vector<8x8xf32>
    %461 = arith.truncf %460 : vector<8x8xf32> to vector<8x8xbf16>
    %462 = vector.extract_strided_slice %392 {offsets = [0, 24], sizes = [8, 8], strides = [1, 1]} : vector<8x32xbf16> to vector<8x8xbf16>
    %cst_209 = arith.constant dense<0.000000e+00> : vector<8x8xf32>
    %463 = tpu.matmul %461, %462, %cst_209 {dimension_numbers = #tpu.dot_dimension_numbers<[1], [0], [0], [1], [0, 0, 1, 1], [], []>} : vector<8x8xbf16>, vector<8x8xbf16>, vector<8x8xf32> -> vector<8x8xf32>
    %c0_210 = arith.constant 0 : index
    %c24_211 = arith.constant 24 : index
    %464 = vector.load %arg44[%c0_210, %c24_211] : memref<8x32xf32, #tpu.memory_space<vmem>>, vector<8x8xf32>
    tpu.vector_store %arg44[%c0_210, %c24_211], %463 {strides = array<i32>} : memref<8x32xf32, #tpu.memory_space<vmem>>, vector<8x8xf32>,
    %c0_212 = arith.constant 0 : index
    %c0_213 = arith.constant 0 : index
    %465 = vector.load %arg44[%c0_212, %c0_213] : memref<8x32xf32, #tpu.memory_space<vmem>>, vector<8x32xf32>
    %466 = arith.truncf %465 : vector<8x32xf32> to vector<8x32xbf16>
    %cst_214 = arith.constant dense<0.000000e+00> : vector<8x32xf32>
    %467 = tpu.matmul %466, %378, %cst_214 {dimension_numbers = #tpu.dot_dimension_numbers<[1], [0], [0], [1], [0, 0, 1, 1], [], []>} : vector<8x32xbf16>, vector<32x32xbf16>, vector<8x32xf32> -> vector<8x32xf32>
    %468 = vector.broadcast %380 : vector<1x32xf32> to vector<8x32xf32>
    %469 = arith.addf %467, %468 : vector<8x32xf32>
    %c0_215 = arith.constant 0 : index
    %c0_216 = arith.constant 0 : index
    %c0_217 = arith.constant 0 : index
    %470 = vector.load %arg25[%c0_215, %c0_216, %c0_217] : memref<2x1x32xf32, #tpu.memory_space<vmem>>, vector<1x1x32xf32>
    %471 = vector.shape_cast %470 : vector<1x1x32xf32> to vector<1x32xf32>
    %c0_218 = arith.constant 0 : index
    %c0_219 = arith.constant 0 : index
    %c0_220 = arith.constant 0 : index
    %472 = vector.load %arg26[%c0_218, %c0_219, %c0_220] : memref<2x1x32xf32, #tpu.memory_space<vmem>>, vector<1x1x32xf32>
    %473 = vector.shape_cast %472 : vector<1x1x32xf32> to vector<1x32xf32>
    %474 = arith.addf %469, %372 : vector<8x32xf32>
    %cst_221 = arith.constant dense<0.000000e+00> : vector<8xf32>
    %475 = vector.multi_reduction <add>, %474, %cst_221 [1] : vector<8x32xf32> to vector<8xf32>
    %476 = vector.shape_cast %475 : vector<8xf32> to vector<8x1xf32>
    %cst_222 = arith.constant 3.200000e+01 : f32
    %477 = vector.broadcast %cst_222 : f32 to vector<8x1xf32>
    %478 = arith.divf %476, %477 : vector<8x1xf32>
    %479 = vector.broadcast %478 : vector<8x1xf32> to vector<8x32xf32>
    %480 = arith.subf %474, %479 : vector<8x32xf32>
    %481 = arith.mulf %480, %480 : vector<8x32xf32>
    %cst_223 = arith.constant dense<0.000000e+00> : vector<8xf32>
    %482 = vector.multi_reduction <add>, %481, %cst_223 [1] : vector<8x32xf32> to vector<8xf32>
    %483 = vector.shape_cast %482 : vector<8xf32> to vector<8x1xf32>
    %cst_224 = arith.constant 3.200000e+01 : f32
    %484 = vector.broadcast %cst_224 : f32 to vector<8x1xf32>
    %485 = arith.divf %483, %484 : vector<8x1xf32>
    %486 = vector.broadcast %478 : vector<8x1xf32> to vector<8x32xf32>
    %487 = arith.subf %474, %486 : vector<8x32xf32>
    %cst_225 = arith.constant 9.99999974E-6 : f32
    %488 = vector.broadcast %cst_225 : f32 to vector<8x1xf32>
    %489 = arith.addf %485, %488 : vector<8x1xf32>
    %490 = math.rsqrt %489 : vector<8x1xf32>
    %491 = vector.broadcast %490 : vector<8x1xf32> to vector<8x32xf32>
    %492 = arith.mulf %487, %491 : vector<8x32xf32>
    %493 = vector.broadcast %471 : vector<1x32xf32> to vector<8x32xf32>
    %494 = arith.mulf %492, %493 : vector<8x32xf32>
    %495 = vector.broadcast %473 : vector<1x32xf32> to vector<8x32xf32>
    %496 = arith.addf %494, %495 : vector<8x32xf32>
    %c0_226 = arith.constant 0 : index
    %c0_227 = arith.constant 0 : index
    %c0_228 = arith.constant 0 : index
    %497 = vector.load %arg27[%c0_226, %c0_227, %c0_228] : memref<2x32x32xbf16, #tpu.memory_space<vmem>>, vector<1x32x32xbf16>
    %498 = vector.shape_cast %497 : vector<1x32x32xbf16> to vector<32x32xbf16>
    %c0_229 = arith.constant 0 : index
    %c0_230 = arith.constant 0 : index
    %c0_231 = arith.constant 0 : index
    %499 = vector.load %arg28[%c0_229, %c0_230, %c0_231] : memref<2x1x32xf32, #tpu.memory_space<vmem>>, vector<1x1x32xf32>
    %500 = vector.shape_cast %499 : vector<1x1x32xf32> to vector<1x32xf32>
    %c0_232 = arith.constant 0 : index
    %c0_233 = arith.constant 0 : index
    %c0_234 = arith.constant 0 : index
    %501 = vector.load %arg29[%c0_232, %c0_233, %c0_234] : memref<2x32x64xbf16, #tpu.memory_space<vmem>>, vector<1x32x64xbf16>
    %502 = vector.shape_cast %501 : vector<1x32x64xbf16> to vector<32x64xbf16>
    %c0_235 = arith.constant 0 : index
    %c0_236 = arith.constant 0 : index
    %c0_237 = arith.constant 0 : index
    %503 = vector.load %arg30[%c0_235, %c0_236, %c0_237] : memref<2x1x64xf32, #tpu.memory_space<vmem>>, vector<1x1x64xf32>
    %504 = vector.shape_cast %503 : vector<1x1x64xf32> to vector<1x64xf32>
    %c0_238 = arith.constant 0 : index
    %c0_239 = arith.constant 0 : index
    %c0_240 = arith.constant 0 : index
    %505 = vector.load %arg31[%c0_238, %c0_239, %c0_240] : memref<2x32x32xbf16, #tpu.memory_space<vmem>>, vector<1x32x32xbf16>
    %506 = vector.shape_cast %505 : vector<1x32x32xbf16> to vector<32x32xbf16>
    %c0_241 = arith.constant 0 : index
    %c0_242 = arith.constant 0 : index
    %c0_243 = arith.constant 0 : index
    %507 = vector.load %arg32[%c0_241, %c0_242, %c0_243] : memref<2x1x32xf32, #tpu.memory_space<vmem>>, vector<1x1x32xf32>
    %508 = vector.shape_cast %507 : vector<1x1x32xf32> to vector<1x32xf32>
    %509 = arith.truncf %496 : vector<8x32xf32> to vector<8x32xbf16>
    %cst_244 = arith.constant dense<0.000000e+00> : vector<8x32xf32>
    %510 = tpu.matmul %509, %498, %cst_244 {dimension_numbers = #tpu.dot_dimension_numbers<[1], [0], [0], [1], [0, 0, 1, 1], [], []>} : vector<8x32xbf16>, vector<32x32xbf16>, vector<8x32xf32> -> vector<8x32xf32>
    %511 = vector.broadcast %500 : vector<1x32xf32> to vector<8x32xf32>
    %512 = arith.addf %510, %511 : vector<8x32xf32>
    %513 = arith.truncf %364 : vector<8x32xf32> to vector<8x32xbf16>
    %cst_245 = arith.constant dense<0.000000e+00> : vector<8x64xf32>
    %514 = tpu.matmul %513, %502, %cst_245 {dimension_numbers = #tpu.dot_dimension_numbers<[1], [0], [0], [1], [0, 0, 1, 1], [], []>} : vector<8x32xbf16>, vector<32x64xbf16>, vector<8x64xf32> -> vector<8x64xf32>
    %515 = vector.broadcast %504 : vector<1x64xf32> to vector<8x64xf32>
    %516 = arith.addf %514, %515 : vector<8x64xf32>
    %517 = vector.extract_strided_slice %516 {offsets = [0, 0], sizes = [8, 32], strides = [1, 1]} : vector<8x64xf32> to vector<8x32xf32>
    %518 = vector.extract_strided_slice %516 {offsets = [0, 32], sizes = [8, 32], strides = [1, 1]} : vector<8x64xf32> to vector<8x32xf32>
    %cst_246 = arith.constant 0.353553385 : f32
    %519 = vector.broadcast %cst_246 : f32 to vector<8x32xf32>
    %520 = arith.mulf %512, %519 : vector<8x32xf32>
    %521 = arith.truncf %520 : vector<8x32xf32> to vector<8x32xbf16>
    %522 = arith.truncf %517 : vector<8x32xf32> to vector<8x32xbf16>
    %523 = arith.truncf %518 : vector<8x32xf32> to vector<8x32xbf16>
    %524 = vector.extract_strided_slice %521 {offsets = [0, 0], sizes = [8, 8], strides = [1, 1]} : vector<8x32xbf16> to vector<8x8xbf16>
    %525 = vector.extract_strided_slice %522 {offsets = [0, 0], sizes = [8, 8], strides = [1, 1]} : vector<8x32xbf16> to vector<8x8xbf16>
    %cst_247 = arith.constant dense<0.000000e+00> : vector<8x8xf32>
    %526 = tpu.matmul %524, %525, %cst_247 {dimension_numbers = #tpu.dot_dimension_numbers<[1], [1], [0], [0], [0, 0, 1, 0], [], []>} : vector<8x8xbf16>, vector<8x8xbf16>, vector<8x8xf32> -> vector<8x8xf32>
    %527 = arith.addf %526, %11 : vector<8x8xf32>
    %cst_248 = arith.constant dense<0xFF800000> : vector<8xf32>
    %528 = vector.multi_reduction <maximumf>, %527, %cst_248 [1] : vector<8x8xf32> to vector<8xf32>
    %529 = vector.shape_cast %528 : vector<8xf32> to vector<8x1xf32>
    %530 = vector.broadcast %529 : vector<8x1xf32> to vector<8x8xf32>
    %531 = arith.subf %527, %530 : vector<8x8xf32>
    %532 = math.exp %531 : vector<8x8xf32>
    %cst_249 = arith.constant dense<0.000000e+00> : vector<8xf32>
    %533 = vector.multi_reduction <add>, %532, %cst_249 [1] : vector<8x8xf32> to vector<8xf32>
    %534 = vector.shape_cast %533 : vector<8xf32> to vector<8x1xf32>
    %535 = tpu.reciprocal %534 {approx = true} : vector<8x1xf32> -> vector<8x1xf32>
    %536 = vector.broadcast %535 : vector<8x1xf32> to vector<8x8xf32>
    %537 = arith.mulf %532, %536 : vector<8x8xf32>
    %538 = arith.truncf %537 : vector<8x8xf32> to vector<8x8xbf16>
    %539 = vector.extract_strided_slice %523 {offsets = [0, 0], sizes = [8, 8], strides = [1, 1]} : vector<8x32xbf16> to vector<8x8xbf16>
    %cst_250 = arith.constant dense<0.000000e+00> : vector<8x8xf32>
    %540 = tpu.matmul %538, %539, %cst_250 {dimension_numbers = #tpu.dot_dimension_numbers<[1], [0], [0], [1], [0, 0, 1, 1], [], []>} : vector<8x8xbf16>, vector<8x8xbf16>, vector<8x8xf32> -> vector<8x8xf32>
    %c0_251 = arith.constant 0 : index
    %c0_252 = arith.constant 0 : index
    %541 = vector.load %arg44[%c0_251, %c0_252] : memref<8x32xf32, #tpu.memory_space<vmem>>, vector<8x8xf32>
    tpu.vector_store %arg44[%c0_251, %c0_252], %540 {strides = array<i32>} : memref<8x32xf32, #tpu.memory_space<vmem>>, vector<8x8xf32>,
    %542 = vector.extract_strided_slice %521 {offsets = [0, 8], sizes = [8, 8], strides = [1, 1]} : vector<8x32xbf16> to vector<8x8xbf16>
    %543 = vector.extract_strided_slice %522 {offsets = [0, 8], sizes = [8, 8], strides = [1, 1]} : vector<8x32xbf16> to vector<8x8xbf16>
    %cst_253 = arith.constant dense<0.000000e+00> : vector<8x8xf32>
    %544 = tpu.matmul %542, %543, %cst_253 {dimension_numbers = #tpu.dot_dimension_numbers<[1], [1], [0], [0], [0, 0, 1, 0], [], []>} : vector<8x8xbf16>, vector<8x8xbf16>, vector<8x8xf32> -> vector<8x8xf32>
    %545 = arith.addf %544, %11 : vector<8x8xf32>
    %cst_254 = arith.constant dense<0xFF800000> : vector<8xf32>
    %546 = vector.multi_reduction <maximumf>, %545, %cst_254 [1] : vector<8x8xf32> to vector<8xf32>
    %547 = vector.shape_cast %546 : vector<8xf32> to vector<8x1xf32>
    %548 = vector.broadcast %547 : vector<8x1xf32> to vector<8x8xf32>
    %549 = arith.subf %545, %548 : vector<8x8xf32>
    %550 = math.exp %549 : vector<8x8xf32>
    %cst_255 = arith.constant dense<0.000000e+00> : vector<8xf32>
    %551 = vector.multi_reduction <add>, %550, %cst_255 [1] : vector<8x8xf32> to vector<8xf32>
    %552 = vector.shape_cast %551 : vector<8xf32> to vector<8x1xf32>
    %553 = tpu.reciprocal %552 {approx = true} : vector<8x1xf32> -> vector<8x1xf32>
    %554 = vector.broadcast %553 : vector<8x1xf32> to vector<8x8xf32>
    %555 = arith.mulf %550, %554 : vector<8x8xf32>
    %556 = arith.truncf %555 : vector<8x8xf32> to vector<8x8xbf16>
    %557 = vector.extract_strided_slice %523 {offsets = [0, 8], sizes = [8, 8], strides = [1, 1]} : vector<8x32xbf16> to vector<8x8xbf16>
    %cst_256 = arith.constant dense<0.000000e+00> : vector<8x8xf32>
    %558 = tpu.matmul %556, %557, %cst_256 {dimension_numbers = #tpu.dot_dimension_numbers<[1], [0], [0], [1], [0, 0, 1, 1], [], []>} : vector<8x8xbf16>, vector<8x8xbf16>, vector<8x8xf32> -> vector<8x8xf32>
    %c0_257 = arith.constant 0 : index
    %c8_258 = arith.constant 8 : index
    %559 = vector.load %arg44[%c0_257, %c8_258] : memref<8x32xf32, #tpu.memory_space<vmem>>, vector<8x8xf32>
    tpu.vector_store %arg44[%c0_257, %c8_258], %558 {strides = array<i32>} : memref<8x32xf32, #tpu.memory_space<vmem>>, vector<8x8xf32>,
    %560 = vector.extract_strided_slice %521 {offsets = [0, 16], sizes = [8, 8], strides = [1, 1]} : vector<8x32xbf16> to vector<8x8xbf16>
    %561 = vector.extract_strided_slice %522 {offsets = [0, 16], sizes = [8, 8], strides = [1, 1]} : vector<8x32xbf16> to vector<8x8xbf16>
    %cst_259 = arith.constant dense<0.000000e+00> : vector<8x8xf32>
    %562 = tpu.matmul %560, %561, %cst_259 {dimension_numbers = #tpu.dot_dimension_numbers<[1], [1], [0], [0], [0, 0, 1, 0], [], []>} : vector<8x8xbf16>, vector<8x8xbf16>, vector<8x8xf32> -> vector<8x8xf32>
    %563 = arith.addf %562, %11 : vector<8x8xf32>
    %cst_260 = arith.constant dense<0xFF800000> : vector<8xf32>
    %564 = vector.multi_reduction <maximumf>, %563, %cst_260 [1] : vector<8x8xf32> to vector<8xf32>
    %565 = vector.shape_cast %564 : vector<8xf32> to vector<8x1xf32>
    %566 = vector.broadcast %565 : vector<8x1xf32> to vector<8x8xf32>
    %567 = arith.subf %563, %566 : vector<8x8xf32>
    %568 = math.exp %567 : vector<8x8xf32>
    %cst_261 = arith.constant dense<0.000000e+00> : vector<8xf32>
    %569 = vector.multi_reduction <add>, %568, %cst_261 [1] : vector<8x8xf32> to vector<8xf32>
    %570 = vector.shape_cast %569 : vector<8xf32> to vector<8x1xf32>
    %571 = tpu.reciprocal %570 {approx = true} : vector<8x1xf32> -> vector<8x1xf32>
    %572 = vector.broadcast %571 : vector<8x1xf32> to vector<8x8xf32>
    %573 = arith.mulf %568, %572 : vector<8x8xf32>
    %574 = arith.truncf %573 : vector<8x8xf32> to vector<8x8xbf16>
    %575 = vector.extract_strided_slice %523 {offsets = [0, 16], sizes = [8, 8], strides = [1, 1]} : vector<8x32xbf16> to vector<8x8xbf16>
    %cst_262 = arith.constant dense<0.000000e+00> : vector<8x8xf32>
    %576 = tpu.matmul %574, %575, %cst_262 {dimension_numbers = #tpu.dot_dimension_numbers<[1], [0], [0], [1], [0, 0, 1, 1], [], []>} : vector<8x8xbf16>, vector<8x8xbf16>, vector<8x8xf32> -> vector<8x8xf32>
    %c0_263 = arith.constant 0 : index
    %c16_264 = arith.constant 16 : index
    %577 = vector.load %arg44[%c0_263, %c16_264] : memref<8x32xf32, #tpu.memory_space<vmem>>, vector<8x8xf32>
    tpu.vector_store %arg44[%c0_263, %c16_264], %576 {strides = array<i32>} : memref<8x32xf32, #tpu.memory_space<vmem>>, vector<8x8xf32>,
    %578 = vector.extract_strided_slice %521 {offsets = [0, 24], sizes = [8, 8], strides = [1, 1]} : vector<8x32xbf16> to vector<8x8xbf16>
    %579 = vector.extract_strided_slice %522 {offsets = [0, 24], sizes = [8, 8], strides = [1, 1]} : vector<8x32xbf16> to vector<8x8xbf16>
    %cst_265 = arith.constant dense<0.000000e+00> : vector<8x8xf32>
    %580 = tpu.matmul %578, %579, %cst_265 {dimension_numbers = #tpu.dot_dimension_numbers<[1], [1], [0], [0], [0, 0, 1, 0], [], []>} : vector<8x8xbf16>, vector<8x8xbf16>, vector<8x8xf32> -> vector<8x8xf32>
    %581 = arith.addf %580, %11 : vector<8x8xf32>
    %cst_266 = arith.constant dense<0xFF800000> : vector<8xf32>
    %582 = vector.multi_reduction <maximumf>, %581, %cst_266 [1] : vector<8x8xf32> to vector<8xf32>
    %583 = vector.shape_cast %582 : vector<8xf32> to vector<8x1xf32>
    %584 = vector.broadcast %583 : vector<8x1xf32> to vector<8x8xf32>
    %585 = arith.subf %581, %584 : vector<8x8xf32>
    %586 = math.exp %585 : vector<8x8xf32>
    %cst_267 = arith.constant dense<0.000000e+00> : vector<8xf32>
    %587 = vector.multi_reduction <add>, %586, %cst_267 [1] : vector<8x8xf32> to vector<8xf32>
    %588 = vector.shape_cast %587 : vector<8xf32> to vector<8x1xf32>
    %589 = tpu.reciprocal %588 {approx = true} : vector<8x1xf32> -> vector<8x1xf32>
    %590 = vector.broadcast %589 : vector<8x1xf32> to vector<8x8xf32>
    %591 = arith.mulf %586, %590 : vector<8x8xf32>
    %592 = arith.truncf %591 : vector<8x8xf32> to vector<8x8xbf16>
    %593 = vector.extract_strided_slice %523 {offsets = [0, 24], sizes = [8, 8], strides = [1, 1]} : vector<8x32xbf16> to vector<8x8xbf16>
    %cst_268 = arith.constant dense<0.000000e+00> : vector<8x8xf32>
    %594 = tpu.matmul %592, %593, %cst_268 {dimension_numbers = #tpu.dot_dimension_numbers<[1], [0], [0], [1], [0, 0, 1, 1], [], []>} : vector<8x8xbf16>, vector<8x8xbf16>, vector<8x8xf32> -> vector<8x8xf32>
    %c0_269 = arith.constant 0 : index
    %c24_270 = arith.constant 24 : index
    %595 = vector.load %arg44[%c0_269, %c24_270] : memref<8x32xf32, #tpu.memory_space<vmem>>, vector<8x8xf32>
    tpu.vector_store %arg44[%c0_269, %c24_270], %594 {strides = array<i32>} : memref<8x32xf32, #tpu.memory_space<vmem>>, vector<8x8xf32>,
    %c0_271 = arith.constant 0 : index
    %c0_272 = arith.constant 0 : index
    %596 = vector.load %arg44[%c0_271, %c0_272] : memref<8x32xf32, #tpu.memory_space<vmem>>, vector<8x32xf32>
    %597 = arith.truncf %596 : vector<8x32xf32> to vector<8x32xbf16>
    %cst_273 = arith.constant dense<0.000000e+00> : vector<8x32xf32>
    %598 = tpu.matmul %597, %506, %cst_273 {dimension_numbers = #tpu.dot_dimension_numbers<[1], [0], [0], [1], [0, 0, 1, 1], [], []>} : vector<8x32xbf16>, vector<32x32xbf16>, vector<8x32xf32> -> vector<8x32xf32>
    %599 = vector.broadcast %508 : vector<1x32xf32> to vector<8x32xf32>
    %600 = arith.addf %598, %599 : vector<8x32xf32>
    %c0_274 = arith.constant 0 : index
    %c0_275 = arith.constant 0 : index
    %c0_276 = arith.constant 0 : index
    %601 = vector.load %arg33[%c0_274, %c0_275, %c0_276] : memref<2x1x32xf32, #tpu.memory_space<vmem>>, vector<1x1x32xf32>
    %602 = vector.shape_cast %601 : vector<1x1x32xf32> to vector<1x32xf32>
    %c0_277 = arith.constant 0 : index
    %c0_278 = arith.constant 0 : index
    %c0_279 = arith.constant 0 : index
    %603 = vector.load %arg34[%c0_277, %c0_278, %c0_279] : memref<2x1x32xf32, #tpu.memory_space<vmem>>, vector<1x1x32xf32>
    %604 = vector.shape_cast %603 : vector<1x1x32xf32> to vector<1x32xf32>
    %605 = arith.addf %600, %496 : vector<8x32xf32>
    %cst_280 = arith.constant dense<0.000000e+00> : vector<8xf32>
    %606 = vector.multi_reduction <add>, %605, %cst_280 [1] : vector<8x32xf32> to vector<8xf32>
    %607 = vector.shape_cast %606 : vector<8xf32> to vector<8x1xf32>
    %cst_281 = arith.constant 3.200000e+01 : f32
    %608 = vector.broadcast %cst_281 : f32 to vector<8x1xf32>
    %609 = arith.divf %607, %608 : vector<8x1xf32>
    %610 = vector.broadcast %609 : vector<8x1xf32> to vector<8x32xf32>
    %611 = arith.subf %605, %610 : vector<8x32xf32>
    %612 = arith.mulf %611, %611 : vector<8x32xf32>
    %cst_282 = arith.constant dense<0.000000e+00> : vector<8xf32>
    %613 = vector.multi_reduction <add>, %612, %cst_282 [1] : vector<8x32xf32> to vector<8xf32>
    %614 = vector.shape_cast %613 : vector<8xf32> to vector<8x1xf32>
    %cst_283 = arith.constant 3.200000e+01 : f32
    %615 = vector.broadcast %cst_283 : f32 to vector<8x1xf32>
    %616 = arith.divf %614, %615 : vector<8x1xf32>
    %617 = vector.broadcast %609 : vector<8x1xf32> to vector<8x32xf32>
    %618 = arith.subf %605, %617 : vector<8x32xf32>
    %cst_284 = arith.constant 9.99999974E-6 : f32
    %619 = vector.broadcast %cst_284 : f32 to vector<8x1xf32>
    %620 = arith.addf %616, %619 : vector<8x1xf32>
    %621 = math.rsqrt %620 : vector<8x1xf32>
    %622 = vector.broadcast %621 : vector<8x1xf32> to vector<8x32xf32>
    %623 = arith.mulf %618, %622 : vector<8x32xf32>
    %624 = vector.broadcast %602 : vector<1x32xf32> to vector<8x32xf32>
    %625 = arith.mulf %623, %624 : vector<8x32xf32>
    %626 = vector.broadcast %604 : vector<1x32xf32> to vector<8x32xf32>
    %627 = arith.addf %625, %626 : vector<8x32xf32>
    %c0_285 = arith.constant 0 : index
    %c0_286 = arith.constant 0 : index
    %c0_287 = arith.constant 0 : index
    %628 = vector.load %arg35[%c0_285, %c0_286, %c0_287] : memref<2x32x64xbf16, #tpu.memory_space<vmem>>, vector<1x32x64xbf16>
    %629 = vector.shape_cast %628 : vector<1x32x64xbf16> to vector<32x64xbf16>
    %c0_288 = arith.constant 0 : index
    %c0_289 = arith.constant 0 : index
    %c0_290 = arith.constant 0 : index
    %630 = vector.load %arg36[%c0_288, %c0_289, %c0_290] : memref<2x1x64xf32, #tpu.memory_space<vmem>>, vector<1x1x64xf32>
    %631 = vector.shape_cast %630 : vector<1x1x64xf32> to vector<1x64xf32>
    %c0_291 = arith.constant 0 : index
    %c0_292 = arith.constant 0 : index
    %c0_293 = arith.constant 0 : index
    %632 = vector.load %arg37[%c0_291, %c0_292, %c0_293] : memref<2x64x32xbf16, #tpu.memory_space<vmem>>, vector<1x64x32xbf16>
    %633 = vector.shape_cast %632 : vector<1x64x32xbf16> to vector<64x32xbf16>
    %c0_294 = arith.constant 0 : index
    %c0_295 = arith.constant 0 : index
    %c0_296 = arith.constant 0 : index
    %634 = vector.load %arg38[%c0_294, %c0_295, %c0_296] : memref<2x1x32xf32, #tpu.memory_space<vmem>>, vector<1x1x32xf32>
    %635 = vector.shape_cast %634 : vector<1x1x32xf32> to vector<1x32xf32>
    %636 = arith.truncf %627 : vector<8x32xf32> to vector<8x32xbf16>
    %cst_297 = arith.constant dense<0.000000e+00> : vector<8x64xf32>
    %637 = tpu.matmul %636, %629, %cst_297 {dimension_numbers = #tpu.dot_dimension_numbers<[1], [0], [0], [1], [0, 0, 1, 1], [], []>} : vector<8x32xbf16>, vector<32x64xbf16>, vector<8x64xf32> -> vector<8x64xf32>
    %638 = vector.broadcast %631 : vector<1x64xf32> to vector<8x64xf32>
    %639 = arith.addf %637, %638 : vector<8x64xf32>
    %cst_298 = arith.constant 0.000000e+00 : f32
    %640 = vector.broadcast %cst_298 : f32 to vector<8x64xf32>
    %641 = arith.maximumf %639, %640 : vector<8x64xf32>
    %642 = arith.truncf %641 : vector<8x64xf32> to vector<8x64xbf16>
    %cst_299 = arith.constant dense<0.000000e+00> : vector<8x32xf32>
    %643 = tpu.matmul %642, %633, %cst_299 {dimension_numbers = #tpu.dot_dimension_numbers<[1], [0], [0], [1], [0, 0, 1, 1], [], []>} : vector<8x64xbf16>, vector<64x32xbf16>, vector<8x32xf32> -> vector<8x32xf32>
    %644 = vector.broadcast %635 : vector<1x32xf32> to vector<8x32xf32>
    %645 = arith.addf %643, %644 : vector<8x32xf32>
    %c0_300 = arith.constant 0 : index
    %c0_301 = arith.constant 0 : index
    %c0_302 = arith.constant 0 : index
    %646 = vector.load %arg39[%c0_300, %c0_301, %c0_302] : memref<2x1x32xf32, #tpu.memory_space<vmem>>, vector<1x1x32xf32>
    %647 = vector.shape_cast %646 : vector<1x1x32xf32> to vector<1x32xf32>
    %c0_303 = arith.constant 0 : index
    %c0_304 = arith.constant 0 : index
    %c0_305 = arith.constant 0 : index
    %648 = vector.load %arg40[%c0_303, %c0_304, %c0_305] : memref<2x1x32xf32, #tpu.memory_space<vmem>>, vector<1x1x32xf32>
    %649 = vector.shape_cast %648 : vector<1x1x32xf32> to vector<1x32xf32>
    %650 = arith.addf %645, %627 : vector<8x32xf32>
    %cst_306 = arith.constant dense<0.000000e+00> : vector<8xf32>
    %651 = vector.multi_reduction <add>, %650, %cst_306 [1] : vector<8x32xf32> to vector<8xf32>
    %652 = vector.shape_cast %651 : vector<8xf32> to vector<8x1xf32>
    %cst_307 = arith.constant 3.200000e+01 : f32
    %653 = vector.broadcast %cst_307 : f32 to vector<8x1xf32>
    %654 = arith.divf %652, %653 : vector<8x1xf32>
    %655 = vector.broadcast %654 : vector<8x1xf32> to vector<8x32xf32>
    %656 = arith.subf %650, %655 : vector<8x32xf32>
    %657 = arith.mulf %656, %656 : vector<8x32xf32>
    %cst_308 = arith.constant dense<0.000000e+00> : vector<8xf32>
    %658 = vector.multi_reduction <add>, %657, %cst_308 [1] : vector<8x32xf32> to vector<8xf32>
    %659 = vector.shape_cast %658 : vector<8xf32> to vector<8x1xf32>
    %cst_309 = arith.constant 3.200000e+01 : f32
    %660 = vector.broadcast %cst_309 : f32 to vector<8x1xf32>
    %661 = arith.divf %659, %660 : vector<8x1xf32>
    %662 = vector.broadcast %654 : vector<8x1xf32> to vector<8x32xf32>
    %663 = arith.subf %650, %662 : vector<8x32xf32>
    %cst_310 = arith.constant 9.99999974E-6 : f32
    %664 = vector.broadcast %cst_310 : f32 to vector<8x1xf32>
    %665 = arith.addf %661, %664 : vector<8x1xf32>
    %666 = math.rsqrt %665 : vector<8x1xf32>
    %667 = vector.broadcast %666 : vector<8x1xf32> to vector<8x32xf32>
    %668 = arith.mulf %663, %667 : vector<8x32xf32>
    %669 = vector.broadcast %647 : vector<1x32xf32> to vector<8x32xf32>
    %670 = arith.mulf %668, %669 : vector<8x32xf32>
    %671 = vector.broadcast %649 : vector<1x32xf32> to vector<8x32xf32>
    %672 = arith.addf %670, %671 : vector<8x32xf32>
    %c1_311 = arith.constant 1 : index
    %c0_312 = arith.constant 0 : index
    %c0_313 = arith.constant 0 : index
    %673 = vector.load %arg21[%c1_311, %c0_312, %c0_313] : memref<2x32x96xbf16, #tpu.memory_space<vmem>>, vector<1x32x96xbf16>
    %674 = vector.shape_cast %673 : vector<1x32x96xbf16> to vector<32x96xbf16>
    %c1_314 = arith.constant 1 : index
    %c0_315 = arith.constant 0 : index
    %c0_316 = arith.constant 0 : index
    %675 = vector.load %arg22[%c1_314, %c0_315, %c0_316] : memref<2x1x96xf32, #tpu.memory_space<vmem>>, vector<1x1x96xf32>
    %676 = vector.shape_cast %675 : vector<1x1x96xf32> to vector<1x96xf32>
    %c1_317 = arith.constant 1 : index
    %c0_318 = arith.constant 0 : index
    %c0_319 = arith.constant 0 : index
    %677 = vector.load %arg23[%c1_317, %c0_318, %c0_319] : memref<2x32x32xbf16, #tpu.memory_space<vmem>>, vector<1x32x32xbf16>
    %678 = vector.shape_cast %677 : vector<1x32x32xbf16> to vector<32x32xbf16>
    %c1_320 = arith.constant 1 : index
    %c0_321 = arith.constant 0 : index
    %c0_322 = arith.constant 0 : index
    %679 = vector.load %arg24[%c1_320, %c0_321, %c0_322] : memref<2x1x32xf32, #tpu.memory_space<vmem>>, vector<1x1x32xf32>
    %680 = vector.shape_cast %679 : vector<1x1x32xf32> to vector<1x32xf32>
    %681 = arith.truncf %672 : vector<8x32xf32> to vector<8x32xbf16>
    %cst_323 = arith.constant dense<0.000000e+00> : vector<8x96xf32>
    %682 = tpu.matmul %681, %674, %cst_323 {dimension_numbers = #tpu.dot_dimension_numbers<[1], [0], [0], [1], [0, 0, 1, 1], [], []>} : vector<8x32xbf16>, vector<32x96xbf16>, vector<8x96xf32> -> vector<8x96xf32>
    %683 = vector.broadcast %676 : vector<1x96xf32> to vector<8x96xf32>
    %684 = arith.addf %682, %683 : vector<8x96xf32>
    %685 = vector.extract_strided_slice %684 {offsets = [0, 0], sizes = [8, 32], strides = [1, 1]} : vector<8x96xf32> to vector<8x32xf32>
    %686 = vector.extract_strided_slice %684 {offsets = [0, 32], sizes = [8, 32], strides = [1, 1]} : vector<8x96xf32> to vector<8x32xf32>
    %687 = vector.extract_strided_slice %684 {offsets = [0, 64], sizes = [8, 32], strides = [1, 1]} : vector<8x96xf32> to vector<8x32xf32>
    %cst_324 = arith.constant 0.353553385 : f32
    %688 = vector.broadcast %cst_324 : f32 to vector<8x32xf32>
    %689 = arith.mulf %685, %688 : vector<8x32xf32>
    %690 = arith.truncf %689 : vector<8x32xf32> to vector<8x32xbf16>
    %691 = arith.truncf %686 : vector<8x32xf32> to vector<8x32xbf16>
    %692 = arith.truncf %687 : vector<8x32xf32> to vector<8x32xbf16>
    %693 = vector.extract_strided_slice %690 {offsets = [0, 0], sizes = [8, 8], strides = [1, 1]} : vector<8x32xbf16> to vector<8x8xbf16>
    %694 = vector.extract_strided_slice %691 {offsets = [0, 0], sizes = [8, 8], strides = [1, 1]} : vector<8x32xbf16> to vector<8x8xbf16>
    %cst_325 = arith.constant dense<0.000000e+00> : vector<8x8xf32>
    %695 = tpu.matmul %693, %694, %cst_325 {dimension_numbers = #tpu.dot_dimension_numbers<[1], [1], [0], [0], [0, 0, 1, 0], [], []>} : vector<8x8xbf16>, vector<8x8xbf16>, vector<8x8xf32> -> vector<8x8xf32>
    %696 = arith.addf %695, %18 : vector<8x8xf32>
    %cst_326 = arith.constant dense<0xFF800000> : vector<8xf32>
    %697 = vector.multi_reduction <maximumf>, %696, %cst_326 [1] : vector<8x8xf32> to vector<8xf32>
    %698 = vector.shape_cast %697 : vector<8xf32> to vector<8x1xf32>
    %699 = vector.broadcast %698 : vector<8x1xf32> to vector<8x8xf32>
    %700 = arith.subf %696, %699 : vector<8x8xf32>
    %701 = math.exp %700 : vector<8x8xf32>
    %cst_327 = arith.constant dense<0.000000e+00> : vector<8xf32>
    %702 = vector.multi_reduction <add>, %701, %cst_327 [1] : vector<8x8xf32> to vector<8xf32>
    %703 = vector.shape_cast %702 : vector<8xf32> to vector<8x1xf32>
    %704 = tpu.reciprocal %703 {approx = true} : vector<8x1xf32> -> vector<8x1xf32>
    %705 = vector.broadcast %704 : vector<8x1xf32> to vector<8x8xf32>
    %706 = arith.mulf %701, %705 : vector<8x8xf32>
    %707 = arith.truncf %706 : vector<8x8xf32> to vector<8x8xbf16>
    %708 = vector.extract_strided_slice %692 {offsets = [0, 0], sizes = [8, 8], strides = [1, 1]} : vector<8x32xbf16> to vector<8x8xbf16>
    %cst_328 = arith.constant dense<0.000000e+00> : vector<8x8xf32>
    %709 = tpu.matmul %707, %708, %cst_328 {dimension_numbers = #tpu.dot_dimension_numbers<[1], [0], [0], [1], [0, 0, 1, 1], [], []>} : vector<8x8xbf16>, vector<8x8xbf16>, vector<8x8xf32> -> vector<8x8xf32>
    %c0_329 = arith.constant 0 : index
    %c0_330 = arith.constant 0 : index
    %710 = vector.load %arg44[%c0_329, %c0_330] : memref<8x32xf32, #tpu.memory_space<vmem>>, vector<8x8xf32>
    tpu.vector_store %arg44[%c0_329, %c0_330], %709 {strides = array<i32>} : memref<8x32xf32, #tpu.memory_space<vmem>>, vector<8x8xf32>,
    %711 = vector.extract_strided_slice %690 {offsets = [0, 8], sizes = [8, 8], strides = [1, 1]} : vector<8x32xbf16> to vector<8x8xbf16>
    %712 = vector.extract_strided_slice %691 {offsets = [0, 8], sizes = [8, 8], strides = [1, 1]} : vector<8x32xbf16> to vector<8x8xbf16>
    %cst_331 = arith.constant dense<0.000000e+00> : vector<8x8xf32>
    %713 = tpu.matmul %711, %712, %cst_331 {dimension_numbers = #tpu.dot_dimension_numbers<[1], [1], [0], [0], [0, 0, 1, 0], [], []>} : vector<8x8xbf16>, vector<8x8xbf16>, vector<8x8xf32> -> vector<8x8xf32>
    %714 = arith.addf %713, %18 : vector<8x8xf32>
    %cst_332 = arith.constant dense<0xFF800000> : vector<8xf32>
    %715 = vector.multi_reduction <maximumf>, %714, %cst_332 [1] : vector<8x8xf32> to vector<8xf32>
    %716 = vector.shape_cast %715 : vector<8xf32> to vector<8x1xf32>
    %717 = vector.broadcast %716 : vector<8x1xf32> to vector<8x8xf32>
    %718 = arith.subf %714, %717 : vector<8x8xf32>
    %719 = math.exp %718 : vector<8x8xf32>
    %cst_333 = arith.constant dense<0.000000e+00> : vector<8xf32>
    %720 = vector.multi_reduction <add>, %719, %cst_333 [1] : vector<8x8xf32> to vector<8xf32>
    %721 = vector.shape_cast %720 : vector<8xf32> to vector<8x1xf32>
    %722 = tpu.reciprocal %721 {approx = true} : vector<8x1xf32> -> vector<8x1xf32>
    %723 = vector.broadcast %722 : vector<8x1xf32> to vector<8x8xf32>
    %724 = arith.mulf %719, %723 : vector<8x8xf32>
    %725 = arith.truncf %724 : vector<8x8xf32> to vector<8x8xbf16>
    %726 = vector.extract_strided_slice %692 {offsets = [0, 8], sizes = [8, 8], strides = [1, 1]} : vector<8x32xbf16> to vector<8x8xbf16>
    %cst_334 = arith.constant dense<0.000000e+00> : vector<8x8xf32>
    %727 = tpu.matmul %725, %726, %cst_334 {dimension_numbers = #tpu.dot_dimension_numbers<[1], [0], [0], [1], [0, 0, 1, 1], [], []>} : vector<8x8xbf16>, vector<8x8xbf16>, vector<8x8xf32> -> vector<8x8xf32>
    %c0_335 = arith.constant 0 : index
    %c8_336 = arith.constant 8 : index
    %728 = vector.load %arg44[%c0_335, %c8_336] : memref<8x32xf32, #tpu.memory_space<vmem>>, vector<8x8xf32>
    tpu.vector_store %arg44[%c0_335, %c8_336], %727 {strides = array<i32>} : memref<8x32xf32, #tpu.memory_space<vmem>>, vector<8x8xf32>,
    %729 = vector.extract_strided_slice %690 {offsets = [0, 16], sizes = [8, 8], strides = [1, 1]} : vector<8x32xbf16> to vector<8x8xbf16>
    %730 = vector.extract_strided_slice %691 {offsets = [0, 16], sizes = [8, 8], strides = [1, 1]} : vector<8x32xbf16> to vector<8x8xbf16>
    %cst_337 = arith.constant dense<0.000000e+00> : vector<8x8xf32>
    %731 = tpu.matmul %729, %730, %cst_337 {dimension_numbers = #tpu.dot_dimension_numbers<[1], [1], [0], [0], [0, 0, 1, 0], [], []>} : vector<8x8xbf16>, vector<8x8xbf16>, vector<8x8xf32> -> vector<8x8xf32>
    %732 = arith.addf %731, %18 : vector<8x8xf32>
    %cst_338 = arith.constant dense<0xFF800000> : vector<8xf32>
    %733 = vector.multi_reduction <maximumf>, %732, %cst_338 [1] : vector<8x8xf32> to vector<8xf32>
    %734 = vector.shape_cast %733 : vector<8xf32> to vector<8x1xf32>
    %735 = vector.broadcast %734 : vector<8x1xf32> to vector<8x8xf32>
    %736 = arith.subf %732, %735 : vector<8x8xf32>
    %737 = math.exp %736 : vector<8x8xf32>
    %cst_339 = arith.constant dense<0.000000e+00> : vector<8xf32>
    %738 = vector.multi_reduction <add>, %737, %cst_339 [1] : vector<8x8xf32> to vector<8xf32>
    %739 = vector.shape_cast %738 : vector<8xf32> to vector<8x1xf32>
    %740 = tpu.reciprocal %739 {approx = true} : vector<8x1xf32> -> vector<8x1xf32>
    %741 = vector.broadcast %740 : vector<8x1xf32> to vector<8x8xf32>
    %742 = arith.mulf %737, %741 : vector<8x8xf32>
    %743 = arith.truncf %742 : vector<8x8xf32> to vector<8x8xbf16>
    %744 = vector.extract_strided_slice %692 {offsets = [0, 16], sizes = [8, 8], strides = [1, 1]} : vector<8x32xbf16> to vector<8x8xbf16>
    %cst_340 = arith.constant dense<0.000000e+00> : vector<8x8xf32>
    %745 = tpu.matmul %743, %744, %cst_340 {dimension_numbers = #tpu.dot_dimension_numbers<[1], [0], [0], [1], [0, 0, 1, 1], [], []>} : vector<8x8xbf16>, vector<8x8xbf16>, vector<8x8xf32> -> vector<8x8xf32>
    %c0_341 = arith.constant 0 : index
    %c16_342 = arith.constant 16 : index
    %746 = vector.load %arg44[%c0_341, %c16_342] : memref<8x32xf32, #tpu.memory_space<vmem>>, vector<8x8xf32>
    tpu.vector_store %arg44[%c0_341, %c16_342], %745 {strides = array<i32>} : memref<8x32xf32, #tpu.memory_space<vmem>>, vector<8x8xf32>,
    %747 = vector.extract_strided_slice %690 {offsets = [0, 24], sizes = [8, 8], strides = [1, 1]} : vector<8x32xbf16> to vector<8x8xbf16>
    %748 = vector.extract_strided_slice %691 {offsets = [0, 24], sizes = [8, 8], strides = [1, 1]} : vector<8x32xbf16> to vector<8x8xbf16>
    %cst_343 = arith.constant dense<0.000000e+00> : vector<8x8xf32>
    %749 = tpu.matmul %747, %748, %cst_343 {dimension_numbers = #tpu.dot_dimension_numbers<[1], [1], [0], [0], [0, 0, 1, 0], [], []>} : vector<8x8xbf16>, vector<8x8xbf16>, vector<8x8xf32> -> vector<8x8xf32>
    %750 = arith.addf %749, %18 : vector<8x8xf32>
    %cst_344 = arith.constant dense<0xFF800000> : vector<8xf32>
    %751 = vector.multi_reduction <maximumf>, %750, %cst_344 [1] : vector<8x8xf32> to vector<8xf32>
    %752 = vector.shape_cast %751 : vector<8xf32> to vector<8x1xf32>
    %753 = vector.broadcast %752 : vector<8x1xf32> to vector<8x8xf32>
    %754 = arith.subf %750, %753 : vector<8x8xf32>
    %755 = math.exp %754 : vector<8x8xf32>
    %cst_345 = arith.constant dense<0.000000e+00> : vector<8xf32>
    %756 = vector.multi_reduction <add>, %755, %cst_345 [1] : vector<8x8xf32> to vector<8xf32>
    %757 = vector.shape_cast %756 : vector<8xf32> to vector<8x1xf32>
    %758 = tpu.reciprocal %757 {approx = true} : vector<8x1xf32> -> vector<8x1xf32>
    %759 = vector.broadcast %758 : vector<8x1xf32> to vector<8x8xf32>
    %760 = arith.mulf %755, %759 : vector<8x8xf32>
    %761 = arith.truncf %760 : vector<8x8xf32> to vector<8x8xbf16>
    %762 = vector.extract_strided_slice %692 {offsets = [0, 24], sizes = [8, 8], strides = [1, 1]} : vector<8x32xbf16> to vector<8x8xbf16>
    %cst_346 = arith.constant dense<0.000000e+00> : vector<8x8xf32>
    %763 = tpu.matmul %761, %762, %cst_346 {dimension_numbers = #tpu.dot_dimension_numbers<[1], [0], [0], [1], [0, 0, 1, 1], [], []>} : vector<8x8xbf16>, vector<8x8xbf16>, vector<8x8xf32> -> vector<8x8xf32>
    %c0_347 = arith.constant 0 : index
    %c24_348 = arith.constant 24 : index
    %764 = vector.load %arg44[%c0_347, %c24_348] : memref<8x32xf32, #tpu.memory_space<vmem>>, vector<8x8xf32>
    tpu.vector_store %arg44[%c0_347, %c24_348], %763 {strides = array<i32>} : memref<8x32xf32, #tpu.memory_space<vmem>>, vector<8x8xf32>,
    %c0_349 = arith.constant 0 : index
    %c0_350 = arith.constant 0 : index
    %765 = vector.load %arg44[%c0_349, %c0_350] : memref<8x32xf32, #tpu.memory_space<vmem>>, vector<8x32xf32>
    %766 = arith.truncf %765 : vector<8x32xf32> to vector<8x32xbf16>
    %cst_351 = arith.constant dense<0.000000e+00> : vector<8x32xf32>
    %767 = tpu.matmul %766, %678, %cst_351 {dimension_numbers = #tpu.dot_dimension_numbers<[1], [0], [0], [1], [0, 0, 1, 1], [], []>} : vector<8x32xbf16>, vector<32x32xbf16>, vector<8x32xf32> -> vector<8x32xf32>
    %768 = vector.broadcast %680 : vector<1x32xf32> to vector<8x32xf32>
    %769 = arith.addf %767, %768 : vector<8x32xf32>
    %c1_352 = arith.constant 1 : index
    %c0_353 = arith.constant 0 : index
    %c0_354 = arith.constant 0 : index
    %770 = vector.load %arg25[%c1_352, %c0_353, %c0_354] : memref<2x1x32xf32, #tpu.memory_space<vmem>>, vector<1x1x32xf32>
    %771 = vector.shape_cast %770 : vector<1x1x32xf32> to vector<1x32xf32>
    %c1_355 = arith.constant 1 : index
    %c0_356 = arith.constant 0 : index
    %c0_357 = arith.constant 0 : index
    %772 = vector.load %arg26[%c1_355, %c0_356, %c0_357] : memref<2x1x32xf32, #tpu.memory_space<vmem>>, vector<1x1x32xf32>
    %773 = vector.shape_cast %772 : vector<1x1x32xf32> to vector<1x32xf32>
    %774 = arith.addf %769, %672 : vector<8x32xf32>
    %cst_358 = arith.constant dense<0.000000e+00> : vector<8xf32>
    %775 = vector.multi_reduction <add>, %774, %cst_358 [1] : vector<8x32xf32> to vector<8xf32>
    %776 = vector.shape_cast %775 : vector<8xf32> to vector<8x1xf32>
    %cst_359 = arith.constant 3.200000e+01 : f32
    %777 = vector.broadcast %cst_359 : f32 to vector<8x1xf32>
    %778 = arith.divf %776, %777 : vector<8x1xf32>
    %779 = vector.broadcast %778 : vector<8x1xf32> to vector<8x32xf32>
    %780 = arith.subf %774, %779 : vector<8x32xf32>
    %781 = arith.mulf %780, %780 : vector<8x32xf32>
    %cst_360 = arith.constant dense<0.000000e+00> : vector<8xf32>
    %782 = vector.multi_reduction <add>, %781, %cst_360 [1] : vector<8x32xf32> to vector<8xf32>
    %783 = vector.shape_cast %782 : vector<8xf32> to vector<8x1xf32>
    %cst_361 = arith.constant 3.200000e+01 : f32
    %784 = vector.broadcast %cst_361 : f32 to vector<8x1xf32>
    %785 = arith.divf %783, %784 : vector<8x1xf32>
    %786 = vector.broadcast %778 : vector<8x1xf32> to vector<8x32xf32>
    %787 = arith.subf %774, %786 : vector<8x32xf32>
    %cst_362 = arith.constant 9.99999974E-6 : f32
    %788 = vector.broadcast %cst_362 : f32 to vector<8x1xf32>
    %789 = arith.addf %785, %788 : vector<8x1xf32>
    %790 = math.rsqrt %789 : vector<8x1xf32>
    %791 = vector.broadcast %790 : vector<8x1xf32> to vector<8x32xf32>
    %792 = arith.mulf %787, %791 : vector<8x32xf32>
    %793 = vector.broadcast %771 : vector<1x32xf32> to vector<8x32xf32>
    %794 = arith.mulf %792, %793 : vector<8x32xf32>
    %795 = vector.broadcast %773 : vector<1x32xf32> to vector<8x32xf32>
    %796 = arith.addf %794, %795 : vector<8x32xf32>
    %c1_363 = arith.constant 1 : index
    %c0_364 = arith.constant 0 : index
    %c0_365 = arith.constant 0 : index
    %797 = vector.load %arg27[%c1_363, %c0_364, %c0_365] : memref<2x32x32xbf16, #tpu.memory_space<vmem>>, vector<1x32x32xbf16>
    %798 = vector.shape_cast %797 : vector<1x32x32xbf16> to vector<32x32xbf16>
    %c1_366 = arith.constant 1 : index
    %c0_367 = arith.constant 0 : index
    %c0_368 = arith.constant 0 : index
    %799 = vector.load %arg28[%c1_366, %c0_367, %c0_368] : memref<2x1x32xf32, #tpu.memory_space<vmem>>, vector<1x1x32xf32>
    %800 = vector.shape_cast %799 : vector<1x1x32xf32> to vector<1x32xf32>
    %c1_369 = arith.constant 1 : index
    %c0_370 = arith.constant 0 : index
    %c0_371 = arith.constant 0 : index
    %801 = vector.load %arg29[%c1_369, %c0_370, %c0_371] : memref<2x32x64xbf16, #tpu.memory_space<vmem>>, vector<1x32x64xbf16>
    %802 = vector.shape_cast %801 : vector<1x32x64xbf16> to vector<32x64xbf16>
    %c1_372 = arith.constant 1 : index
    %c0_373 = arith.constant 0 : index
    %c0_374 = arith.constant 0 : index
    %803 = vector.load %arg30[%c1_372, %c0_373, %c0_374] : memref<2x1x64xf32, #tpu.memory_space<vmem>>, vector<1x1x64xf32>
    %804 = vector.shape_cast %803 : vector<1x1x64xf32> to vector<1x64xf32>
    %c1_375 = arith.constant 1 : index
    %c0_376 = arith.constant 0 : index
    %c0_377 = arith.constant 0 : index
    %805 = vector.load %arg31[%c1_375, %c0_376, %c0_377] : memref<2x32x32xbf16, #tpu.memory_space<vmem>>, vector<1x32x32xbf16>
    %806 = vector.shape_cast %805 : vector<1x32x32xbf16> to vector<32x32xbf16>
    %c1_378 = arith.constant 1 : index
    %c0_379 = arith.constant 0 : index
    %c0_380 = arith.constant 0 : index
    %807 = vector.load %arg32[%c1_378, %c0_379, %c0_380] : memref<2x1x32xf32, #tpu.memory_space<vmem>>, vector<1x1x32xf32>
    %808 = vector.shape_cast %807 : vector<1x1x32xf32> to vector<1x32xf32>
    %809 = arith.truncf %796 : vector<8x32xf32> to vector<8x32xbf16>
    %cst_381 = arith.constant dense<0.000000e+00> : vector<8x32xf32>
    %810 = tpu.matmul %809, %798, %cst_381 {dimension_numbers = #tpu.dot_dimension_numbers<[1], [0], [0], [1], [0, 0, 1, 1], [], []>} : vector<8x32xbf16>, vector<32x32xbf16>, vector<8x32xf32> -> vector<8x32xf32>
    %811 = vector.broadcast %800 : vector<1x32xf32> to vector<8x32xf32>
    %812 = arith.addf %810, %811 : vector<8x32xf32>
    %813 = arith.truncf %364 : vector<8x32xf32> to vector<8x32xbf16>
    %cst_382 = arith.constant dense<0.000000e+00> : vector<8x64xf32>
    %814 = tpu.matmul %813, %802, %cst_382 {dimension_numbers = #tpu.dot_dimension_numbers<[1], [0], [0], [1], [0, 0, 1, 1], [], []>} : vector<8x32xbf16>, vector<32x64xbf16>, vector<8x64xf32> -> vector<8x64xf32>
    %815 = vector.broadcast %804 : vector<1x64xf32> to vector<8x64xf32>
    %816 = arith.addf %814, %815 : vector<8x64xf32>
    %817 = vector.extract_strided_slice %816 {offsets = [0, 0], sizes = [8, 32], strides = [1, 1]} : vector<8x64xf32> to vector<8x32xf32>
    %818 = vector.extract_strided_slice %816 {offsets = [0, 32], sizes = [8, 32], strides = [1, 1]} : vector<8x64xf32> to vector<8x32xf32>
    %cst_383 = arith.constant 0.353553385 : f32
    %819 = vector.broadcast %cst_383 : f32 to vector<8x32xf32>
    %820 = arith.mulf %812, %819 : vector<8x32xf32>
    %821 = arith.truncf %820 : vector<8x32xf32> to vector<8x32xbf16>
    %822 = arith.truncf %817 : vector<8x32xf32> to vector<8x32xbf16>
    %823 = arith.truncf %818 : vector<8x32xf32> to vector<8x32xbf16>
    %824 = vector.extract_strided_slice %821 {offsets = [0, 0], sizes = [8, 8], strides = [1, 1]} : vector<8x32xbf16> to vector<8x8xbf16>
    %825 = vector.extract_strided_slice %822 {offsets = [0, 0], sizes = [8, 8], strides = [1, 1]} : vector<8x32xbf16> to vector<8x8xbf16>
    %cst_384 = arith.constant dense<0.000000e+00> : vector<8x8xf32>
    %826 = tpu.matmul %824, %825, %cst_384 {dimension_numbers = #tpu.dot_dimension_numbers<[1], [1], [0], [0], [0, 0, 1, 0], [], []>} : vector<8x8xbf16>, vector<8x8xbf16>, vector<8x8xf32> -> vector<8x8xf32>
    %827 = arith.addf %826, %11 : vector<8x8xf32>
    %cst_385 = arith.constant dense<0xFF800000> : vector<8xf32>
    %828 = vector.multi_reduction <maximumf>, %827, %cst_385 [1] : vector<8x8xf32> to vector<8xf32>
    %829 = vector.shape_cast %828 : vector<8xf32> to vector<8x1xf32>
    %830 = vector.broadcast %829 : vector<8x1xf32> to vector<8x8xf32>
    %831 = arith.subf %827, %830 : vector<8x8xf32>
    %832 = math.exp %831 : vector<8x8xf32>
    %cst_386 = arith.constant dense<0.000000e+00> : vector<8xf32>
    %833 = vector.multi_reduction <add>, %832, %cst_386 [1] : vector<8x8xf32> to vector<8xf32>
    %834 = vector.shape_cast %833 : vector<8xf32> to vector<8x1xf32>
    %835 = tpu.reciprocal %834 {approx = true} : vector<8x1xf32> -> vector<8x1xf32>
    %836 = vector.broadcast %835 : vector<8x1xf32> to vector<8x8xf32>
    %837 = arith.mulf %832, %836 : vector<8x8xf32>
    %838 = arith.truncf %837 : vector<8x8xf32> to vector<8x8xbf16>
    %839 = vector.extract_strided_slice %823 {offsets = [0, 0], sizes = [8, 8], strides = [1, 1]} : vector<8x32xbf16> to vector<8x8xbf16>
    %cst_387 = arith.constant dense<0.000000e+00> : vector<8x8xf32>
    %840 = tpu.matmul %838, %839, %cst_387 {dimension_numbers = #tpu.dot_dimension_numbers<[1], [0], [0], [1], [0, 0, 1, 1], [], []>} : vector<8x8xbf16>, vector<8x8xbf16>, vector<8x8xf32> -> vector<8x8xf32>
    %c0_388 = arith.constant 0 : index
    %c0_389 = arith.constant 0 : index
    %841 = vector.load %arg44[%c0_388, %c0_389] : memref<8x32xf32, #tpu.memory_space<vmem>>, vector<8x8xf32>
    tpu.vector_store %arg44[%c0_388, %c0_389], %840 {strides = array<i32>} : memref<8x32xf32, #tpu.memory_space<vmem>>, vector<8x8xf32>,
    %842 = vector.extract_strided_slice %821 {offsets = [0, 8], sizes = [8, 8], strides = [1, 1]} : vector<8x32xbf16> to vector<8x8xbf16>
    %843 = vector.extract_strided_slice %822 {offsets = [0, 8], sizes = [8, 8], strides = [1, 1]} : vector<8x32xbf16> to vector<8x8xbf16>
    %cst_390 = arith.constant dense<0.000000e+00> : vector<8x8xf32>
    %844 = tpu.matmul %842, %843, %cst_390 {dimension_numbers = #tpu.dot_dimension_numbers<[1], [1], [0], [0], [0, 0, 1, 0], [], []>} : vector<8x8xbf16>, vector<8x8xbf16>, vector<8x8xf32> -> vector<8x8xf32>
    %845 = arith.addf %844, %11 : vector<8x8xf32>
    %cst_391 = arith.constant dense<0xFF800000> : vector<8xf32>
    %846 = vector.multi_reduction <maximumf>, %845, %cst_391 [1] : vector<8x8xf32> to vector<8xf32>
    %847 = vector.shape_cast %846 : vector<8xf32> to vector<8x1xf32>
    %848 = vector.broadcast %847 : vector<8x1xf32> to vector<8x8xf32>
    %849 = arith.subf %845, %848 : vector<8x8xf32>
    %850 = math.exp %849 : vector<8x8xf32>
    %cst_392 = arith.constant dense<0.000000e+00> : vector<8xf32>
    %851 = vector.multi_reduction <add>, %850, %cst_392 [1] : vector<8x8xf32> to vector<8xf32>
    %852 = vector.shape_cast %851 : vector<8xf32> to vector<8x1xf32>
    %853 = tpu.reciprocal %852 {approx = true} : vector<8x1xf32> -> vector<8x1xf32>
    %854 = vector.broadcast %853 : vector<8x1xf32> to vector<8x8xf32>
    %855 = arith.mulf %850, %854 : vector<8x8xf32>
    %856 = arith.truncf %855 : vector<8x8xf32> to vector<8x8xbf16>
    %857 = vector.extract_strided_slice %823 {offsets = [0, 8], sizes = [8, 8], strides = [1, 1]} : vector<8x32xbf16> to vector<8x8xbf16>
    %cst_393 = arith.constant dense<0.000000e+00> : vector<8x8xf32>
    %858 = tpu.matmul %856, %857, %cst_393 {dimension_numbers = #tpu.dot_dimension_numbers<[1], [0], [0], [1], [0, 0, 1, 1], [], []>} : vector<8x8xbf16>, vector<8x8xbf16>, vector<8x8xf32> -> vector<8x8xf32>
    %c0_394 = arith.constant 0 : index
    %c8_395 = arith.constant 8 : index
    %859 = vector.load %arg44[%c0_394, %c8_395] : memref<8x32xf32, #tpu.memory_space<vmem>>, vector<8x8xf32>
    tpu.vector_store %arg44[%c0_394, %c8_395], %858 {strides = array<i32>} : memref<8x32xf32, #tpu.memory_space<vmem>>, vector<8x8xf32>,
    %860 = vector.extract_strided_slice %821 {offsets = [0, 16], sizes = [8, 8], strides = [1, 1]} : vector<8x32xbf16> to vector<8x8xbf16>
    %861 = vector.extract_strided_slice %822 {offsets = [0, 16], sizes = [8, 8], strides = [1, 1]} : vector<8x32xbf16> to vector<8x8xbf16>
    %cst_396 = arith.constant dense<0.000000e+00> : vector<8x8xf32>
    %862 = tpu.matmul %860, %861, %cst_396 {dimension_numbers = #tpu.dot_dimension_numbers<[1], [1], [0], [0], [0, 0, 1, 0], [], []>} : vector<8x8xbf16>, vector<8x8xbf16>, vector<8x8xf32> -> vector<8x8xf32>
    %863 = arith.addf %862, %11 : vector<8x8xf32>
    %cst_397 = arith.constant dense<0xFF800000> : vector<8xf32>
    %864 = vector.multi_reduction <maximumf>, %863, %cst_397 [1] : vector<8x8xf32> to vector<8xf32>
    %865 = vector.shape_cast %864 : vector<8xf32> to vector<8x1xf32>
    %866 = vector.broadcast %865 : vector<8x1xf32> to vector<8x8xf32>
    %867 = arith.subf %863, %866 : vector<8x8xf32>
    %868 = math.exp %867 : vector<8x8xf32>
    %cst_398 = arith.constant dense<0.000000e+00> : vector<8xf32>
    %869 = vector.multi_reduction <add>, %868, %cst_398 [1] : vector<8x8xf32> to vector<8xf32>
    %870 = vector.shape_cast %869 : vector<8xf32> to vector<8x1xf32>
    %871 = tpu.reciprocal %870 {approx = true} : vector<8x1xf32> -> vector<8x1xf32>
    %872 = vector.broadcast %871 : vector<8x1xf32> to vector<8x8xf32>
    %873 = arith.mulf %868, %872 : vector<8x8xf32>
    %874 = arith.truncf %873 : vector<8x8xf32> to vector<8x8xbf16>
    %875 = vector.extract_strided_slice %823 {offsets = [0, 16], sizes = [8, 8], strides = [1, 1]} : vector<8x32xbf16> to vector<8x8xbf16>
    %cst_399 = arith.constant dense<0.000000e+00> : vector<8x8xf32>
    %876 = tpu.matmul %874, %875, %cst_399 {dimension_numbers = #tpu.dot_dimension_numbers<[1], [0], [0], [1], [0, 0, 1, 1], [], []>} : vector<8x8xbf16>, vector<8x8xbf16>, vector<8x8xf32> -> vector<8x8xf32>
    %c0_400 = arith.constant 0 : index
    %c16_401 = arith.constant 16 : index
    %877 = vector.load %arg44[%c0_400, %c16_401] : memref<8x32xf32, #tpu.memory_space<vmem>>, vector<8x8xf32>
    tpu.vector_store %arg44[%c0_400, %c16_401], %876 {strides = array<i32>} : memref<8x32xf32, #tpu.memory_space<vmem>>, vector<8x8xf32>,
    %878 = vector.extract_strided_slice %821 {offsets = [0, 24], sizes = [8, 8], strides = [1, 1]} : vector<8x32xbf16> to vector<8x8xbf16>
    %879 = vector.extract_strided_slice %822 {offsets = [0, 24], sizes = [8, 8], strides = [1, 1]} : vector<8x32xbf16> to vector<8x8xbf16>
    %cst_402 = arith.constant dense<0.000000e+00> : vector<8x8xf32>
    %880 = tpu.matmul %878, %879, %cst_402 {dimension_numbers = #tpu.dot_dimension_numbers<[1], [1], [0], [0], [0, 0, 1, 0], [], []>} : vector<8x8xbf16>, vector<8x8xbf16>, vector<8x8xf32> -> vector<8x8xf32>
    %881 = arith.addf %880, %11 : vector<8x8xf32>
    %cst_403 = arith.constant dense<0xFF800000> : vector<8xf32>
    %882 = vector.multi_reduction <maximumf>, %881, %cst_403 [1] : vector<8x8xf32> to vector<8xf32>
    %883 = vector.shape_cast %882 : vector<8xf32> to vector<8x1xf32>
    %884 = vector.broadcast %883 : vector<8x1xf32> to vector<8x8xf32>
    %885 = arith.subf %881, %884 : vector<8x8xf32>
    %886 = math.exp %885 : vector<8x8xf32>
    %cst_404 = arith.constant dense<0.000000e+00> : vector<8xf32>
    %887 = vector.multi_reduction <add>, %886, %cst_404 [1] : vector<8x8xf32> to vector<8xf32>
    %888 = vector.shape_cast %887 : vector<8xf32> to vector<8x1xf32>
    %889 = tpu.reciprocal %888 {approx = true} : vector<8x1xf32> -> vector<8x1xf32>
    %890 = vector.broadcast %889 : vector<8x1xf32> to vector<8x8xf32>
    %891 = arith.mulf %886, %890 : vector<8x8xf32>
    %892 = arith.truncf %891 : vector<8x8xf32> to vector<8x8xbf16>
    %893 = vector.extract_strided_slice %823 {offsets = [0, 24], sizes = [8, 8], strides = [1, 1]} : vector<8x32xbf16> to vector<8x8xbf16>
    %cst_405 = arith.constant dense<0.000000e+00> : vector<8x8xf32>
    %894 = tpu.matmul %892, %893, %cst_405 {dimension_numbers = #tpu.dot_dimension_numbers<[1], [0], [0], [1], [0, 0, 1, 1], [], []>} : vector<8x8xbf16>, vector<8x8xbf16>, vector<8x8xf32> -> vector<8x8xf32>
    %c0_406 = arith.constant 0 : index
    %c24_407 = arith.constant 24 : index
    %895 = vector.load %arg44[%c0_406, %c24_407] : memref<8x32xf32, #tpu.memory_space<vmem>>, vector<8x8xf32>
    tpu.vector_store %arg44[%c0_406, %c24_407], %894 {strides = array<i32>} : memref<8x32xf32, #tpu.memory_space<vmem>>, vector<8x8xf32>,
    %c0_408 = arith.constant 0 : index
    %c0_409 = arith.constant 0 : index
    %896 = vector.load %arg44[%c0_408, %c0_409] : memref<8x32xf32, #tpu.memory_space<vmem>>, vector<8x32xf32>
    %897 = arith.truncf %896 : vector<8x32xf32> to vector<8x32xbf16>
    %cst_410 = arith.constant dense<0.000000e+00> : vector<8x32xf32>
    %898 = tpu.matmul %897, %806, %cst_410 {dimension_numbers = #tpu.dot_dimension_numbers<[1], [0], [0], [1], [0, 0, 1, 1], [], []>} : vector<8x32xbf16>, vector<32x32xbf16>, vector<8x32xf32> -> vector<8x32xf32>
    %899 = vector.broadcast %808 : vector<1x32xf32> to vector<8x32xf32>
    %900 = arith.addf %898, %899 : vector<8x32xf32>
    %c1_411 = arith.constant 1 : index
    %c0_412 = arith.constant 0 : index
    %c0_413 = arith.constant 0 : index
    %901 = vector.load %arg33[%c1_411, %c0_412, %c0_413] : memref<2x1x32xf32, #tpu.memory_space<vmem>>, vector<1x1x32xf32>
    %902 = vector.shape_cast %901 : vector<1x1x32xf32> to vector<1x32xf32>
    %c1_414 = arith.constant 1 : index
    %c0_415 = arith.constant 0 : index
    %c0_416 = arith.constant 0 : index
    %903 = vector.load %arg34[%c1_414, %c0_415, %c0_416] : memref<2x1x32xf32, #tpu.memory_space<vmem>>, vector<1x1x32xf32>
    %904 = vector.shape_cast %903 : vector<1x1x32xf32> to vector<1x32xf32>
    %905 = arith.addf %900, %796 : vector<8x32xf32>
    %cst_417 = arith.constant dense<0.000000e+00> : vector<8xf32>
    %906 = vector.multi_reduction <add>, %905, %cst_417 [1] : vector<8x32xf32> to vector<8xf32>
    %907 = vector.shape_cast %906 : vector<8xf32> to vector<8x1xf32>
    %cst_418 = arith.constant 3.200000e+01 : f32
    %908 = vector.broadcast %cst_418 : f32 to vector<8x1xf32>
    %909 = arith.divf %907, %908 : vector<8x1xf32>
    %910 = vector.broadcast %909 : vector<8x1xf32> to vector<8x32xf32>
    %911 = arith.subf %905, %910 : vector<8x32xf32>
    %912 = arith.mulf %911, %911 : vector<8x32xf32>
    %cst_419 = arith.constant dense<0.000000e+00> : vector<8xf32>
    %913 = vector.multi_reduction <add>, %912, %cst_419 [1] : vector<8x32xf32> to vector<8xf32>
    %914 = vector.shape_cast %913 : vector<8xf32> to vector<8x1xf32>
    %cst_420 = arith.constant 3.200000e+01 : f32
    %915 = vector.broadcast %cst_420 : f32 to vector<8x1xf32>
    %916 = arith.divf %914, %915 : vector<8x1xf32>
    %917 = vector.broadcast %909 : vector<8x1xf32> to vector<8x32xf32>
    %918 = arith.subf %905, %917 : vector<8x32xf32>
    %cst_421 = arith.constant 9.99999974E-6 : f32
    %919 = vector.broadcast %cst_421 : f32 to vector<8x1xf32>
    %920 = arith.addf %916, %919 : vector<8x1xf32>
    %921 = math.rsqrt %920 : vector<8x1xf32>
    %922 = vector.broadcast %921 : vector<8x1xf32> to vector<8x32xf32>
    %923 = arith.mulf %918, %922 : vector<8x32xf32>
    %924 = vector.broadcast %902 : vector<1x32xf32> to vector<8x32xf32>
    %925 = arith.mulf %923, %924 : vector<8x32xf32>
    %926 = vector.broadcast %904 : vector<1x32xf32> to vector<8x32xf32>
    %927 = arith.addf %925, %926 : vector<8x32xf32>
    %c1_422 = arith.constant 1 : index
    %c0_423 = arith.constant 0 : index
    %c0_424 = arith.constant 0 : index
    %928 = vector.load %arg35[%c1_422, %c0_423, %c0_424] : memref<2x32x64xbf16, #tpu.memory_space<vmem>>, vector<1x32x64xbf16>
    %929 = vector.shape_cast %928 : vector<1x32x64xbf16> to vector<32x64xbf16>
    %c1_425 = arith.constant 1 : index
    %c0_426 = arith.constant 0 : index
    %c0_427 = arith.constant 0 : index
    %930 = vector.load %arg36[%c1_425, %c0_426, %c0_427] : memref<2x1x64xf32, #tpu.memory_space<vmem>>, vector<1x1x64xf32>
    %931 = vector.shape_cast %930 : vector<1x1x64xf32> to vector<1x64xf32>
    %c1_428 = arith.constant 1 : index
    %c0_429 = arith.constant 0 : index
    %c0_430 = arith.constant 0 : index
    %932 = vector.load %arg37[%c1_428, %c0_429, %c0_430] : memref<2x64x32xbf16, #tpu.memory_space<vmem>>, vector<1x64x32xbf16>
    %933 = vector.shape_cast %932 : vector<1x64x32xbf16> to vector<64x32xbf16>
    %c1_431 = arith.constant 1 : index
    %c0_432 = arith.constant 0 : index
    %c0_433 = arith.constant 0 : index
    %934 = vector.load %arg38[%c1_431, %c0_432, %c0_433] : memref<2x1x32xf32, #tpu.memory_space<vmem>>, vector<1x1x32xf32>
    %935 = vector.shape_cast %934 : vector<1x1x32xf32> to vector<1x32xf32>
    %936 = arith.truncf %927 : vector<8x32xf32> to vector<8x32xbf16>
    %cst_434 = arith.constant dense<0.000000e+00> : vector<8x64xf32>
    %937 = tpu.matmul %936, %929, %cst_434 {dimension_numbers = #tpu.dot_dimension_numbers<[1], [0], [0], [1], [0, 0, 1, 1], [], []>} : vector<8x32xbf16>, vector<32x64xbf16>, vector<8x64xf32> -> vector<8x64xf32>
    %938 = vector.broadcast %931 : vector<1x64xf32> to vector<8x64xf32>
    %939 = arith.addf %937, %938 : vector<8x64xf32>
    %cst_435 = arith.constant 0.000000e+00 : f32
    %940 = vector.broadcast %cst_435 : f32 to vector<8x64xf32>
    %941 = arith.maximumf %939, %940 : vector<8x64xf32>
    %942 = arith.truncf %941 : vector<8x64xf32> to vector<8x64xbf16>
    %cst_436 = arith.constant dense<0.000000e+00> : vector<8x32xf32>
    %943 = tpu.matmul %942, %933, %cst_436 {dimension_numbers = #tpu.dot_dimension_numbers<[1], [0], [0], [1], [0, 0, 1, 1], [], []>} : vector<8x64xbf16>, vector<64x32xbf16>, vector<8x32xf32> -> vector<8x32xf32>
    %944 = vector.broadcast %935 : vector<1x32xf32> to vector<8x32xf32>
    %945 = arith.addf %943, %944 : vector<8x32xf32>
    %c1_437 = arith.constant 1 : index
    %c0_438 = arith.constant 0 : index
    %c0_439 = arith.constant 0 : index
    %946 = vector.load %arg39[%c1_437, %c0_438, %c0_439] : memref<2x1x32xf32, #tpu.memory_space<vmem>>, vector<1x1x32xf32>
    %947 = vector.shape_cast %946 : vector<1x1x32xf32> to vector<1x32xf32>
    %c1_440 = arith.constant 1 : index
    %c0_441 = arith.constant 0 : index
    %c0_442 = arith.constant 0 : index
    %948 = vector.load %arg40[%c1_440, %c0_441, %c0_442] : memref<2x1x32xf32, #tpu.memory_space<vmem>>, vector<1x1x32xf32>
    %949 = vector.shape_cast %948 : vector<1x1x32xf32> to vector<1x32xf32>
    %950 = arith.addf %945, %927 : vector<8x32xf32>
    %cst_443 = arith.constant dense<0.000000e+00> : vector<8xf32>
    %951 = vector.multi_reduction <add>, %950, %cst_443 [1] : vector<8x32xf32> to vector<8xf32>
    %952 = vector.shape_cast %951 : vector<8xf32> to vector<8x1xf32>
    %cst_444 = arith.constant 3.200000e+01 : f32
    %953 = vector.broadcast %cst_444 : f32 to vector<8x1xf32>
    %954 = arith.divf %952, %953 : vector<8x1xf32>
    %955 = vector.broadcast %954 : vector<8x1xf32> to vector<8x32xf32>
    %956 = arith.subf %950, %955 : vector<8x32xf32>
    %957 = arith.mulf %956, %956 : vector<8x32xf32>
    %cst_445 = arith.constant dense<0.000000e+00> : vector<8xf32>
    %958 = vector.multi_reduction <add>, %957, %cst_445 [1] : vector<8x32xf32> to vector<8xf32>
    %959 = vector.shape_cast %958 : vector<8xf32> to vector<8x1xf32>
    %cst_446 = arith.constant 3.200000e+01 : f32
    %960 = vector.broadcast %cst_446 : f32 to vector<8x1xf32>
    %961 = arith.divf %959, %960 : vector<8x1xf32>
    %962 = vector.broadcast %954 : vector<8x1xf32> to vector<8x32xf32>
    %963 = arith.subf %950, %962 : vector<8x32xf32>
    %cst_447 = arith.constant 9.99999974E-6 : f32
    %964 = vector.broadcast %cst_447 : f32 to vector<8x1xf32>
    %965 = arith.addf %961, %964 : vector<8x1xf32>
    %966 = math.rsqrt %965 : vector<8x1xf32>
    %967 = vector.broadcast %966 : vector<8x1xf32> to vector<8x32xf32>
    %968 = arith.mulf %963, %967 : vector<8x32xf32>
    %969 = vector.broadcast %947 : vector<1x32xf32> to vector<8x32xf32>
    %970 = arith.mulf %968, %969 : vector<8x32xf32>
    %971 = vector.broadcast %949 : vector<1x32xf32> to vector<8x32xf32>
    %972 = arith.addf %970, %971 : vector<8x32xf32>
    %c0_448 = arith.constant 0 : index
    %c0_449 = arith.constant 0 : index
    %973 = vector.load %arg41[%c0_448, %c0_449] : memref<1x32xf32, #tpu.memory_space<vmem>>, vector<1x32xf32>
    %974 = vector.broadcast %973 : vector<1x32xf32> to vector<8x32xf32>
    %975 = arith.mulf %972, %974 : vector<8x32xf32>
    %cst_450 = arith.constant dense<0.000000e+00> : vector<8xf32>
    %976 = vector.multi_reduction <add>, %975, %cst_450 [1] : vector<8x32xf32> to vector<8xf32>
    %977 = vector.shape_cast %976 : vector<8xf32> to vector<8x1xf32>
    %c0_451 = arith.constant 0 : index
    %c0_452 = arith.constant 0 : index
    %978 = vector.load %arg42[%c0_451, %c0_452] : memref<1x1xf32, #tpu.memory_space<vmem>>, vector<1x1xf32>
    %979 = vector.broadcast %978 : vector<1x1xf32> to vector<8x1xf32>
    %980 = arith.addf %977, %979 : vector<8x1xf32>
    %c0_453 = arith.constant 0 : index
    %c0_454 = arith.constant 0 : index
    %c0_455 = arith.constant 0 : index
    %981 = vector.load %arg43[%c0_453, %c0_454, %c0_455] : memref<1x8x1xf32, #tpu.memory_space<vmem>>, vector<1x8x1xf32>
    %982 = vector.shape_cast %981 : vector<1x8x1xf32> to vector<8x1xf32>
    %983 = vector.shape_cast %980 : vector<8x1xf32> to vector<1x8x1xf32>
    tpu.vector_store %arg43[%c0_453, %c0_454, %c0_455], %983 {strides = array<i32>} : memref<1x8x1xf32, #tpu.memory_space<vmem>>, vector<1x8x1xf32>,
    return
  }
  func.func @transform_0(%arg0: i32) -> (i32, i32, i32) {
    %c0_i32 = arith.constant 0 : i32
    %c0_i32_0 = arith.constant 0 : i32
    %c0_i32_1 = arith.constant 0 : i32
    return %arg0, %c0_i32, %c0_i32_0 : i32, i32, i32
  }
  func.func @transform_1(%arg0: i32) -> (i32, i32, i32) {
    %c0_i32 = arith.constant 0 : i32
    %c0_i32_0 = arith.constant 0 : i32
    %c0_i32_1 = arith.constant 0 : i32
    return %arg0, %c0_i32, %c0_i32_0 : i32, i32, i32
  }
  func.func @transform_2(%arg0: i32) -> (i32, i32, i32) {
    %c0_i32 = arith.constant 0 : i32
    %c0_i32_0 = arith.constant 0 : i32
    %c0_i32_1 = arith.constant 0 : i32
    return %arg0, %c0_i32, %c0_i32_0 : i32, i32, i32
  }
  func.func @transform_3(%arg0: i32) -> (i32, i32) {
    %c0_i32 = arith.constant 0 : i32
    %c0_i32_0 = arith.constant 0 : i32
    %c0_i32_1 = arith.constant 0 : i32
    return %c0_i32, %c0_i32_0 : i32, i32
  }
  func.func @transform_4(%arg0: i32) -> (i32, i32) {
    %c0_i32 = arith.constant 0 : i32
    %c0_i32_0 = arith.constant 0 : i32
    %c0_i32_1 = arith.constant 0 : i32
    return %c0_i32, %c0_i32_0 : i32, i32
  }
  func.func @transform_5(%arg0: i32) -> (i32, i32) {
    %c0_i32 = arith.constant 0 : i32
    %c0_i32_0 = arith.constant 0 : i32
    %c0_i32_1 = arith.constant 0 : i32
    return %c0_i32, %c0_i32_0 : i32, i32
  }
  func.func @transform_6(%arg0: i32) -> (i32, i32, i32) {
    %c0_i32 = arith.constant 0 : i32
    %c0_i32_0 = arith.constant 0 : i32
    %c0_i32_1 = arith.constant 0 : i32
    %c0_i32_2 = arith.constant 0 : i32
    return %c0_i32, %c0_i32_0, %c0_i32_1 : i32, i32, i32
  }
  func.func @transform_7(%arg0: i32) -> (i32, i32, i32) {
    %c0_i32 = arith.constant 0 : i32
    %c0_i32_0 = arith.constant 0 : i32
    %c0_i32_1 = arith.constant 0 : i32
    %c0_i32_2 = arith.constant 0 : i32
    return %c0_i32, %c0_i32_0, %c0_i32_1 : i32, i32, i32
  }
  func.func @transform_8(%arg0: i32) -> (i32, i32, i32) {
    %c0_i32 = arith.constant 0 : i32
    %c0_i32_0 = arith.constant 0 : i32
    %c0_i32_1 = arith.constant 0 : i32
    %c0_i32_2 = arith.constant 0 : i32
    return %c0_i32, %c0_i32_0, %c0_i32_1 : i32, i32, i32
  }
  func.func @transform_9(%arg0: i32) -> (i32, i32, i32) {
    %c0_i32 = arith.constant 0 : i32
    %c0_i32_0 = arith.constant 0 : i32
    %c0_i32_1 = arith.constant 0 : i32
    %c0_i32_2 = arith.constant 0 : i32
    return %c0_i32, %c0_i32_0, %c0_i32_1 : i32, i32, i32
  }
  func.func @transform_10(%arg0: i32) -> (i32, i32, i32) {
    %c0_i32 = arith.constant 0 : i32
    %c0_i32_0 = arith.constant 0 : i32
    %c0_i32_1 = arith.constant 0 : i32
    %c0_i32_2 = arith.constant 0 : i32
    return %c0_i32, %c0_i32_0, %c0_i32_1 : i32, i32, i32
  }
  func.func @transform_11(%arg0: i32) -> (i32, i32, i32) {
    %c0_i32 = arith.constant 0 : i32
    %c0_i32_0 = arith.constant 0 : i32
    %c0_i32_1 = arith.constant 0 : i32
    %c0_i32_2 = arith.constant 0 : i32
    return %c0_i32, %c0_i32_0, %c0_i32_1 : i32, i32, i32
  }
  func.func @transform_12(%arg0: i32) -> (i32, i32, i32) {
    %c0_i32 = arith.constant 0 : i32
    %c0_i32_0 = arith.constant 0 : i32
    %c0_i32_1 = arith.constant 0 : i32
    %c0_i32_2 = arith.constant 0 : i32
    return %c0_i32, %c0_i32_0, %c0_i32_1 : i32, i32, i32
  }
  func.func @transform_13(%arg0: i32) -> (i32, i32, i32) {
    %c0_i32 = arith.constant 0 : i32
    %c0_i32_0 = arith.constant 0 : i32
    %c0_i32_1 = arith.constant 0 : i32
    %c0_i32_2 = arith.constant 0 : i32
    return %c0_i32, %c0_i32_0, %c0_i32_1 : i32, i32, i32
  }
  func.func @transform_14(%arg0: i32) -> (i32, i32, i32) {
    %c0_i32 = arith.constant 0 : i32
    %c0_i32_0 = arith.constant 0 : i32
    %c0_i32_1 = arith.constant 0 : i32
    %c0_i32_2 = arith.constant 0 : i32
    return %c0_i32, %c0_i32_0, %c0_i32_1 : i32, i32, i32
  }
  func.func @transform_15(%arg0: i32) -> (i32, i32, i32) {
    %c0_i32 = arith.constant 0 : i32
    %c0_i32_0 = arith.constant 0 : i32
    %c0_i32_1 = arith.constant 0 : i32
    %c0_i32_2 = arith.constant 0 : i32
    return %c0_i32, %c0_i32_0, %c0_i32_1 : i32, i32, i32
  }
  func.func @transform_16(%arg0: i32) -> (i32, i32, i32) {
    %c0_i32 = arith.constant 0 : i32
    %c0_i32_0 = arith.constant 0 : i32
    %c0_i32_1 = arith.constant 0 : i32
    %c0_i32_2 = arith.constant 0 : i32
    return %c0_i32, %c0_i32_0, %c0_i32_1 : i32, i32, i32
  }
  func.func @transform_17(%arg0: i32) -> (i32, i32, i32) {
    %c0_i32 = arith.constant 0 : i32
    %c0_i32_0 = arith.constant 0 : i32
    %c0_i32_1 = arith.constant 0 : i32
    %c0_i32_2 = arith.constant 0 : i32
    return %c0_i32, %c0_i32_0, %c0_i32_1 : i32, i32, i32
  }
  func.func @transform_18(%arg0: i32) -> (i32, i32) {
    %c0_i32 = arith.constant 0 : i32
    %c0_i32_0 = arith.constant 0 : i32
    %c0_i32_1 = arith.constant 0 : i32
    return %c0_i32, %c0_i32_0 : i32, i32
  }
  func.func @transform_19(%arg0: i32) -> (i32, i32) {
    %c0_i32 = arith.constant 0 : i32
    %c0_i32_0 = arith.constant 0 : i32
    %c0_i32_1 = arith.constant 0 : i32
    return %c0_i32, %c0_i32_0 : i32, i32
  }
  func.func @transform_20(%arg0: i32) -> (i32, i32, i32) {
    %c0_i32 = arith.constant 0 : i32
    %c0_i32_0 = arith.constant 0 : i32
    %c0_i32_1 = arith.constant 0 : i32
    %c0_i32_2 = arith.constant 0 : i32
    return %c0_i32, %c0_i32_0, %c0_i32_1 : i32, i32, i32
  }
  func.func @transform_21(%arg0: i32) -> (i32, i32, i32) {
    %c0_i32 = arith.constant 0 : i32
    %c0_i32_0 = arith.constant 0 : i32
    %c0_i32_1 = arith.constant 0 : i32
    %c0_i32_2 = arith.constant 0 : i32
    return %c0_i32, %c0_i32_0, %c0_i32_1 : i32, i32, i32
  }
  func.func @transform_22(%arg0: i32) -> (i32, i32, i32) {
    %c0_i32 = arith.constant 0 : i32
    %c0_i32_0 = arith.constant 0 : i32
    %c0_i32_1 = arith.constant 0 : i32
    %c0_i32_2 = arith.constant 0 : i32
    return %c0_i32, %c0_i32_0, %c0_i32_1 : i32, i32, i32
  }
  func.func @transform_23(%arg0: i32) -> (i32, i32, i32) {
    %c0_i32 = arith.constant 0 : i32
    %c0_i32_0 = arith.constant 0 : i32
    %c0_i32_1 = arith.constant 0 : i32
    %c0_i32_2 = arith.constant 0 : i32
    return %c0_i32, %c0_i32_0, %c0_i32_1 : i32, i32, i32
  }
  func.func @transform_24(%arg0: i32) -> (i32, i32, i32) {
    %c0_i32 = arith.constant 0 : i32
    %c0_i32_0 = arith.constant 0 : i32
    %c0_i32_1 = arith.constant 0 : i32
    %c0_i32_2 = arith.constant 0 : i32
    return %c0_i32, %c0_i32_0, %c0_i32_1 : i32, i32, i32
  }
  func.func @transform_25(%arg0: i32) -> (i32, i32, i32) {
    %c0_i32 = arith.constant 0 : i32
    %c0_i32_0 = arith.constant 0 : i32
    %c0_i32_1 = arith.constant 0 : i32
    %c0_i32_2 = arith.constant 0 : i32
    return %c0_i32, %c0_i32_0, %c0_i32_1 : i32, i32, i32
  }
  func.func @transform_26(%arg0: i32) -> (i32, i32, i32) {
    %c0_i32 = arith.constant 0 : i32
    %c0_i32_0 = arith.constant 0 : i32
    %c0_i32_1 = arith.constant 0 : i32
    %c0_i32_2 = arith.constant 0 : i32
    return %c0_i32, %c0_i32_0, %c0_i32_1 : i32, i32, i32
  }
  func.func @transform_27(%arg0: i32) -> (i32, i32, i32) {
    %c0_i32 = arith.constant 0 : i32
    %c0_i32_0 = arith.constant 0 : i32
    %c0_i32_1 = arith.constant 0 : i32
    %c0_i32_2 = arith.constant 0 : i32
    return %c0_i32, %c0_i32_0, %c0_i32_1 : i32, i32, i32
  }
  func.func @transform_28(%arg0: i32) -> (i32, i32, i32) {
    %c0_i32 = arith.constant 0 : i32
    %c0_i32_0 = arith.constant 0 : i32
    %c0_i32_1 = arith.constant 0 : i32
    %c0_i32_2 = arith.constant 0 : i32
    return %c0_i32, %c0_i32_0, %c0_i32_1 : i32, i32, i32
  }
  func.func @transform_29(%arg0: i32) -> (i32, i32, i32) {
    %c0_i32 = arith.constant 0 : i32
    %c0_i32_0 = arith.constant 0 : i32
    %c0_i32_1 = arith.constant 0 : i32
    %c0_i32_2 = arith.constant 0 : i32
    return %c0_i32, %c0_i32_0, %c0_i32_1 : i32, i32, i32
  }
  func.func @transform_30(%arg0: i32) -> (i32, i32, i32) {
    %c0_i32 = arith.constant 0 : i32
    %c0_i32_0 = arith.constant 0 : i32
    %c0_i32_1 = arith.constant 0 : i32
    %c0_i32_2 = arith.constant 0 : i32
    return %c0_i32, %c0_i32_0, %c0_i32_1 : i32, i32, i32
  }
  func.func @transform_31(%arg0: i32) -> (i32, i32, i32) {
    %c0_i32 = arith.constant 0 : i32
    %c0_i32_0 = arith.constant 0 : i32
    %c0_i32_1 = arith.constant 0 : i32
    %c0_i32_2 = arith.constant 0 : i32
    return %c0_i32, %c0_i32_0, %c0_i32_1 : i32, i32, i32
  }
  func.func @transform_32(%arg0: i32) -> (i32, i32, i32) {
    %c0_i32 = arith.constant 0 : i32
    %c0_i32_0 = arith.constant 0 : i32
    %c0_i32_1 = arith.constant 0 : i32
    %c0_i32_2 = arith.constant 0 : i32
    return %c0_i32, %c0_i32_0, %c0_i32_1 : i32, i32, i32
  }
  func.func @transform_33(%arg0: i32) -> (i32, i32, i32) {
    %c0_i32 = arith.constant 0 : i32
    %c0_i32_0 = arith.constant 0 : i32
    %c0_i32_1 = arith.constant 0 : i32
    %c0_i32_2 = arith.constant 0 : i32
    return %c0_i32, %c0_i32_0, %c0_i32_1 : i32, i32, i32
  }
  func.func @transform_34(%arg0: i32) -> (i32, i32, i32) {
    %c0_i32 = arith.constant 0 : i32
    %c0_i32_0 = arith.constant 0 : i32
    %c0_i32_1 = arith.constant 0 : i32
    %c0_i32_2 = arith.constant 0 : i32
    return %c0_i32, %c0_i32_0, %c0_i32_1 : i32, i32, i32
  }
  func.func @transform_35(%arg0: i32) -> (i32, i32, i32) {
    %c0_i32 = arith.constant 0 : i32
    %c0_i32_0 = arith.constant 0 : i32
    %c0_i32_1 = arith.constant 0 : i32
    %c0_i32_2 = arith.constant 0 : i32
    return %c0_i32, %c0_i32_0, %c0_i32_1 : i32, i32, i32
  }
  func.func @transform_36(%arg0: i32) -> (i32, i32, i32) {
    %c0_i32 = arith.constant 0 : i32
    %c0_i32_0 = arith.constant 0 : i32
    %c0_i32_1 = arith.constant 0 : i32
    %c0_i32_2 = arith.constant 0 : i32
    return %c0_i32, %c0_i32_0, %c0_i32_1 : i32, i32, i32
  }
  func.func @transform_37(%arg0: i32) -> (i32, i32, i32) {
    %c0_i32 = arith.constant 0 : i32
    %c0_i32_0 = arith.constant 0 : i32
    %c0_i32_1 = arith.constant 0 : i32
    %c0_i32_2 = arith.constant 0 : i32
    return %c0_i32, %c0_i32_0, %c0_i32_1 : i32, i32, i32
  }
  func.func @transform_38(%arg0: i32) -> (i32, i32, i32) {
    %c0_i32 = arith.constant 0 : i32
    %c0_i32_0 = arith.constant 0 : i32
    %c0_i32_1 = arith.constant 0 : i32
    %c0_i32_2 = arith.constant 0 : i32
    return %c0_i32, %c0_i32_0, %c0_i32_1 : i32, i32, i32
  }
  func.func @transform_39(%arg0: i32) -> (i32, i32, i32) {
    %c0_i32 = arith.constant 0 : i32
    %c0_i32_0 = arith.constant 0 : i32
    %c0_i32_1 = arith.constant 0 : i32
    %c0_i32_2 = arith.constant 0 : i32
    return %c0_i32, %c0_i32_0, %c0_i32_1 : i32, i32, i32
  }
  func.func @transform_40(%arg0: i32) -> (i32, i32) {
    %c0_i32 = arith.constant 0 : i32
    %c0_i32_0 = arith.constant 0 : i32
    %c0_i32_1 = arith.constant 0 : i32
    return %c0_i32, %c0_i32_0 : i32, i32
  }
  func.func @transform_41(%arg0: i32) -> (i32, i32) {
    %c0_i32 = arith.constant 0 : i32
    %c0_i32_0 = arith.constant 0 : i32
    %c0_i32_1 = arith.constant 0 : i32
    return %c0_i32, %c0_i32_0 : i32, i32
  }
  func.func @transform_42(%arg0: i32) -> (i32, i32, i32) {
    %c0_i32 = arith.constant 0 : i32
    %c0_i32_0 = arith.constant 0 : i32
    %c0_i32_1 = arith.constant 0 : i32
    return %arg0, %c0_i32, %c0_i32_0 : i32, i32, i32
  }
}

</mosaic_0001>

<bundles_post_ra>
// kernel: transformer_forward.1
= control target key start
LH: loop header
LB: loop body
LE: loop exit
PB: predicated region body
PF: predicated region fallthrough
CT: control target
= control target key end

     0   :  { %s8407_s6 = smov 1   ;;  %s8408_s10 = smov 2   ;;  %s9757_s0 = inlined_call_operand.smem [shape: u32[43], index: -1, kind: input, shape index: {}] }
   0x1   :  { %s8495_s5 = sld [smem:[%s9757_s0]]   ;;  %s8409_s14 = smov 3  }
   0x2   :  { %s8500_s9 = sld [smem:[%s9757_s0 + %s8407_s6]]   ;;  %s8410_s18 = smov 4  }
   0x3   :  { %s8505_s13 = sld [smem:[%s9757_s0 + %s8408_s10]]   ;;  %s8411_s22 = smov 5  }
   0x4   :  { %s8510_s17 = sld [smem:[%s9757_s0 + %s8409_s14]]   ;;  %s8412_s26 = smov 6  }
   0x5   :  { %s8515_s21 = sld [smem:[%s9757_s0 + %s8410_s18]]   ;;  %s8413_s30 = smov 7  }
   0x6   :  { %s8520_s25 = sld [smem:[%s9757_s0 + %s8411_s22]]   ;;  %s8414_s4 = smov 8  }
   0x7   :  { %9834 = sst [smem:[#allocation38_spill]] %s8495_s5  ;;  %s8415_s10 = smov 9  }
   0x8   :  { %9835 = sst [smem:[#allocation39_spill]] %s8500_s9  ;;  %s8416_s15 = smov 10  }
   0x9   :  { %9836 = sst [smem:[#allocation40_spill]] %s8505_s13  ;;  %s8417_s20 = smov 11  }
   0xa   :  { %9837 = sst [smem:[#allocation41_spill]] %s8510_s17  ;;  %s8419_s1 = smov 13  }
   0xb   :  { %9838 = sst [smem:[#allocation42_spill]] %s8515_s21  ;;  %s8420_s7 = smov 14  }
   0xc   :  { %9839 = sst [smem:[#allocation43_spill]] %s8520_s25  ;;  %s8422_s22 = smov 16  }
   0xd   :  { %s8525_s29 = sld [smem:[%s9757_s0 + %s8412_s26]]   ;;  %s8418_s26 = smov 12  }
   0xe   :  { %s8530_s3 = sld [smem:[%s9757_s0 + %s8413_s30]]   ;;  %s8423_s28 = smov 17  }
   0xf   :  { %s8535_s8 = sld [smem:[%s9757_s0 + %s8414_s4]]  }
  0x10   :  { %s8540_s14 = sld [smem:[%s9757_s0 + %s8415_s10]]   ;;  %s8448_s10 = smov 42  }
  0x11   :  { %s8545_s19 = sld [smem:[%s9757_s0 + %s8416_s15]]   ;;  %s8421_s15 = smov 15  }
  0x12   :  { %s8550_s24 = sld [smem:[%s9757_s0 + %s8417_s20]]  }
  0x13   :  { %9840 = sst [smem:[#allocation44_spill]] %s8525_s29 }
  0x14   :  { %9841 = sst [smem:[#allocation45_spill]] %s8530_s3 }
  0x15   :  { %9842 = sst [smem:[#allocation46_spill]] %s8535_s8 }
  0x16   :  { %9843 = sst [smem:[#allocation47_spill]] %s8540_s14 }
  0x17   :  { %9844 = sst [smem:[#allocation48_spill]] %s8545_s19 }
  0x18   :  { %9845 = sst [smem:[#allocation49_spill]] %s8550_s24 }
  0x19   :  { %s8555_s30 = sld [smem:[%s9757_s0 + %s8418_s26]]  }
  0x1a   :  { %s8560_s6 = sld [smem:[%s9757_s0 + %s8419_s1]]  }
  0x1b   :  { %s8565_s12 = sld [smem:[%s9757_s0 + %s8420_s7]]   ;;  %s8424_s7 = smov 18  }
  0x1c   :  { %s8570_s20 = sld [smem:[%s9757_s0 + %s8421_s15]]   ;;  %s8425_s15 = smov 19  }
  0x1d   :  { %s8575_s27 = sld [smem:[%s9757_s0 + %s8422_s22]]   ;;  %s8426_s22 = smov 20  }
  0x1e   :  { %s8580_s4 = sld [smem:[%s9757_s0 + %s8423_s28]]   ;;  %s8427_s28 = smov 21  }
  0x1f   :  { %9846 = sst [smem:[#allocation50_spill]] %s8555_s30 }
  0x20   :  { %9847 = sst [smem:[#allocation51_spill]] %s8560_s6 }
  0x21   :  { %9848 = sst [smem:[#allocation52_spill]] %s8565_s12 }
  0x22   :  { %9849 = sst [smem:[#allocation53_spill]] %s8570_s20 }
  0x23   :  { %9850 = sst [smem:[#allocation54_spill]] %s8575_s27 }
  0x24   :  { %9851 = sst [smem:[#allocation55_spill]] %s8580_s4 }
  0x25   :  { %s8585_s6 = sld [smem:[%s9757_s0 + %s8424_s7]]   ;;  %s8428_s7 = smov 22  }
  0x26   :  { %s8590_s20 = sld [smem:[%s9757_s0 + %s8425_s15]]   ;;  %s8429_s15 = smov 23  }
  0x27   :  { %s8595_s27 = sld [smem:[%s9757_s0 + %s8426_s22]]   ;;  %s8430_s22 = smov 24  }
  0x28   :  { %s8600_s4 = sld [smem:[%s9757_s0 + %s8427_s28]]   ;;  %s8431_s28 = smov 25  }
  0x29   :  { %s8605_s24 = sld [smem:[%s9757_s0 + %s8428_s7]]   ;;  %s8432_s7 = smov 26  }
  0x2a   :  { %s8610_s19 = sld [smem:[%s9757_s0 + %s8429_s15]]   ;;  %s8433_s15 = smov 27  }
  0x2b   :  { %9852 = sst [smem:[#allocation56_spill]] %s8585_s6 }
  0x2c   :  { %9853 = sst [smem:[#allocation57_spill]] %s8590_s20 }
  0x2d   :  { %9854 = sst [smem:[#allocation58_spill]] %s8595_s27 }
  0x2e   :  { %9855 = sst [smem:[#allocation59_spill]] %s8600_s4 }
  0x2f   :  { %9856 = sst [smem:[#allocation60_spill]] %s8605_s24 }
  0x30   :  { %9857 = sst [smem:[#allocation61_spill]] %s8610_s19 }
  0x31   :  { %s8615_s27 = sld [smem:[%s9757_s0 + %s8430_s22]]   ;;  %s8434_s22 = smov 28  }
  0x32   :  { %s8620_s12 = sld [smem:[%s9757_s0 + %s8431_s28]]   ;;  %s8435_s28 = smov 29  }
  0x33   :  { %s8625_s24 = sld [smem:[%s9757_s0 + %s8432_s7]]   ;;  %s8436_s7 = smov 30  }
  0x34   :  { %s8630_s30 = sld [smem:[%s9757_s0 + %s8433_s15]]   ;;  %s8437_s15 = smov 31  }
  0x35   :  { %s8635_s14 = sld [smem:[%s9757_s0 + %s8434_s22]]   ;;  %s8438_s22 = smov 32  }
  0x36   :  { %s8640_s8 = sld [smem:[%s9757_s0 + %s8435_s28]]   ;;  %s8439_s28 = smov 33  }
  0x37   :  { %9858 = sst [smem:[#allocation62_spill]] %s8615_s27 }
  0x38   :  { %9859 = sst [smem:[#allocation63_spill]] %s8620_s12 }
  0x39   :  { %9860 = sst [smem:[#allocation64_spill]] %s8625_s24 }
  0x3a   :  { %s8645_s24 = sld [smem:[%s9757_s0 + %s8436_s7]]   ;;  %s8440_s7 = smov 34  }
  0x3b   :  { %9861 = sst [smem:[#allocation65_spill]] %s8635_s14 }
  0x3c   :  { %9862 = sst [smem:[#allocation66_spill]] %s8640_s8 }
  0x3d   :  { %s8650_s13 = sld [smem:[%s9757_s0 + %s8437_s15]]   ;;  %s8441_s15 = smov 35  }
  0x3e   :  { %s8655_s14 = sld [smem:[%s9757_s0 + %s8438_s22]]   ;;  %s8442_s22 = smov 36  }
  0x3f   :  { %s8660_s9 = sld [smem:[%s9757_s0 + %s8439_s28]]   ;;  %s8443_s28 = smov 37  }
  0x40   :  { %9863 = sst [smem:[#allocation67_spill]] %s8645_s24 }
  0x41   :  { %s8665_s3 = sld [smem:[%s9757_s0 + %s8440_s7]]   ;;  %s8444_s7 = smov 38  }
  0x42   :  { %s8670_s17 = sld [smem:[%s9757_s0 + %s8441_s15]]   ;;  %s8445_s15 = smov 39  }
  0x43   :  { %9864 = sst [smem:[#allocation68_spill]] %s8650_s13 }
  0x44   :  { %9865 = sst [smem:[#allocation69_spill]] %s8655_s14 }
  0x45   :  { %9866 = sst [smem:[#allocation70_spill]] %s8660_s9 }
  0x46   :  { %s8675_s25 = sld [smem:[%s9757_s0 + %s8442_s22]]   ;;  %s8446_s22 = smov 40  }
  0x47   :  { %9867 = sst [smem:[#allocation71_spill]] %s8665_s3 }
  0x48   :  { %9868 = sst [smem:[#allocation72_spill]] %s8670_s17 }
  0x49   :  { %s8680_s29 = sld [smem:[%s9757_s0 + %s8443_s28]]   ;;  %s8447_s28 = smov 41  }
  0x4a   :  { %s8685_s3 = sld [smem:[%s9757_s0 + %s8444_s7]]  }
  0x4b   :  { %s8690_s21 = sld [smem:[%s9757_s0 + %s8445_s15]]  }
  0x4c   :  { %9869 = sst [smem:[#allocation73_spill]] %s8675_s25 }
  0x4d   :  { %s8695_s25 = sld [smem:[%s9757_s0 + %s8446_s22]]  }
  0x4e   :  { %s6582_s5 = sld [smem:[%s9757_s0 + %s8447_s28]]  }
  0x50   :  { %9870 = sst [smem:[#allocation74_spill]] %s8685_s3 }
  0x51   :  { %9871 = sst [smem:[#allocation75_spill]] %s8690_s21 }
  0x52   :  { %s8703_s3 = sld [smem:[%s9757_s0 + %s8448_s10]]  }
  0x54   :  { %v90_v0 = vstv %s6582_s5 }
  0x55   :  { %91 = vst [vmem:[#allocation3] sm:$0x1] %v90_v0 }
  0x56   :  { %92 = vsyncpa [#allocation5], 0 }
  0x57   :  { %93 = vsyncpa [#allocation7], 0 }
  0x58   :  { %94 = vsyncpa [#allocation10], 0 }
  0x59   :  { %95 = vsyncpa [#allocation13], 0 }
  0x5a   :  { %96 = vsyncpa [#allocation16], 0 }
  0x5b   :  { %97 = vsyncpa [#allocation19], 0 }
  0x5c   :  { %98 = vsyncpa [#allocation22], 0 }
  0x5d   :  { %99 = vsyncpa [#allocation25], 0 }
  0x5e   :  { %100 = vsyncpa [#allocation28], 0  ;;  %s8705_s15 = smov 0  }
  0x5f LB: > { %s9872_s27 = sld [smem:[#allocation62_spill]]  ;;  %s9873_s24 = sld [smem:[#allocation67_spill]]  ;;  %s8405_s15 = sphi %s8705_s15, %s106_s15  }
  0x60   : > { %s9874_s21 = sld [smem:[#allocation75_spill]]  ;;  %s9875_s20 = sld [smem:[#allocation57_spill]] }
  0x61   : > { %s9876_s19 = sld [smem:[#allocation61_spill]]  ;;  %s9877_s17 = sld [smem:[#allocation72_spill]] }
  0x62   : > { %s9878_s14 = sld [smem:[#allocation69_spill]]  ;;  %s9879_s13 = sld [smem:[#allocation68_spill]] }
  0x63   : > { %s9880_s12 = sld [smem:[#allocation63_spill]]  ;;  %s9881_s9 = sld [smem:[#allocation70_spill]] }
  0x64   : > { %s9882_s8 = sld [smem:[#allocation66_spill]]  ;;  %s9883_s6 = sld [smem:[#allocation56_spill]] }
  0x65   : > { %s9884_s4 = sld [smem:[#allocation59_spill]]  ;;  %s8449_s0 = smov [#allocation6]  }
  0x66   : > { %s1103_s5 = sshll.u32 %s8449_s0, 4  ;;  %s8711_s16 = sadd.s32 4294967295, %s8405_s15   ;;  %s8716_s5 = int_to_ptr.vmem [resolvable:$true] %s1103_s5 }
  0x67   : > { %p6586_p0 = scmp.ge.s32.totalorder %s8405_s15, 1  ;;  %p1034_p1 = scmp.lt.s32.totalorder %s8405_s15, 3 }
  0x68   : > { %p9778_p2 = scmp.eq.s32.totalorder %s8711_s16, 0  ;;  %s8450_s22 = smov [#allocation9]  }
  0x69   : > { %p8718_p3 = pnand %p6586_p0, %p1034_p1  ;;  %s1132_s23 = sshll.u32 %s8450_s22, 4  ;;  %s8724_s23 = int_to_ptr.vmem [resolvable:$true] %s1132_s23 }
  0x6a   : > { %s8451_s28 = smov [#allocation12]   ;;  %s8452_s2 = smov [#allocation15]  }
  0x6b   : > { %s9885_s18 = scalar_select %p8718_p3, 1, 0 }
  0x6c   : > { %p7575_p4 = pneg %p8718_p3  ;;  %s1158_s1 = sshll.u32 %s8451_s28, 4  ;;  %s8732_s1 = int_to_ptr.vmem [resolvable:$true] %s1158_s1 }
  0x6d   : > { %s8734_s10 = sshll.u32 %s8452_s2, 4  ;;  %s7915_s7 = scalar_lea.hbm %s9875_s20, 16  ;;  %s1191_s10 = int_to_ptr.vmem [resolvable:$true] %s8734_s10 }
  0x6e   : > { %p8728_p5 = pnand %p9778_p2, %p7575_p4  ;;  %p7916_p6 = scmp.ne.s32.totalorder %s9875_s20, %s7915_s7 }
  0x6f   : > { %p7922_p10 = scmp.lt.u32.totalorder %s7915_s7, %s9875_s20 }
  0x70   : > { %p8740_p7 = pneg %p8728_p5 }
  0x72   : > { %p7918_p8 = pnand %p8740_p7, %p7916_p6 }
  0x74   : > { %p7919_p9 = pneg %p7918_p8 }
  0x76   : > { %p7924_p11 = pnand %p7922_p10, %p7919_p9 }
  0x78   : > { %7927 = shalt.err (!%p7924_p11)
}
  0x79   : > { %s7928_s0 = scalar_lea.vmem %s8716_s5, 16  ;;  %s7935_s22 = scalar_lea.vmem %s8716_s5, 32 }
  0x7a   : > { %p7929_p12 = scmp.ne.s32.totalorder %s8716_s5, %s7928_s0  ;;  %p7936_p1 = scmp.lt.s32.totalorder %s8716_s5, %s8716_s5 }
  0x7b   : > { %p7937_p4 = scmp.lt.s32.totalorder %s7935_s22, %s7928_s0 }
  0x7c   : > { %p7931_p13 = pnand %p7929_p12, %p8740_p7 }
  0x7d   : > { %p7938_p2 = por %p7937_p4, %p7936_p1 }
  0x7e   : > { %p7932_p0 = pneg %p7931_p13 }
  0x80   : > { %p7939_p6 = pnand %p7938_p2, %p7932_p0 }
  0x82   : > { %7942 = shalt.err (!%p7939_p6)
}
  0x83   : > { %7581 = dma.hbm_to_vmem [thread:$0]  (!%p8728_p5), %s9875_s20, 16, %s8716_s5, [#allocation7]  }
  0x84   : > { %s7943_s28 = scalar_lea.hbm %s9876_s19, 32 }
  0x85   : > { %p7944_p8 = scmp.ne.s32.totalorder %s9876_s19, %s7943_s28  ;;  %p7950_p11 = scmp.lt.u32.totalorder %s7943_s28, %s9876_s19 }
  0x87   : > { %p7946_p9 = pnand %p7944_p8, %p8740_p7 }
  0x89   : > { %p7947_p10 = pneg %p7946_p9 }
  0x8b   : > { %p7952_p12 = pnand %p7950_p11, %p7947_p10 }
  0x8d   : > { %7955 = shalt.err (!%p7952_p12)
}
  0x8e   : > { %s7956_s2 = scalar_lea.vmem %s8724_s23, 32  ;;  %p7964_p1 = scmp.lt.s32.totalorder %s8724_s23, %s8724_s23 }
  0x8f   : > { %p7957_p2 = scmp.ne.s32.totalorder %s8724_s23, %s7956_s2  ;;  %p7965_p4 = scmp.lt.s32.totalorder %s7956_s2, %s7956_s2 }
  0x91   : > { %p7959_p13 = pnand %p7957_p2, %p8740_p7  ;;  %p7966_p6 = por %p7965_p4, %p7964_p1 }
  0x93   : > { %p7960_p0 = pneg %p7959_p13 }
  0x95   : > { %p7967_p3 = pnand %p7966_p6, %p7960_p0 }
  0x97   : > { %7970 = shalt.err (!%p7967_p3)
}
  0x98   : > { %s9780_s5 = smov 16   ;;  %s9782_s7 = smov 1  }
  0x99   : > { %7587 = dma.hbm_to_vmem [thread:$0]  (!%p8728_p5), %s9876_s19, 32, %s8724_s23, [#allocation10], %s9780_s5, %s9780_s5, %s9782_s7  }
  0x9a   : > { %s7971_s0 = scalar_lea.hbm %s9880_s12, 32 }
  0x9b   : > { %p7972_p8 = scmp.ne.s32.totalorder %s9880_s12, %s7971_s0  ;;  %p7978_p3 = scmp.lt.u32.totalorder %s7971_s0, %s9880_s12 }
  0x9d   : > { %p7974_p9 = pnand %p7972_p8, %p8740_p7 }
  0x9f   : > { %p7975_p10 = pneg %p7974_p9 }
  0xa1   : > { %p7980_p11 = pnand %p7978_p3, %p7975_p10 }
  0xa3   : > { %7983 = shalt.err (!%p7980_p11)
}
  0xa4   : > { %s7984_s22 = scalar_lea.vmem %s8732_s1, 32  ;;  %p7992_p0 = scmp.lt.s32.totalorder %s8732_s1, %s8732_s1 }
  0xa5   : > { %p7985_p12 = scmp.ne.s32.totalorder %s8732_s1, %s7984_s22  ;;  %p7993_p1 = scmp.lt.s32.totalorder %s7984_s22, %s7984_s22 }
  0xa7   : > { %p7987_p2 = pnand %p7985_p12, %p8740_p7  ;;  %p7994_p4 = por %p7993_p1, %p7992_p0 }
  0xa9   : > { %p7988_p13 = pneg %p7987_p2 }
  0xab   : > { %p7995_p6 = pnand %p7994_p4, %p7988_p13 }
  0xad   : > { %7998 = shalt.err (!%p7995_p6)
}
  0xae   : > { %7593 = dma.hbm_to_vmem [thread:$0]  (!%p8728_p5), %s9880_s12, 32, %s8732_s1, [#allocation13], %s9780_s5, %s9780_s5, %s9782_s7  }
  0xaf   : > { %s7999_s23 = scalar_lea.hbm %s9882_s8, 32 }
  0xb0   : > { %p8000_p8 = scmp.ne.s32.totalorder %s9882_s8, %s7999_s23  ;;  %p8006_p3 = scmp.lt.u32.totalorder %s7999_s23, %s9882_s8 }
  0xb2   : > { %p8002_p9 = pnand %p8000_p8, %p8740_p7 }
  0xb4   : > { %p8003_p10 = pneg %p8002_p9 }
  0xb6   : > { %p8008_p11 = pnand %p8006_p3, %p8003_p10 }
  0xb8   : > { %8011 = shalt.err (!%p8008_p11)
}
  0xb9   : > { %s8012_s28 = scalar_lea.vmem %s1191_s10, 32  ;;  %p8020_p0 = scmp.lt.s32.totalorder %s1191_s10, %s1191_s10 }
  0xba   : > { %p8013_p12 = scmp.ne.s32.totalorder %s1191_s10, %s8012_s28  ;;  %p8021_p1 = scmp.lt.s32.totalorder %s8012_s28, %s8012_s28 }
  0xbc   : > { %p8015_p2 = pnand %p8013_p12, %p8740_p7  ;;  %p8022_p4 = por %p8021_p1, %p8020_p0 }
  0xbe   : > { %p8016_p13 = pneg %p8015_p2 }
  0xc0   : > { %p8023_p6 = pnand %p8022_p4, %p8016_p13 }
  0xc2   : > { %8026 = shalt.err (!%p8023_p6)
}
  0xc3   : > { %7599 = dma.hbm_to_vmem [thread:$0]  (!%p8728_p5), %s9882_s8, 32, %s1191_s10, [#allocation16], %s9780_s5, %s9780_s5, %s9782_s7  }
  0xc4   : > { %s8455_s1 = smov [#allocation18]   ;;  %s8456_s0 = smov [#allocation21]  }
  0xc5   : > { %s1216_s2 = sshll.u32 %s8455_s1, 4  ;;  %s1242_s22 = sshll.u32 %s8456_s0, 4  ;;  %s1217_s2 = int_to_ptr.vmem [resolvable:$true] %s1216_s2  ;;  %s1243_s22 = int_to_ptr.vmem [resolvable:$true] %s1242_s22 }
  0xc6   : > { %s8027_s23 = scalar_lea.hbm %s9879_s13, 32 }
  0xc7   : > { %p8028_p8 = scmp.ne.s32.totalorder %s9879_s13, %s8027_s23  ;;  %p8034_p3 = scmp.lt.u32.totalorder %s8027_s23, %s9879_s13 }
  0xc9   : > { %p8030_p9 = pnand %p8028_p8, %p8740_p7 }
  0xcb   : > { %p8031_p10 = pneg %p8030_p9 }
  0xcd   : > { %p8036_p11 = pnand %p8034_p3, %p8031_p10 }
  0xcf   : > { %8039 = shalt.err (!%p8036_p11)
}
  0xd0   : > { %s8040_s28 = scalar_lea.vmem %s1217_s2, 32  ;;  %p8048_p0 = scmp.lt.s32.totalorder %s1217_s2, %s1217_s2 }
  0xd1   : > { %p8041_p12 = scmp.ne.s32.totalorder %s1217_s2, %s8040_s28  ;;  %p8049_p1 = scmp.lt.s32.totalorder %s8040_s28, %s8040_s28 }
  0xd3   : > { %p8043_p2 = pnand %p8041_p12, %p8740_p7  ;;  %p8050_p4 = por %p8049_p1, %p8048_p0 }
  0xd5   : > { %p8044_p13 = pneg %p8043_p2 }
  0xd7   : > { %p8051_p6 = pnand %p8050_p4, %p8044_p13 }
  0xd9   : > { %8054 = shalt.err (!%p8051_p6)
}
  0xda   : > { %7605 = dma.hbm_to_vmem [thread:$0]  (!%p8728_p5), %s9879_s13, 32, %s1217_s2, [#allocation19], %s9780_s5, %s9780_s5, %s9782_s7  }
  0xdb   : > { %s8055_s10 = scalar_lea.hbm %s9881_s9, 32 }
  0xdc   : > { %p8056_p8 = scmp.ne.s32.totalorder %s9881_s9, %s8055_s10  ;;  %p8062_p3 = scmp.lt.u32.totalorder %s8055_s10, %s9881_s9 }
  0xde   : > { %p8058_p9 = pnand %p8056_p8, %p8740_p7 }
  0xe0   : > { %p8059_p10 = pneg %p8058_p9 }
  0xe2   : > { %p8064_p11 = pnand %p8062_p3, %p8059_p10 }
  0xe4   : > { %8067 = shalt.err (!%p8064_p11)
}
  0xe5   : > { %s8068_s1 = scalar_lea.vmem %s1243_s22, 32  ;;  %p8076_p0 = scmp.lt.s32.totalorder %s1243_s22, %s1243_s22 }
  0xe6   : > { %p8069_p12 = scmp.ne.s32.totalorder %s1243_s22, %s8068_s1  ;;  %p8077_p1 = scmp.lt.s32.totalorder %s8068_s1, %s8068_s1 }
  0xe8   : > { %p8071_p2 = pnand %p8069_p12, %p8740_p7  ;;  %p8078_p4 = por %p8077_p1, %p8076_p0 }
  0xea   : > { %p8072_p13 = pneg %p8071_p2 }
  0xec   : > { %p8079_p6 = pnand %p8078_p4, %p8072_p13 }
  0xee   : > { %8082 = shalt.err (!%p8079_p6)
}
  0xef   : > { %7611 = dma.hbm_to_vmem [thread:$0]  (!%p8728_p5), %s9881_s9, 32, %s1243_s22, [#allocation22], %s9780_s5, %s9780_s5, %s9782_s7  }
  0xf0   : > { %s8457_s2 = smov [#allocation24]   ;;  %s8458_s23 = smov [#allocation4]  }
  0xf1   : > { %s1274_s0 = sshll.u32 %s8457_s2, 4  ;;  %s1092_s28 = sshll.u32 %s8458_s23, 4  ;;  %s1275_s0 = int_to_ptr.vmem [resolvable:$true] %s1274_s0  ;;  %s1093_s28 = int_to_ptr.vmem [resolvable:$true] %s1092_s28 }
  0xf2   : > { %s8083_s10 = scalar_lea.hbm %s8680_s29, 32 }
  0xf3   : > { %p8084_p8 = scmp.ne.s32.totalorder %s8680_s29, %s8083_s10  ;;  %p8090_p3 = scmp.lt.u32.totalorder %s8083_s10, %s8680_s29 }
  0xf5   : > { %p8086_p9 = pnand %p8084_p8, %p8740_p7 }
  0xf7   : > { %p8087_p10 = pneg %p8086_p9 }
  0xf9   : > { %p8092_p11 = pnand %p8090_p3, %p8087_p10 }
  0xfb   : > { %8095 = shalt.err (!%p8092_p11)
}
  0xfc   : > { %s8096_s1 = scalar_lea.vmem %s1275_s0, 32  ;;  %p8104_p0 = scmp.lt.s32.totalorder %s1275_s0, %s1275_s0 }
  0xfd   : > { %p8097_p12 = scmp.ne.s32.totalorder %s1275_s0, %s8096_s1  ;;  %p8105_p1 = scmp.lt.s32.totalorder %s8096_s1, %s8096_s1 }
  0xff   : > { %p8099_p2 = pnand %p8097_p12, %p8740_p7  ;;  %p8106_p4 = por %p8105_p1, %p8104_p0 }
 0x101   : > { %p8100_p13 = pneg %p8099_p2 }
 0x103   : > { %p8107_p6 = pnand %p8106_p4, %p8100_p13 }
 0x105   : > { %8110 = shalt.err (!%p8107_p6)
}
 0x106   : > { %7617 = dma.hbm_to_vmem [thread:$0]  (!%p8728_p5), %s8680_s29, 32, %s1275_s0, [#allocation25], %s9780_s5, %s9780_s5, %s9782_s7  }
 0x107   : > { %s8111_s22 = scalar_lea.hbm %s9883_s6, 16 }
 0x108   : > { %p8112_p8 = scmp.ne.s32.totalorder %s9883_s6, %s8111_s22  ;;  %p8118_p3 = scmp.lt.u32.totalorder %s8111_s22, %s9883_s6 }
 0x10a   : > { %p8114_p9 = pnand %p8112_p8, %p8740_p7 }
 0x10c   : > { %p8115_p10 = pneg %p8114_p9 }
 0x10e   : > { %p8120_p11 = pnand %p8118_p3, %p8115_p10 }
 0x110   : > { %8123 = shalt.err (!%p8120_p11)
}
 0x111   : > { %s8124_s2 = scalar_lea.vmem %s1093_s28, 16  ;;  %s8131_s23 = scalar_lea.vmem %s1093_s28, 32 }
 0x112   : > { %p8125_p12 = scmp.ne.s32.totalorder %s1093_s28, %s8124_s2  ;;  %p8132_p0 = scmp.lt.s32.totalorder %s1093_s28, %s1093_s28 }
 0x113   : > { %p8133_p1 = scmp.lt.s32.totalorder %s8131_s23, %s8124_s2 }
 0x114   : > { %p8127_p2 = pnand %p8125_p12, %p8740_p7 }
 0x115   : > { %p8134_p4 = por %p8133_p1, %p8132_p0 }
 0x116   : > { %p8128_p13 = pneg %p8127_p2 }
 0x118   : > { %p8135_p6 = pnand %p8134_p4, %p8128_p13 }
 0x11a   : > { %8138 = shalt.err (!%p8135_p6)
}
 0x11b   : > { %7578 = dma.hbm_to_vmem [thread:$0]  (!%p8728_p5), %s9883_s6, 16, %s1093_s28, [#allocation5]  }
 0x11c   : > { %s8459_s0 = smov [#allocation8]   ;;  %s8460_s1 = smov [#allocation11]  }
 0x11d   : > { %s1116_s10 = sshll.u32 %s8459_s0, 4  ;;  %s1145_s22 = sshll.u32 %s8460_s1, 4  ;;  %s1117_s10 = int_to_ptr.vmem [resolvable:$true] %s1116_s10  ;;  %s1146_s22 = int_to_ptr.vmem [resolvable:$true] %s1145_s22 }
 0x11e   : > { %s8139_s5 = scalar_lea.hbm %s9884_s4, 32 }
 0x11f   : > { %p8140_p8 = scmp.ne.s32.totalorder %s9884_s4, %s8139_s5  ;;  %p8146_p3 = scmp.lt.u32.totalorder %s8139_s5, %s9884_s4 }
 0x121   : > { %p8142_p9 = pnand %p8140_p8, %p8740_p7 }
 0x123   : > { %p8143_p10 = pneg %p8142_p9 }
 0x125   : > { %p8148_p11 = pnand %p8146_p3, %p8143_p10 }
 0x127   : > { %8151 = shalt.err (!%p8148_p11)
}
 0x128   : > { %s8152_s2 = scalar_lea.vmem %s1117_s10, 32  ;;  %p8160_p0 = scmp.lt.s32.totalorder %s1117_s10, %s1117_s10 }
 0x129   : > { %p8153_p12 = scmp.ne.s32.totalorder %s1117_s10, %s8152_s2  ;;  %p8161_p1 = scmp.lt.s32.totalorder %s8152_s2, %s8152_s2 }
 0x12b   : > { %p8155_p2 = pnand %p8153_p12, %p8740_p7  ;;  %p8162_p4 = por %p8161_p1, %p8160_p0 }
 0x12d   : > { %p8156_p13 = pneg %p8155_p2 }
 0x12f   : > { %p8163_p6 = pnand %p8162_p4, %p8156_p13 }
 0x131   : > { %8166 = shalt.err (!%p8163_p6)
}
 0x132   : > { %s9888_s28 = smov 16   ;;  %s8167_s5 = scalar_lea.hbm %s9872_s27, 32 }
 0x133   : > { %7584 = dma.hbm_to_vmem [thread:$0]  (!%p8728_p5), %s9884_s4, 32, %s1117_s10, [#allocation7], %s9888_s28, %s9888_s28, %s9782_s7  }
 0x134   : > { %p8168_p8 = scmp.ne.s32.totalorder %s9872_s27, %s8167_s5  ;;  %p8174_p3 = scmp.lt.u32.totalorder %s8167_s5, %s9872_s27 }
 0x136   : > { %p8170_p9 = pnand %p8168_p8, %p8740_p7 }
 0x138   : > { %p8171_p10 = pneg %p8170_p9 }
 0x13a   : > { %p8176_p11 = pnand %p8174_p3, %p8171_p10 }
 0x13c   : > { %8179 = shalt.err (!%p8176_p11)
}
 0x13d   : > { %s8180_s23 = scalar_lea.vmem %s1146_s22, 32  ;;  %p8188_p0 = scmp.lt.s32.totalorder %s1146_s22, %s1146_s22 }
 0x13e   : > { %p8181_p12 = scmp.ne.s32.totalorder %s1146_s22, %s8180_s23  ;;  %p8189_p1 = scmp.lt.s32.totalorder %s8180_s23, %s8180_s23 }
 0x140   : > { %p8183_p2 = pnand %p8181_p12, %p8740_p7  ;;  %p8190_p4 = por %p8189_p1, %p8188_p0 }
 0x142   : > { %p8184_p13 = pneg %p8183_p2 }
 0x144   : > { %p8191_p6 = pnand %p8190_p4, %p8184_p13 }
 0x146   : > { %8194 = shalt.err (!%p8191_p6)
}
 0x147   : > { %7590 = dma.hbm_to_vmem [thread:$0]  (!%p8728_p5), %s9872_s27, 32, %s1146_s22, [#allocation10], %s9888_s28, %s9888_s28, %s9782_s7  }
 0x148   : > { %s8461_s0 = smov [#allocation14]   ;;  %s8462_s1 = smov [#allocation17]  }
 0x149   : > { %s1174_s10 = sshll.u32 %s8461_s0, 4  ;;  %s1203_s2 = sshll.u32 %s8462_s1, 4  ;;  %s1175_s10 = int_to_ptr.vmem [resolvable:$true] %s1174_s10  ;;  %s1204_s2 = int_to_ptr.vmem [resolvable:$true] %s1203_s2 }
 0x14a   : > { %s8195_s5 = scalar_lea.hbm %s8630_s30, 32 }
 0x14b   : > { %p8196_p8 = scmp.ne.s32.totalorder %s8630_s30, %s8195_s5  ;;  %p8202_p3 = scmp.lt.u32.totalorder %s8195_s5, %s8630_s30 }
 0x14d   : > { %p8198_p9 = pnand %p8196_p8, %p8740_p7 }
 0x14f   : > { %p8199_p10 = pneg %p8198_p9 }
 0x151   : > { %p8204_p11 = pnand %p8202_p3, %p8199_p10 }
 0x153   : > { %8207 = shalt.err (!%p8204_p11)
}
 0x154   : > { %s8208_s23 = scalar_lea.vmem %s1175_s10, 32  ;;  %p8216_p0 = scmp.lt.s32.totalorder %s1175_s10, %s1175_s10 }
 0x155   : > { %p8209_p12 = scmp.ne.s32.totalorder %s1175_s10, %s8208_s23  ;;  %p8217_p1 = scmp.lt.s32.totalorder %s8208_s23, %s8208_s23 }
 0x157   : > { %p8211_p2 = pnand %p8209_p12, %p8740_p7  ;;  %p8218_p4 = por %p8217_p1, %p8216_p0 }
 0x159   : > { %p8212_p13 = pneg %p8211_p2 }
 0x15b   : > { %p8219_p6 = pnand %p8218_p4, %p8212_p13 }
 0x15d   : > { %8222 = shalt.err (!%p8219_p6)
}
 0x15e   : > { %7596 = dma.hbm_to_vmem [thread:$0]  (!%p8728_p5), %s8630_s30, 32, %s1175_s10, [#allocation13], %s9888_s28, %s9888_s28, %s9782_s7  }
 0x15f   : > { %s8223_s22 = scalar_lea.hbm %s9873_s24, 512 }
 0x160   : > { %p8224_p8 = scmp.ne.s32.totalorder %s9873_s24, %s8223_s22  ;;  %p8230_p3 = scmp.lt.u32.totalorder %s8223_s22, %s9873_s24 }
 0x162   : > { %p8226_p9 = pnand %p8224_p8, %p8740_p7 }
 0x164   : > { %p8227_p10 = pneg %p8226_p9 }
 0x166   : > { %p8232_p11 = pnand %p8230_p3, %p8227_p10 }
 0x168   : > { %8235 = shalt.err (!%p8232_p11)
}
 0x169   : > { %s8236_s0 = scalar_lea.vmem %s1204_s2, 512  ;;  %p8244_p0 = scmp.lt.s32.totalorder %s1204_s2, %s1204_s2 }
 0x16a   : > { %p8237_p12 = scmp.ne.s32.totalorder %s1204_s2, %s8236_s0  ;;  %p8245_p1 = scmp.lt.s32.totalorder %s8236_s0, %s8236_s0 }
 0x16c   : > { %p8239_p2 = pnand %p8237_p12, %p8740_p7  ;;  %p8246_p4 = por %p8245_p1, %p8244_p0 }
 0x16e   : > { %p8240_p13 = pneg %p8239_p2 }
 0x170   : > { %p8247_p6 = pnand %p8246_p4, %p8240_p13 }
 0x172   : > { %8250 = shalt.err (!%p8247_p6)
}
 0x173   : > { %s8463_s10 = smov 64   ;;  %s8464_s1 = smov 4  }
 0x174   : > { %7602 = dma.hbm_to_vmem [thread:$0]  (!%p8728_p5), %s9873_s24, 512, %s1204_s2, [#allocation16], %s8463_s10, %s8463_s10, %s8464_s1  }
 0x175   : > { %s8465_s5 = smov [#allocation20]   ;;  %s8466_s22 = smov [#allocation23]  }
 0x176   : > { %s1229_s23 = sshll.u32 %s8465_s5, 4  ;;  %s1258_s7 = sshll.u32 %s8466_s22, 4  ;;  %s1230_s23 = int_to_ptr.vmem [resolvable:$true] %s1229_s23  ;;  %s1259_s7 = int_to_ptr.vmem [resolvable:$true] %s1258_s7 }
 0x177   : > { %s8251_s4 = scalar_lea.hbm %s9878_s14, 32 }
 0x178   : > { %p8252_p8 = scmp.ne.s32.totalorder %s9878_s14, %s8251_s4  ;;  %p8258_p3 = scmp.lt.u32.totalorder %s8251_s4, %s9878_s14 }
 0x17a   : > { %p8254_p9 = pnand %p8252_p8, %p8740_p7 }
 0x17c   : > { %p8255_p10 = pneg %p8254_p9 }
 0x17e   : > { %p8260_p11 = pnand %p8258_p3, %p8255_p10 }
 0x180   : > { %8263 = shalt.err (!%p8260_p11)
}
 0x181   : > { %s8264_s0 = scalar_lea.vmem %s1230_s23, 32  ;;  %p8272_p0 = scmp.lt.s32.totalorder %s1230_s23, %s1230_s23 }
 0x182   : > { %p8265_p12 = scmp.ne.s32.totalorder %s1230_s23, %s8264_s0  ;;  %p8273_p1 = scmp.lt.s32.totalorder %s8264_s0, %s8264_s0 }
 0x184   : > { %p8267_p2 = pnand %p8265_p12, %p8740_p7  ;;  %p8274_p4 = por %p8273_p1, %p8272_p0 }
 0x186   : > { %p8268_p13 = pneg %p8267_p2 }
 0x188   : > { %p8275_p6 = pnand %p8274_p4, %p8268_p13 }
 0x18a   : > { %8278 = shalt.err (!%p8275_p6)
}
 0x18b   : > { %s9889_s2 = smov 1   ;;  %s8279_s4 = scalar_lea.hbm %s9877_s17, 32 }
 0x18c   : > { %7608 = dma.hbm_to_vmem [thread:$0]  (!%p8728_p5), %s9878_s14, 32, %s1230_s23, [#allocation19], %s9888_s28, %s9888_s28, %s9889_s2  }
 0x18d   : > { %p8280_p8 = scmp.ne.s32.totalorder %s9877_s17, %s8279_s4  ;;  %p8286_p3 = scmp.lt.u32.totalorder %s8279_s4, %s9877_s17 }
 0x18f   : > { %p8282_p9 = pnand %p8280_p8, %p8740_p7 }
 0x191   : > { %p8283_p10 = pneg %p8282_p9 }
 0x193   : > { %p8288_p11 = pnand %p8286_p3, %p8283_p10 }
 0x195   : > { %8291 = shalt.err (!%p8288_p11)
}
 0x196   : > { %s8292_s10 = scalar_lea.vmem %s1259_s7, 32  ;;  %p8300_p0 = scmp.lt.s32.totalorder %s1259_s7, %s1259_s7 }
 0x197   : > { %p8293_p12 = scmp.ne.s32.totalorder %s1259_s7, %s8292_s10  ;;  %p8301_p1 = scmp.lt.s32.totalorder %s8292_s10, %s8292_s10 }
 0x199   : > { %p8295_p2 = pnand %p8293_p12, %p8740_p7  ;;  %p8302_p4 = por %p8301_p1, %p8300_p0 }
 0x19b   : > { %p8296_p13 = pneg %p8295_p2 }
 0x19d   : > { %p8303_p6 = pnand %p8302_p4, %p8296_p13 }
 0x19f   : > { %8306 = shalt.err (!%p8303_p6)
}
 0x1a0   : > { %s9890_s1 = sld [smem:[#allocation74_spill]]  ;;  %s8467_s5 = smov [#allocation26]  }
 0x1a1   : > { %7614 = dma.hbm_to_vmem [thread:$0]  (!%p8728_p5), %s9877_s17, 32, %s1259_s7, [#allocation22], %s9888_s28, %s9888_s28, %s9889_s2  }
 0x1a2   : > { %s1287_s23 = sshll.u32 %s8467_s5, 4  ;;  %s8468_s22 = smov [#allocation27]   ;;  %s1288_s23 = int_to_ptr.vmem [resolvable:$true] %s1287_s23 }
 0x1a3   : > { %s1300_s0 = sshll.u32 %s8468_s22, 4  ;;  %s1301_s0 = int_to_ptr.vmem [resolvable:$true] %s1300_s0 }
 0x1a6   : > { %s8307_s4 = scalar_lea.hbm %s9890_s1, 32 }
 0x1a7   : > { %p8308_p8 = scmp.ne.s32.totalorder %s9890_s1, %s8307_s4  ;;  %p8314_p3 = scmp.lt.u32.totalorder %s8307_s4, %s9890_s1 }
 0x1a9   : > { %p8310_p9 = pnand %p8308_p8, %p8740_p7 }
 0x1ab   : > { %p8311_p10 = pneg %p8310_p9 }
 0x1ad   : > { %p8316_p11 = pnand %p8314_p3, %p8311_p10 }
 0x1af   : > { %8319 = shalt.err (!%p8316_p11)
}
 0x1b0   : > { %s8320_s10 = scalar_lea.vmem %s1288_s23, 32  ;;  %p8328_p0 = scmp.lt.s32.totalorder %s1288_s23, %s1288_s23 }
 0x1b1   : > { %p8321_p12 = scmp.ne.s32.totalorder %s1288_s23, %s8320_s10  ;;  %p8329_p1 = scmp.lt.s32.totalorder %s8320_s10, %s8320_s10 }
 0x1b3   : > { %p8323_p2 = pnand %p8321_p12, %p8740_p7  ;;  %p8330_p4 = por %p8329_p1, %p8328_p0 }
 0x1b5   : > { %p8324_p13 = pneg %p8323_p2 }
 0x1b7   : > { %p8331_p6 = pnand %p8330_p4, %p8324_p13 }
 0x1b9   : > { %8334 = shalt.err (!%p8331_p6)
}
 0x1ba   : > { %7620 = dma.hbm_to_vmem [thread:$0]  (!%p8728_p5), %s9890_s1, 32, %s1288_s23, [#allocation25], %s9888_s28, %s9888_s28, %s9889_s2  }
 0x1bb   : > { %s8335_s7 = scalar_lea.hbm %s9874_s21, 32 }
 0x1bc   : > { %p8336_p8 = scmp.ne.s32.totalorder %s9874_s21, %s8335_s7  ;;  %p8342_p3 = scmp.lt.u32.totalorder %s8335_s7, %s9874_s21 }
 0x1be   : > { %p8338_p9 = pnand %p8336_p8, %p8740_p7 }
 0x1c0   : > { %p8339_p10 = pneg %p8338_p9 }
 0x1c2   : > { %p8344_p11 = pnand %p8342_p3, %p8339_p10 }
 0x1c4   : > { %8347 = shalt.err (!%p8344_p11)
}
 0x1c5   : > { %s8348_s5 = scalar_lea.vmem %s1301_s0, 32  ;;  %p8356_p0 = scmp.lt.s32.totalorder %s1301_s0, %s1301_s0 }
 0x1c6   : > { %p8349_p12 = scmp.ne.s32.totalorder %s1301_s0, %s8348_s5  ;;  %p8357_p1 = scmp.lt.s32.totalorder %s8348_s5, %s8348_s5 }
 0x1c8   : > { %p8351_p2 = pnand %p8349_p12, %p8740_p7  ;;  %p8358_p4 = por %p8357_p1, %p8356_p0 }
 0x1ca   : > { %p8352_p13 = pneg %p8351_p2 }
 0x1cc   : > { %p8359_p6 = pnand %p8358_p4, %p8352_p13 }
 0x1ce   : > { %8362 = shalt.err (!%p8359_p6)
}
 0x1cf   : > { %7623 = dma.hbm_to_vmem [thread:$0]  (!%p8728_p5), %s9874_s21, 32, %s1301_s0, [#allocation28], %s9888_s28, %s9888_s28, %s9889_s2  }
 0x1d0   : > { %p9891_p8 = scmp.ne.s32.totalorder %s9885_s18, 0 }
 0x1d1   : > { %p9892_p9 = scmp.eq.s32.totalorder (!%p9891_p8), %s8711_s16, 0 }
 0x1d2   : > { %1342 = sbr.rel (%p9891_p8) target bundleno = 13860 (0x3624), region = 188 }
 0x1d9   : > { %8368 = dma.done.wait (%p9892_p9), [#allocation5], 16   ;;  %p9893_p7 = pmov %p9892_p9 }
 0x1db   : > { %8370 = vsyncadd (%p9893_p7), [#allocation5], 4294967280  ;;  %p9894_p10 = pmov %p9893_p7 }
 0x1dc   : > { %p9895_p3 = pmov %p9893_p7 }
 0x1dd   : > { %8372 = dma.done.wait (%p9894_p10), [#allocation7], 48  }
 0x1de   : > { %8374 = vsyncadd (%p9895_p3), [#allocation7], 4294967248  ;;  %p9896_p11 = pmov %p9895_p3 }
 0x1df   : > { %p9897_p5 = pmov %p9895_p3 }
 0x1e0   : > { %8376 = dma.done.wait (%p9896_p11), [#allocation10], 64  }
 0x1e1   : > { %8378 = vsyncadd (%p9897_p5), [#allocation10], 4294967232  ;;  %p9898_p12 = pmov %p9895_p3 }
 0x1e2   : > { %p9899_p2 = pmov %p9895_p3 }
 0x1e3   : > { %8380 = dma.done.wait (%p9898_p12), [#allocation13], 64  }
 0x1e4   : > { %8382 = vsyncadd (%p9899_p2), [#allocation13], 4294967232  ;;  %p9900_p13 = pmov %p9899_p2 }
 0x1e5   : > { %p9901_p0 = pmov %p9899_p2 }
 0x1e6   : > { %8384 = dma.done.wait (%p9900_p13), [#allocation16], 544  }
 0x1e7   : > { %8386 = vsyncadd (%p9901_p0), [#allocation16], 4294966752  ;;  %p9902_p1 = pmov %p9901_p0 }
 0x1e8   : > { %p9903_p4 = pmov %p9901_p0 }
 0x1e9   : > { %8388 = dma.done.wait (%p9902_p1), [#allocation19], 64  }
 0x1ea   : > { %8390 = vsyncadd (%p9903_p4), [#allocation19], 4294967232  ;;  %p9904_p6 = pmov %p9901_p0 }
 0x1eb   : > { %p9905_p8 = pmov %p9901_p0 }
 0x1ec   : > { %8392 = dma.done.wait (%p9904_p6), [#allocation22], 64  }
 0x1ed   : > { %8394 = vsyncadd (%p9905_p8), [#allocation22], 4294967232  ;;  %p9906_p9 = pmov %p9901_p0 }
 0x1ee   : > { %p9907_p7 = pmov %p9901_p0 }
 0x1ef   : > { %8396 = dma.done.wait (%p9906_p9), [#allocation25], 64  }
 0x1f0   : > { %8398 = vsyncadd (%p9907_p7), [#allocation25], 4294967232  ;;  %p9908_p10 = pmov %p9901_p0 }
 0x1f1   : > { %p9909_p3 = pmov %p9901_p0 }
 0x1f2   : > { %8400 = dma.done.wait (%p9908_p10), [#allocation28], 32  }
 0x1f3   : > { %8402 = vsyncadd (%p9909_p3), [#allocation28], 4294967264  ;;  %s9910_s18 = sld [smem:[#allocation38_spill]]  ;;  %s9911_s26 = sld [smem:[#allocation42_spill]]  ;;  %v8469_v1 = vmov 0.0   ;;  %vm8470_vm0 = vmmov 0  }
 0x1f4   : > { %p1509_p11 = scmp.lt.s32.totalorder %s8711_s16, 1  ;;  %7026 = vmatprep.subr.mxu1 %v8469_v1  ;;  %s9912_s11 = sld [smem:[#allocation44_spill]]  ;;  %7028 = vmatprep.mubr.msk.f32.mxu1 %vm8470_vm0, %v8469_v1  ;;  %vm1562_vm1 = vcmask 1043456   ;;  %vm1558_vm2 = vcmask 31744   ;;  %vm1666_vm3 = vcmask 261120   ;;  %v8478_v22 = vmov 0  }
 0x1f5   : > { %7031 = vmatprep.subr.bf16.mxu0 %v8469_v1  ;;  %7035 = vmatprep.mubr.msk.bf16.mxu0 %vm8470_vm0, %v8469_v1  ;;  %s9913_s2 = sld [smem:[#allocation43_spill]]  ;;  %s9914_s23 = sld [smem:[#allocation41_spill]]  ;;  %vm1716_vm5 = vcmask 64512   ;;  %vm1939_vm6 = vcmask 130112   ;;  %vm2055_vm7 = vcmask 195712   ;;  %vm2171_vm8 = vcmask 261312  }
 0x1f6   : > { %s9949_s16 = smov (!%p1509_p11, %s8711_s16), 1  ;;  %s9915_s0 = sld [smem:[#allocation45_spill]]  ;;  %7744 = vset.pattern.permute.xlu1 %v8478_v22  ;;  %7745 = vset.pattern.permute.xlu0 %v8478_v22  ;;  %vm2375_vm9 = vcmask 523264   ;;  %vm6311_vm11 = vcmask 7168  }
 0x1f7   : > { %s9007_s28 = sshll.u32 %s9949_s16, 3  ;;  %s9916_s4 = sld [smem:[#allocation39_spill]] }
 0x1f8   : > { %s9785_s10 = smov 96   ;;  %s9807_s7 = smov 120  }
 0x1f9   : > { %s1512_s22 = scalar_lea.vmem %s9910_s18, %s9007_s28  ;;  %v1550_v2 = vld [vmem:[%s9911_s26] sm:$0xf]  ;;  %s9811_s5 = smov 88  }
 0x1fa   : > { %v1549_v3 = vld [vmem:[%s1512_s22] sm:$0xff]  ;;  %7027 = vmatpush3.msk.msra.mxu1 %vm1562_vm1, %v1550_v2  ;;  %v7747_v5 = vld [vmem:[%s9912_s11 + $0x8] sm:$0xff]   ;;  %s9809_s18 = smov 80   ;;  %s9803_s26 = smov 112  }
 0x1fb   : > { %7029 = vmatmul.mubr.msk.f32.vlgmr.msra.gmra.mrb[0].mxu1 %vm1558_vm2, %v1549_v3  ;;  %7045 = vmatprep.subr.bf16.mxu1 %v8469_v1  ;;  %v7746_v4 = vld [vmem:[%s9912_s11] sm:$0xff]   ;;  %s9797_s22 = smov 104   ;;  %s9927_s1 = sld [smem:[#allocation55_spill]] }
 0x1fc   : > { %7047 = vmatprep.mubr.msk.bf16.mxu1 %vm8470_vm0, %v8469_v1  ;;  %7032 = vmatpush3.bf16.msra.mxu0 %v7746_v4  ;;  %v6625_v6 = vld [vmem:[%s9913_s2] ss:$0 sm:$0xff]  ;;  %s9805_s2 = smov 72   ;;  %s9928_s6 = smov 88  }
 0x1fd   : > { %7033 = vmatprep.subr.bf16.mxu0 %v8469_v1  ;;  %v1526_v7 = vld [vmem:[%s9914_s23] sm:$0xff]  ;;  %s9929_s8 = smov 96   ;;  %s9930_s9 = smov 80  }
 0x1fe   : > { %v6628_v13 = vld [vmem:[%s9915_s0] ss:$0 sm:$0xff]  ;;  %s9933_s12 = smov 112   ;;  %s9934_s13 = smov 104  }
 0x1ff   : > { %s9935_s14 = smov 64   ;;  %s9936_s17 = smov 56  }
 0x200   : > { %7034 = vmatpush3.bf16.msra.mxu0 %v7747_v5  ;;  %s9937_s19 = smov 48   ;;  %s9938_s20 = smov 40  }
 0x201   : > { %7039 = vmatprep.subr.bf16.mxu0 %v8469_v1  ;;  %s9939_s21 = smov 8   ;;  %s9940_s24 = smov 16  }
 0x202   : > { %s9941_s27 = smov 24  }
 0x2ce   : > { %v1632_v8 = vpop.f32.mrb[0].mxu1 }
 0x2cf   : > { %v1633_v9 = vadd.f32 %v6625_v6, %v1632_v8  ;;  %v7030_v10 = vpop.f32.mrb[1].mxu1 }
 0x2d1   : > { %v9022_v11 = vadd.f32 %v1633_v9, %v1526_v7 }
 0x2d3   : > { %v1647_v12 = vpack.c.bf16 %v9022_v11, %v9022_v11 }
 0x2d5   : > { %7036 = vmatmul.mubr.msk.bf16.vlgmr.msra.gmra.mrb[0].mxu0 %vm1666_vm3, %v1647_v12 }
 0x2d6   : > { %7041 = vmatprep.mubr.msk.bf16.mxu0 %vm8470_vm0, %v8469_v1 }
 0x3a8   : > { %v1704_v14 = vpop.f32.mrb[0].mxu0 }
 0x3a9   : > { %v1705_v15 = vadd.f32 %v6628_v13, %v1704_v14  ;;  %v7037_v16 = vpop.f32.mrb[1].mxu0 }
 0x3aa   : > { %v1707_v17 = vpop.f32.mrb[2].mxu0 }
 0x3ab   : > { %v1710_v18 = vmul.f32 0.35355338, %v1705_v15  ;;  %v9030_v19 = vpack.c.bf16 %v1705_v15, %v1705_v15  ;;  %v7038_v20 = vpop.f32.mrb[3].mxu0 }
 0x3ad   : > { %v1711_v21 = vpack.c.bf16 %v1710_v18, %v1710_v18  ;;  %1714 = vrot.lane.b32.xlu0 %v9030_v19, %s9785_s10  ;;  %s1516_s10 = scalar_lea.vmem %s9916_s4, %s9007_s28  ;;  %s9917_s4 = sld [smem:[#allocation40_spill]] }
 0x3ae   : > { %v9045_v23 = vld [vmem:[%s1516_s10] sm:$0xff] }
 0x3af   : > { %1825 = vrot.lane.b32.xlu1 %v1711_v21, %s9807_s7  ;;  %vm1527_vm4 = vcmp.ne.f32.partialorder %v9045_v23, %v9045_v23  ;;  %s9924_s7 = sld [smem:[#allocation51_spill]] }
 0x3b0   : > { %v1528_v24 = vsel %vm1527_vm4, -1e+09, %v8469_v1 }
 0x3b1   : > { %1827 = vrot.lane.b32.xlu0 %v9030_v19, %s9811_s5  ;;  %s9926_s5 = sld [smem:[#allocation54_spill]] }
 0x3b3   : > { %1943 = vrot.lane.b32.xlu1 %v9030_v19, %s9809_s18  ;;  %s1519_s10 = scalar_lea.vmem %s9917_s4, %s9949_s16  ;;  %s9787_s16 = smov 64  }
 0x3b4   : > { %v6624_v36 = vld [vmem:[%s1519_s10] ss:$0 sm:$0xff]  ;;  %s9793_s4 = smov 56   ;;  %s9791_s10 = smov 48  }
 0x3b5   : > { %1941 = vrot.lane.b32.xlu0 %v1711_v21, %s9803_s26  ;;  %s9922_s26 = sld [smem:[#allocation48_spill]]  ;;  %s9925_s18 = sld [smem:[#allocation53_spill]] }
 0x3b7   : > { %2059 = vrot.lane.b32.xlu1 %v9030_v19, %s9805_s2  ;;  %s9923_s2 = sld [smem:[#allocation49_spill]] }
 0x3b9   : > { %2057 = vrot.lane.b32.xlu0 %v1711_v21, %s9797_s22  ;;  %s9919_s22 = sld [smem:[#allocation47_spill]] }
 0x3bb   : > { %1532 = vperm.xlu1 %7744, %v1528_v24  }
 0x41f   : > { %v1715_v25 = vpop.permute.xlu0 %1714 }
 0x420   : > { %v1721_v26 = vsel %vm1716_vm5, %v1715_v25, 0 }
 0x421   : > { %7040 = vmatpush3.bf16.xpose.msra.mxu0 %v1721_v26  ;;  %v1826_v28 = vpop.permute.xlu1 %1825 }
 0x422   : > { %7051 = vmatprep.subr.bf16.mxu0 %v8469_v1 }
 0x423   : > { %v1828_v27 = vpop.permute.xlu0 %1827 }
 0x424   : > { %v1833_v29 = vsel %vm1716_vm5, %v1828_v27, 0 }
 0x425   : > { %v1944_v30 = vpop.permute.xlu1 %1943 }
 0x426   : > { %v1949_v31 = vsel %vm1716_vm5, %v1944_v30, 0 }
 0x427   : > { %v1942_v33 = vpop.permute.xlu0 %1941 }
 0x428   : > { %7042 = vmatmul.mubr.msk.bf16.vlgmr.msra.gmra.mrb[4].mxu0 %vm1716_vm5, %v1711_v21 }
 0x429   : > { %7052 = vmatpush3.bf16.xpose.msra.mxu0 %v1833_v29  ;;  %7053 = vmatprep.mubr.msk.bf16.mxu0 %vm8470_vm0, %v8469_v1  ;;  %v2060_v32 = vpop.permute.xlu1 %2059 }
 0x42a   : > { %7063 = vmatprep.subr.bf16.mxu0 %v8469_v1  ;;  %v2065_v34 = vsel %vm1716_vm5, %v2060_v32, 0 }
 0x42b   : > { %v2058_v35 = vpop.permute.xlu0 %2057 }
 0x430   : > { %7054 = vmatmul.mubr.msk.bf16.vlgmr.msra.gmra.mrb[8].mxu0 %vm1716_vm5, %v1826_v28 }
 0x431   : > { %7064 = vmatpush3.bf16.xpose.msra.mxu0 %v1949_v31  ;;  %7065 = vmatprep.mubr.msk.bf16.mxu0 %vm8470_vm0, %v8469_v1 }
 0x432   : > { %7075 = vmatprep.subr.bf16.mxu0 %v8469_v1 }
 0x438   : > { %7066 = vmatmul.mubr.msk.bf16.vlgmr.msra.gmra.mrb[12].mxu0 %vm1716_vm5, %v1942_v33 }
 0x439   : > { %7076 = vmatpush3.bf16.xpose.msra.mxu0 %v2065_v34  ;;  %7077 = vmatprep.mubr.msk.bf16.mxu0 %vm8470_vm0, %v8469_v1 }
 0x43a   : > { %7087 = vmatprep.subr.bf16.mxu0 %v8469_v1  ;;  %v1533_v37 = vpop.permute.xlu1 %1532 }
 0x43b   : > { %v9072_v38 = vadd.f32 %v6624_v36, %v1533_v37 }
 0x440   : > { %7078 = vmatmul.mubr.msk.bf16.vlgmr.msra.gmra.mrb[16].mxu0 %vm1716_vm5, %v2058_v35 }
 0x441   : > { %7091 = vmatprep.mubr.msk.bf16.mxu0 %vm8470_vm0, %v8469_v1 }
 0x4fb   : > { %v1757_v39 = vpop.f32.mrb[4].mxu0 }
 0x4fc   : > { %v1758_v40 = vadd.f32 %v1757_v39, %v9072_v38  ;;  %v7043_v41 = vpop.f32.mrb[5].mxu0 }
 0x4fd   : > { %v1760_v42 = vpop.f32.mrb[6].mxu0 }
 0x4fe   : > { %v7044_v43 = vpop.f32.mrb[7].mxu0  ;;  %v1763_v44 = vsel %vm1716_vm5, %v1758_v40, -inf }
 0x4ff   : > { %1764 = vmax.xlane.f32.xlu0 %v1763_v44 }
 0x503   : > { %v1869_v45 = vpop.f32.mrb[8].mxu0 }
 0x504   : > { %v1870_v46 = vadd.f32 %v1869_v45, %v9072_v38  ;;  %v7055_v47 = vpop.f32.mrb[9].mxu0 }
 0x505   : > { %v1872_v48 = vpop.f32.mrb[10].mxu0 }
 0x506   : > { %v7056_v49 = vpop.f32.mrb[11].mxu0  ;;  %v1875_v50 = vsel %vm1716_vm5, %v1870_v46, -inf }
 0x507   : > { %1876 = vmax.xlane.f32.xlu1 %v1875_v50 }
 0x50b   : > { %v1985_v51 = vpop.f32.mrb[12].mxu0 }
 0x50c   : > { %v1986_v52 = vadd.f32 %v1985_v51, %v9072_v38  ;;  %v7067_v53 = vpop.f32.mrb[13].mxu0 }
 0x50d   : > { %v1988_v54 = vpop.f32.mrb[14].mxu0 }
 0x50e   : > { %v7068_v55 = vpop.f32.mrb[15].mxu0  ;;  %v1991_v56 = vsel %vm1716_vm5, %v1986_v52, -inf }
 0x50f   : > { %1992 = vmax.xlane.f32.xlu0 %v1991_v56 }
 0x513   : > { %v2101_v57 = vpop.f32.mrb[16].mxu0 }
 0x514   : > { %v2102_v58 = vadd.f32 %v2101_v57, %v9072_v38  ;;  %v7079_v59 = vpop.f32.mrb[17].mxu0 }
 0x515   : > { %v2104_v60 = vpop.f32.mrb[18].mxu0 }
 0x516   : > { %v7080_v61 = vpop.f32.mrb[19].mxu0  ;;  %v2107_v62 = vsel %vm1716_vm5, %v2102_v58, -inf }
 0x517   : > { %2108 = vmax.xlane.f32.xlu0 %v2107_v62 }
 0x58c   : > { %v1765_v63 = vpop.xlane.xlu0 %1764 }
 0x58d   : > { %v1766_v0 = vsub.f32 %v1758_v40, %v1765_v63 }
 0x58f   : > { %v1767_v2 = vmul.f32 1.442695, %v1766_v0 }
 0x591   : > { %7798 = vpow2.f32 %v1767_v2 }
 0x594   : > { %v1877_v3 = vpop.xlane.xlu1 %1876 }
 0x595   : > { %v1878_v4 = vsub.f32 %v1870_v46, %v1877_v3 }
 0x597   : > { %v1879_v5 = vmul.f32 1.442695, %v1878_v4 }
 0x599   : > { %7800 = vpow2.f32 %v1879_v5 }
 0x59b   : > { %v7799_v6 = vpop.eup %7798 }
 0x59c   : > { %v1769_v7 = vsel %vm1716_vm5, %v7799_v6, 0.0  ;;  %v1993_v8 = vpop.xlane.xlu0 %1992 }
 0x59d   : > { %1770 = vadd.xlane.f32.xlu1 %v1769_v7  ;;  %v1994_v17 = vsub.f32 %v1986_v52, %v1993_v8  ;;  %v6640_v7 = vld [vmem:[%s9919_s22] ss:$0 sm:$0xff] }
 0x59f   : > { %v1995_v18 = vmul.f32 1.442695, %v1994_v17 }
 0x5a3   : > { %v7801_v9 = vpop.eup %7800 }
 0x5a4   : > { %v2109_v10 = vpop.xlane.xlu0 %2108  ;;  %v1881_v12 = vsel %vm1716_vm5, %v7801_v9, 0.0 }
 0x5a5   : > { %v2110_v13 = vsub.f32 %v2102_v58, %v2109_v10  ;;  %1882 = vadd.xlane.f32.xlu0 %v1881_v12 }
 0x5a7   : > { %v2111_v14 = vmul.f32 1.442695, %v2110_v13 }
 0x5a9   : > { %7802 = vpow2.f32 %v2111_v14 }
 0x5aa   : > { %7804 = vpow2.f32 %v1995_v18 }
 0x5ae   : > { %1775 = vrot.lane.b32.xlu1 %v9030_v19, %s9787_s16  ;;  %s9789_s16 = smov 40  }
 0x5b3   : > { %v7803_v15 = vpop.eup %7802 }
 0x5b4   : > { %v2113_v16 = vsel %vm1716_vm5, %v7803_v15, 0.0  ;;  %v7805_v20 = vpop.eup %7804 }
 0x5b5   : > { %2114 = vadd.xlane.f32.xlu0 %v2113_v16  ;;  %v1997_v21 = vsel %vm1716_vm5, %v7805_v20, 0.0 }
 0x5cb   : > { %1887 = vrot.lane.b32.xlu0 %v9030_v19, %s9793_s4  ;;  %s9801_s4 = smov 16  }
 0x5d2   : > { %1998 = vadd.xlane.f32.xlu1 %v1997_v21 }
 0x5e3   : > { %2003 = vrot.lane.b32.xlu1 %v9030_v19, %s9791_s10  ;;  %s9795_s10 = smov 8  }
 0x5e7   : > { %2119 = vrot.lane.b32.xlu1 %v9030_v19, %s9789_s16  ;;  %s9918_s16 = sld [smem:[#allocation46_spill]] }
 0x5ed   : > { %v7748_v55 = vld [vmem:[%s9918_s16] sm:$0xff]   ;;  %v7749_v56 = vld [vmem:[%s9918_s16 + $0x8] sm:$0xff]  }
 0x5ee   : > { %7088 = vmatpush3.bf16.msra.mxu0 %v7748_v55 }
 0x5ef   : > { %7089 = vmatprep.subr.bf16.mxu0 %v8469_v1 }
 0x5f2   : > { %7090 = vmatpush3.bf16.msra.mxu0 %v7749_v56 }
 0x5f3   : > { %7103 = vmatprep.subr.bf16.mxu0 %v8469_v1 }
 0x62a   : > { %v1771_v22 = vpop.xlane.xlu1 %1770 }
 0x62b   : > { %7806 = vrcp.f32 %v1771_v22 }
 0x62e   : > { %v1776_v24 = vpop.permute.xlu1 %1775 }
 0x62f   : > { %v1781_v25 = vsel %vm1562_vm1, %v1776_v24, 0 }
 0x630   : > { %7046 = vmatpush3.bf16.msra.mxu1 %v1781_v25 }
 0x631   : > { %7057 = vmatprep.subr.bf16.mxu1 %v8469_v1 }
 0x632   : > { %v1883_v27 = vpop.xlane.xlu0 %1882 }
 0x633   : > { %7808 = vrcp.f32 %v1883_v27 }
 0x635   : > { %v7807_v26 = vpop.eup %7806 }
 0x636   : > { %v1773_v28 = vmul.f32 %v7807_v26, %v7799_v6 }
 0x638   : > { %v1774_v29 = vpack.c.bf16 %v1773_v28, %v1773_v28 }
 0x63a   : > { %7048 = vmatmul.mubr.msk.bf16.vlgmr.msra.gmra.mrb[4].mxu1 %vm1716_vm5, %v1774_v29 }
 0x63b   : > { %7059 = vmatprep.mubr.msk.bf16.mxu1 %vm8470_vm0, %v8469_v1 }
 0x63d   : > { %v7809_v30 = vpop.eup %7808 }
 0x63e   : > { %v1885_v31 = vmul.f32 %v7809_v30, %v7801_v9  ;;  %v6644_v30 = vld [vmem:[%s9922_s26] ss:$0 sm:$0xff] }
 0x640   : > { %v1886_v34 = vpack.c.bf16 %v1885_v31, %v1885_v31  ;;  %v6645_v31 = vld [vmem:[%s9923_s2] ss:$0 sm:$0xff] }
 0x642   : > { %v2115_v19 = vpop.xlane.xlu0 %2114 }
 0x646   : > { %v1888_v32 = vpop.permute.xlu0 %1887 }
 0x647   : > { %v1893_v33 = vsel %vm1562_vm1, %v1888_v32, 0 }
 0x648   : > { %7058 = vmatpush3.bf16.msra.mxu1 %v1893_v33 }
 0x649   : > { %7069 = vmatprep.subr.bf16.mxu1 %v8469_v1 }
 0x64b   : > { %7060 = vmatmul.mubr.msk.bf16.vlgmr.msra.gmra.mrb[8].mxu1 %vm1716_vm5, %v1886_v34 }
 0x64c   : > { %7071 = vmatprep.mubr.msk.bf16.mxu1 %vm8470_vm0, %v8469_v1 }
 0x65f   : > { %v1999_v35 = vpop.xlane.xlu1 %1998 }
 0x660   : > { %7810 = vrcp.f32 %v1999_v35 }
 0x661   : > { %7812 = vrcp.f32 %v2115_v19 }
 0x663   : > { %v2004_v36 = vpop.permute.xlu1 %2003 }
 0x664   : > { %v2009_v37 = vsel %vm1562_vm1, %v2004_v36, 0 }
 0x665   : > { %7070 = vmatpush3.bf16.msra.mxu1 %v2009_v37  ;;  %v6646_v37 = vld [vmem:[%s9924_s7] ss:$0 sm:$0xff] }
 0x666   : > { %7081 = vmatprep.subr.bf16.mxu1 %v8469_v1 }
 0x667   : > { %v2120_v41 = vpop.permute.xlu1 %2119 }
 0x668   : > { %v2125_v44 = vsel %vm1562_vm1, %v2120_v41, 0 }
 0x66a   : > { %v7811_v39 = vpop.eup %7810 }
 0x66b   : > { %v2001_v40 = vmul.f32 %v7811_v39, %v7805_v20  ;;  %v7813_v43 = vpop.eup %7812 }
 0x66c   : > { %v2117_v45 = vmul.f32 %v7813_v43, %v7803_v15 }
 0x66d   : > { %v2002_v42 = vpack.c.bf16 %v2001_v40, %v2001_v40 }
 0x66e   : > { %v2118_v46 = vpack.c.bf16 %v2117_v45, %v2117_v45 }
 0x66f   : > { %7072 = vmatmul.mubr.msk.bf16.vlgmr.msra.gmra.mrb[12].mxu1 %vm1716_vm5, %v2002_v42 }
 0x670   : > { %7082 = vmatpush3.bf16.msra.mxu1 %v2125_v44  ;;  %7083 = vmatprep.mubr.msk.bf16.mxu1 %vm8470_vm0, %v8469_v1 }
 0x671   : > { %7095 = vmatprep.subr.bf16.mxu1 %v8469_v1 }
 0x677   : > { %7084 = vmatmul.mubr.msk.bf16.vlgmr.msra.gmra.mrb[16].mxu1 %vm1716_vm5, %v2118_v46  ;;  %v6650_v46 = vld [vmem:[%s9925_s18] ss:$0 sm:$0xff] }
 0x678   : > { %7099 = vmatprep.mubr.msk.bf16.mxu1 %vm8470_vm0, %v8469_v1 }
 0x70d   : > { %v1817_v47 = vpop.f32.mrb[4].mxu1 }
 0x70e   : > { %1823 = vst.msk [vmem:[#allocation2] sm:$0xff] %vm1716_vm5, %v1817_v47  ;;  %v7049_v48 = vpop.f32.mrb[5].mxu1 }
 0x70f   : > { %v1820_v49 = vpop.f32.mrb[6].mxu1 }
 0x710   : > { %v7050_v50 = vpop.f32.mrb[7].mxu1 }
 0x71e   : > { %v1929_v51 = vpop.f32.mrb[8].mxu1 }
 0x71f   : > { %1936 = vrot.lane.b32.xlu0 %v1929_v51, %s9795_s10  ;;  %v7061_v52 = vpop.f32.mrb[9].mxu1  ;;  %s9799_s10 = smov 24  }
 0x720   : > { %v1932_v53 = vpop.f32.mrb[10].mxu1 }
 0x721   : > { %v7062_v54 = vpop.f32.mrb[11].mxu1 }
 0x742   : > { %v2045_v57 = vpop.f32.mrb[12].mxu1 }
 0x743   : > { %2052 = vrot.lane.b32.xlu1 %v2045_v57, %s9801_s4  ;;  %v7073_v58 = vpop.f32.mrb[13].mxu1  ;;  %s9921_s4 = sld [smem:[#allocation52_spill]] }
 0x744   : > { %v2048_v59 = vpop.f32.mrb[14].mxu1 }
 0x745   : > { %v7074_v60 = vpop.f32.mrb[15].mxu1  ;;  %v7756_v59 = vld [vmem:[%s9912_s11 + $0x10] sm:$0xff]  }
 0x746   : > { %v7757_v60 = vld [vmem:[%s9912_s11 + $0x18] sm:$0xff]   ;;  %s9931_s11 = smov 120  }
 0x749   : > { %v7753_v25 = vld [vmem:[%s9921_s4 + $0x8] sm:$0xff]   ;;  %v7754_v35 = vld [vmem:[%s9921_s4 + $0x10] sm:$0xff]   ;;  %v7755_v36 = vld [vmem:[%s9921_s4 + $0x18] sm:$0xff]  }
 0x74a   : > { %v2161_v61 = vpop.f32.mrb[16].mxu1 }
 0x74b   : > { %2168 = vrot.lane.b32.xlu0 %v2161_v61, %s9799_s10  ;;  %v7085_v62 = vpop.f32.mrb[17].mxu1  ;;  %s9920_s10 = sld [smem:[#allocation50_spill]] }
 0x74c   : > { %v2164_v63 = vpop.f32.mrb[18].mxu1 }
 0x74d   : > { %v7086_v0 = vpop.f32.mrb[19].mxu1 }
 0x751   : > { %v7750_v22 = vld [vmem:[%s9920_s10] sm:$0xff]   ;;  %v7751_v24 = vld [vmem:[%s9920_s10 + $0x8] sm:$0xff]  }
 0x752   : > { %7096 = vmatpush3.bf16.msra.mxu1 %v7750_v22 }
 0x753   : > { %7097 = vmatprep.subr.bf16.mxu1 %v8469_v1 }
 0x756   : > { %7098 = vmatpush3.bf16.msra.mxu1 %v7751_v24 }
 0x757   : > { %7115 = vmatprep.subr.bf16.mxu1 %v8469_v1 }
 0x791   : > { %v1937_v2 = vpop.permute.xlu0 %1936 }
 0x792   : > { %1940 = vst.msk [vmem:[#allocation2] sm:$0xff] %vm1939_vm6, %v1937_v2  ;;  %v6656_v2 = vld [vmem:[%s9926_s5] ss:$0 sm:$0xff] }
 0x7b5   : > { %v2053_v3 = vpop.permute.xlu1 %2052 }
 0x7b6   : > { %2056 = vst.msk [vmem:[#allocation2] sm:$0xff] %vm2055_vm7, %v2053_v3 }
 0x7bd   : > { %v2169_v4 = vpop.permute.xlu0 %2168 }
 0x7be   : > { %2172 = vst.msk [vmem:[#allocation2] sm:$0xff] %vm2171_vm8, %v2169_v4  ;;  %v6657_v4 = vld [vmem:[%s9927_s1] ss:$0 sm:$0xff] }
 0x7c5   : > { %v2173_v5 = vld [vmem:[#allocation2] sm:$0xff] }
 0x7c6   : > { %v2174_v6 = vpack.c.bf16 %v2173_v5, %v2173_v5 }
 0x7c8   : > { %7092 = vmatmul.mubr.msk.bf16.vlgmr.msra.gmra.mrb[20].mxu0 %vm1666_vm3, %v2174_v6 }
 0x7c9   : > { %7111 = vmatprep.mubr.msk.bf16.mxu0 %vm8470_vm0, %v8469_v1 }
 0x89b   : > { %v2230_v8 = vpop.f32.mrb[20].mxu0 }
 0x89c   : > { %v2231_v9 = vadd.f32 %v6640_v7, %v2230_v8  ;;  %v7093_v10 = vpop.f32.mrb[21].mxu0  ;;  %v6668_v8 = vld [vmem:[%s9915_s0 + $0x1] ss:$0 sm:$0xff]  ;;  %s9932_s0 = smov 72  }
 0x89d   : > { %v2233_v12 = vpop.f32.mrb[22].mxu0 }
 0x89e   : > { %v7094_v13 = vpop.f32.mrb[23].mxu0  ;;  %v2238_v14 = vadd.f32 %v2231_v9, %v9022_v11  ;;  %v7752_v11 = vld [vmem:[%s9921_s4] sm:$0xff]  }
 0x89f   : > { %7104 = vmatpush3.bf16.msra.mxu0 %v7752_v11 }
 0x8a0   : > { %v2239_v15 = vsel %vm1666_vm3, %v2238_v14, 0.0  ;;  %7105 = vmatprep.subr.bf16.mxu0 %v8469_v1 }
 0x8a1   : > { %2240 = vadd.xlane.f32.xlu1 %v2239_v15 }
 0x8a3   : > { %7106 = vmatpush3.bf16.msra.mxu0 %v7753_v25 }
 0x8a4   : > { %7107 = vmatprep.subr.bf16.mxu0 %v8469_v1 }
 0x8a7   : > { %7108 = vmatpush3.bf16.msra.mxu0 %v7754_v35 }
 0x8a8   : > { %7109 = vmatprep.subr.bf16.mxu0 %v8469_v1 }
 0x8ab   : > { %7110 = vmatpush3.bf16.msra.mxu0 %v7755_v36 }
 0x8ac   : > { %7129 = vmatprep.subr.bf16.mxu0 %v8469_v1 }
 0x92e   : > { %v2241_v16 = vpop.xlane.xlu1 %2240 }
 0x92f   : > { %v2243_v17 = vmul.f32 0.03125, %v2241_v16 }
 0x931   : > { %v2244_v18 = vsub.f32 %v2238_v14, %v2243_v17 }
 0x933   : > { %v2245_v20 = vmul.f32 %v2244_v18, %v2244_v18 }
 0x935   : > { %v2246_v21 = vsel %vm1666_vm3, %v2245_v20, 0.0 }
 0x936   : > { %2247 = vadd.xlane.f32.xlu0 %v2246_v21 }
 0x9c3   : > { %v2248_v26 = vpop.xlane.xlu0 %2247 }
 0x9c4   : > { %v2249_v27 = vmul.f32 0.03125, %v2248_v26 }
 0x9c6   : > { %v2250_v28 = vadd.f32 1e-05, %v2249_v27 }
 0x9c8   : > { %7814 = vrsqrt.f32 %v2250_v28 }
 0x9d2   : > { %v7815_v29 = vpop.eup %7814 }
 0x9d3   : > { %v2252_v19 = vmul.f32 %v7815_v29, %v2244_v18 }
 0x9d5   : > { %v2259_v32 = vmul.f32 %v6644_v30, %v2252_v19 }
 0x9d7   : > { %v2266_v33 = vadd.f32 %v6645_v31, %v2259_v32 }
 0x9d9   : > { %v2281_v34 = vpack.c.bf16 %v2266_v33, %v2266_v33 }
 0x9db   : > { %7100 = vmatmul.mubr.msk.bf16.vlgmr.msra.gmra.mrb[20].mxu1 %vm1666_vm3, %v2281_v34 }
 0x9dc   : > { %7119 = vmatprep.mubr.msk.bf16.mxu1 %vm8470_vm0, %v8469_v1  ;;  %7116 = vmatpush3.bf16.msra.mxu1 %v7756_v59 }
 0x9dd   : > { %7117 = vmatprep.subr.bf16.mxu1 %v8469_v1 }
 0x9e0   : > { %7118 = vmatpush3.bf16.msra.mxu1 %v7757_v60 }
 0x9e1   : > { %7123 = vmatprep.subr.bf16.mxu1 %v8469_v1 }
 0xaae   : > { %v2337_v39 = vpop.f32.mrb[20].mxu1 }
 0xaaf   : > { %v2338_v40 = vadd.f32 %v6646_v37, %v2337_v39  ;;  %v7101_v41 = vpop.f32.mrb[21].mxu1 }
 0xab0   : > { %v2340_v42 = vpop.f32.mrb[22].mxu1 }
 0xab1   : > { %v2343_v43 = vmax.f32 %v2338_v40, 0.0  ;;  %v7102_v44 = vpop.f32.mrb[23].mxu1 }
 0xab3   : > { %v2344_v45 = vpack.c.bf16 %v2343_v43, %v2343_v43 }
 0xab5   : > { %7112 = vmatmul.mubr.msk.bf16.vlgmr.msra.gmra.mrb[24].mxu0 %vm2375_vm9, %v2344_v45 }
 0xab6   : > { %7131 = vmatprep.mubr.msk.bf16.mxu0 %vm8470_vm0, %v8469_v1 }
 0xb88   : > { %v2413_v47 = vpop.f32.mrb[24].mxu0 }
 0xb89   : > { %v2414_v48 = vadd.f32 %v6650_v46, %v2413_v47  ;;  %v7113_v49 = vpop.f32.mrb[25].mxu0 }
 0xb8a   : > { %v2416_v50 = vpop.f32.mrb[26].mxu0 }
 0xb8b   : > { %v7114_v51 = vpop.f32.mrb[27].mxu0  ;;  %v2421_v52 = vadd.f32 %v2414_v48, %v2266_v33 }
 0xb8d   : > { %v2422_v53 = vsel %vm1666_vm3, %v2421_v52, 0.0 }
 0xb8e   : > { %2423 = vadd.xlane.f32.xlu0 %v2422_v53 }
 0xc1b   : > { %v2424_v54 = vpop.xlane.xlu0 %2423 }
 0xc1c   : > { %v2425_v55 = vmul.f32 0.03125, %v2424_v54 }
 0xc1e   : > { %v2426_v56 = vsub.f32 %v2421_v52, %v2425_v55 }
 0xc20   : > { %v2427_v57 = vmul.f32 %v2426_v56, %v2426_v56 }
 0xc22   : > { %v2428_v58 = vsel %vm1666_vm3, %v2427_v57, 0.0 }
 0xc23   : > { %2429 = vadd.xlane.f32.xlu1 %v2428_v58 }
 0xcb0   : > { %v2430_v61 = vpop.xlane.xlu1 %2429 }
 0xcb1   : > { %v2431_v62 = vmul.f32 0.03125, %v2430_v61 }
 0xcb3   : > { %v2432_v63 = vadd.f32 1e-05, %v2431_v62 }
 0xcb5   : > { %7816 = vrsqrt.f32 %v2432_v63 }
 0xcbf   : > { %v7817_v0 = vpop.eup %7816 }
 0xcc0   : > { %v2434_v3 = vmul.f32 %v7817_v0, %v2426_v56 }
 0xcc2   : > { %v2441_v5 = vmul.f32 %v6656_v2, %v2434_v3 }
 0xcc4   : > { %v9162_v6 = vadd.f32 %v6657_v4, %v2441_v5 }
 0xcc6   : > { %v2463_v7 = vpack.c.bf16 %v9162_v6, %v9162_v6 }
 0xcc8   : > { %7120 = vmatmul.mubr.msk.bf16.vlgmr.msra.gmra.mrb[24].mxu1 %vm1666_vm3, %v2463_v7 }
 0xcc9   : > { %7125 = vmatprep.mubr.msk.bf16.mxu1 %vm8470_vm0, %v8469_v1 }
 0xd9b   : > { %v2519_v9 = vpop.f32.mrb[24].mxu1 }
 0xd9c   : > { %v2520_v10 = vadd.f32 %v6668_v8, %v2519_v9  ;;  %v7121_v12 = vpop.f32.mrb[25].mxu1 }
 0xd9d   : > { %v2522_v13 = vpop.f32.mrb[26].mxu1 }
 0xd9e   : > { %v2525_v14 = vmul.f32 0.35355338, %v2520_v10  ;;  %v9170_v15 = vpack.c.bf16 %v2520_v10, %v2520_v10  ;;  %v7122_v16 = vpop.f32.mrb[27].mxu1 }
 0xda0   : > { %2641 = vrot.lane.b32.xlu1 %v9170_v15, %s9928_s6  ;;  %2529 = vrot.lane.b32.xlu0 %v9170_v15, %s9929_s8  ;;  %v2526_v17 = vpack.c.bf16 %v2525_v14, %v2525_v14 }
 0xda4   : > { %2756 = vrot.lane.b32.xlu0 %v9170_v15, %s9930_s9  ;;  %2639 = vrot.lane.b32.xlu1 %v2526_v17, %s9931_s11 }
 0xda8   : > { %2871 = vrot.lane.b32.xlu0 %v9170_v15, %s9932_s0  ;;  %2754 = vrot.lane.b32.xlu1 %v2526_v17, %s9933_s12 }
 0xdac   : > { %2869 = vrot.lane.b32.xlu1 %v2526_v17, %s9934_s13 }
 0xe12   : > { %v2530_v18 = vpop.permute.xlu0 %2529  ;;  %v2642_v21 = vpop.permute.xlu1 %2641 }
 0xe13   : > { %v2535_v20 = vsel %vm1716_vm5, %v2530_v18, 0  ;;  %v2647_v22 = vsel %vm1716_vm5, %v2642_v21, 0 }
 0xe14   : > { %7124 = vmatpush3.bf16.xpose.msra.mxu1 %v2535_v20 }
 0xe15   : > { %7135 = vmatprep.subr.bf16.mxu1 %v8469_v1 }
 0xe16   : > { %v2757_v24 = vpop.permute.xlu0 %2756  ;;  %v2640_v11 = vpop.permute.xlu1 %2639 }
 0xe17   : > { %v2762_v25 = vsel %vm1716_vm5, %v2757_v24, 0 }
 0xe1a   : > { %v2872_v26 = vpop.permute.xlu0 %2871  ;;  %v2755_v27 = vpop.permute.xlu1 %2754 }
 0xe1b   : > { %7126 = vmatmul.mubr.msk.bf16.vlgmr.msra.gmra.mrb[28].mxu1 %vm1716_vm5, %v2526_v17  ;;  %v2877_v28 = vsel %vm1716_vm5, %v2872_v26, 0 }
 0xe1c   : > { %7136 = vmatpush3.bf16.xpose.msra.mxu1 %v2647_v22  ;;  %7137 = vmatprep.mubr.msk.bf16.mxu1 %vm8470_vm0, %v8469_v1 }
 0xe1d   : > { %7147 = vmatprep.subr.bf16.mxu1 %v8469_v1 }
 0xe1e   : > { %v2870_v29 = vpop.permute.xlu1 %2869 }
 0xe23   : > { %7138 = vmatmul.mubr.msk.bf16.vlgmr.msra.gmra.mrb[32].mxu1 %vm1716_vm5, %v2640_v11 }
 0xe24   : > { %7148 = vmatpush3.bf16.xpose.msra.mxu1 %v2762_v25  ;;  %7149 = vmatprep.mubr.msk.bf16.mxu1 %vm8470_vm0, %v8469_v1 }
 0xe25   : > { %7159 = vmatprep.subr.bf16.mxu1 %v8469_v1 }
 0xe2b   : > { %7150 = vmatmul.mubr.msk.bf16.vlgmr.msra.gmra.mrb[36].mxu1 %vm1716_vm5, %v2755_v27 }
 0xe2c   : > { %7160 = vmatpush3.bf16.xpose.msra.mxu1 %v2877_v28  ;;  %7161 = vmatprep.mubr.msk.bf16.mxu1 %vm8470_vm0, %v8469_v1 }
 0xe2d   : > { %7171 = vmatprep.subr.bf16.mxu1 %v8469_v1 }
 0xe33   : > { %7162 = vmatmul.mubr.msk.bf16.vlgmr.msra.gmra.mrb[40].mxu1 %vm1716_vm5, %v2870_v29 }
 0xe34   : > { %7175 = vmatprep.mubr.msk.bf16.mxu1 %vm8470_vm0, %v8469_v1 }
 0xeee   : > { %v2571_v30 = vpop.f32.mrb[28].mxu1 }
 0xeef   : > { %v2572_v19 = vadd.f32 %v2571_v30, %v9072_v38  ;;  %v7127_v31 = vpop.f32.mrb[29].mxu1 }
 0xef0   : > { %v2574_v32 = vpop.f32.mrb[30].mxu1 }
 0xef1   : > { %v7128_v33 = vpop.f32.mrb[31].mxu1  ;;  %v2577_v34 = vsel %vm1716_vm5, %v2572_v19, -inf }
 0xef2   : > { %2578 = vmax.xlane.f32.xlu0 %v2577_v34 }
 0xef6   : > { %v2683_v35 = vpop.f32.mrb[32].mxu1 }
 0xef7   : > { %v2684_v36 = vadd.f32 %v2683_v35, %v9072_v38  ;;  %v7139_v37 = vpop.f32.mrb[33].mxu1 }
 0xef8   : > { %v2686_v39 = vpop.f32.mrb[34].mxu1 }
 0xef9   : > { %v7140_v40 = vpop.f32.mrb[35].mxu1  ;;  %v2689_v41 = vsel %vm1716_vm5, %v2684_v36, -inf }
 0xefa   : > { %2690 = vmax.xlane.f32.xlu1 %v2689_v41 }
 0xefe   : > { %v2798_v42 = vpop.f32.mrb[36].mxu1 }
 0xeff   : > { %v2799_v43 = vadd.f32 %v2798_v42, %v9072_v38  ;;  %v7151_v44 = vpop.f32.mrb[37].mxu1 }
 0xf00   : > { %v2801_v45 = vpop.f32.mrb[38].mxu1 }
 0xf01   : > { %v7152_v46 = vpop.f32.mrb[39].mxu1  ;;  %v2804_v47 = vsel %vm1716_vm5, %v2799_v43, -inf }
 0xf02   : > { %2805 = vmax.xlane.f32.xlu0 %v2804_v47  ;;  %v7758_v46 = vld [vmem:[%s9918_s16 + $0x10] sm:$0xff]   ;;  %v7759_v47 = vld [vmem:[%s9918_s16 + $0x18] sm:$0xff]   ;;  %s9942_s16 = sld [smem:[#allocation58_spill]] }
 0xf03   : > { %7172 = vmatpush3.bf16.msra.mxu1 %v7758_v46  ;;  %v6718_v46 = vld [vmem:[#allocation8] ss:$0 sm:$0xff] }
 0xf04   : > { %7173 = vmatprep.subr.bf16.mxu1 %v8469_v1 }
 0xf06   : > { %v2913_v48 = vpop.f32.mrb[40].mxu1 }
 0xf07   : > { %v2914_v49 = vadd.f32 %v2913_v48, %v9072_v38  ;;  %v7163_v50 = vpop.f32.mrb[41].mxu1  ;;  %7174 = vmatpush3.bf16.msra.mxu1 %v7759_v47 }
 0xf08   : > { %v2916_v51 = vpop.f32.mrb[42].mxu1  ;;  %7187 = vmatprep.subr.bf16.mxu1 %v8469_v1 }
 0xf09   : > { %v7164_v52 = vpop.f32.mrb[43].mxu1  ;;  %v2919_v53 = vsel %vm1716_vm5, %v2914_v49, -inf }
 0xf0a   : > { %2920 = vmax.xlane.f32.xlu0 %v2919_v53 }
 0xf7f   : > { %v2579_v54 = vpop.xlane.xlu0 %2578 }
 0xf80   : > { %v2580_v55 = vsub.f32 %v2572_v19, %v2579_v54 }
 0xf82   : > { %v2581_v56 = vmul.f32 1.442695, %v2580_v55 }
 0xf84   : > { %7818 = vpow2.f32 %v2581_v56 }
 0xf87   : > { %v2691_v57 = vpop.xlane.xlu1 %2690 }
 0xf88   : > { %v2692_v58 = vsub.f32 %v2684_v36, %v2691_v57 }
 0xf8a   : > { %v2693_v59 = vmul.f32 1.442695, %v2692_v58 }
 0xf8c   : > { %7820 = vpow2.f32 %v2693_v59 }
 0xf8e   : > { %v7819_v60 = vpop.eup %7818 }
 0xf8f   : > { %v2583_v61 = vsel %vm1716_vm5, %v7819_v60, 0.0  ;;  %v2806_v62 = vpop.xlane.xlu0 %2805 }
 0xf90   : > { %2584 = vadd.xlane.f32.xlu1 %v2583_v61  ;;  %v2807_v8 = vsub.f32 %v2799_v43, %v2806_v62  ;;  %v6680_v61 = vld [vmem:[%s9919_s22 + $0x1] ss:$0 sm:$0xff] }
 0xf92   : > { %v2808_v9 = vmul.f32 1.442695, %v2807_v8 }
 0xf96   : > { %v7821_v63 = vpop.eup %7820 }
 0xf97   : > { %v2921_v0 = vpop.xlane.xlu0 %2920  ;;  %v2695_v2 = vsel %vm1716_vm5, %v7821_v63, 0.0 }
 0xf98   : > { %v2922_v3 = vsub.f32 %v2914_v49, %v2921_v0  ;;  %2696 = vadd.xlane.f32.xlu0 %v2695_v2 }
 0xf9a   : > { %v2923_v4 = vmul.f32 1.442695, %v2922_v3 }
 0xf9c   : > { %7822 = vpow2.f32 %v2923_v4 }
 0xf9d   : > { %7824 = vpow2.f32 %v2808_v9 }
 0xfa1   : > { %2589 = vrot.lane.b32.xlu1 %v9170_v15, %s9935_s14 }
 0xfa6   : > { %v7823_v5 = vpop.eup %7822 }
 0xfa7   : > { %v2925_v7 = vsel %vm1716_vm5, %v7823_v5, 0.0  ;;  %v7825_v10 = vpop.eup %7824 }
 0xfa8   : > { %2926 = vadd.xlane.f32.xlu0 %v2925_v7  ;;  %v2810_v12 = vsel %vm1716_vm5, %v7825_v10, 0.0 }
 0xfbe   : > { %2701 = vrot.lane.b32.xlu0 %v9170_v15, %s9936_s17 }
 0xfc5   : > { %2811 = vadd.xlane.f32.xlu1 %v2810_v12 }
 0xfd6   : > { %2816 = vrot.lane.b32.xlu1 %v9170_v15, %s9937_s19 }
 0xfda   : > { %2931 = vrot.lane.b32.xlu1 %v9170_v15, %s9938_s20 }
0x101d   : > { %v2585_v13 = vpop.xlane.xlu1 %2584 }
0x101e   : > { %7826 = vrcp.f32 %v2585_v13  ;;  %v7760_v13 = vld [vmem:[%s9920_s10 + $0x10] sm:$0xff]  }
0x1021   : > { %v2590_v14 = vpop.permute.xlu1 %2589 }
0x1022   : > { %v2595_v16 = vsel %vm1562_vm1, %v2590_v14, 0  ;;  %v7761_v14 = vld [vmem:[%s9920_s10 + $0x18] sm:$0xff]  }
0x1023   : > { %7130 = vmatpush3.bf16.msra.mxu0 %v2595_v16  ;;  %v7765_v16 = vld [vmem:[%s9921_s4 + $0x28] sm:$0xff]  }
0x1024   : > { %7141 = vmatprep.subr.bf16.mxu0 %v8469_v1 }
0x1025   : > { %v2697_v18 = vpop.xlane.xlu0 %2696 }
0x1026   : > { %7828 = vrcp.f32 %v2697_v18 }
0x1028   : > { %v7827_v17 = vpop.eup %7826 }
0x1029   : > { %v2587_v20 = vmul.f32 %v7827_v17, %v7819_v60 }
0x102b   : > { %v2588_v21 = vpack.c.bf16 %v2587_v20, %v2587_v20  ;;  %v6716_v20 = vld [vmem:[#allocation4] ss:$0 sm:$0xff] }
0x102d   : > { %7132 = vmatmul.mubr.msk.bf16.vlgmr.msra.gmra.mrb[28].mxu0 %vm1716_vm5, %v2588_v21 }
0x102e   : > { %7143 = vmatprep.mubr.msk.bf16.mxu0 %vm8470_vm0, %v8469_v1 }
0x1030   : > { %v7829_v22 = vpop.eup %7828 }
0x1031   : > { %v2699_v24 = vmul.f32 %v7829_v22, %v7821_v63 }
0x1033   : > { %v2700_v26 = vpack.c.bf16 %v2699_v24, %v2699_v24 }
0x1035   : > { %v2927_v15 = vpop.xlane.xlu0 %2926 }
0x1039   : > { %v2702_v11 = vpop.permute.xlu0 %2701 }
0x103a   : > { %v2707_v25 = vsel %vm1562_vm1, %v2702_v11, 0 }
0x103b   : > { %7142 = vmatpush3.bf16.msra.mxu0 %v2707_v25  ;;  %v6717_v25 = vld [vmem:[#allocation6] ss:$0 sm:$0xff] }
0x103c   : > { %7153 = vmatprep.subr.bf16.mxu0 %v8469_v1 }
0x103e   : > { %7144 = vmatmul.mubr.msk.bf16.vlgmr.msra.gmra.mrb[32].mxu0 %vm1716_vm5, %v2700_v26  ;;  %v6687_v26 = vld [vmem:[%s9923_s2 + $0x1] ss:$0 sm:$0xff]  ;;  %s9943_s2 = sld [smem:[#allocation60_spill]] }
0x103f   : > { %7155 = vmatprep.mubr.msk.bf16.mxu0 %vm8470_vm0, %v8469_v1 }
0x1052   : > { %v2812_v27 = vpop.xlane.xlu1 %2811 }
0x1053   : > { %7830 = vrcp.f32 %v2812_v27 }
0x1054   : > { %7832 = vrcp.f32 %v2927_v15  ;;  %v6686_v15 = vld [vmem:[%s9922_s26 + $0x1] ss:$0 sm:$0xff] }
0x1056   : > { %v2817_v28 = vpop.permute.xlu1 %2816 }
0x1057   : > { %v2822_v29 = vsel %vm1562_vm1, %v2817_v28, 0 }
0x1058   : > { %7154 = vmatpush3.bf16.msra.mxu0 %v2822_v29 }
0x1059   : > { %7165 = vmatprep.subr.bf16.mxu0 %v8469_v1 }
0x105a   : > { %v2932_v31 = vpop.permute.xlu1 %2931 }
0x105b   : > { %v2937_v34 = vsel %vm1562_vm1, %v2932_v31, 0  ;;  %v7914_v31 = vld [vmem:[%s9914_s23] sm:$0xff] }
0x105d   : > { %v7831_v30 = vpop.eup %7830 }
0x105e   : > { %v2814_v19 = vmul.f32 %v7831_v30, %v7825_v10  ;;  %v7833_v33 = vpop.eup %7832  ;;  %v7762_v30 = vld [vmem:[%s9942_s16] sm:$0xff]  }
0x105f   : > { %v2929_v35 = vmul.f32 %v7833_v33, %v7823_v5  ;;  %v7763_v33 = vld [vmem:[%s9942_s16 + $0x8] sm:$0xff]  }
0x1060   : > { %v2815_v32 = vpack.c.bf16 %v2814_v19, %v2814_v19 }
0x1061   : > { %v2930_v36 = vpack.c.bf16 %v2929_v35, %v2929_v35  ;;  %v7766_v35 = vld [vmem:[%s9921_s4 + $0x30] sm:$0xff]  }
0x1062   : > { %7156 = vmatmul.mubr.msk.bf16.vlgmr.msra.gmra.mrb[36].mxu0 %vm1716_vm5, %v2815_v32 }
0x1063   : > { %7166 = vmatpush3.bf16.msra.mxu0 %v2937_v34  ;;  %7167 = vmatprep.mubr.msk.bf16.mxu0 %vm8470_vm0, %v8469_v1 }
0x1064   : > { %7179 = vmatprep.subr.bf16.mxu0 %v8469_v1 }
0x106a   : > { %7168 = vmatmul.mubr.msk.bf16.vlgmr.msra.gmra.mrb[40].mxu0 %vm1716_vm5, %v2930_v36  ;;  %v7767_v36 = vld [vmem:[%s9921_s4 + $0x38] sm:$0xff]  }
0x106b   : > { %7183 = vmatprep.mubr.msk.bf16.mxu0 %vm8470_vm0, %v8469_v1  ;;  %7180 = vmatpush3.bf16.msra.mxu0 %v7760_v13 }
0x106c   : > { %7181 = vmatprep.subr.bf16.mxu0 %v8469_v1 }
0x106f   : > { %7182 = vmatpush3.bf16.msra.mxu0 %v7761_v14 }
0x1070   : > { %7199 = vmatprep.subr.bf16.mxu0 %v8469_v1 }
0x1100   : > { %v2631_v37 = vpop.f32.mrb[28].mxu0 }
0x1101   : > { %2637 = vst.msk [vmem:[#allocation2] sm:$0xff] %vm1716_vm5, %v2631_v37  ;;  %v7133_v39 = vpop.f32.mrb[29].mxu0  ;;  %v6702_v37 = vld [vmem:[%s9924_s7 + $0x1] ss:$0 sm:$0xff]  ;;  %s9945_s7 = sld [smem:[#allocation64_spill]] }
0x1102   : > { %v2634_v40 = vpop.f32.mrb[30].mxu0 }
0x1103   : > { %v7134_v41 = vpop.f32.mrb[31].mxu0 }
0x1111   : > { %v2743_v42 = vpop.f32.mrb[32].mxu0 }
0x1112   : > { %2750 = vrot.lane.b32.xlu0 %v2743_v42, %s9939_s21  ;;  %v7145_v43 = vpop.f32.mrb[33].mxu0 }
0x1113   : > { %v2746_v44 = vpop.f32.mrb[34].mxu0 }
0x1114   : > { %v7146_v45 = vpop.f32.mrb[35].mxu0 }
0x1135   : > { %v2858_v48 = vpop.f32.mrb[36].mxu0 }
0x1136   : > { %2865 = vrot.lane.b32.xlu1 %v2858_v48, %s9940_s24  ;;  %v7157_v49 = vpop.f32.mrb[37].mxu0 }
0x1137   : > { %v2861_v50 = vpop.f32.mrb[38].mxu0 }
0x1138   : > { %v7158_v51 = vpop.f32.mrb[39].mxu0 }
0x113d   : > { %v2973_v52 = vpop.f32.mrb[40].mxu0 }
0x113e   : > { %2980 = vrot.lane.b32.xlu0 %v2973_v52, %s9941_s27  ;;  %v7169_v53 = vpop.f32.mrb[41].mxu0 }
0x113f   : > { %v2976_v54 = vpop.f32.mrb[42].mxu0 }
0x1140   : > { %v7170_v55 = vpop.f32.mrb[43].mxu0 }
0x1184   : > { %v2751_v56 = vpop.permute.xlu0 %2750 }
0x1185   : > { %2753 = vst.msk [vmem:[#allocation2] sm:$0xff] %vm1939_vm6, %v2751_v56 }
0x11a8   : > { %v2866_v57 = vpop.permute.xlu1 %2865 }
0x11a9   : > { %2868 = vst.msk [vmem:[#allocation2] sm:$0xff] %vm2055_vm7, %v2866_v57 }
0x11b0   : > { %v2981_v58 = vpop.permute.xlu0 %2980 }
0x11b1   : > { %2983 = vst.msk [vmem:[#allocation2] sm:$0xff] %vm2171_vm8, %v2981_v58 }
0x11b8   : > { %v2984_v59 = vld [vmem:[#allocation2] sm:$0xff] }
0x11b9   : > { %v2985_v60 = vpack.c.bf16 %v2984_v59, %v2984_v59 }
0x11bb   : > { %7176 = vmatmul.mubr.msk.bf16.vlgmr.msra.gmra.mrb[44].mxu1 %vm1666_vm3, %v2985_v60 }
0x11bc   : > { %7195 = vmatprep.mubr.msk.bf16.mxu1 %vm8470_vm0, %v8469_v1 }
0x128e   : > { %v3041_v62 = vpop.f32.mrb[44].mxu1 }
0x128f   : > { %v3042_v63 = vadd.f32 %v6680_v61, %v3041_v62  ;;  %v7177_v0 = vpop.f32.mrb[45].mxu1 }
0x1290   : > { %v3044_v2 = vpop.f32.mrb[46].mxu1 }
0x1291   : > { %v7178_v3 = vpop.f32.mrb[47].mxu1  ;;  %v3051_v4 = vadd.f32 %v3042_v63, %v9162_v6  ;;  %v7764_v6 = vld [vmem:[%s9921_s4 + $0x20] sm:$0xff]   ;;  %s9944_s4 = sld [smem:[#allocation65_spill]] }
0x1292   : > { %7188 = vmatpush3.bf16.msra.mxu1 %v7764_v6 }
0x1293   : > { %v3052_v5 = vsel %vm1666_vm3, %v3051_v4, 0.0  ;;  %7189 = vmatprep.subr.bf16.mxu1 %v8469_v1 }
0x1294   : > { %3053 = vadd.xlane.f32.xlu1 %v3052_v5 }
0x1296   : > { %7190 = vmatpush3.bf16.msra.mxu1 %v7765_v16 }
0x1297   : > { %7191 = vmatprep.subr.bf16.mxu1 %v8469_v1 }
0x129a   : > { %7192 = vmatpush3.bf16.msra.mxu1 %v7766_v35 }
0x129b   : > { %7193 = vmatprep.subr.bf16.mxu1 %v8469_v1 }
0x129e   : > { %7194 = vmatpush3.bf16.msra.mxu1 %v7767_v36 }
0x129f   : > { %7213 = vmatprep.subr.bf16.mxu1 %v8469_v1 }
0x1321   : > { %v3054_v7 = vpop.xlane.xlu1 %3053 }
0x1322   : > { %v3055_v8 = vmul.f32 0.03125, %v3054_v7 }
0x1324   : > { %v3056_v9 = vsub.f32 %v3051_v4, %v3055_v8  ;;  %v1542_v8 = vlaneseq }
0x1326   : > { %v3057_v10 = vmul.f32 %v3056_v9, %v3056_v9 }
0x1328   : > { %v3058_v12 = vsel %vm1666_vm3, %v3057_v10, 0.0  ;;  %v1545_v10 = vand.u32 127, %v1542_v8 }
0x1329   : > { %3059 = vadd.xlane.f32.xlu0 %v3058_v12  ;;  %v8486_v12 = vmov -1e+09  }
0x133f   : > { %3269 = vperm.xlu0 %7745, %v9045_v23  }
0x13b6   : > { %v3060_v23 = vpop.xlane.xlu0 %3059 }
0x13b7   : > { %v3061_v17 = vmul.f32 0.03125, %v3060_v23 }
0x13b9   : > { %v3062_v18 = vadd.f32 1e-05, %v3061_v17 }
0x13bb   : > { %7834 = vrsqrt.f32 %v3062_v18 }
0x13be   : > { %v3270_v21 = vpop.permute.xlu0 %3269 }
0x13bf   : > { %v3278_v11 = vmul.f32 %v6716_v20, %v3270_v21 }
0x13c1   : > { %v3286_v28 = vadd.f32 %v6717_v25, %v3278_v11 }
0x13c3   : > { %v9278_v32 = vadd.f32 %v7914_v31, %v3286_v28 }
0x13c5   : > { %v7835_v22 = vpop.eup %7834  ;;  %v3298_v34 = vpack.c.bf16 %v9278_v32, %v9278_v32 }
0x13c6   : > { %v3064_v24 = vmul.f32 %v7835_v22, %v3056_v9  ;;  %v1543_v9 = vshrl.u32 %v1542_v8, 7 }
0x13c8   : > { %v3071_v27 = vmul.f32 %v6686_v15, %v3064_v24  ;;  %vm1546_vm10 = vcmp.ge.s32.totalorder %v1543_v9, %v1545_v10 }
0x13c9   : > { %v1547_v13 = vsel %vm1546_vm10, 0.0, %v8486_v12 }
0x13ca   : > { %v9272_v29 = vadd.f32 %v6687_v26, %v3071_v27  ;;  %v9335_v14 = vadd.f32 %v1547_v13, %v9072_v38 }
0x13cc   : > { %v3097_v19 = vpack.c.bf16 %v9272_v29, %v9272_v29 }
0x13ce   : > { %7184 = vmatmul.mubr.msk.bf16.vlgmr.msra.gmra.mrb[44].mxu0 %vm1666_vm3, %v3097_v19 }
0x13cf   : > { %7200 = vmatpush3.bf16.msra.mxu0 %v7762_v30  ;;  %7203 = vmatprep.mubr.msk.bf16.mxu0 %vm8470_vm0, %v8469_v1 }
0x13d0   : > { %7201 = vmatprep.subr.bf16.mxu0 %v8469_v1 }
0x13d3   : > { %7202 = vmatpush3.bf16.msra.mxu0 %v7763_v33 }
0x13d4   : > { %7207 = vmatprep.subr.bf16.mxu0 %v8469_v1 }
0x13d6   : > { %7204 = vmatmul.mubr.msk.bf16.vlgmr.msra.gmra.mrb[48].mxu0 %vm1666_vm3, %v3298_v34 }
0x13d7   : > { %7209 = vmatprep.mubr.msk.bf16.mxu0 %vm8470_vm0, %v8469_v1 }
0x14a1   : > { %v3153_v39 = vpop.f32.mrb[44].mxu0 }
0x14a2   : > { %v3154_v40 = vadd.f32 %v6702_v37, %v3153_v39  ;;  %v7185_v41 = vpop.f32.mrb[45].mxu0 }
0x14a3   : > { %v3156_v42 = vpop.f32.mrb[46].mxu0 }
0x14a4   : > { %v3159_v43 = vmax.f32 %v3154_v40, 0.0  ;;  %v7186_v44 = vpop.f32.mrb[47].mxu0 }
0x14a6   : > { %v3160_v45 = vpack.c.bf16 %v3159_v43, %v3159_v43 }
0x14a8   : > { %7196 = vmatmul.mubr.msk.bf16.vlgmr.msra.gmra.mrb[48].mxu1 %vm2375_vm9, %v3160_v45 }
0x14a9   : > { %v3354_v47 = vpop.f32.mrb[48].mxu0  ;;  %7215 = vmatprep.mubr.msk.bf16.mxu1 %vm8470_vm0, %v8469_v1 }
0x14aa   : > { %v3355_v48 = vadd.f32 %v6718_v46, %v3354_v47  ;;  %v7205_v49 = vpop.f32.mrb[49].mxu0 }
0x14ab   : > { %v3357_v50 = vpop.f32.mrb[50].mxu0 }
0x14ac   : > { %v9299_v51 = vpack.c.bf16 %v3355_v48, %v3355_v48  ;;  %v7206_v52 = vpop.f32.mrb[51].mxu0  ;;  %v3360_v53 = vmul.f32 0.35355338, %v3355_v48 }
0x14ae   : > { %3364 = vrot.lane.b32.xlu1 %v9299_v51, %s9929_s8  ;;  %v3361_v54 = vpack.c.bf16 %v3360_v53, %v3360_v53 }
0x14b2   : > { %3476 = vrot.lane.b32.xlu1 %v9299_v51, %s9928_s6 }
0x14b6   : > { %3591 = vrot.lane.b32.xlu1 %v9299_v51, %s9930_s9 }
0x14ba   : > { %3474 = vrot.lane.b32.xlu1 %v3361_v54, %s9931_s11 }
0x14be   : > { %3589 = vrot.lane.b32.xlu1 %v3361_v54, %s9933_s12 }
0x14c2   : > { %3706 = vrot.lane.b32.xlu1 %v9299_v51, %s9932_s0 }
0x14c6   : > { %3704 = vrot.lane.b32.xlu1 %v3361_v54, %s9934_s13 }
0x1520   : > { %v3365_v55 = vpop.permute.xlu1 %3364 }
0x1521   : > { %v3370_v56 = vsel %vm1716_vm5, %v3365_v55, 0 }
0x1522   : > { %7208 = vmatpush3.bf16.xpose.msra.mxu0 %v3370_v56 }
0x1523   : > { %7219 = vmatprep.subr.bf16.mxu0 %v8469_v1 }
0x1524   : > { %v3477_v57 = vpop.permute.xlu1 %3476 }
0x1525   : > { %v3482_v59 = vsel %vm1716_vm5, %v3477_v57, 0 }
0x1528   : > { %v3592_v58 = vpop.permute.xlu1 %3591 }
0x1529   : > { %7210 = vmatmul.mubr.msk.bf16.vlgmr.msra.gmra.mrb[52].mxu0 %vm1716_vm5, %v3361_v54  ;;  %v3597_v62 = vsel %vm1716_vm5, %v3592_v58, 0 }
0x152a   : > { %7220 = vmatpush3.bf16.xpose.msra.mxu0 %v3482_v59  ;;  %7221 = vmatprep.mubr.msk.bf16.mxu0 %vm8470_vm0, %v8469_v1 }
0x152b   : > { %7231 = vmatprep.subr.bf16.mxu0 %v8469_v1 }
0x152c   : > { %v3475_v60 = vpop.permute.xlu1 %3474 }
0x1530   : > { %v3590_v61 = vpop.permute.xlu1 %3589 }
0x1531   : > { %7222 = vmatmul.mubr.msk.bf16.vlgmr.msra.gmra.mrb[56].mxu0 %vm1716_vm5, %v3475_v60 }
0x1532   : > { %7232 = vmatpush3.bf16.xpose.msra.mxu0 %v3597_v62  ;;  %7233 = vmatprep.mubr.msk.bf16.mxu0 %vm8470_vm0, %v8469_v1 }
0x1533   : > { %7243 = vmatprep.subr.bf16.mxu0 %v8469_v1 }
0x1534   : > { %v3707_v63 = vpop.permute.xlu1 %3706 }
0x1535   : > { %v3712_v0 = vsel %vm1716_vm5, %v3707_v63, 0 }
0x1538   : > { %v3705_v2 = vpop.permute.xlu1 %3704 }
0x1539   : > { %7234 = vmatmul.mubr.msk.bf16.vlgmr.msra.gmra.mrb[60].mxu0 %vm1716_vm5, %v3590_v61 }
0x153a   : > { %7244 = vmatpush3.bf16.xpose.msra.mxu0 %v3712_v0  ;;  %7245 = vmatprep.mubr.msk.bf16.mxu0 %vm8470_vm0, %v8469_v1 }
0x153b   : > { %7255 = vmatprep.subr.bf16.mxu0 %v8469_v1 }
0x1541   : > { %7246 = vmatmul.mubr.msk.bf16.vlgmr.msra.gmra.mrb[64].mxu0 %vm1716_vm5, %v3705_v2 }
0x1542   : > { %7259 = vmatprep.mubr.msk.bf16.mxu0 %vm8470_vm0, %v8469_v1 }
0x157b   : > { %v9332_v3 = vpop.f32.mrb[48].mxu1 }
0x157c   : > { %v7197_v4 = vpop.f32.mrb[49].mxu1 }
0x157d   : > { %v3231_v5 = vpop.f32.mrb[50].mxu1 }
0x157e   : > { %v7198_v7 = vpop.f32.mrb[51].mxu1 }
0x15fc   : > { %v3406_v6 = vpop.f32.mrb[52].mxu0 }
0x15fd   : > { %v3407_v16 = vadd.f32 %v3406_v6, %v9335_v14  ;;  %v7211_v23 = vpop.f32.mrb[53].mxu0 }
0x15fe   : > { %v3409_v17 = vpop.f32.mrb[54].mxu0 }
0x15ff   : > { %v7212_v18 = vpop.f32.mrb[55].mxu0  ;;  %v3412_v20 = vsel %vm1716_vm5, %v3407_v16, -inf }
0x1600   : > { %3413 = vmax.xlane.f32.xlu1 %v3412_v20 }
0x1604   : > { %v3518_v21 = vpop.f32.mrb[56].mxu0 }
0x1605   : > { %v3519_v22 = vadd.f32 %v3518_v21, %v9335_v14  ;;  %v7223_v15 = vpop.f32.mrb[57].mxu0 }
0x1606   : > { %v3521_v24 = vpop.f32.mrb[58].mxu0 }
0x1607   : > { %v7224_v11 = vpop.f32.mrb[59].mxu0  ;;  %v3524_v25 = vsel %vm1716_vm5, %v3519_v22, -inf }
0x1608   : > { %3525 = vmax.xlane.f32.xlu0 %v3524_v25 }
0x160c   : > { %v3633_v26 = vpop.f32.mrb[60].mxu0 }
0x160d   : > { %v3634_v27 = vadd.f32 %v3633_v26, %v9335_v14  ;;  %v7235_v28 = vpop.f32.mrb[61].mxu0 }
0x160e   : > { %v3636_v30 = vpop.f32.mrb[62].mxu0 }
0x160f   : > { %v7236_v19 = vpop.f32.mrb[63].mxu0  ;;  %v3639_v31 = vsel %vm1716_vm5, %v3634_v27, -inf }
0x1610   : > { %3640 = vmax.xlane.f32.xlu0 %v3639_v31 }
0x1614   : > { %v3748_v33 = vpop.f32.mrb[64].mxu0 }
0x1615   : > { %v3749_v34 = vadd.f32 %v3748_v33, %v9335_v14  ;;  %v7247_v35 = vpop.f32.mrb[65].mxu0  ;;  %v7768_v33 = vld [vmem:[%s9943_s2] sm:$0xff]  }
0x1616   : > { %v3751_v36 = vpop.f32.mrb[66].mxu0  ;;  %7256 = vmatpush3.bf16.msra.mxu0 %v7768_v33 }
0x1617   : > { %v7248_v37 = vpop.f32.mrb[67].mxu0  ;;  %v3754_v39 = vsel %vm1716_vm5, %v3749_v34, -inf  ;;  %7257 = vmatprep.subr.bf16.mxu0 %v8469_v1 }
0x1618   : > { %3755 = vmax.xlane.f32.xlu1 %v3754_v39 }
0x168d   : > { %v3414_v40 = vpop.xlane.xlu1 %3413 }
0x168e   : > { %v3415_v41 = vsub.f32 %v3407_v16, %v3414_v40 }
0x1690   : > { %v3416_v42 = vmul.f32 1.442695, %v3415_v41 }
0x1692   : > { %7836 = vpow2.f32 %v3416_v42 }
0x1695   : > { %v3526_v43 = vpop.xlane.xlu0 %3525 }
0x1696   : > { %v3527_v44 = vsub.f32 %v3519_v22, %v3526_v43 }
0x1698   : > { %v3528_v45 = vmul.f32 1.442695, %v3527_v44  ;;  %v6706_v44 = vld [vmem:[%s9925_s18 + $0x1] ss:$0 sm:$0xff] }
0x169a   : > { %7838 = vpow2.f32 %v3528_v45  ;;  %v3229_v45 = vadd.f32 %v6706_v44, %v9332_v3 }
0x169c   : > { %v7837_v46 = vpop.eup %7836 }
0x169d   : > { %v3641_v47 = vpop.xlane.xlu0 %3640  ;;  %v3418_v48 = vsel %vm1716_vm5, %v7837_v46, 0.0 }
0x169e   : > { %v3642_v49 = vsub.f32 %v3634_v27, %v3641_v47  ;;  %3419 = vadd.xlane.f32.xlu0 %v3418_v48 }
0x16a0   : > { %v3643_v50 = vmul.f32 1.442695, %v3642_v49 }
0x16a2   : > { %7840 = vpow2.f32 %v3643_v50 }
0x16a4   : > { %v7839_v52 = vpop.eup %7838 }
0x16a5   : > { %v3530_v53 = vsel %vm1716_vm5, %v7839_v52, 0.0  ;;  %v3756_v56 = vpop.xlane.xlu1 %3755 }
0x16a6   : > { %3531 = vadd.xlane.f32.xlu1 %v3530_v53  ;;  %v3757_v57 = vsub.f32 %v3749_v34, %v3756_v56  ;;  %v7769_v34 = vld [vmem:[%s9943_s2 + $0x8] sm:$0xff]  }
0x16a7   : > { %7258 = vmatpush3.bf16.msra.mxu0 %v7769_v34  ;;  %v6734_v34 = vld [vmem:[#allocation11] ss:$0 sm:$0xff] }
0x16a8   : > { %v3758_v58 = vmul.f32 1.442695, %v3757_v57  ;;  %7271 = vmatprep.subr.bf16.mxu0 %v8469_v1  ;;  %v7770_v57 = vld [vmem:[%s9944_s4] sm:$0xff]  }
0x16aa   : > { %7842 = vpow2.f32 %v3758_v58  ;;  %v7771_v58 = vld [vmem:[%s9944_s4 + $0x8] sm:$0xff]  }
0x16ac   : > { %v7841_v54 = vpop.eup %7840 }
0x16ad   : > { %v3645_v55 = vsel %vm1716_vm5, %v7841_v54, 0.0 }
0x16ae   : > { %3646 = vadd.xlane.f32.xlu0 %v3645_v55 }
0x16b4   : > { %v7843_v59 = vpop.eup %7842 }
0x16b5   : > { %v3760_v60 = vsel %vm1716_vm5, %v7843_v59, 0.0 }
0x16b7   : > { %3536 = vrot.lane.b32.xlu1 %v9299_v51, %s9936_s17 }
0x16c4   : > { %3424 = vrot.lane.b32.xlu0 %v9299_v51, %s9935_s14 }
0x16c8   : > { %3766 = vrot.lane.b32.xlu0 %v9299_v51, %s9938_s20 }
0x16db   : > { %3761 = vadd.xlane.f32.xlu1 %v3760_v60 }
0x16ec   : > { %3651 = vrot.lane.b32.xlu1 %v9299_v51, %s9937_s19 }
0x172b   : > { %v3420_v61 = vpop.xlane.xlu0 %3419 }
0x172c   : > { %7844 = vrcp.f32 %v3420_v61 }
0x1733   : > { %v3532_v62 = vpop.xlane.xlu1 %3531 }
0x1734   : > { %7846 = vrcp.f32 %v3532_v62 }
0x1736   : > { %v7845_v63 = vpop.eup %7844 }
0x1737   : > { %v3422_v2 = vmul.f32 %v7845_v63, %v7837_v46  ;;  %v3537_v7 = vpop.permute.xlu1 %3536  ;;  %v3238_v46 = vadd.f32 %v3229_v45, %v9272_v29  ;;  %v6714_v63 = vld [vmem:[%s9926_s5 + $0x1] ss:$0 sm:$0xff]  ;;  %s9947_s5 = sld [smem:[#allocation73_spill]] }
0x1738   : > { %v3542_v10 = vsel %vm1562_vm1, %v3537_v7, 0  ;;  %v6730_v7 = vld [vmem:[#allocation9] ss:$0 sm:$0xff] }
0x1739   : > { %v3423_v8 = vpack.c.bf16 %v3422_v2, %v3422_v2  ;;  %v3239_v47 = vsel %vm1666_vm3, %v3238_v46, 0.0  ;;  %v6715_v2 = vld [vmem:[%s9927_s1 + $0x1] ss:$0 sm:$0xff]  ;;  %s9946_s1 = sld [smem:[#allocation71_spill]] }
0x173b   : > { %v3647_v0 = vpop.xlane.xlu0 %3646 }
0x173c   : > { %7848 = vrcp.f32 %v3647_v0 }
0x173e   : > { %v7847_v9 = vpop.eup %7846 }
0x173f   : > { %v3425_v4 = vpop.permute.xlu0 %3424  ;;  %v3534_v51 = vmul.f32 %v7847_v9, %v7839_v52 }
0x1740   : > { %v3430_v5 = vsel %vm1562_vm1, %v3425_v4, 0 }
0x1741   : > { %7214 = vmatpush3.bf16.msra.mxu1 %v3430_v5  ;;  %v3535_v12 = vpack.c.bf16 %v3534_v51, %v3534_v51 }
0x1742   : > { %7225 = vmatprep.subr.bf16.mxu1 %v8469_v1 }
0x1743   : > { %v3767_v18 = vpop.permute.xlu0 %3766 }
0x1744   : > { %7216 = vmatmul.mubr.msk.bf16.vlgmr.msra.gmra.mrb[52].mxu1 %vm1716_vm5, %v3423_v8  ;;  %v3772_v21 = vsel %vm1562_vm1, %v3767_v18, 0 }
0x1745   : > { %7226 = vmatpush3.bf16.msra.mxu1 %v3542_v10  ;;  %7227 = vmatprep.mubr.msk.bf16.mxu1 %vm8470_vm0, %v8469_v1 }
0x1746   : > { %7237 = vmatprep.subr.bf16.mxu1 %v8469_v1  ;;  %v7849_v13 = vpop.eup %7848 }
0x1747   : > { %v3649_v16 = vmul.f32 %v7849_v13, %v7841_v54 }
0x1749   : > { %v3650_v20 = vpack.c.bf16 %v3649_v16, %v3649_v16 }
0x174c   : > { %7228 = vmatmul.mubr.msk.bf16.vlgmr.msra.gmra.mrb[56].mxu1 %vm1716_vm5, %v3535_v12 }
0x174d   : > { %7239 = vmatprep.mubr.msk.bf16.mxu1 %vm8470_vm0, %v8469_v1 }
0x1768   : > { %v3762_v6 = vpop.xlane.xlu1 %3761 }
0x1769   : > { %7850 = vrcp.f32 %v3762_v6 }
0x176c   : > { %v3652_v23 = vpop.permute.xlu1 %3651 }
0x176d   : > { %v3657_v17 = vsel %vm1562_vm1, %v3652_v23, 0 }
0x176e   : > { %7238 = vmatpush3.bf16.msra.mxu1 %v3657_v17 }
0x176f   : > { %7249 = vmatprep.subr.bf16.mxu1 %v8469_v1 }
0x1771   : > { %7240 = vmatmul.mubr.msk.bf16.vlgmr.msra.gmra.mrb[60].mxu1 %vm1716_vm5, %v3650_v20 }
0x1772   : > { %7250 = vmatpush3.bf16.msra.mxu1 %v3772_v21  ;;  %7251 = vmatprep.mubr.msk.bf16.mxu1 %vm8470_vm0, %v8469_v1 }
0x1773   : > { %v7851_v22 = vpop.eup %7850  ;;  %7263 = vmatprep.subr.bf16.mxu1 %v8469_v1 }
0x1774   : > { %v3764_v15 = vmul.f32 %v7851_v22, %v7843_v59  ;;  %v7772_v22 = vld [vmem:[%s9945_s7] sm:$0xff]  }
0x1776   : > { %v3765_v24 = vpack.c.bf16 %v3764_v15, %v3764_v15  ;;  %v7773_v15 = vld [vmem:[%s9945_s7 + $0x8] sm:$0xff]  }
0x1779   : > { %7252 = vmatmul.mubr.msk.bf16.vlgmr.msra.gmra.mrb[64].mxu1 %vm1716_vm5, %v3765_v24  ;;  %v6740_v24 = vld [vmem:[#allocation15] ss:$0 sm:$0xff] }
0x177a   : > { %7267 = vmatprep.mubr.msk.bf16.mxu1 %vm8470_vm0, %v8469_v1  ;;  %7264 = vmatpush3.bf16.msra.mxu1 %v7772_v22 }
0x177b   : > { %7265 = vmatprep.subr.bf16.mxu1 %v8469_v1 }
0x177e   : > { %7266 = vmatpush3.bf16.msra.mxu1 %v7773_v15 }
0x177f   : > { %7279 = vmatprep.subr.bf16.mxu1 %v8469_v1 }
0x1817   : > { %v3466_v11 = vpop.f32.mrb[52].mxu1 }
0x1818   : > { %3472 = vst.msk [vmem:[#allocation2] sm:$0xff] %vm1716_vm5, %v3466_v11  ;;  %v7217_v25 = vpop.f32.mrb[53].mxu1 }
0x1819   : > { %v3469_v26 = vpop.f32.mrb[54].mxu1 }
0x181a   : > { %v7218_v27 = vpop.f32.mrb[55].mxu1 }
0x181f   : > { %v3578_v28 = vpop.f32.mrb[56].mxu1 }
0x1820   : > { %3585 = vrot.lane.b32.xlu1 %v3578_v28, %s9939_s21  ;;  %v7229_v30 = vpop.f32.mrb[57].mxu1 }
0x1821   : > { %v3581_v19 = vpop.f32.mrb[58].mxu1 }
0x1822   : > { %v7230_v31 = vpop.f32.mrb[59].mxu1 }
0x1844   : > { %v3693_v35 = vpop.f32.mrb[60].mxu1 }
0x1845   : > { %3700 = vrot.lane.b32.xlu0 %v3693_v35, %s9940_s24  ;;  %v7241_v36 = vpop.f32.mrb[61].mxu1 }
0x1846   : > { %v3696_v37 = vpop.f32.mrb[62].mxu1  ;;  %v6735_v36 = vld [vmem:[#allocation12] ss:$0 sm:$0xff] }
0x1847   : > { %v7242_v39 = vpop.f32.mrb[63].mxu1 }
0x184c   : > { %v3808_v40 = vpop.f32.mrb[64].mxu1 }
0x184d   : > { %3815 = vrot.lane.b32.xlu1 %v3808_v40, %s9941_s27  ;;  %v7253_v41 = vpop.f32.mrb[65].mxu1 }
0x184e   : > { %v3811_v42 = vpop.f32.mrb[66].mxu1 }
0x184f   : > { %v7254_v43 = vpop.f32.mrb[67].mxu1  ;;  %v6736_v42 = vld [vmem:[#allocation14] ss:$0 sm:$0xff] }
0x1864   : > { %3240 = vadd.xlane.f32.xlu0 %v3239_v47 }
0x1892   : > { %v3586_v48 = vpop.permute.xlu1 %3585 }
0x1893   : > { %3588 = vst.msk [vmem:[#allocation2] sm:$0xff] %vm1939_vm6, %v3586_v48 }
0x18b7   : > { %v3701_v49 = vpop.permute.xlu0 %3700 }
0x18b8   : > { %3703 = vst.msk [vmem:[#allocation2] sm:$0xff] %vm2055_vm7, %v3701_v49 }
0x18bf   : > { %v3816_v50 = vpop.permute.xlu1 %3815 }
0x18c0   : > { %3818 = vst.msk [vmem:[#allocation2] sm:$0xff] %vm2171_vm8, %v3816_v50 }
0x18c7   : > { %v3819_v52 = vld [vmem:[#allocation2] sm:$0xff] }
0x18c8   : > { %v3820_v53 = vpack.c.bf16 %v3819_v52, %v3819_v52 }
0x18ca   : > { %7260 = vmatmul.mubr.msk.bf16.vlgmr.msra.gmra.mrb[68].mxu0 %vm1666_vm3, %v3820_v53 }
0x18cb   : > { %7275 = vmatprep.mubr.msk.bf16.mxu0 %vm8470_vm0, %v8469_v1  ;;  %7272 = vmatpush3.bf16.msra.mxu0 %v7770_v57 }
0x18cc   : > { %7273 = vmatprep.subr.bf16.mxu0 %v8469_v1 }
0x18cf   : > { %7274 = vmatpush3.bf16.msra.mxu0 %v7771_v58 }
0x18d0   : > { %7285 = vmatprep.subr.bf16.mxu0 %v8469_v1 }
0x18f1   : > { %v3241_v29 = vpop.xlane.xlu0 %3240 }
0x18f2   : > { %v3242_v3 = vmul.f32 0.03125, %v3241_v29 }
0x18f4   : > { %v3243_v54 = vsub.f32 %v3238_v46, %v3242_v3 }
0x18f6   : > { %v3244_v55 = vmul.f32 %v3243_v54, %v3243_v54 }
0x18f8   : > { %v3245_v56 = vsel %vm1666_vm3, %v3244_v55, 0.0 }
0x18f9   : > { %3246 = vadd.xlane.f32.xlu0 %v3245_v56 }
0x1986   : > { %v3247_v59 = vpop.xlane.xlu0 %3246 }
0x1987   : > { %v3248_v60 = vmul.f32 0.03125, %v3247_v59 }
0x1989   : > { %v3249_v61 = vadd.f32 1e-05, %v3248_v60 }
0x198b   : > { %7852 = vrsqrt.f32 %v3249_v61 }
0x1995   : > { %v7853_v62 = vpop.eup %7852 }
0x1996   : > { %v3251_v0 = vmul.f32 %v7853_v62, %v3243_v54 }
0x1998   : > { %v3258_v4 = vmul.f32 %v6714_v63, %v3251_v0 }
0x199a   : > { %v3265_v5 = vadd.f32 %v6715_v2, %v3258_v4 }
0x199c   : > { %v9402_v8 = vpack.c.bf16 %v3265_v5, %v3265_v5 }
0x199d   : > { %v3876_v9 = vpop.f32.mrb[68].mxu0 }
0x199e   : > { %v3877_v10 = vadd.f32 %v6730_v7, %v3876_v9  ;;  %v7261_v51 = vpop.f32.mrb[69].mxu0  ;;  %7276 = vmatmul.mubr.msk.bf16.vlgmr.msra.gmra.mrb[72].mxu0 %vm1666_vm3, %v9402_v8 }
0x199f   : > { %v3879_v12 = vpop.f32.mrb[70].mxu0  ;;  %7287 = vmatprep.mubr.msk.bf16.mxu0 %vm8470_vm0, %v8469_v1 }
0x19a0   : > { %v7262_v13 = vpop.f32.mrb[71].mxu0  ;;  %v3884_v6 = vadd.f32 %v3877_v10, %v9278_v32 }
0x19a2   : > { %v3885_v16 = vsel %vm1666_vm3, %v3884_v6, 0.0 }
0x19a3   : > { %3886 = vadd.xlane.f32.xlu1 %v3885_v16 }
0x1a30   : > { %v3887_v23 = vpop.xlane.xlu1 %3886 }
0x1a31   : > { %v3888_v17 = vmul.f32 0.03125, %v3887_v23 }
0x1a33   : > { %v3889_v18 = vsub.f32 %v3884_v6, %v3888_v17 }
0x1a35   : > { %v3890_v20 = vmul.f32 %v3889_v18, %v3889_v18 }
0x1a37   : > { %v3891_v21 = vsel %vm1666_vm3, %v3890_v20, 0.0 }
0x1a38   : > { %3892 = vadd.xlane.f32.xlu0 %v3891_v21 }
0x1a71   : > { %v4045_v32 = vpop.f32.mrb[72].mxu0 }
0x1a72   : > { %v4046_v11 = vadd.f32 %v6740_v24, %v4045_v32  ;;  %v7277_v25 = vpop.f32.mrb[73].mxu0 }
0x1a73   : > { %v4048_v26 = vpop.f32.mrb[74].mxu0 }
0x1a74   : > { %v9415_v27 = vpack.c.bf16 %v4046_v11, %v4046_v11  ;;  %v7278_v28 = vpop.f32.mrb[75].mxu0 }
0x1a76   : > { %4165 = vrot.lane.b32.xlu1 %v9415_v27, %s9931_s11  ;;  %v4058_v41 = vsel %vm1716_vm5, %v9415_v27, 0 }
0x1a7a   : > { %4280 = vrot.lane.b32.xlu1 %v9415_v27, %s9933_s12 }
0x1ac5   : > { %v3893_v30 = vpop.xlane.xlu0 %3892 }
0x1ac6   : > { %v3894_v19 = vmul.f32 0.03125, %v3893_v30 }
0x1ac8   : > { %v3895_v31 = vadd.f32 1e-05, %v3894_v19 }
0x1aca   : > { %7854 = vrsqrt.f32 %v3895_v31 }
0x1ad4   : > { %v7855_v33 = vpop.eup %7854 }
0x1ad5   : > { %v3897_v35 = vmul.f32 %v7855_v33, %v3889_v18 }
0x1ad7   : > { %v3904_v37 = vmul.f32 %v6734_v34, %v3897_v35 }
0x1ad9   : > { %v9421_v39 = vadd.f32 %v6735_v36, %v3904_v37 }
0x1adb   : > { %v3927_v40 = vpack.c.bf16 %v9421_v39, %v9421_v39 }
0x1add   : > { %7268 = vmatmul.mubr.msk.bf16.vlgmr.msra.gmra.mrb[68].mxu1 %vm1666_vm3, %v3927_v40 }
0x1ade   : > { %7280 = vmatpush3.bf16.xpose.msra.mxu1 %v4058_v41  ;;  %7281 = vmatprep.mubr.msk.bf16.mxu1 %vm8470_vm0, %v8469_v1 }
0x1adf   : > { %7291 = vmatprep.subr.bf16.mxu1 %v8469_v1 }
0x1ae8   : > { %v4166_v49 = vpop.permute.xlu1 %4165 }
0x1ae9   : > { %v4171_v52 = vsel %vm1716_vm5, %v4166_v49, 0 }
0x1aec   : > { %v4281_v53 = vpop.permute.xlu1 %4280 }
0x1aed   : > { %v4286_v3 = vsel %vm1716_vm5, %v4281_v53, 0 }
0x1bb0   : > { %v3983_v43 = vpop.f32.mrb[68].mxu1 }
0x1bb1   : > { %v3984_v44 = vadd.f32 %v6736_v42, %v3983_v43  ;;  %v7269_v45 = vpop.f32.mrb[69].mxu1 }
0x1bb2   : > { %v3986_v46 = vpop.f32.mrb[70].mxu1 }
0x1bb3   : > { %v4051_v47 = vmul.f32 0.35355338, %v3984_v44  ;;  %v7270_v48 = vpop.f32.mrb[71].mxu1 }
0x1bb5   : > { %v4052_v50 = vpack.c.bf16 %v4051_v47, %v4051_v47 }
0x1bb7   : > { %4163 = vrot.lane.b32.xlu0 %v4052_v50, %s9931_s11  ;;  %4278 = vrot.lane.b32.xlu1 %v4052_v50, %s9933_s12 }
0x1bb8   : > { %7282 = vmatmul.mubr.msk.bf16.vlgmr.msra.gmra.mrb[72].mxu1 %vm1716_vm5, %v4052_v50 }
0x1bb9   : > { %7292 = vmatpush3.bf16.xpose.msra.mxu1 %v4171_v52  ;;  %7293 = vmatprep.mubr.msk.bf16.mxu1 %vm8470_vm0, %v8469_v1 }
0x1bba   : > { %7303 = vmatprep.subr.bf16.mxu1 %v8469_v1 }
0x1bbb   : > { %4395 = vrot.lane.b32.xlu0 %v9415_v27, %s9934_s13  ;;  %4393 = vrot.lane.b32.xlu1 %v4052_v50, %s9934_s13 }
0x1c29   : > { %v4164_v29 = vpop.permute.xlu0 %4163  ;;  %v4279_v55 = vpop.permute.xlu1 %4278 }
0x1c2a   : > { %7294 = vmatmul.mubr.msk.bf16.vlgmr.msra.gmra.mrb[76].mxu1 %vm1716_vm5, %v4164_v29 }
0x1c2b   : > { %7304 = vmatpush3.bf16.xpose.msra.mxu1 %v4286_v3  ;;  %7305 = vmatprep.mubr.msk.bf16.mxu1 %vm8470_vm0, %v8469_v1 }
0x1c2c   : > { %7315 = vmatprep.subr.bf16.mxu1 %v8469_v1 }
0x1c2d   : > { %v4396_v54 = vpop.permute.xlu0 %4395  ;;  %v4394_v57 = vpop.permute.xlu1 %4393 }
0x1c2e   : > { %v4401_v56 = vsel %vm1716_vm5, %v4396_v54, 0 }
0x1c32   : > { %7306 = vmatmul.mubr.msk.bf16.vlgmr.msra.gmra.mrb[80].mxu1 %vm1716_vm5, %v4279_v55 }
0x1c33   : > { %7316 = vmatpush3.bf16.xpose.msra.mxu1 %v4401_v56  ;;  %7317 = vmatprep.mubr.msk.bf16.mxu1 %vm8470_vm0, %v8469_v1 }
0x1c34   : > { %7327 = vmatprep.subr.bf16.mxu1 %v8469_v1 }
0x1c3a   : > { %7318 = vmatmul.mubr.msk.bf16.vlgmr.msra.gmra.mrb[84].mxu1 %vm1716_vm5, %v4394_v57 }
0x1c3b   : > { %7331 = vmatprep.mubr.msk.bf16.mxu1 %vm8470_vm0, %v8469_v1 }
0x1c8b   : > { %v4094_v58 = vpop.f32.mrb[72].mxu1 }
0x1c8c   : > { %v4095_v59 = vadd.f32 %v4094_v58, %v9072_v38  ;;  %v7283_v60 = vpop.f32.mrb[73].mxu1 }
0x1c8d   : > { %v4097_v61 = vpop.f32.mrb[74].mxu1 }
0x1c8e   : > { %v7284_v62 = vpop.f32.mrb[75].mxu1  ;;  %v4100_v63 = vsel %vm1716_vm5, %v4095_v59, -inf }
0x1c8f   : > { %4101 = vmax.xlane.f32.xlu0 %v4100_v63 }
0x1cfd   : > { %v4207_v0 = vpop.f32.mrb[76].mxu1 }
0x1cfe   : > { %v4208_v2 = vadd.f32 %v4207_v0, %v9072_v38  ;;  %v7295_v4 = vpop.f32.mrb[77].mxu1 }
0x1cff   : > { %v4210_v5 = vpop.f32.mrb[78].mxu1 }
0x1d00   : > { %v7296_v7 = vpop.f32.mrb[79].mxu1  ;;  %v4213_v9 = vsel %vm1716_vm5, %v4208_v2, -inf }
0x1d01   : > { %4214 = vmax.xlane.f32.xlu1 %v4213_v9 }
0x1d05   : > { %v4322_v10 = vpop.f32.mrb[80].mxu1 }
0x1d06   : > { %v4323_v51 = vadd.f32 %v4322_v10, %v9072_v38  ;;  %v7307_v12 = vpop.f32.mrb[81].mxu1 }
0x1d07   : > { %v4325_v13 = vpop.f32.mrb[82].mxu1 }
0x1d08   : > { %v7308_v6 = vpop.f32.mrb[83].mxu1  ;;  %v4328_v16 = vsel %vm1716_vm5, %v4323_v51, -inf }
0x1d09   : > { %4329 = vmax.xlane.f32.xlu0 %v4328_v16  ;;  %v7774_v16 = vld [vmem:[#allocation17] sm:$0xff]  }
0x1d0a   : > { %7328 = vmatpush3.bf16.msra.mxu1 %v7774_v16 }
0x1d0b   : > { %7329 = vmatprep.subr.bf16.mxu1 %v8469_v1 }
0x1d0d   : > { %v4437_v23 = vpop.f32.mrb[84].mxu1 }
0x1d0e   : > { %v4438_v17 = vadd.f32 %v4437_v23, %v9072_v38  ;;  %v7319_v18 = vpop.f32.mrb[85].mxu1  ;;  %v7775_v23 = vld [vmem:[#allocation17 + $0x8] sm:$0xff]  }
0x1d0f   : > { %v4440_v20 = vpop.f32.mrb[86].mxu1  ;;  %7330 = vmatpush3.bf16.msra.mxu1 %v7775_v23 }
0x1d10   : > { %v7320_v21 = vpop.f32.mrb[87].mxu1  ;;  %v4443_v22 = vsel %vm1716_vm5, %v4438_v17, -inf  ;;  %7343 = vmatprep.subr.bf16.mxu1 %v8469_v1 }
0x1d11   : > { %4444 = vmax.xlane.f32.xlu0 %v4443_v22 }
0x1d1c   : > { %v4102_v15 = vpop.xlane.xlu0 %4101 }
0x1d1d   : > { %v4103_v24 = vsub.f32 %v4095_v59, %v4102_v15 }
0x1d1f   : > { %v4104_v32 = vmul.f32 1.442695, %v4103_v24 }
0x1d21   : > { %7856 = vpow2.f32 %v4104_v32 }
0x1d2b   : > { %v7857_v11 = vpop.eup %7856 }
0x1d2c   : > { %v4106_v25 = vsel %vm1716_vm5, %v7857_v11, 0.0 }
0x1d2d   : > { %4107 = vadd.xlane.f32.xlu1 %v4106_v25 }
0x1d3e   : > { %4113 = vrot.lane.b32.xlu1 %v9415_v27, %s9929_s8 }
0x1d8e   : > { %v4215_v26 = vpop.xlane.xlu1 %4214 }
0x1d8f   : > { %v4216_v28 = vsub.f32 %v4208_v2, %v4215_v26 }
0x1d91   : > { %v4217_v30 = vmul.f32 1.442695, %v4216_v28 }
0x1d93   : > { %7858 = vpow2.f32 %v4217_v30 }
0x1d96   : > { %v4330_v19 = vpop.xlane.xlu0 %4329 }
0x1d97   : > { %v4331_v31 = vsub.f32 %v4323_v51, %v4330_v19  ;;  %v6752_v19 = vld [vmem:[#allocation18] ss:$0 sm:$0xff] }
0x1d99   : > { %v4332_v33 = vmul.f32 1.442695, %v4331_v31 }
0x1d9b   : > { %7860 = vpow2.f32 %v4332_v33 }
0x1d9d   : > { %v7859_v34 = vpop.eup %7858 }
0x1d9e   : > { %v4445_v35 = vpop.xlane.xlu0 %4444  ;;  %v4219_v36 = vsel %vm1716_vm5, %v7859_v34, 0.0 }
0x1d9f   : > { %v4446_v37 = vsub.f32 %v4438_v17, %v4445_v35  ;;  %4220 = vadd.xlane.f32.xlu0 %v4219_v36 }
0x1da1   : > { %v4447_v40 = vmul.f32 1.442695, %v4446_v37 }
0x1da3   : > { %7862 = vpow2.f32 %v4447_v40 }
0x1da5   : > { %v7861_v41 = vpop.eup %7860 }
0x1da6   : > { %v4334_v42 = vsel %vm1716_vm5, %v7861_v41, 0.0 }
0x1da7   : > { %4335 = vadd.xlane.f32.xlu1 %v4334_v42 }
0x1dad   : > { %v7863_v43 = vpop.eup %7862 }
0x1dae   : > { %v4449_v44 = vsel %vm1716_vm5, %v7863_v43, 0.0 }
0x1daf   : > { %4450 = vadd.xlane.f32.xlu0 %v4449_v44 }
0x1db8   : > { %4340 = vrot.lane.b32.xlu1 %v9415_v27, %s9930_s9 }
0x1dba   : > { %v4108_v45 = vpop.xlane.xlu1 %4107 }
0x1dbb   : > { %7864 = vrcp.f32 %v4108_v45 }
0x1dbc   : > { %4455 = vrot.lane.b32.xlu1 %v9415_v27, %s9932_s0 }
0x1dbe   : > { %v4114_v46 = vpop.permute.xlu1 %4113 }
0x1dbf   : > { %v4119_v47 = vsel %vm1562_vm1, %v4114_v46, 0  ;;  %v7776_v46 = vld [vmem:[%s9946_s1] sm:$0xff]  }
0x1dc0   : > { %7286 = vmatpush3.bf16.msra.mxu0 %v4119_v47  ;;  %v7777_v47 = vld [vmem:[%s9946_s1 + $0x8] sm:$0xff]  }
0x1dc1   : > { %7297 = vmatprep.subr.bf16.mxu0 %v8469_v1 }
0x1dc5   : > { %v7865_v48 = vpop.eup %7864  ;;  %4225 = vrot.lane.b32.xlu0 %v9415_v27, %s9928_s6 }
0x1dc6   : > { %v4110_v49 = vmul.f32 %v7865_v48, %v7857_v11  ;;  %v7778_v48 = vld [vmem:[%s9947_s5] sm:$0xff]  }
0x1dc8   : > { %v4111_v50 = vpack.c.bf16 %v4110_v49, %v4110_v49 }
0x1dca   : > { %7288 = vmatmul.mubr.msk.bf16.vlgmr.msra.gmra.mrb[76].mxu0 %vm1716_vm5, %v4111_v50 }
0x1dcb   : > { %7299 = vmatprep.mubr.msk.bf16.mxu0 %vm8470_vm0, %v8469_v1 }
0x1e2c   : > { %v4221_v52 = vpop.xlane.xlu0 %4220 }
0x1e2d   : > { %7866 = vrcp.f32 %v4221_v52 }
0x1e34   : > { %v4336_v53 = vpop.xlane.xlu1 %4335 }
0x1e35   : > { %7868 = vrcp.f32 %v4336_v53 }
0x1e37   : > { %v7867_v29 = vpop.eup %7866 }
0x1e38   : > { %v4223_v54 = vmul.f32 %v7867_v29, %v7859_v34  ;;  %v4341_v57 = vpop.permute.xlu1 %4340  ;;  %v6756_v29 = vld [vmem:[#allocation20] ss:$0 sm:$0xff] }
0x1e39   : > { %v4346_v59 = vsel %vm1562_vm1, %v4341_v57, 0 }
0x1e3a   : > { %v4224_v27 = vpack.c.bf16 %v4223_v54, %v4223_v54  ;;  %v6757_v54 = vld [vmem:[#allocation21] ss:$0 sm:$0xff] }
0x1e3c   : > { %v4451_v3 = vpop.xlane.xlu0 %4450  ;;  %v4456_v61 = vpop.permute.xlu1 %4455 }
0x1e3d   : > { %7870 = vrcp.f32 %v4451_v3  ;;  %v4461_v0 = vsel %vm1562_vm1, %v4456_v61, 0 }
0x1e3f   : > { %v7869_v58 = vpop.eup %7868 }
0x1e40   : > { %v4226_v55 = vpop.permute.xlu0 %4225  ;;  %v4338_v60 = vmul.f32 %v7869_v58, %v7861_v41  ;;  %v7781_v58 = vld [vmem:[%s9947_s5 + $0x18] sm:$0xff]  }
0x1e41   : > { %v4231_v56 = vsel %vm1562_vm1, %v4226_v55, 0 }
0x1e42   : > { %7298 = vmatpush3.bf16.msra.mxu0 %v4231_v56  ;;  %v4339_v62 = vpack.c.bf16 %v4338_v60, %v4338_v60 }
0x1e43   : > { %7309 = vmatprep.subr.bf16.mxu0 %v8469_v1 }
0x1e45   : > { %7300 = vmatmul.mubr.msk.bf16.vlgmr.msra.gmra.mrb[80].mxu0 %vm1716_vm5, %v4224_v27  ;;  %v7780_v27 = vld [vmem:[%s9947_s5 + $0x10] sm:$0xff]  }
0x1e46   : > { %7310 = vmatpush3.bf16.msra.mxu0 %v4346_v59  ;;  %7311 = vmatprep.mubr.msk.bf16.mxu0 %vm8470_vm0, %v8469_v1  ;;  %v6758_v59 = vld [vmem:[#allocation23] ss:$0 sm:$0xff] }
0x1e47   : > { %7321 = vmatprep.subr.bf16.mxu0 %v8469_v1  ;;  %v7871_v63 = vpop.eup %7870 }
0x1e48   : > { %v4453_v2 = vmul.f32 %v7871_v63, %v7863_v43 }
0x1e4a   : > { %v4454_v4 = vpack.c.bf16 %v4453_v2, %v4453_v2 }
0x1e4d   : > { %7312 = vmatmul.mubr.msk.bf16.vlgmr.msra.gmra.mrb[84].mxu0 %vm1716_vm5, %v4339_v62 }
0x1e4e   : > { %7322 = vmatpush3.bf16.msra.mxu0 %v4461_v0  ;;  %7323 = vmatprep.mubr.msk.bf16.mxu0 %vm8470_vm0, %v8469_v1 }
0x1e4f   : > { %7335 = vmatprep.subr.bf16.mxu0 %v8469_v1 }
0x1e55   : > { %7324 = vmatmul.mubr.msk.bf16.vlgmr.msra.gmra.mrb[88].mxu0 %vm1716_vm5, %v4454_v4 }
0x1e56   : > { %7339 = vmatprep.mubr.msk.bf16.mxu0 %vm8470_vm0, %v8469_v1  ;;  %7336 = vmatpush3.bf16.msra.mxu0 %v7776_v46 }
0x1e57   : > { %7337 = vmatprep.subr.bf16.mxu0 %v8469_v1 }
0x1e5a   : > { %7338 = vmatpush3.bf16.msra.mxu0 %v7777_v47 }
0x1e5b   : > { %7355 = vmatprep.subr.bf16.mxu0 %v8469_v1 }
0x1e9d   : > { %v4155_v5 = vpop.f32.mrb[76].mxu0 }
0x1e9e   : > { %4161 = vst.msk [vmem:[#allocation2] sm:$0xff] %vm1716_vm5, %v4155_v5  ;;  %v7289_v7 = vpop.f32.mrb[77].mxu0  ;;  %v6762_v5 = vld [vmem:[#allocation24] ss:$0 sm:$0xff] }
0x1e9f   : > { %v4158_v9 = vpop.f32.mrb[78].mxu0 }
0x1ea0   : > { %v7290_v10 = vpop.f32.mrb[79].mxu0 }
0x1f18   : > { %v4267_v51 = vpop.f32.mrb[80].mxu0 }
0x1f19   : > { %4274 = vrot.lane.b32.xlu0 %v4267_v51, %s9939_s21  ;;  %v7301_v12 = vpop.f32.mrb[81].mxu0 }
0x1f1a   : > { %v4270_v13 = vpop.f32.mrb[82].mxu0 }
0x1f1b   : > { %v7302_v6 = vpop.f32.mrb[83].mxu0 }
0x1f20   : > { %v4382_v17 = vpop.f32.mrb[84].mxu0 }
0x1f21   : > { %4389 = vrot.lane.b32.xlu1 %v4382_v17, %s9940_s24  ;;  %v7313_v18 = vpop.f32.mrb[85].mxu0 }
0x1f22   : > { %v4385_v20 = vpop.f32.mrb[86].mxu0 }
0x1f23   : > { %v7314_v21 = vpop.f32.mrb[87].mxu0 }
0x1f24   : > { %v7782_v21 = vld [vmem:[%s9942_s16 + $0x10] sm:$0xff]  }
0x1f28   : > { %v4497_v22 = vpop.f32.mrb[88].mxu0 }
0x1f29   : > { %4504 = vrot.lane.b32.xlu0 %v4497_v22, %s9941_s27  ;;  %v7325_v15 = vpop.f32.mrb[89].mxu0  ;;  %v7783_v22 = vld [vmem:[%s9942_s16 + $0x18] sm:$0xff]  }
0x1f2a   : > { %v4500_v24 = vpop.f32.mrb[90].mxu0 }
0x1f2b   : > { %v7326_v32 = vpop.f32.mrb[91].mxu0 }
0x1f8b   : > { %v4275_v11 = vpop.permute.xlu0 %4274 }
0x1f8c   : > { %4277 = vst.msk [vmem:[#allocation2] sm:$0xff] %vm1939_vm6, %v4275_v11 }
0x1f93   : > { %v4390_v25 = vpop.permute.xlu1 %4389 }
0x1f94   : > { %4392 = vst.msk [vmem:[#allocation2] sm:$0xff] %vm2055_vm7, %v4390_v25  ;;  %v6768_v25 = vld [vmem:[#allocation26] ss:$0 sm:$0xff] }
0x1f9b   : > { %v4505_v26 = vpop.permute.xlu0 %4504 }
0x1f9c   : > { %4507 = vst.msk [vmem:[#allocation2] sm:$0xff] %vm2171_vm8, %v4505_v26 }
0x1fa3   : > { %v4508_v28 = vld [vmem:[#allocation2] sm:$0xff] }
0x1fa4   : > { %v4509_v30 = vpack.c.bf16 %v4508_v28, %v4508_v28  ;;  %v6769_v28 = vld [vmem:[#allocation27] ss:$0 sm:$0xff] }
0x1fa6   : > { %7332 = vmatmul.mubr.msk.bf16.vlgmr.msra.gmra.mrb[88].mxu1 %vm1666_vm3, %v4509_v30 }
0x1fa7   : > { %7351 = vmatprep.mubr.msk.bf16.mxu1 %vm8470_vm0, %v8469_v1  ;;  %7344 = vmatpush3.bf16.msra.mxu1 %v7778_v48 }
0x1fa8   : > { %7345 = vmatprep.subr.bf16.mxu1 %v8469_v1 }
0x2079   : > { %v4565_v31 = vpop.f32.mrb[88].mxu1 }
0x207a   : > { %v4566_v33 = vadd.f32 %v6752_v19, %v4565_v31  ;;  %v7333_v34 = vpop.f32.mrb[89].mxu1 }
0x207b   : > { %v4568_v35 = vpop.f32.mrb[90].mxu1 }
0x207c   : > { %v4573_v36 = vadd.f32 %v4566_v33, %v9421_v39  ;;  %v7334_v37 = vpop.f32.mrb[91].mxu1  ;;  %v7779_v39 = vld [vmem:[%s9947_s5 + $0x8] sm:$0xff]  }
0x207d   : > { %7346 = vmatpush3.bf16.msra.mxu1 %v7779_v39  ;;  %v6778_v33 = vld [vmem:[#allocation8 + $0x1] ss:$0 sm:$0xff] }
0x207e   : > { %v4574_v40 = vsel %vm1666_vm3, %v4573_v36, 0.0  ;;  %7347 = vmatprep.subr.bf16.mxu1 %v8469_v1 }
0x207f   : > { %4575 = vadd.xlane.f32.xlu1 %v4574_v40 }
0x2081   : > { %7348 = vmatpush3.bf16.msra.mxu1 %v7780_v27 }
0x2082   : > { %7349 = vmatprep.subr.bf16.mxu1 %v8469_v1 }
0x2085   : > { %7350 = vmatpush3.bf16.msra.mxu1 %v7781_v58 }
0x2086   : > { %7369 = vmatprep.subr.bf16.mxu1 %v8469_v1 }
0x210c   : > { %v4576_v41 = vpop.xlane.xlu1 %4575 }
0x210d   : > { %v4577_v42 = vmul.f32 0.03125, %v4576_v41 }
0x210f   : > { %v4578_v43 = vsub.f32 %v4573_v36, %v4577_v42 }
0x2111   : > { %v4579_v44 = vmul.f32 %v4578_v43, %v4578_v43 }
0x2113   : > { %v4580_v45 = vsel %vm1666_vm3, %v4579_v44, 0.0 }
0x2114   : > { %4581 = vadd.xlane.f32.xlu0 %v4580_v45 }
0x21a1   : > { %v4582_v49 = vpop.xlane.xlu0 %4581 }
0x21a2   : > { %v4583_v50 = vmul.f32 0.03125, %v4582_v49 }
0x21a4   : > { %v4584_v52 = vadd.f32 1e-05, %v4583_v50 }
0x21a6   : > { %7872 = vrsqrt.f32 %v4584_v52 }
0x21b0   : > { %v7873_v53 = vpop.eup %7872 }
0x21b1   : > { %v4586_v3 = vmul.f32 %v7873_v53, %v4578_v43 }
0x21b3   : > { %v4593_v55 = vmul.f32 %v6756_v29, %v4586_v3 }
0x21b5   : > { %v4600_v56 = vadd.f32 %v6757_v54, %v4593_v55 }
0x21b7   : > { %v4615_v57 = vpack.c.bf16 %v4600_v56, %v4600_v56 }
0x21b9   : > { %7340 = vmatmul.mubr.msk.bf16.vlgmr.msra.gmra.mrb[92].mxu0 %vm1666_vm3, %v4615_v57 }
0x21ba   : > { %7359 = vmatprep.mubr.msk.bf16.mxu0 %vm8470_vm0, %v8469_v1  ;;  %7356 = vmatpush3.bf16.msra.mxu0 %v7782_v21 }
0x21bb   : > { %7357 = vmatprep.subr.bf16.mxu0 %v8469_v1 }
0x21be   : > { %7358 = vmatpush3.bf16.msra.mxu0 %v7783_v22 }
0x21bf   : > { %7363 = vmatprep.subr.bf16.mxu0 %v8469_v1 }
0x228c   : > { %v4671_v60 = vpop.f32.mrb[92].mxu0 }
0x228d   : > { %v4672_v61 = vadd.f32 %v6758_v59, %v4671_v60  ;;  %v7341_v62 = vpop.f32.mrb[93].mxu0 }
0x228e   : > { %v4674_v63 = vpop.f32.mrb[94].mxu0 }
0x228f   : > { %v4677_v0 = vmax.f32 %v4672_v61, 0.0  ;;  %v7342_v2 = vpop.f32.mrb[95].mxu0 }
0x2291   : > { %v4678_v4 = vpack.c.bf16 %v4677_v0, %v4677_v0 }
0x2293   : > { %7352 = vmatmul.mubr.msk.bf16.vlgmr.msra.gmra.mrb[92].mxu1 %vm2375_vm9, %v4678_v4 }
0x2294   : > { %7371 = vmatprep.mubr.msk.bf16.mxu1 %vm8470_vm0, %v8469_v1 }
0x2366   : > { %v4746_v7 = vpop.f32.mrb[92].mxu1 }
0x2367   : > { %v4747_v9 = vadd.f32 %v6762_v5, %v4746_v7  ;;  %v7353_v10 = vpop.f32.mrb[93].mxu1 }
0x2368   : > { %v4749_v51 = vpop.f32.mrb[94].mxu1 }
0x2369   : > { %v7354_v12 = vpop.f32.mrb[95].mxu1  ;;  %v4754_v13 = vadd.f32 %v4747_v9, %v4600_v56 }
0x236b   : > { %v4755_v6 = vsel %vm1666_vm3, %v4754_v13, 0.0 }
0x236c   : > { %4756 = vadd.xlane.f32.xlu0 %v4755_v6 }
0x23f9   : > { %v4757_v16 = vpop.xlane.xlu0 %4756 }
0x23fa   : > { %v4758_v23 = vmul.f32 0.03125, %v4757_v16 }
0x23fc   : > { %v4759_v17 = vsub.f32 %v4754_v13, %v4758_v23 }
0x23fe   : > { %v4760_v18 = vmul.f32 %v4759_v17, %v4759_v17 }
0x2400   : > { %v4761_v20 = vsel %vm1666_vm3, %v4760_v18, 0.0 }
0x2401   : > { %4762 = vadd.xlane.f32.xlu1 %v4761_v20 }
0x248e   : > { %v4763_v15 = vpop.xlane.xlu1 %4762 }
0x248f   : > { %v4764_v24 = vmul.f32 0.03125, %v4763_v15 }
0x2491   : > { %v4765_v32 = vadd.f32 1e-05, %v4764_v24 }
0x2493   : > { %7874 = vrsqrt.f32 %v4765_v32 }
0x249d   : > { %v7875_v11 = vpop.eup %7874 }
0x249e   : > { %v4767_v26 = vmul.f32 %v7875_v11, %v4759_v17 }
0x24a0   : > { %v4774_v30 = vmul.f32 %v6768_v25, %v4767_v26 }
0x24a2   : > { %v9533_v19 = vadd.f32 %v6769_v28, %v4774_v30 }
0x24a4   : > { %v4796_v31 = vpack.c.bf16 %v9533_v19, %v9533_v19 }
0x24a6   : > { %7360 = vmatmul.mubr.msk.bf16.vlgmr.msra.gmra.mrb[96].mxu0 %vm1666_vm3, %v4796_v31 }
0x24a7   : > { %7365 = vmatprep.mubr.msk.bf16.mxu0 %vm8470_vm0, %v8469_v1 }
0x2579   : > { %v4852_v34 = vpop.f32.mrb[96].mxu0 }
0x257a   : > { %v4853_v35 = vadd.f32 %v6778_v33, %v4852_v34  ;;  %v7361_v36 = vpop.f32.mrb[97].mxu0 }
0x257b   : > { %v4855_v37 = vpop.f32.mrb[98].mxu0 }
0x257c   : > { %v4858_v40 = vmul.f32 0.35355338, %v4853_v35  ;;  %v9540_v41 = vpack.c.bf16 %v4853_v35, %v4853_v35  ;;  %v7362_v42 = vpop.f32.mrb[99].mxu0 }
0x257e   : > { %4974 = vrot.lane.b32.xlu1 %v9540_v41, %s9928_s6  ;;  %4862 = vrot.lane.b32.xlu0 %v9540_v41, %s9929_s8  ;;  %v4859_v43 = vpack.c.bf16 %v4858_v40, %v4858_v40 }
0x2582   : > { %5089 = vrot.lane.b32.xlu0 %v9540_v41, %s9930_s9  ;;  %4972 = vrot.lane.b32.xlu1 %v4859_v43, %s9931_s11 }
0x2586   : > { %5204 = vrot.lane.b32.xlu0 %v9540_v41, %s9932_s0  ;;  %5087 = vrot.lane.b32.xlu1 %v4859_v43, %s9933_s12 }
0x258a   : > { %5202 = vrot.lane.b32.xlu1 %v4859_v43, %s9934_s13 }
0x25f0   : > { %v4863_v44 = vpop.permute.xlu0 %4862  ;;  %v4975_v46 = vpop.permute.xlu1 %4974 }
0x25f1   : > { %v4868_v45 = vsel %vm1716_vm5, %v4863_v44, 0  ;;  %v4980_v47 = vsel %vm1716_vm5, %v4975_v46, 0 }
0x25f2   : > { %7364 = vmatpush3.bf16.xpose.msra.mxu0 %v4868_v45 }
0x25f3   : > { %7375 = vmatprep.subr.bf16.mxu0 %v8469_v1 }
0x25f4   : > { %v5090_v48 = vpop.permute.xlu0 %5089  ;;  %v4973_v39 = vpop.permute.xlu1 %4972 }
0x25f5   : > { %v5095_v49 = vsel %vm1716_vm5, %v5090_v48, 0 }
0x25f8   : > { %v5205_v50 = vpop.permute.xlu0 %5204  ;;  %v5088_v52 = vpop.permute.xlu1 %5087 }
0x25f9   : > { %7366 = vmatmul.mubr.msk.bf16.vlgmr.msra.gmra.mrb[100].mxu0 %vm1716_vm5, %v4859_v43  ;;  %v5210_v53 = vsel %vm1716_vm5, %v5205_v50, 0 }
0x25fa   : > { %7376 = vmatpush3.bf16.xpose.msra.mxu0 %v4980_v47  ;;  %7377 = vmatprep.mubr.msk.bf16.mxu0 %vm8470_vm0, %v8469_v1 }
0x25fb   : > { %7387 = vmatprep.subr.bf16.mxu0 %v8469_v1 }
0x25fc   : > { %v5203_v29 = vpop.permute.xlu1 %5202 }
0x2601   : > { %7378 = vmatmul.mubr.msk.bf16.vlgmr.msra.gmra.mrb[104].mxu0 %vm1716_vm5, %v4973_v39 }
0x2602   : > { %7388 = vmatpush3.bf16.xpose.msra.mxu0 %v5095_v49  ;;  %7389 = vmatprep.mubr.msk.bf16.mxu0 %vm8470_vm0, %v8469_v1 }
0x2603   : > { %7399 = vmatprep.subr.bf16.mxu0 %v8469_v1 }
0x2609   : > { %7390 = vmatmul.mubr.msk.bf16.vlgmr.msra.gmra.mrb[108].mxu0 %vm1716_vm5, %v5088_v52 }
0x260a   : > { %7400 = vmatpush3.bf16.xpose.msra.mxu0 %v5210_v53  ;;  %7401 = vmatprep.mubr.msk.bf16.mxu0 %vm8470_vm0, %v8469_v1 }
0x260b   : > { %7411 = vmatprep.subr.bf16.mxu0 %v8469_v1 }
0x2611   : > { %7402 = vmatmul.mubr.msk.bf16.vlgmr.msra.gmra.mrb[112].mxu0 %vm1716_vm5, %v5203_v29 }
0x2612   : > { %7415 = vmatprep.mubr.msk.bf16.mxu0 %vm8470_vm0, %v8469_v1 }
0x26cc   : > { %v4904_v3 = vpop.f32.mrb[100].mxu0 }
0x26cd   : > { %v4905_v54 = vadd.f32 %v4904_v3, %v9335_v14  ;;  %v7367_v55 = vpop.f32.mrb[101].mxu0 }
0x26ce   : > { %v4907_v56 = vpop.f32.mrb[102].mxu0 }
0x26cf   : > { %v7368_v57 = vpop.f32.mrb[103].mxu0  ;;  %v4910_v27 = vsel %vm1716_vm5, %v4905_v54, -inf }
0x26d0   : > { %4911 = vmax.xlane.f32.xlu0 %v4910_v27 }
0x26d4   : > { %v5016_v58 = vpop.f32.mrb[104].mxu0 }
0x26d5   : > { %v5017_v59 = vadd.f32 %v5016_v58, %v9335_v14  ;;  %v7379_v60 = vpop.f32.mrb[105].mxu0 }
0x26d6   : > { %v5019_v61 = vpop.f32.mrb[106].mxu0 }
0x26d7   : > { %v7380_v62 = vpop.f32.mrb[107].mxu0  ;;  %v5022_v63 = vsel %vm1716_vm5, %v5017_v59, -inf }
0x26d8   : > { %5023 = vmax.xlane.f32.xlu1 %v5022_v63 }
0x26dc   : > { %v5131_v0 = vpop.f32.mrb[108].mxu0 }
0x26dd   : > { %v5132_v2 = vadd.f32 %v5131_v0, %v9335_v14  ;;  %v7391_v4 = vpop.f32.mrb[109].mxu0 }
0x26de   : > { %v5134_v5 = vpop.f32.mrb[110].mxu0 }
0x26df   : > { %v7392_v7 = vpop.f32.mrb[111].mxu0  ;;  %v5137_v9 = vsel %vm1716_vm5, %v5132_v2, -inf }
0x26e0   : > { %5138 = vmax.xlane.f32.xlu0 %v5137_v9  ;;  %v7784_v7 = vld [vmem:[%s9943_s2 + $0x10] sm:$0xff]   ;;  %v7785_v9 = vld [vmem:[%s9943_s2 + $0x18] sm:$0xff]  }
0x26e1   : > { %7412 = vmatpush3.bf16.msra.mxu0 %v7784_v7 }
0x26e2   : > { %7413 = vmatprep.subr.bf16.mxu0 %v8469_v1 }
0x26e4   : > { %v5246_v10 = vpop.f32.mrb[112].mxu0 }
0x26e5   : > { %v5247_v51 = vadd.f32 %v5246_v10, %v9335_v14  ;;  %v7403_v12 = vpop.f32.mrb[113].mxu0  ;;  %7414 = vmatpush3.bf16.msra.mxu0 %v7785_v9 }
0x26e6   : > { %v5249_v13 = vpop.f32.mrb[114].mxu0  ;;  %7427 = vmatprep.subr.bf16.mxu0 %v8469_v1 }
0x26e7   : > { %v7404_v6 = vpop.f32.mrb[115].mxu0  ;;  %v5252_v16 = vsel %vm1716_vm5, %v5247_v51, -inf }
0x26e8   : > { %5253 = vmax.xlane.f32.xlu0 %v5252_v16 }
0x275d   : > { %v4912_v23 = vpop.xlane.xlu0 %4911 }
0x275e   : > { %v4913_v17 = vsub.f32 %v4905_v54, %v4912_v23 }
0x2760   : > { %v4914_v18 = vmul.f32 1.442695, %v4913_v17 }
0x2762   : > { %7876 = vpow2.f32 %v4914_v18 }
0x2765   : > { %v5024_v20 = vpop.xlane.xlu1 %5023 }
0x2766   : > { %v5025_v21 = vsub.f32 %v5017_v59, %v5024_v20 }
0x2768   : > { %v5026_v22 = vmul.f32 1.442695, %v5025_v21 }
0x276a   : > { %7878 = vpow2.f32 %v5026_v22 }
0x276c   : > { %v7877_v15 = vpop.eup %7876 }
0x276d   : > { %v4916_v24 = vsel %vm1716_vm5, %v7877_v15, 0.0  ;;  %v5139_v32 = vpop.xlane.xlu0 %5138 }
0x276e   : > { %4917 = vadd.xlane.f32.xlu1 %v4916_v24  ;;  %v5140_v33 = vsub.f32 %v5132_v2, %v5139_v32  ;;  %v7787_v32 = vld [vmem:[%s9944_s4 + $0x18] sm:$0xff]  }
0x2770   : > { %v5141_v34 = vmul.f32 1.442695, %v5140_v33 }
0x2774   : > { %v7879_v14 = vpop.eup %7878 }
0x2775   : > { %v5254_v11 = vpop.xlane.xlu0 %5253  ;;  %v5028_v25 = vsel %vm1716_vm5, %v7879_v14, 0.0 }
0x2776   : > { %v5255_v26 = vsub.f32 %v5247_v51, %v5254_v11  ;;  %5029 = vadd.xlane.f32.xlu0 %v5028_v25 }
0x2778   : > { %v5256_v28 = vmul.f32 1.442695, %v5255_v26 }
0x277a   : > { %7880 = vpow2.f32 %v5256_v28 }
0x277b   : > { %7882 = vpow2.f32 %v5141_v34 }
0x277f   : > { %4922 = vrot.lane.b32.xlu1 %v9540_v41, %s9935_s14 }
0x2784   : > { %v7881_v30 = vpop.eup %7880 }
0x2785   : > { %v5258_v31 = vsel %vm1716_vm5, %v7881_v30, 0.0  ;;  %v7883_v35 = vpop.eup %7882 }
0x2786   : > { %5259 = vadd.xlane.f32.xlu0 %v5258_v31  ;;  %v5143_v36 = vsel %vm1716_vm5, %v7883_v35, 0.0 }
0x279c   : > { %5034 = vrot.lane.b32.xlu0 %v9540_v41, %s9936_s17 }
0x27a3   : > { %5144 = vadd.xlane.f32.xlu1 %v5143_v36 }
0x27b4   : > { %5149 = vrot.lane.b32.xlu1 %v9540_v41, %s9937_s19 }
0x27b8   : > { %5264 = vrot.lane.b32.xlu1 %v9540_v41, %s9938_s20 }
0x27fb   : > { %v4918_v37 = vpop.xlane.xlu1 %4917 }
0x27fc   : > { %7884 = vrcp.f32 %v4918_v37 }
0x27ff   : > { %v4923_v40 = vpop.permute.xlu1 %4922 }
0x2800   : > { %v4928_v42 = vsel %vm1562_vm1, %v4923_v40, 0 }
0x2801   : > { %7370 = vmatpush3.bf16.msra.mxu1 %v4928_v42 }
0x2802   : > { %7381 = vmatprep.subr.bf16.mxu1 %v8469_v1 }
0x2803   : > { %v5030_v44 = vpop.xlane.xlu0 %5029 }
0x2804   : > { %7886 = vrcp.f32 %v5030_v44 }
0x2806   : > { %v7885_v43 = vpop.eup %7884 }
0x2807   : > { %v4920_v45 = vmul.f32 %v7885_v43, %v7877_v15  ;;  %v7786_v15 = vld [vmem:[%s9944_s4 + $0x10] sm:$0xff]  }
0x2809   : > { %v4921_v46 = vpack.c.bf16 %v4920_v45, %v4920_v45  ;;  %v6808_v45 = vld [vmem:[#allocation15 + $0x1] ss:$0 sm:$0xff] }
0x280b   : > { %7372 = vmatmul.mubr.msk.bf16.vlgmr.msra.gmra.mrb[96].mxu1 %vm1716_vm5, %v4921_v46 }
0x280c   : > { %7383 = vmatprep.mubr.msk.bf16.mxu1 %vm8470_vm0, %v8469_v1 }
0x280e   : > { %v7887_v47 = vpop.eup %7886 }
0x280f   : > { %v5032_v48 = vmul.f32 %v7887_v47, %v7879_v14  ;;  %v6790_v14 = vld [vmem:[#allocation9 + $0x1] ss:$0 sm:$0xff] }
0x2810   : > { %v7788_v47 = vld [vmem:[%s9945_s7 + $0x10] sm:$0xff]  }
0x2811   : > { %v5033_v50 = vpack.c.bf16 %v5032_v48, %v5032_v48 }
0x2813   : > { %v5260_v41 = vpop.xlane.xlu0 %5259 }
0x2817   : > { %v5035_v39 = vpop.permute.xlu0 %5034 }
0x2818   : > { %v5040_v49 = vsel %vm1562_vm1, %v5035_v39, 0 }
0x2819   : > { %7382 = vmatpush3.bf16.msra.mxu1 %v5040_v49 }
0x281a   : > { %7393 = vmatprep.subr.bf16.mxu1 %v8469_v1 }
0x281c   : > { %7384 = vmatmul.mubr.msk.bf16.vlgmr.msra.gmra.mrb[100].mxu1 %vm1716_vm5, %v5033_v50 }
0x281d   : > { %7395 = vmatprep.mubr.msk.bf16.mxu1 %vm8470_vm0, %v8469_v1 }
0x2830   : > { %v5145_v52 = vpop.xlane.xlu1 %5144 }
0x2831   : > { %7888 = vrcp.f32 %v5145_v52  ;;  %v6794_v52 = vld [vmem:[#allocation11 + $0x1] ss:$0 sm:$0xff] }
0x2832   : > { %7890 = vrcp.f32 %v5260_v41  ;;  %v7789_v41 = vld [vmem:[%s9945_s7 + $0x18] sm:$0xff]  }
0x2834   : > { %v5150_v53 = vpop.permute.xlu1 %5149 }
0x2835   : > { %v5155_v29 = vsel %vm1562_vm1, %v5150_v53, 0 }
0x2836   : > { %7394 = vmatpush3.bf16.msra.mxu1 %v5155_v29  ;;  %v6795_v29 = vld [vmem:[#allocation12 + $0x1] ss:$0 sm:$0xff] }
0x2837   : > { %7405 = vmatprep.subr.bf16.mxu1 %v8469_v1 }
0x2838   : > { %v5265_v55 = vpop.permute.xlu1 %5264 }
0x2839   : > { %v5270_v27 = vsel %vm1562_vm1, %v5265_v55, 0 }
0x283b   : > { %v7889_v3 = vpop.eup %7888 }
0x283c   : > { %v5147_v54 = vmul.f32 %v7889_v3, %v7883_v35  ;;  %v7891_v57 = vpop.eup %7890 }
0x283d   : > { %v5262_v58 = vmul.f32 %v7891_v57, %v7881_v30  ;;  %v6804_v57 = vld [vmem:[#allocation14 + $0x1] ss:$0 sm:$0xff] }
0x283e   : > { %v5148_v56 = vpack.c.bf16 %v5147_v54, %v5147_v54 }
0x283f   : > { %v5263_v59 = vpack.c.bf16 %v5262_v58, %v5262_v58 }
0x2840   : > { %7396 = vmatmul.mubr.msk.bf16.vlgmr.msra.gmra.mrb[104].mxu1 %vm1716_vm5, %v5148_v56 }
0x2841   : > { %7406 = vmatpush3.bf16.msra.mxu1 %v5270_v27  ;;  %7407 = vmatprep.mubr.msk.bf16.mxu1 %vm8470_vm0, %v8469_v1 }
0x2842   : > { %7419 = vmatprep.subr.bf16.mxu1 %v8469_v1 }
0x2848   : > { %7408 = vmatmul.mubr.msk.bf16.vlgmr.msra.gmra.mrb[108].mxu1 %vm1716_vm5, %v5263_v59 }
0x2849   : > { %7423 = vmatprep.mubr.msk.bf16.mxu1 %vm8470_vm0, %v8469_v1  ;;  %7420 = vmatpush3.bf16.msra.mxu1 %v7788_v47 }
0x284a   : > { %7421 = vmatprep.subr.bf16.mxu1 %v8469_v1 }
0x284d   : > { %7422 = vmatpush3.bf16.msra.mxu1 %v7789_v41 }
0x284e   : > { %7435 = vmatprep.subr.bf16.mxu1 %v8469_v1 }
0x28de   : > { %v4964_v60 = vpop.f32.mrb[96].mxu1 }
0x28df   : > { %4970 = vst.msk [vmem:[#allocation2] sm:$0xff] %vm1716_vm5, %v4964_v60  ;;  %v7373_v61 = vpop.f32.mrb[97].mxu1 }
0x28e0   : > { %v4967_v62 = vpop.f32.mrb[98].mxu1 }
0x28e1   : > { %v7374_v63 = vpop.f32.mrb[99].mxu1 }
0x28ef   : > { %v5076_v0 = vpop.f32.mrb[100].mxu1 }
0x28f0   : > { %5083 = vrot.lane.b32.xlu0 %v5076_v0, %s9939_s21  ;;  %v7385_v2 = vpop.f32.mrb[101].mxu1 }
0x28f1   : > { %v5079_v4 = vpop.f32.mrb[102].mxu1 }
0x28f2   : > { %v7386_v5 = vpop.f32.mrb[103].mxu1 }
0x2913   : > { %v5191_v10 = vpop.f32.mrb[104].mxu1 }
0x2914   : > { %5198 = vrot.lane.b32.xlu1 %v5191_v10, %s9940_s24  ;;  %v7397_v51 = vpop.f32.mrb[105].mxu1 }
0x2915   : > { %v5194_v12 = vpop.f32.mrb[106].mxu1 }
0x2916   : > { %v7398_v13 = vpop.f32.mrb[107].mxu1 }
0x291b   : > { %v5306_v6 = vpop.f32.mrb[108].mxu1 }
0x291c   : > { %5313 = vrot.lane.b32.xlu0 %v5306_v6, %s9941_s27  ;;  %v7409_v16 = vpop.f32.mrb[109].mxu1 }
0x291d   : > { %v5309_v23 = vpop.f32.mrb[110].mxu1 }
0x291e   : > { %v7410_v17 = vpop.f32.mrb[111].mxu1 }
0x2962   : > { %v5084_v18 = vpop.permute.xlu0 %5083 }
0x2963   : > { %5086 = vst.msk [vmem:[#allocation2] sm:$0xff] %vm1939_vm6, %v5084_v18 }
0x2986   : > { %v5199_v20 = vpop.permute.xlu1 %5198 }
0x2987   : > { %5201 = vst.msk [vmem:[#allocation2] sm:$0xff] %vm2055_vm7, %v5199_v20 }
0x298e   : > { %v5314_v21 = vpop.permute.xlu0 %5313 }
0x298f   : > { %5316 = vst.msk [vmem:[#allocation2] sm:$0xff] %vm2171_vm8, %v5314_v21 }
0x2996   : > { %v5317_v22 = vld [vmem:[#allocation2] sm:$0xff] }
0x2997   : > { %v5318_v24 = vpack.c.bf16 %v5317_v22, %v5317_v22 }
0x2999   : > { %7416 = vmatmul.mubr.msk.bf16.vlgmr.msra.gmra.mrb[116].mxu0 %vm1666_vm3, %v5318_v24 }
0x299a   : > { %7428 = vmatpush3.bf16.msra.mxu0 %v7786_v15  ;;  %7431 = vmatprep.mubr.msk.bf16.mxu0 %vm8470_vm0, %v8469_v1 }
0x299b   : > { %7429 = vmatprep.subr.bf16.mxu0 %v8469_v1 }
0x299e   : > { %7430 = vmatpush3.bf16.msra.mxu0 %v7787_v32 }
0x299f   : > { %7441 = vmatprep.subr.bf16.mxu0 %v8469_v1 }
0x29a1   : > { %7432 = vmatmul.mubr.msk.bf16.vlgmr.msra.gmra.mrb[120].mxu0 %vm1666_vm3, %v9402_v8 }
0x29a2   : > { %7443 = vmatprep.mubr.msk.bf16.mxu0 %vm8470_vm0, %v8469_v1 }
0x2a6c   : > { %v5374_v11 = vpop.f32.mrb[116].mxu0 }
0x2a6d   : > { %v5375_v25 = vadd.f32 %v6790_v14, %v5374_v11  ;;  %v7417_v26 = vpop.f32.mrb[117].mxu0 }
0x2a6e   : > { %v5377_v28 = vpop.f32.mrb[118].mxu0 }
0x2a6f   : > { %v5384_v30 = vadd.f32 %v5375_v25, %v9533_v19  ;;  %v7418_v31 = vpop.f32.mrb[119].mxu0 }
0x2a71   : > { %v5385_v33 = vsel %vm1666_vm3, %v5384_v30, 0.0 }
0x2a72   : > { %5386 = vadd.xlane.f32.xlu1 %v5385_v33 }
0x2a74   : > { %v5547_v34 = vpop.f32.mrb[120].mxu0 }
0x2a75   : > { %v7433_v35 = vpop.f32.mrb[121].mxu0  ;;  %v5548_v46 = vadd.f32 %v6808_v45, %v5547_v34 }
0x2a76   : > { %v5550_v36 = vpop.f32.mrb[122].mxu0 }
0x2a77   : > { %v7434_v8 = vpop.f32.mrb[123].mxu0  ;;  %v9638_v19 = vpack.c.bf16 %v5548_v46, %v5548_v46 }
0x2a79   : > { %v5560_v56 = vsel %vm1716_vm5, %v9638_v19, 0 }
0x2aff   : > { %v5387_v37 = vpop.xlane.xlu1 %5386 }
0x2b00   : > { %v5388_v40 = vmul.f32 0.03125, %v5387_v37 }
0x2b02   : > { %v5389_v42 = vsub.f32 %v5384_v30, %v5388_v40 }
0x2b04   : > { %v5390_v43 = vmul.f32 %v5389_v42, %v5389_v42 }
0x2b06   : > { %v5391_v44 = vsel %vm1666_vm3, %v5390_v43, 0.0 }
0x2b07   : > { %5392 = vadd.xlane.f32.xlu0 %v5391_v44 }
0x2b1d   : > { %5667 = vrot.lane.b32.xlu0 %v9638_v19, %s9931_s11 }
0x2b94   : > { %v5393_v48 = vpop.xlane.xlu0 %5392 }
0x2b95   : > { %v5394_v39 = vmul.f32 0.03125, %v5393_v48 }
0x2b97   : > { %v5395_v49 = vadd.f32 1e-05, %v5394_v39 }
0x2b98   : > { %v5668_v63 = vpop.permute.xlu0 %5667 }
0x2b99   : > { %7892 = vrsqrt.f32 %v5395_v49  ;;  %v5673_v2 = vsel %vm1716_vm5, %v5668_v63, 0 }
0x2ba3   : > { %v7893_v50 = vpop.eup %7892 }
0x2ba4   : > { %v5397_v53 = vmul.f32 %v7893_v50, %v5389_v42 }
0x2ba6   : > { %v5404_v3 = vmul.f32 %v6794_v52, %v5397_v53 }
0x2ba8   : > { %v9646_v54 = vadd.f32 %v6795_v29, %v5404_v3 }
0x2baa   : > { %v5433_v55 = vpack.c.bf16 %v9646_v54, %v9646_v54 }
0x2bac   : > { %7424 = vmatmul.mubr.msk.bf16.vlgmr.msra.gmra.mrb[112].mxu1 %vm1666_vm3, %v5433_v55 }
0x2bad   : > { %7436 = vmatpush3.bf16.xpose.msra.mxu1 %v5560_v56  ;;  %7437 = vmatprep.mubr.msk.bf16.mxu1 %vm8470_vm0, %v8469_v1 }
0x2bae   : > { %7447 = vmatprep.subr.bf16.mxu1 %v8469_v1 }
0x2c7f   : > { %v5489_v27 = vpop.f32.mrb[112].mxu1 }
0x2c80   : > { %v5490_v58 = vadd.f32 %v6804_v57, %v5489_v27  ;;  %v7425_v59 = vpop.f32.mrb[113].mxu1 }
0x2c81   : > { %v5492_v60 = vpop.f32.mrb[114].mxu1 }
0x2c82   : > { %v5553_v61 = vmul.f32 0.35355338, %v5490_v58  ;;  %v7426_v62 = vpop.f32.mrb[115].mxu1 }
0x2c84   : > { %v5554_v0 = vpack.c.bf16 %v5553_v61, %v5553_v61 }
0x2c86   : > { %5665 = vrot.lane.b32.xlu1 %v5554_v0, %s9931_s11  ;;  %5780 = vrot.lane.b32.xlu0 %v5554_v0, %s9933_s12 }
0x2c87   : > { %7438 = vmatmul.mubr.msk.bf16.vlgmr.msra.gmra.mrb[116].mxu1 %vm1716_vm5, %v5554_v0 }
0x2c88   : > { %7448 = vmatpush3.bf16.xpose.msra.mxu1 %v5673_v2  ;;  %7449 = vmatprep.mubr.msk.bf16.mxu1 %vm8470_vm0, %v8469_v1 }
0x2c89   : > { %7459 = vmatprep.subr.bf16.mxu1 %v8469_v1 }
0x2c8a   : > { %5782 = vrot.lane.b32.xlu1 %v9638_v19, %s9933_s12  ;;  %5895 = vrot.lane.b32.xlu0 %v5554_v0, %s9934_s13 }
0x2c8e   : > { %5897 = vrot.lane.b32.xlu1 %v9638_v19, %s9934_s13 }
0x2cf8   : > { %v5666_v4 = vpop.permute.xlu1 %5665  ;;  %v5781_v10 = vpop.permute.xlu0 %5780 }
0x2cf9   : > { %7450 = vmatmul.mubr.msk.bf16.vlgmr.msra.gmra.mrb[120].mxu1 %vm1716_vm5, %v5666_v4 }
0x2cfa   : > { %7461 = vmatprep.mubr.msk.bf16.mxu1 %vm8470_vm0, %v8469_v1 }
0x2cfc   : > { %v5783_v5 = vpop.permute.xlu1 %5782  ;;  %v5896_v12 = vpop.permute.xlu0 %5895 }
0x2cfd   : > { %v5788_v7 = vsel %vm1716_vm5, %v5783_v5, 0 }
0x2cfe   : > { %7460 = vmatpush3.bf16.xpose.msra.mxu1 %v5788_v7 }
0x2cff   : > { %7471 = vmatprep.subr.bf16.mxu1 %v8469_v1 }
0x2d00   : > { %v5898_v9 = vpop.permute.xlu1 %5897 }
0x2d01   : > { %v5903_v51 = vsel %vm1716_vm5, %v5898_v9, 0 }
0x2d05   : > { %7462 = vmatmul.mubr.msk.bf16.vlgmr.msra.gmra.mrb[124].mxu1 %vm1716_vm5, %v5781_v10 }
0x2d06   : > { %7472 = vmatpush3.bf16.xpose.msra.mxu1 %v5903_v51  ;;  %7473 = vmatprep.mubr.msk.bf16.mxu1 %vm8470_vm0, %v8469_v1 }
0x2d07   : > { %7483 = vmatprep.subr.bf16.mxu1 %v8469_v1 }
0x2d0d   : > { %7474 = vmatmul.mubr.msk.bf16.vlgmr.msra.gmra.mrb[128].mxu1 %vm1716_vm5, %v5896_v12 }
0x2d0e   : > { %7487 = vmatprep.mubr.msk.bf16.mxu1 %vm8470_vm0, %v8469_v1 }
0x2d5a   : > { %v5596_v13 = vpop.f32.mrb[116].mxu1 }
0x2d5b   : > { %v5597_v6 = vadd.f32 %v5596_v13, %v9072_v38  ;;  %v7439_v16 = vpop.f32.mrb[117].mxu1 }
0x2d5c   : > { %v5599_v23 = vpop.f32.mrb[118].mxu1 }
0x2d5d   : > { %v7440_v17 = vpop.f32.mrb[119].mxu1  ;;  %v5602_v18 = vsel %vm1716_vm5, %v5597_v6, -inf }
0x2d5e   : > { %5603 = vmax.xlane.f32.xlu1 %v5602_v18 }
0x2dcc   : > { %v5709_v20 = vpop.f32.mrb[120].mxu1 }
0x2dcd   : > { %v5710_v21 = vadd.f32 %v5709_v20, %v9072_v38  ;;  %v7451_v22 = vpop.f32.mrb[121].mxu1 }
0x2dce   : > { %v5712_v15 = vpop.f32.mrb[122].mxu1 }
0x2dcf   : > { %v7452_v24 = vpop.f32.mrb[123].mxu1  ;;  %v5715_v32 = vsel %vm1716_vm5, %v5710_v21, -inf }
0x2dd0   : > { %5716 = vmax.xlane.f32.xlu0 %v5715_v32 }
0x2dd8   : > { %v5824_v14 = vpop.f32.mrb[124].mxu1 }
0x2dd9   : > { %v5825_v11 = vadd.f32 %v5824_v14, %v9072_v38  ;;  %v7463_v25 = vpop.f32.mrb[125].mxu1 }
0x2dda   : > { %v5827_v26 = vpop.f32.mrb[126].mxu1  ;;  %v7790_v25 = vld [vmem:[#allocation17 + $0x10] sm:$0xff]  }
0x2ddb   : > { %v7464_v28 = vpop.f32.mrb[127].mxu1  ;;  %v5830_v30 = vsel %vm1716_vm5, %v5825_v11, -inf  ;;  %7484 = vmatpush3.bf16.msra.mxu1 %v7790_v25  ;;  %v7791_v26 = vld [vmem:[#allocation17 + $0x18] sm:$0xff]  }
0x2ddc   : > { %5831 = vmax.xlane.f32.xlu0 %v5830_v30  ;;  %7485 = vmatprep.subr.bf16.mxu1 %v8469_v1 }
0x2ddf   : > { %7486 = vmatpush3.bf16.msra.mxu1 %v7791_v26 }
0x2de0   : > { %v5939_v31 = vpop.f32.mrb[128].mxu1  ;;  %7499 = vmatprep.subr.bf16.mxu1 %v8469_v1 }
0x2de1   : > { %v5940_v33 = vadd.f32 %v5939_v31, %v9072_v38  ;;  %v7475_v34 = vpop.f32.mrb[129].mxu1 }
0x2de2   : > { %v5942_v35 = vpop.f32.mrb[130].mxu1 }
0x2de3   : > { %v7476_v36 = vpop.f32.mrb[131].mxu1  ;;  %v5945_v8 = vsel %vm1716_vm5, %v5940_v33, -inf }
0x2de4   : > { %5946 = vmax.xlane.f32.xlu1 %v5945_v8 }
0x2deb   : > { %v5604_v37 = vpop.xlane.xlu1 %5603 }
0x2dec   : > { %v5605_v40 = vsub.f32 %v5597_v6, %v5604_v37 }
0x2dee   : > { %v5606_v42 = vmul.f32 1.442695, %v5605_v40 }
0x2df0   : > { %7894 = vpow2.f32 %v5606_v42 }
0x2dfa   : > { %v7895_v43 = vpop.eup %7894 }
0x2dfb   : > { %v5608_v44 = vsel %vm1716_vm5, %v7895_v43, 0.0 }
0x2dfc   : > { %5609 = vadd.xlane.f32.xlu0 %v5608_v44 }
0x2e5d   : > { %v5717_v45 = vpop.xlane.xlu0 %5716 }
0x2e5e   : > { %v5718_v46 = vsub.f32 %v5710_v21, %v5717_v45  ;;  %v6820_v45 = vld [vmem:[#allocation18 + $0x1] ss:$0 sm:$0xff] }
0x2e60   : > { %v5719_v47 = vmul.f32 1.442695, %v5718_v46 }
0x2e62   : > { %7896 = vpow2.f32 %v5719_v47 }
0x2e69   : > { %v5832_v41 = vpop.xlane.xlu0 %5831 }
0x2e6a   : > { %v5833_v38 = vsub.f32 %v5825_v11, %v5832_v41 }
0x2e6c   : > { %v7897_v48 = vpop.eup %7896  ;;  %v5834_v39 = vmul.f32 1.442695, %v5833_v38 }
0x2e6d   : > { %v5721_v49 = vsel %vm1716_vm5, %v7897_v48, 0.0 }
0x2e6e   : > { %7898 = vpow2.f32 %v5834_v39  ;;  %5722 = vadd.xlane.f32.xlu1 %v5721_v49 }
0x2e71   : > { %v5947_v53 = vpop.xlane.xlu1 %5946 }
0x2e72   : > { %v5948_v29 = vsub.f32 %v5940_v33, %v5947_v53 }
0x2e74   : > { %v5949_v3 = vmul.f32 1.442695, %v5948_v29 }
0x2e76   : > { %7900 = vpow2.f32 %v5949_v3 }
0x2e78   : > { %v7899_v50 = vpop.eup %7898 }
0x2e79   : > { %v5836_v52 = vsel %vm1716_vm5, %v7899_v50, 0.0 }
0x2e7a   : > { %5837 = vadd.xlane.f32.xlu0 %v5836_v52 }
0x2e7f   : > { %5727 = vrot.lane.b32.xlu1 %v9638_v19, %s9928_s6 }
0x2e80   : > { %v7901_v55 = vpop.eup %7900 }
0x2e81   : > { %v5951_v56 = vsel %vm1716_vm5, %v7901_v55, 0.0 }
0x2e89   : > { %v5610_v57 = vpop.xlane.xlu0 %5609 }
0x2e8a   : > { %7902 = vrcp.f32 %v5610_v57  ;;  %v7794_v57 = vld [vmem:[%s9947_s5 + $0x20] sm:$0xff]  }
0x2e90   : > { %5615 = vrot.lane.b32.xlu0 %v9638_v19, %s9929_s8 }
0x2e94   : > { %5957 = vrot.lane.b32.xlu0 %v9638_v19, %s9932_s0  ;;  %v7903_v58 = vpop.eup %7902 }
0x2e95   : > { %v5612_v60 = vmul.f32 %v7903_v58, %v7895_v43 }
0x2e97   : > { %v5613_v0 = vpack.c.bf16 %v5612_v60, %v5612_v60 }
0x2ea3   : > { %5952 = vadd.xlane.f32.xlu1 %v5951_v56  ;;  %v7793_v56 = vld [vmem:[%s9946_s1 + $0x18] sm:$0xff]  }
0x2eb4   : > { %5842 = vrot.lane.b32.xlu1 %v9638_v19, %s9930_s9  ;;  %s1523_s9 = scalar_lea.vmem %s8703_s3, %s9007_s28 }
0x2efb   : > { %v5723_v27 = vpop.xlane.xlu1 %5722 }
0x2efc   : > { %7904 = vrcp.f32 %v5723_v27 }
0x2eff   : > { %v5728_v63 = vpop.permute.xlu1 %5727 }
0x2f00   : > { %v5733_v4 = vsel %vm1562_vm1, %v5728_v63, 0  ;;  %v6825_v63 = vld [vmem:[#allocation21 + $0x1] ss:$0 sm:$0xff] }
0x2f06   : > { %v7905_v2 = vpop.eup %7904 }
0x2f07   : > { %v5838_v59 = vpop.xlane.xlu0 %5837  ;;  %v5725_v19 = vmul.f32 %v7905_v2, %v7897_v48 }
0x2f08   : > { %7906 = vrcp.f32 %v5838_v59 }
0x2f09   : > { %v5726_v5 = vpack.c.bf16 %v5725_v19, %v5725_v19  ;;  %v7796_v19 = vld [vmem:[%s9947_s5 + $0x30] sm:$0xff]  }
0x2f0b   : > { %v5616_v61 = vpop.permute.xlu0 %5615 }
0x2f0c   : > { %v5621_v62 = vsel %vm1562_vm1, %v5616_v61, 0  ;;  %v6824_v61 = vld [vmem:[#allocation20 + $0x1] ss:$0 sm:$0xff] }
0x2f0d   : > { %7442 = vmatpush3.bf16.msra.mxu0 %v5621_v62 }
0x2f0e   : > { %7453 = vmatprep.subr.bf16.mxu0 %v8469_v1 }
0x2f0f   : > { %v5958_v13 = vpop.permute.xlu0 %5957 }
0x2f10   : > { %7444 = vmatmul.mubr.msk.bf16.vlgmr.msra.gmra.mrb[124].mxu0 %vm1716_vm5, %v5613_v0  ;;  %v5963_v16 = vsel %vm1562_vm1, %v5958_v13, 0 }
0x2f11   : > { %7454 = vmatpush3.bf16.msra.mxu0 %v5733_v4  ;;  %7455 = vmatprep.mubr.msk.bf16.mxu0 %vm8470_vm0, %v8469_v1 }
0x2f12   : > { %7465 = vmatprep.subr.bf16.mxu0 %v8469_v1  ;;  %v7907_v7 = vpop.eup %7906 }
0x2f13   : > { %v5840_v10 = vmul.f32 %v7907_v7, %v7899_v50  ;;  %v6838_v7 = vld [vmem:[#allocation23 + $0x1] ss:$0 sm:$0xff] }
0x2f15   : > { %v5841_v6 = vpack.c.bf16 %v5840_v10, %v5840_v10 }
0x2f18   : > { %7456 = vmatmul.mubr.msk.bf16.vlgmr.msra.gmra.mrb[128].mxu0 %vm1716_vm5, %v5726_v5  ;;  %v7797_v5 = vld [vmem:[%s9947_s5 + $0x38] sm:$0xff]  }
0x2f19   : > { %7467 = vmatprep.mubr.msk.bf16.mxu0 %vm8470_vm0, %v8469_v1 }
0x2f30   : > { %v5953_v9 = vpop.xlane.xlu1 %5952 }
0x2f31   : > { %7908 = vrcp.f32 %v5953_v9 }
0x2f34   : > { %v5843_v51 = vpop.permute.xlu1 %5842 }
0x2f35   : > { %v5848_v12 = vsel %vm1562_vm1, %v5843_v51, 0 }
0x2f36   : > { %7466 = vmatpush3.bf16.msra.mxu0 %v5848_v12 }
0x2f37   : > { %7477 = vmatprep.subr.bf16.mxu0 %v8469_v1 }
0x2f39   : > { %7468 = vmatmul.mubr.msk.bf16.vlgmr.msra.gmra.mrb[132].mxu0 %vm1716_vm5, %v5841_v6 }
0x2f3a   : > { %7478 = vmatpush3.bf16.msra.mxu0 %v5963_v16  ;;  %7479 = vmatprep.mubr.msk.bf16.mxu0 %vm8470_vm0, %v8469_v1 }
0x2f3b   : > { %v7909_v23 = vpop.eup %7908  ;;  %7491 = vmatprep.subr.bf16.mxu0 %v8469_v1 }
0x2f3c   : > { %v5955_v17 = vmul.f32 %v7909_v23, %v7901_v55  ;;  %v7792_v55 = vld [vmem:[%s9946_s1 + $0x10] sm:$0xff]   ;;  %v6842_v23 = vld [vmem:[#allocation24 + $0x1] ss:$0 sm:$0xff] }
0x2f3e   : > { %v5956_v18 = vpack.c.bf16 %v5955_v17, %v5955_v17 }
0x2f41   : > { %7480 = vmatmul.mubr.msk.bf16.vlgmr.msra.gmra.mrb[136].mxu0 %vm1716_vm5, %v5956_v18 }
0x2f42   : > { %7495 = vmatprep.mubr.msk.bf16.mxu0 %vm8470_vm0, %v8469_v1  ;;  %7492 = vmatpush3.bf16.msra.mxu0 %v7792_v55 }
0x2f43   : > { %7493 = vmatprep.subr.bf16.mxu0 %v8469_v1 }
0x2f46   : > { %7494 = vmatpush3.bf16.msra.mxu0 %v7793_v56 }
0x2fe3   : > { %v5657_v20 = vpop.f32.mrb[124].mxu0 }
0x2fe4   : > { %5663 = vst.msk [vmem:[#allocation2] sm:$0xff] %vm1716_vm5, %v5657_v20  ;;  %v7445_v21 = vpop.f32.mrb[125].mxu0 }
0x2fe5   : > { %v5660_v22 = vpop.f32.mrb[126].mxu0 }
0x2fe6   : > { %v7446_v15 = vpop.f32.mrb[127].mxu0 }
0x2feb   : > { %v5769_v24 = vpop.f32.mrb[128].mxu0 }
0x2fec   : > { %5776 = vrot.lane.b32.xlu1 %v5769_v24, %s9939_s21  ;;  %v7457_v32 = vpop.f32.mrb[129].mxu0 }
0x2fed   : > { %v5772_v14 = vpop.f32.mrb[130].mxu0 }
0x2fee   : > { %v7458_v11 = vpop.f32.mrb[131].mxu0 }
0x300c   : > { %v5884_v28 = vpop.f32.mrb[132].mxu0 }
0x300d   : > { %5891 = vrot.lane.b32.xlu0 %v5884_v28, %s9940_s24  ;;  %v7469_v30 = vpop.f32.mrb[133].mxu0 }
0x300e   : > { %v5887_v31 = vpop.f32.mrb[134].mxu0 }
0x300f   : > { %v7470_v33 = vpop.f32.mrb[135].mxu0 }
0x3010   : > { %v6848_v33 = vld [vmem:[#allocation26 + $0x1] ss:$0 sm:$0xff] }
0x3014   : > { %v5999_v34 = vpop.f32.mrb[136].mxu0 }
0x3015   : > { %6006 = vrot.lane.b32.xlu1 %v5999_v34, %s9941_s27  ;;  %v7481_v35 = vpop.f32.mrb[137].mxu0 }
0x3016   : > { %v6002_v36 = vpop.f32.mrb[138].mxu0  ;;  %v6849_v35 = vld [vmem:[#allocation27 + $0x1] ss:$0 sm:$0xff] }
0x3017   : > { %v7482_v8 = vpop.f32.mrb[139].mxu0 }
0x3018   : > { %v6850_v8 = vld [vmem:[%s8695_s25] ss:$0 sm:$0xff] }
0x305e   : > { %v5777_v37 = vpop.permute.xlu1 %5776 }
0x305f   : > { %5779 = vst.msk [vmem:[#allocation2] sm:$0xff] %vm1939_vm6, %v5777_v37 }
0x307f   : > { %v5892_v40 = vpop.permute.xlu0 %5891 }
0x3080   : > { %5894 = vst.msk [vmem:[#allocation2] sm:$0xff] %vm2055_vm7, %v5892_v40 }
0x3087   : > { %v6007_v42 = vpop.permute.xlu1 %6006 }
0x3088   : > { %6009 = vst.msk [vmem:[#allocation2] sm:$0xff] %vm2171_vm8, %v6007_v42 }
0x308f   : > { %v6010_v43 = vld [vmem:[#allocation2] sm:$0xff] }
0x3090   : > { %v6011_v44 = vpack.c.bf16 %v6010_v43, %v6010_v43  ;;  %v6851_v43 = vld [vmem:[#allocation3] ss:$0 sm:$0xff] }
0x3092   : > { %7488 = vmatmul.mubr.msk.bf16.vlgmr.msra.gmra.mrb[132].mxu1 %vm1666_vm3, %v6011_v44 }
0x3093   : > { %7507 = vmatprep.mubr.msk.bf16.mxu1 %vm8470_vm0, %v8469_v1  ;;  %7500 = vmatpush3.bf16.msra.mxu1 %v7794_v57 }
0x3094   : > { %7501 = vmatprep.subr.bf16.mxu1 %v8469_v1 }
0x3165   : > { %v6067_v46 = vpop.f32.mrb[132].mxu1 }
0x3166   : > { %v6068_v47 = vadd.f32 %v6820_v45, %v6067_v46  ;;  %v7489_v41 = vpop.f32.mrb[133].mxu1 }
0x3167   : > { %v6070_v38 = vpop.f32.mrb[134].mxu1 }
0x3168   : > { %v6077_v48 = vadd.f32 %v6068_v47, %v9646_v54  ;;  %v7490_v39 = vpop.f32.mrb[135].mxu1  ;;  %v7795_v54 = vld [vmem:[%s9947_s5 + $0x28] sm:$0xff]  }
0x3169   : > { %7502 = vmatpush3.bf16.msra.mxu1 %v7795_v54 }
0x316a   : > { %v6078_v49 = vsel %vm1666_vm3, %v6077_v48, 0.0  ;;  %7503 = vmatprep.subr.bf16.mxu1 %v8469_v1 }
0x316b   : > { %6079 = vadd.xlane.f32.xlu0 %v6078_v49 }
0x316d   : > { %7504 = vmatpush3.bf16.msra.mxu1 %v7796_v19 }
0x316e   : > { %7505 = vmatprep.subr.bf16.mxu1 %v8469_v1 }
0x3171   : > { %7506 = vmatpush3.bf16.msra.mxu1 %v7797_v5 }
0x31f8   : > { %v6080_v50 = vpop.xlane.xlu0 %6079 }
0x31f9   : > { %v6081_v52 = vmul.f32 0.03125, %v6080_v50 }
0x31fb   : > { %v6082_v53 = vsub.f32 %v6077_v48, %v6081_v52 }
0x31fd   : > { %v6083_v29 = vmul.f32 %v6082_v53, %v6082_v53 }
0x31ff   : > { %v6084_v3 = vsel %vm1666_vm3, %v6083_v29, 0.0 }
0x3200   : > { %6085 = vadd.xlane.f32.xlu1 %v6084_v3 }
0x328d   : > { %v6086_v27 = vpop.xlane.xlu1 %6085 }
0x328e   : > { %v6087_v58 = vmul.f32 0.03125, %v6086_v27 }
0x3290   : > { %v6088_v59 = vadd.f32 1e-05, %v6087_v58 }
0x3292   : > { %7910 = vrsqrt.f32 %v6088_v59 }
0x329c   : > { %v7911_v60 = vpop.eup %7910 }
0x329d   : > { %v6090_v62 = vmul.f32 %v7911_v60, %v6082_v53 }
0x329f   : > { %v6097_v0 = vmul.f32 %v6824_v61, %v6090_v62 }
0x32a1   : > { %v6104_v2 = vadd.f32 %v6825_v63, %v6097_v0 }
0x32a3   : > { %v6123_v4 = vpack.c.bf16 %v6104_v2, %v6104_v2 }
0x32a5   : > { %7496 = vmatmul.mubr.msk.bf16.vlgmr.msra.gmra.mrb[140].mxu0 %vm1666_vm3, %v6123_v4 }
0x3378   : > { %v6179_v9 = vpop.f32.mrb[140].mxu0 }
0x3379   : > { %v6180_v10 = vadd.f32 %v6838_v7, %v6179_v9  ;;  %v7497_v51 = vpop.f32.mrb[141].mxu0 }
0x337a   : > { %v6182_v12 = vpop.f32.mrb[142].mxu0 }
0x337b   : > { %v6185_v13 = vmax.f32 %v6180_v10, 0.0  ;;  %v7498_v6 = vpop.f32.mrb[143].mxu0 }
0x337d   : > { %v6186_v16 = vpack.c.bf16 %v6185_v13, %v6185_v13 }
0x337f   : > { %7508 = vmatmul.mubr.msk.bf16.vlgmr.msra.gmra.mrb[136].mxu1 %vm2375_vm9, %v6186_v16 }
0x3452   : > { %v6254_v17 = vpop.f32.mrb[136].mxu1 }
0x3453   : > { %v6255_v18 = vadd.f32 %v6842_v23, %v6254_v17  ;;  %v7509_v20 = vpop.f32.mrb[137].mxu1 }
0x3454   : > { %v6257_v21 = vpop.f32.mrb[138].mxu1 }
0x3455   : > { %v6264_v22 = vadd.f32 %v6255_v18, %v6104_v2  ;;  %v7510_v15 = vpop.f32.mrb[139].mxu1 }
0x3457   : > { %v6265_v1 = vsel %vm1666_vm3, %v6264_v22, 0.0 }
0x3458   : > { %6266 = vadd.xlane.f32.xlu0 %v6265_v1 }
0x34e5   : > { %v6267_v24 = vpop.xlane.xlu0 %6266 }
0x34e6   : > { %v6268_v32 = vmul.f32 0.03125, %v6267_v24 }
0x34e8   : > { %v6269_v14 = vsub.f32 %v6264_v22, %v6268_v32 }
0x34ea   : > { %v6270_v11 = vmul.f32 %v6269_v14, %v6269_v14 }
0x34ec   : > { %v6271_v25 = vsel %vm1666_vm3, %v6270_v11, 0.0 }
0x34ed   : > { %6272 = vadd.xlane.f32.xlu0 %v6271_v25 }
0x357a   : > { %v6273_v26 = vpop.xlane.xlu0 %6272 }
0x357b   : > { %v6274_v28 = vmul.f32 0.03125, %v6273_v26 }
0x357d   : > { %v6275_v30 = vadd.f32 1e-05, %v6274_v28 }
0x357f   : > { %7912 = vrsqrt.f32 %v6275_v30 }
0x3589   : > { %v7913_v31 = vpop.eup %7912 }
0x358a   : > { %v6277_v34 = vmul.f32 %v7913_v31, %v6269_v14 }
0x358c   : > { %v6284_v36 = vmul.f32 %v6848_v33, %v6277_v34 }
0x358e   : > { %v6291_v37 = vadd.f32 %v6849_v35, %v6284_v36 }
0x3590   : > { %v6299_v40 = vmul.f32 %v6850_v8, %v6291_v37 }
0x3592   : > { %v6300_v42 = vsel %vm1666_vm3, %v6299_v40, 0.0 }
0x3593   : > { %6301 = vadd.xlane.f32.xlu1 %v6300_v42 }
0x3620   : > { %v6302_v44 = vpop.xlane.xlu1 %6301 }
0x3621   : > { %v6310_v45 = vadd.f32 %v6851_v43, %v6302_v44 }
0x3623   : > { %6312 = vst.msk [vmem:[%s1523_s9] sm:$0xff] %vm6311_vm11, %v6310_v45 }
0x3624 PF: > { %s106_s15 = sadd.s32 1, %s8405_s15  }
0x3625   : > { %p103_p5 = scmp.ge.s32.totalorder %s106_s15, 4  }
0x3627   :  { %105 = sbr.rel (!%p103_p5) target bundleno = 95 (0x5f), region = 363 }
0x362e   :  { %6332 = vsyncpa [#allocation5], 1 }
0x362f   :  { %6334 = vsyncpa [#allocation5 + $0x1], 1 }
0x3630   :  { %6335 = vsyncpa [#allocation7], 1 }
0x3631   :  { %6336 = vsyncpa [#allocation10], 1 }
0x3632   :  { %6337 = vsyncpa [#allocation13], 1 }
0x3633   :  { %6338 = vsyncpa [#allocation16], 1 }
0x3634   :  { %6339 = vsyncpa [#allocation19], 1 }
0x3635   :  { %6340 = vsyncpa [#allocation22], 1 }
0x3636   :  { %6341 = vsyncpa [#allocation25], 1 }
0x3637   :  { %6342 = vsyncpa [#allocation28], 1 }

</bundles_post_ra>
